<compile_context>
chip_gen: v5e
topology: v5e:2x2
jax: 0.10.0
libtpu: 0.0.40
codegen_flags: <defaults>
</compile_context>

<pallas_src>
import jax
import jax.numpy as jnp
from jax.experimental import pallas as pl
from jax.experimental.pallas import tpu as pltpu

EPS_F32 = float(jnp.finfo(jnp.float32).eps)  # matches torch.finfo(torch.float32).eps


def _additive_attention_kernel(x_ref, mask_ref, w1_ref, b1_ref, w2_ref, out_ref):
    # x_ref   : [Bt, L, D]   (compute dtype)
    # mask_ref: [Bt, 1, L]   f32
    # w1_ref  : [D, H]       (compute dtype)
    # b1_ref  : [1, H]       f32
    # w2_ref  : [1, 1, H]    f32
    # out_ref : [Bt, D] (dense 2-D, preferred) or [Bt, 1, D] (fallback layout)
    bt, L, D = x_ref.shape
    H = w1_ref.shape[1]

    x = x_ref[...]                                   # [Bt, L, D]
    # Merge (Bt, L) into MXU rows.  With L % 8 == 0 this is a tile-aligned
    # relabeling (no relayout copy); the VMEM budget still reserves one x-sized
    # temp in case Mosaic materializes it (review item on reshape copies).
    x2d = x.reshape(bt * L, D)

    # encoder: Linear(D->H) + Tanh  -- one big MXU matmul with M = Bt*L rows.
    h = jnp.tanh(
        jnp.dot(x2d, w1_ref[...], preferred_element_type=jnp.float32)
        + b1_ref[...]                                # [1, H] broadcasts over rows
    )                                                # [Bt*L, H] f32
    # TODO(synk): cast h to bf16 here only if a bundle dump shows vld/vst spill
    # traffic at large H (halves the largest live temporary; numerics unchanged
    # at the default matmul precision).
    h3 = h.reshape(bt, L, H)                         # [Bt, L, H]

    # Linear(H->1, no bias), emitted lane-dense: [Bt,1,H] x [Bt,L,H] -> [Bt,1,L].
    w2b = jnp.broadcast_to(w2_ref[...], (bt, 1, H))
    scores = jnp.einsum("bqh,bkh->bqk", w2b, h3,
                        preferred_element_type=jnp.float32)           # [Bt, 1, L]

    # exp (no max-subtraction, matching the reference), mask, normalize.
    # NOTE: tanh bounds |scores| by ||w2||_1; a huge H / large-magnitude w2 could
    # still overflow f32 exp -- exactly as the PyTorch module would.
    att = jnp.exp(scores) * mask_ref[...]                             # [Bt, 1, L] f32
    denom = jnp.sum(att, axis=-1, keepdims=True) + EPS_F32            # [Bt, 1, 1]
    inv = pl.reciprocal(denom, approx=True)                           # EUP slot
    inv = inv * (2.0 - denom * inv)                                   # 1 Newton step -> ~f32-exact

    # Weighted sum over L on the MXU: [Bt,1,L] @ [Bt,L,D] -> [Bt,1,D].
    # f32 activations -> HIGHEST (exact parity with the f32 reference; tiny M=1
    # contraction, off the critical path).  bf16 activations -> single native pass.
    precision = jax.lax.Precision.HIGHEST if x.dtype == jnp.float32 else None
    ctx = jnp.einsum("bqk,bkd->bqd", att.astype(x.dtype), x,
                     preferred_element_type=jnp.float32,
                     precision=precision)                             # [Bt, 1, D]

    res = (ctx * inv).astype(out_ref.dtype)
    # Dense (Bt, D) store when the output block is 2-D; no-op reshape for the
    # 3-D fallback layout.
    out_ref[...] = res.reshape(out_ref.shape)


def _vmem_capacity_bytes():
    """Per-TensorCore VMEM capacity; conservative v7x default if the query fails."""
    try:
        info = pltpu.get_tpu_info()
        cap = getattr(info, "vmem_capacity_bytes", None)
        if cap:
            return int(cap)
    except Exception:
        pass
    return 64 * 1024 * 1024


def _pick_block_b(B, L, D, H, x_item, out_item, vmem_budget):
    """Largest batch block that (a) divides B, (b) allows a dense 2-D output block
    (multiple of 8 or == B), (c) fits the VMEM budget with full accounting, while
    preferring >= 4 grid steps (>= 2 per TensorCore on v7x), then >= 2, then 1."""
    pad8 = lambda n: -(-n // 8) * 8
    pad128 = lambda n: -(-n // 128) * 128
    Lp, Dp, Hp = pad8(L), pad128(D), pad128(H)

    # Weights: assume double-buffered (the fallback path) to stay conservative.
    fixed = 2 * (pad8(D) * Hp * x_item + 2 * 8 * Hp * 4)

    def live_bytes(bt):
        x_blk = 2 * bt * Lp * Dp * x_item            # double-buffered x input block
        x_cpy = bt * Lp * Dp * x_item                # potential reshape copy (conservative)
        m_blk = 2 * bt * 8 * pad128(L) * 4           # (bt,1,L) f32, sublane-padded
        o_blk = 2 * bt * 8 * Dp * out_item           # worst-case (bt,1,D) padded out block
        h_tmp = pad8(bt * L) * Hp * 4                # f32 tanh activations
        small = bt * 8 * (pad128(L) + Dp) * 4        # scores/att + ctx accumulators
        return fixed + x_blk + x_cpy + m_blk + o_blk + h_tmp + small

    def ok(bt):
        return (B % bt == 0
                and (bt % 8 == 0 or bt == B)
                and live_bytes(bt) <= vmem_budget)

    for min_steps in (4, 2, 1):
        cands = [bt for bt in range(1, B + 1) if ok(bt) and B // bt >= min_steps]
        if cands:
            return max(cands)

    # Fallback: drop the dense-2-D-output constraint (wrapper uses a 3-D out block).
    cands = [bt for bt in range(1, B + 1) if B % bt == 0 and live_bytes(bt) <= vmem_budget]
    return max(cands) if cands else 1


def additive_attention(inputs, w1, b1, w2, attention_mask=None, *,
                       block_b=None, compute_dtype=None):
    """inputs: [B, L, D]; w1: [D, H]; b1: [H]; w2: [H]; mask: [B, L] or None -> [B, D].

    compute_dtype=jnp.bfloat16 halves HBM traffic on x (fast path, looser numerics);
    None keeps the input dtype (strict f32 parity with the reference for f32 inputs).
    """
    B, L, D = inputs.shape
    H = w1.shape[1]
    out_dtype = inputs.dtype

    x = inputs if compute_dtype is None else inputs.astype(compute_dtype)

    if attention_mask is None:
        attention_mask = jnp.ones((B, L), dtype=jnp.float32)
    mask3 = attention_mask.astype(jnp.float32).reshape(B, 1, L)       # lane-dense [B,1,L]

    w1_c = w1.astype(x.dtype)                       # native-dtype MXU path
    b1_2d = b1.astype(jnp.float32).reshape(1, H)
    w2_3d = w2.astype(jnp.float32).reshape(1, 1, H)

    vmem_cap = _vmem_capacity_bytes()
    vmem_budget = int(vmem_cap * 0.60)              # headroom for compiler scratch / spills
    vmem_limit = min(int(vmem_cap * 0.75), 128 * 1024 * 1024)

    if block_b is None:
        block_b = _pick_block_b(B, L, D, H, x.dtype.itemsize,
                                jnp.dtype(out_dtype).itemsize, vmem_budget)
    assert B % block_b == 0, "block_b must divide the batch size"
    can_out_2d = (block_b % 8 == 0) or (block_b == B)   # (8,128) rule for (block_b, D) blocks

    def build(out_2d, single_buffer_weights):
        wkw = dict(pipeline_mode=pl.Buffered(1)) if single_buffer_weights else {}
        in_specs = [
            pl.BlockSpec((block_b, L, D), lambda i: (i, 0, 0)),           # x
            pl.BlockSpec((block_b, 1, L), lambda i: (i, 0, 0)),           # mask
            pl.BlockSpec((D, H), lambda i: (0, 0), **wkw),                # W1
            pl.BlockSpec((1, H), lambda i: (0, 0), **wkw),                # b1
            pl.BlockSpec((1, 1, H), lambda i: (0, 0, 0), **wkw),          # w2
        ]
        if out_2d:
            out_shape = jax.ShapeDtypeStruct((B, D), out_dtype)
            out_spec = pl.BlockSpec((block_b, D), lambda i: (i, 0))
        else:
            out_shape = jax.ShapeDtypeStruct((B, 1, D), out_dtype)
            out_spec = pl.BlockSpec((block_b, 1, D), lambda i: (i, 0, 0))
        return pl.pallas_call(
            _additive_attention_kernel,
            out_shape=out_shape,
            grid_spec=pltpu.PrefetchScalarGridSpec(
                num_scalar_prefetch=0,
                grid=(B // block_b,),
                in_specs=in_specs,
                out_specs=out_spec,
            ),
            compiler_params=pltpu.CompilerParams(
                dimension_semantics=("parallel",),
                vmem_limit_bytes=vmem_limit,
            ),
        )

    # Graceful-degradation ladder: try the fully optimized layout first, then
    # relax single-buffered weights, then the proven 3-D output layout.
    attempts = []
    if can_out_2d:
        attempts += [(True, True), (True, False)]
    attempts += [(False, True), (False, False)]

    out, last_err = None, None
    for out_2d, sbw in attempts:
        try:
            out = build(out_2d, sbw)(x, mask3, w1_c, b1_2d, w2_3d)
            break
        except Exception as e:           # Buffered(1)/layout unsupported in this build
            last_err = e
    if out is None:
        raise last_err

    return out.reshape(B, D)


def additive_attention_ref(inputs, w1, b1, w2, attention_mask=None):
    """Pure-JAX reference mirroring the PyTorch forward."""
    scores = jnp.tanh(inputs @ w1 + b1) @ w2                          # [B, L]
    att = jnp.exp(scores)
    if attention_mask is not None:
        att = att * attention_mask
    weight = att / (jnp.sum(att, axis=-1, keepdims=True) + EPS_F32)
    return jnp.sum(inputs * weight[..., None], axis=1)


if __name__ == "__main__":
    # Small but TPU-friendly shapes: batch 16, seq 32, embed 128, hidden 128.
    B, L, D, H = 16, 32, 128, 128

    key = jax.random.PRNGKey(0)
    k_x, k_m, k_w1, k_b1, k_w2 = jax.random.split(key, 5)

    inputs = jax.random.normal(k_x, (B, L, D), dtype=jnp.float32)
    attention_mask = (jax.random.uniform(k_m, (B, L)) > 0.3).astype(jnp.float32)

    # Deterministic parameter init (PyTorch Linear-style uniform bounds).
    bound1 = 1.0 / (D ** 0.5)
    w1 = jax.random.uniform(k_w1, (D, H), minval=-bound1, maxval=bound1, dtype=jnp.float32)
    b1 = jax.random.uniform(k_b1, (H,), minval=-bound1, maxval=bound1, dtype=jnp.float32)
    bound2 = 1.0 / (H ** 0.5)
    w2 = jax.random.uniform(k_w2, (H,), minval=-bound2, maxval=bound2, dtype=jnp.float32)

    ref = additive_attention_ref(inputs, w1, b1, w2, attention_mask)

    # Strict f32 path (exact parity with the reference).
    out = jax.block_until_ready(additive_attention(inputs, w1, b1, w2, attention_mask))
    assert out.shape == (B, D)
    assert jnp.allclose(out, ref, atol=1e-5, rtol=1e-5), "mismatch vs pure-JAX reference (f32)"

    # Fast bf16 activation path (halves HBM traffic on x); looser tolerance.
    out_bf16 = jax.block_until_ready(
        additive_attention(inputs, w1, b1, w2, attention_mask, compute_dtype=jnp.bfloat16))
    assert out_bf16.shape == (B, D)
    assert jnp.allclose(out_bf16, ref, atol=2e-2, rtol=2e-2), "mismatch vs reference (bf16 path)"

    print("KERNEL_OK")
</pallas_src>

<mosaic_0001>
module attributes {stable_mosaic.version = 11 : i64} {
  func.func @_additive_attention_kernel(%arg0: i32, %arg1: memref<8x32x128xf32, #tpu.memory_space<vmem>>, %arg2: memref<8x1x32xf32, #tpu.memory_space<vmem>>, %arg3: memref<128x128xf32, #tpu.memory_space<vmem>>, %arg4: memref<1x128xf32, #tpu.memory_space<vmem>>, %arg5: memref<1x1x128xf32, #tpu.memory_space<vmem>>, %arg6: memref<8x128xf32, #tpu.memory_space<vmem>>) attributes {dimension_semantics = [#tpu.dimension_semantics<parallel>], iteration_bounds = array<i64: 2>, scalar_prefetch = 0 : i64, scratch_operands = 0 : i64, tpu.core_type = #tpu.core_type<tc>, window_params = [{transform_indices = @transform_0, window_bounds = array<i64: 8, 32, 128>}, {transform_indices = @transform_1, window_bounds = array<i64: 8, 1, 32>}, {pipeline_mode = #tpu.pipeline_mode<synchronous>, transform_indices = @transform_2, window_bounds = array<i64: 128, 128>}, {pipeline_mode = #tpu.pipeline_mode<synchronous>, transform_indices = @transform_3, window_bounds = array<i64: 1, 128>}, {pipeline_mode = #tpu.pipeline_mode<synchronous>, transform_indices = @transform_4, window_bounds = array<i64: 1, 1, 128>}, {transform_indices = @transform_5, window_bounds = array<i64: 8, 128>}]} {
    %c0 = arith.constant 0 : index
    %c0_0 = arith.constant 0 : index
    %c0_1 = arith.constant 0 : index
    %0 = vector.load %arg1[%c0, %c0_0, %c0_1] : memref<8x32x128xf32, #tpu.memory_space<vmem>>, vector<8x32x128xf32>
    %1 = vector.shape_cast %0 : vector<8x32x128xf32> to vector<256x128xf32>
    %c0_2 = arith.constant 0 : index
    %c0_3 = arith.constant 0 : index
    %2 = vector.load %arg3[%c0_2, %c0_3] : memref<128x128xf32, #tpu.memory_space<vmem>>, vector<128x128xf32>
    %cst = arith.constant dense<0.000000e+00> : vector<256x128xf32>
    %3 = tpu.matmul %1, %2, %cst {dimension_numbers = #tpu.dot_dimension_numbers<[1], [0], [0], [1], [0, 0, 1, 1], [], []>} : vector<256x128xf32>, vector<128x128xf32>, vector<256x128xf32> -> vector<256x128xf32>
    %c0_4 = arith.constant 0 : index
    %c0_5 = arith.constant 0 : index
    %4 = vector.load %arg4[%c0_4, %c0_5] : memref<1x128xf32, #tpu.memory_space<vmem>>, vector<1x128xf32>
    %5 = vector.broadcast %4 : vector<1x128xf32> to vector<256x128xf32>
    %6 = arith.addf %3, %5 : vector<256x128xf32>
    %7 = math.tanh %6 : vector<256x128xf32>
    %8 = vector.shape_cast %7 : vector<256x128xf32> to vector<8x32x128xf32>
    %c0_6 = arith.constant 0 : index
    %c0_7 = arith.constant 0 : index
    %c0_8 = arith.constant 0 : index
    %9 = vector.load %arg5[%c0_6, %c0_7, %c0_8] : memref<1x1x128xf32, #tpu.memory_space<vmem>>, vector<1x1x128xf32>
    %10 = vector.shape_cast %9 : vector<1x1x128xf32> to vector<1x1x128xf32>
    %11 = vector.broadcast %10 : vector<1x1x128xf32> to vector<8x1x128xf32>
    "tpu.trace_start"() <{level = 10 : i32, message = "bqh,bkh->bqk"}> : () -> ()
    %cst_9 = arith.constant dense<0.000000e+00> : vector<8x1x32xf32>
    %12 = tpu.matmul %11, %8, %cst_9 {dimension_numbers = #tpu.dot_dimension_numbers<[2], [2], [1], [1], [0, 0, 0, 1, 1, 1], [0], [0]>} : vector<8x1x128xf32>, vector<8x32x128xf32>, vector<8x1x32xf32> -> vector<8x1x32xf32>
    "tpu.trace_stop"() : () -> ()
    %13 = math.exp %12 : vector<8x1x32xf32>
    %c0_10 = arith.constant 0 : index
    %c0_11 = arith.constant 0 : index
    %c0_12 = arith.constant 0 : index
    %14 = vector.load %arg2[%c0_10, %c0_11, %c0_12] : memref<8x1x32xf32, #tpu.memory_space<vmem>>, vector<8x1x32xf32>
    %15 = arith.mulf %13, %14 : vector<8x1x32xf32>
    %cst_13 = arith.constant dense<0.000000e+00> : vector<8x1xf32>
    %16 = vector.multi_reduction <add>, %15, %cst_13 [2] : vector<8x1x32xf32> to vector<8x1xf32>
    %17 = vector.shape_cast %16 : vector<8x1xf32> to vector<8x1x1xf32>
    %cst_14 = arith.constant 1.1920929E-7 : f32
    %18 = vector.broadcast %cst_14 : f32 to vector<8x1x1xf32>
    %19 = arith.addf %17, %18 : vector<8x1x1xf32>
    %20 = tpu.reciprocal %19 {approx = true} : vector<8x1x1xf32> -> vector<8x1x1xf32>
    %21 = arith.mulf %19, %20 : vector<8x1x1xf32>
    %cst_15 = arith.constant 2.000000e+00 : f32
    %22 = vector.broadcast %cst_15 : f32 to vector<8x1x1xf32>
    %23 = arith.subf %22, %21 : vector<8x1x1xf32>
    %24 = arith.mulf %20, %23 : vector<8x1x1xf32>
    "tpu.trace_start"() <{level = 10 : i32, message = "bqk,bkd->bqd"}> : () -> ()
    %cst_16 = arith.constant dense<0.000000e+00> : vector<8x1x128xf32>
    %25 = tpu.matmul %15, %0, %cst_16 {dimension_numbers = #tpu.dot_dimension_numbers<[2], [1], [1], [2], [0, 0, 0, 1, 1, 2], [0], [0]>, precision = #tpu.contract_precision<fp32>} : vector<8x1x32xf32>, vector<8x32x128xf32>, vector<8x1x128xf32> -> vector<8x1x128xf32>
    "tpu.trace_stop"() : () -> ()
    %26 = vector.broadcast %24 : vector<8x1x1xf32> to vector<8x1x128xf32>
    %27 = arith.mulf %25, %26 : vector<8x1x128xf32>
    %28 = vector.shape_cast %27 : vector<8x1x128xf32> to vector<8x128xf32>
    %c0_17 = arith.constant 0 : index
    %c0_18 = arith.constant 0 : index
    %29 = vector.load %arg6[%c0_17, %c0_18] : memref<8x128xf32, #tpu.memory_space<vmem>>, vector<8x128xf32>
    tpu.vector_store %arg6[%c0_17, %c0_18], %28 {strides = array<i32>} : memref<8x128xf32, #tpu.memory_space<vmem>>, vector<8x128xf32>,
    return
  }
  func.func @transform_0(%arg0: i32) -> (i32, i32, i32) {
    %c0_i32 = arith.constant 0 : i32
    %c0_i32_0 = arith.constant 0 : i32
    %c0_i32_1 = arith.constant 0 : i32
    return %arg0, %c0_i32, %c0_i32_0 : i32, i32, i32
  }
  func.func @transform_1(%arg0: i32) -> (i32, i32, i32) {
    %c0_i32 = arith.constant 0 : i32
    %c0_i32_0 = arith.constant 0 : i32
    %c0_i32_1 = arith.constant 0 : i32
    return %arg0, %c0_i32, %c0_i32_0 : i32, i32, i32
  }
  func.func @transform_2(%arg0: i32) -> (i32, i32) {
    %c0_i32 = arith.constant 0 : i32
    %c0_i32_0 = arith.constant 0 : i32
    %c0_i32_1 = arith.constant 0 : i32
    return %c0_i32, %c0_i32_0 : i32, i32
  }
  func.func @transform_3(%arg0: i32) -> (i32, i32) {
    %c0_i32 = arith.constant 0 : i32
    %c0_i32_0 = arith.constant 0 : i32
    %c0_i32_1 = arith.constant 0 : i32
    return %c0_i32, %c0_i32_0 : i32, i32
  }
  func.func @transform_4(%arg0: i32) -> (i32, i32, i32) {
    %c0_i32 = arith.constant 0 : i32
    %c0_i32_0 = arith.constant 0 : i32
    %c0_i32_1 = arith.constant 0 : i32
    %c0_i32_2 = arith.constant 0 : i32
    return %c0_i32, %c0_i32_0, %c0_i32_1 : i32, i32, i32
  }
  func.func @transform_5(%arg0: i32) -> (i32, i32) {
    %c0_i32 = arith.constant 0 : i32
    %c0_i32_0 = arith.constant 0 : i32
    return %arg0, %c0_i32 : i32, i32
  }
}

module attributes {stable_mosaic.version = 11 : i64} {
  func.func @_additive_attention_kernel(%arg0: i32, %arg1: memref<8x32x128xf32, #tpu.memory_space<vmem>>, %arg2: memref<8x1x32xf32, #tpu.memory_space<vmem>>, %arg3: memref<128x128xf32, #tpu.memory_space<vmem>>, %arg4: memref<1x128xf32, #tpu.memory_space<vmem>>, %arg5: memref<1x1x128xf32, #tpu.memory_space<vmem>>, %arg6: memref<8x128xf32, #tpu.memory_space<vmem>>) attributes {dimension_semantics = [#tpu.dimension_semantics<parallel>], iteration_bounds = array<i64: 2>, scalar_prefetch = 0 : i64, scratch_operands = 0 : i64, tpu.core_type = #tpu.core_type<tc>, window_params = [{transform_indices = @transform_0, window_bounds = array<i64: 8, 32, 128>}, {transform_indices = @transform_1, window_bounds = array<i64: 8, 1, 32>}, {pipeline_mode = #tpu.pipeline_mode<synchronous>, transform_indices = @transform_2, window_bounds = array<i64: 128, 128>}, {pipeline_mode = #tpu.pipeline_mode<synchronous>, transform_indices = @transform_3, window_bounds = array<i64: 1, 128>}, {pipeline_mode = #tpu.pipeline_mode<synchronous>, transform_indices = @transform_4, window_bounds = array<i64: 1, 1, 128>}, {transform_indices = @transform_5, window_bounds = array<i64: 8, 128>}]} {
    %c0 = arith.constant 0 : index
    %c0_0 = arith.constant 0 : index
    %c0_1 = arith.constant 0 : index
    %0 = vector.load %arg1[%c0, %c0_0, %c0_1] : memref<8x32x128xf32, #tpu.memory_space<vmem>>, vector<8x32x128xf32>
    %1 = vector.shape_cast %0 : vector<8x32x128xf32> to vector<256x128xf32>
    %c0_2 = arith.constant 0 : index
    %c0_3 = arith.constant 0 : index
    %2 = vector.load %arg3[%c0_2, %c0_3] : memref<128x128xf32, #tpu.memory_space<vmem>>, vector<128x128xf32>
    %cst = arith.constant dense<0.000000e+00> : vector<256x128xf32>
    %3 = tpu.matmul %1, %2, %cst {dimension_numbers = #tpu.dot_dimension_numbers<[1], [0], [0], [1], [0, 0, 1, 1], [], []>} : vector<256x128xf32>, vector<128x128xf32>, vector<256x128xf32> -> vector<256x128xf32>
    %c0_4 = arith.constant 0 : index
    %c0_5 = arith.constant 0 : index
    %4 = vector.load %arg4[%c0_4, %c0_5] : memref<1x128xf32, #tpu.memory_space<vmem>>, vector<1x128xf32>
    %5 = vector.broadcast %4 : vector<1x128xf32> to vector<256x128xf32>
    %6 = arith.addf %3, %5 : vector<256x128xf32>
    %7 = math.tanh %6 : vector<256x128xf32>
    %8 = vector.shape_cast %7 : vector<256x128xf32> to vector<8x32x128xf32>
    %c0_6 = arith.constant 0 : index
    %c0_7 = arith.constant 0 : index
    %c0_8 = arith.constant 0 : index
    %9 = vector.load %arg5[%c0_6, %c0_7, %c0_8] : memref<1x1x128xf32, #tpu.memory_space<vmem>>, vector<1x1x128xf32>
    %10 = vector.shape_cast %9 : vector<1x1x128xf32> to vector<1x1x128xf32>
    %11 = vector.broadcast %10 : vector<1x1x128xf32> to vector<8x1x128xf32>
    "tpu.trace_start"() <{level = 10 : i32, message = "bqh,bkh->bqk"}> : () -> ()
    %cst_9 = arith.constant dense<0.000000e+00> : vector<8x1x32xf32>
    %12 = tpu.matmul %11, %8, %cst_9 {dimension_numbers = #tpu.dot_dimension_numbers<[2], [2], [1], [1], [0, 0, 0, 1, 1, 1], [0], [0]>} : vector<8x1x128xf32>, vector<8x32x128xf32>, vector<8x1x32xf32> -> vector<8x1x32xf32>
    "tpu.trace_stop"() : () -> ()
    %13 = math.exp %12 : vector<8x1x32xf32>
    %c0_10 = arith.constant 0 : index
    %c0_11 = arith.constant 0 : index
    %c0_12 = arith.constant 0 : index
    %14 = vector.load %arg2[%c0_10, %c0_11, %c0_12] : memref<8x1x32xf32, #tpu.memory_space<vmem>>, vector<8x1x32xf32>
    %15 = arith.mulf %13, %14 : vector<8x1x32xf32>
    %cst_13 = arith.constant dense<0.000000e+00> : vector<8x1xf32>
    %16 = vector.multi_reduction <add>, %15, %cst_13 [2] : vector<8x1x32xf32> to vector<8x1xf32>
    %17 = vector.shape_cast %16 : vector<8x1xf32> to vector<8x1x1xf32>
    %cst_14 = arith.constant 1.1920929E-7 : f32
    %18 = vector.broadcast %cst_14 : f32 to vector<8x1x1xf32>
    %19 = arith.addf %17, %18 : vector<8x1x1xf32>
    %20 = tpu.reciprocal %19 {approx = true} : vector<8x1x1xf32> -> vector<8x1x1xf32>
    %21 = arith.mulf %19, %20 : vector<8x1x1xf32>
    %cst_15 = arith.constant 2.000000e+00 : f32
    %22 = vector.broadcast %cst_15 : f32 to vector<8x1x1xf32>
    %23 = arith.subf %22, %21 : vector<8x1x1xf32>
    %24 = arith.mulf %20, %23 : vector<8x1x1xf32>
    "tpu.trace_start"() <{level = 10 : i32, message = "bqk,bkd->bqd"}> : () -> ()
    %cst_16 = arith.constant dense<0.000000e+00> : vector<8x1x128xf32>
    %25 = tpu.matmul %15, %0, %cst_16 {dimension_numbers = #tpu.dot_dimension_numbers<[2], [1], [1], [2], [0, 0, 0, 1, 1, 2], [0], [0]>, precision = #tpu.contract_precision<fp32>} : vector<8x1x32xf32>, vector<8x32x128xf32>, vector<8x1x128xf32> -> vector<8x1x128xf32>
    "tpu.trace_stop"() : () -> ()
    %26 = vector.broadcast %24 : vector<8x1x1xf32> to vector<8x1x128xf32>
    %27 = arith.mulf %25, %26 : vector<8x1x128xf32>
    %28 = vector.shape_cast %27 : vector<8x1x128xf32> to vector<8x128xf32>
    %c0_17 = arith.constant 0 : index
    %c0_18 = arith.constant 0 : index
    %29 = vector.load %arg6[%c0_17, %c0_18] : memref<8x128xf32, #tpu.memory_space<vmem>>, vector<8x128xf32>
    tpu.vector_store %arg6[%c0_17, %c0_18], %28 {strides = array<i32>} : memref<8x128xf32, #tpu.memory_space<vmem>>, vector<8x128xf32>,
    return
  }
  func.func @transform_0(%arg0: i32) -> (i32, i32, i32) {
    %c0_i32 = arith.constant 0 : i32
    %c0_i32_0 = arith.constant 0 : i32
    %c0_i32_1 = arith.constant 0 : i32
    return %arg0, %c0_i32, %c0_i32_0 : i32, i32, i32
  }
  func.func @transform_1(%arg0: i32) -> (i32, i32, i32) {
    %c0_i32 = arith.constant 0 : i32
    %c0_i32_0 = arith.constant 0 : i32
    %c0_i32_1 = arith.constant 0 : i32
    return %arg0, %c0_i32, %c0_i32_0 : i32, i32, i32
  }
  func.func @transform_2(%arg0: i32) -> (i32, i32) {
    %c0_i32 = arith.constant 0 : i32
    %c0_i32_0 = arith.constant 0 : i32
    %c0_i32_1 = arith.constant 0 : i32
    return %c0_i32, %c0_i32_0 : i32, i32
  }
  func.func @transform_3(%arg0: i32) -> (i32, i32) {
    %c0_i32 = arith.constant 0 : i32
    %c0_i32_0 = arith.constant 0 : i32
    %c0_i32_1 = arith.constant 0 : i32
    return %c0_i32, %c0_i32_0 : i32, i32
  }
  func.func @transform_4(%arg0: i32) -> (i32, i32, i32) {
    %c0_i32 = arith.constant 0 : i32
    %c0_i32_0 = arith.constant 0 : i32
    %c0_i32_1 = arith.constant 0 : i32
    %c0_i32_2 = arith.constant 0 : i32
    return %c0_i32, %c0_i32_0, %c0_i32_1 : i32, i32, i32
  }
  func.func @transform_5(%arg0: i32) -> (i32, i32) {
    %c0_i32 = arith.constant 0 : i32
    %c0_i32_0 = arith.constant 0 : i32
    return %arg0, %c0_i32 : i32, i32
  }
}

module attributes {stable_mosaic.version = 11 : i64} {
  func.func @_additive_attention_kernel(%arg0: i32, %arg1: memref<8x32x128xf32, #tpu.memory_space<vmem>>, %arg2: memref<8x1x32xf32, #tpu.memory_space<vmem>>, %arg3: memref<128x128xf32, #tpu.memory_space<vmem>>, %arg4: memref<1x128xf32, #tpu.memory_space<vmem>>, %arg5: memref<1x1x128xf32, #tpu.memory_space<vmem>>, %arg6: memref<8x1x128xf32, #tpu.memory_space<vmem>>) attributes {dimension_semantics = [#tpu.dimension_semantics<parallel>], iteration_bounds = array<i64: 2>, scalar_prefetch = 0 : i64, scratch_operands = 0 : i64, tpu.core_type = #tpu.core_type<tc>, window_params = [{transform_indices = @transform_0, window_bounds = array<i64: 8, 32, 128>}, {transform_indices = @transform_1, window_bounds = array<i64: 8, 1, 32>}, {pipeline_mode = #tpu.pipeline_mode<synchronous>, transform_indices = @transform_2, window_bounds = array<i64: 128, 128>}, {pipeline_mode = #tpu.pipeline_mode<synchronous>, transform_indices = @transform_3, window_bounds = array<i64: 1, 128>}, {pipeline_mode = #tpu.pipeline_mode<synchronous>, transform_indices = @transform_4, window_bounds = array<i64: 1, 1, 128>}, {transform_indices = @transform_5, window_bounds = array<i64: 8, 1, 128>}]} {
    %c0 = arith.constant 0 : index
    %c0_0 = arith.constant 0 : index
    %c0_1 = arith.constant 0 : index
    %0 = vector.load %arg1[%c0, %c0_0, %c0_1] : memref<8x32x128xf32, #tpu.memory_space<vmem>>, vector<8x32x128xf32>
    %1 = vector.shape_cast %0 : vector<8x32x128xf32> to vector<256x128xf32>
    %c0_2 = arith.constant 0 : index
    %c0_3 = arith.constant 0 : index
    %2 = vector.load %arg3[%c0_2, %c0_3] : memref<128x128xf32, #tpu.memory_space<vmem>>, vector<128x128xf32>
    %cst = arith.constant dense<0.000000e+00> : vector<256x128xf32>
    %3 = tpu.matmul %1, %2, %cst {dimension_numbers = #tpu.dot_dimension_numbers<[1], [0], [0], [1], [0, 0, 1, 1], [], []>} : vector<256x128xf32>, vector<128x128xf32>, vector<256x128xf32> -> vector<256x128xf32>
    %c0_4 = arith.constant 0 : index
    %c0_5 = arith.constant 0 : index
    %4 = vector.load %arg4[%c0_4, %c0_5] : memref<1x128xf32, #tpu.memory_space<vmem>>, vector<1x128xf32>
    %5 = vector.broadcast %4 : vector<1x128xf32> to vector<256x128xf32>
    %6 = arith.addf %3, %5 : vector<256x128xf32>
    %7 = math.tanh %6 : vector<256x128xf32>
    %8 = vector.shape_cast %7 : vector<256x128xf32> to vector<8x32x128xf32>
    %c0_6 = arith.constant 0 : index
    %c0_7 = arith.constant 0 : index
    %c0_8 = arith.constant 0 : index
    %9 = vector.load %arg5[%c0_6, %c0_7, %c0_8] : memref<1x1x128xf32, #tpu.memory_space<vmem>>, vector<1x1x128xf32>
    %10 = vector.shape_cast %9 : vector<1x1x128xf32> to vector<1x1x128xf32>
    %11 = vector.broadcast %10 : vector<1x1x128xf32> to vector<8x1x128xf32>
    "tpu.trace_start"() <{level = 10 : i32, message = "bqh,bkh->bqk"}> : () -> ()
    %cst_9 = arith.constant dense<0.000000e+00> : vector<8x1x32xf32>
    %12 = tpu.matmul %11, %8, %cst_9 {dimension_numbers = #tpu.dot_dimension_numbers<[2], [2], [1], [1], [0, 0, 0, 1, 1, 1], [0], [0]>} : vector<8x1x128xf32>, vector<8x32x128xf32>, vector<8x1x32xf32> -> vector<8x1x32xf32>
    "tpu.trace_stop"() : () -> ()
    %13 = math.exp %12 : vector<8x1x32xf32>
    %c0_10 = arith.constant 0 : index
    %c0_11 = arith.constant 0 : index
    %c0_12 = arith.constant 0 : index
    %14 = vector.load %arg2[%c0_10, %c0_11, %c0_12] : memref<8x1x32xf32, #tpu.memory_space<vmem>>, vector<8x1x32xf32>
    %15 = arith.mulf %13, %14 : vector<8x1x32xf32>
    %cst_13 = arith.constant dense<0.000000e+00> : vector<8x1xf32>
    %16 = vector.multi_reduction <add>, %15, %cst_13 [2] : vector<8x1x32xf32> to vector<8x1xf32>
    %17 = vector.shape_cast %16 : vector<8x1xf32> to vector<8x1x1xf32>
    %cst_14 = arith.constant 1.1920929E-7 : f32
    %18 = vector.broadcast %cst_14 : f32 to vector<8x1x1xf32>
    %19 = arith.addf %17, %18 : vector<8x1x1xf32>
    %20 = tpu.reciprocal %19 {approx = true} : vector<8x1x1xf32> -> vector<8x1x1xf32>
    %21 = arith.mulf %19, %20 : vector<8x1x1xf32>
    %cst_15 = arith.constant 2.000000e+00 : f32
    %22 = vector.broadcast %cst_15 : f32 to vector<8x1x1xf32>
    %23 = arith.subf %22, %21 : vector<8x1x1xf32>
    %24 = arith.mulf %20, %23 : vector<8x1x1xf32>
    "tpu.trace_start"() <{level = 10 : i32, message = "bqk,bkd->bqd"}> : () -> ()
    %cst_16 = arith.constant dense<0.000000e+00> : vector<8x1x128xf32>
    %25 = tpu.matmul %15, %0, %cst_16 {dimension_numbers = #tpu.dot_dimension_numbers<[2], [1], [1], [2], [0, 0, 0, 1, 1, 2], [0], [0]>, precision = #tpu.contract_precision<fp32>} : vector<8x1x32xf32>, vector<8x32x128xf32>, vector<8x1x128xf32> -> vector<8x1x128xf32>
    "tpu.trace_stop"() : () -> ()
    %26 = vector.broadcast %24 : vector<8x1x1xf32> to vector<8x1x128xf32>
    %27 = arith.mulf %25, %26 : vector<8x1x128xf32>
    %c0_17 = arith.constant 0 : index
    %c0_18 = arith.constant 0 : index
    %c0_19 = arith.constant 0 : index
    %28 = vector.load %arg6[%c0_17, %c0_18, %c0_19] : memref<8x1x128xf32, #tpu.memory_space<vmem>>, vector<8x1x128xf32>
    tpu.vector_store %arg6[%c0_17, %c0_18, %c0_19], %27 {strides = array<i32>} : memref<8x1x128xf32, #tpu.memory_space<vmem>>, vector<8x1x128xf32>,
    return
  }
  func.func @transform_0(%arg0: i32) -> (i32, i32, i32) {
    %c0_i32 = arith.constant 0 : i32
    %c0_i32_0 = arith.constant 0 : i32
    %c0_i32_1 = arith.constant 0 : i32
    return %arg0, %c0_i32, %c0_i32_0 : i32, i32, i32
  }
  func.func @transform_1(%arg0: i32) -> (i32, i32, i32) {
    %c0_i32 = arith.constant 0 : i32
    %c0_i32_0 = arith.constant 0 : i32
    %c0_i32_1 = arith.constant 0 : i32
    return %arg0, %c0_i32, %c0_i32_0 : i32, i32, i32
  }
  func.func @transform_2(%arg0: i32) -> (i32, i32) {
    %c0_i32 = arith.constant 0 : i32
    %c0_i32_0 = arith.constant 0 : i32
    %c0_i32_1 = arith.constant 0 : i32
    return %c0_i32, %c0_i32_0 : i32, i32
  }
  func.func @transform_3(%arg0: i32) -> (i32, i32) {
    %c0_i32 = arith.constant 0 : i32
    %c0_i32_0 = arith.constant 0 : i32
    %c0_i32_1 = arith.constant 0 : i32
    return %c0_i32, %c0_i32_0 : i32, i32
  }
  func.func @transform_4(%arg0: i32) -> (i32, i32, i32) {
    %c0_i32 = arith.constant 0 : i32
    %c0_i32_0 = arith.constant 0 : i32
    %c0_i32_1 = arith.constant 0 : i32
    %c0_i32_2 = arith.constant 0 : i32
    return %c0_i32, %c0_i32_0, %c0_i32_1 : i32, i32, i32
  }
  func.func @transform_5(%arg0: i32) -> (i32, i32, i32) {
    %c0_i32 = arith.constant 0 : i32
    %c0_i32_0 = arith.constant 0 : i32
    %c0_i32_1 = arith.constant 0 : i32
    return %arg0, %c0_i32, %c0_i32_0 : i32, i32, i32
  }
}

module attributes {stable_mosaic.version = 11 : i64} {
  func.func @_additive_attention_kernel(%arg0: i32, %arg1: memref<8x32x128xf32, #tpu.memory_space<vmem>>, %arg2: memref<8x1x32xf32, #tpu.memory_space<vmem>>, %arg3: memref<128x128xf32, #tpu.memory_space<vmem>>, %arg4: memref<1x128xf32, #tpu.memory_space<vmem>>, %arg5: memref<1x1x128xf32, #tpu.memory_space<vmem>>, %arg6: memref<8x1x128xf32, #tpu.memory_space<vmem>>) attributes {dimension_semantics = [#tpu.dimension_semantics<parallel>], iteration_bounds = array<i64: 2>, scalar_prefetch = 0 : i64, scratch_operands = 0 : i64, tpu.core_type = #tpu.core_type<tc>, window_params = [{transform_indices = @transform_0, window_bounds = array<i64: 8, 32, 128>}, {transform_indices = @transform_1, window_bounds = array<i64: 8, 1, 32>}, {pipeline_mode = #tpu.pipeline_mode<synchronous>, transform_indices = @transform_2, window_bounds = array<i64: 128, 128>}, {pipeline_mode = #tpu.pipeline_mode<synchronous>, transform_indices = @transform_3, window_bounds = array<i64: 1, 128>}, {pipeline_mode = #tpu.pipeline_mode<synchronous>, transform_indices = @transform_4, window_bounds = array<i64: 1, 1, 128>}, {transform_indices = @transform_5, window_bounds = array<i64: 8, 1, 128>}]} {
    %c0 = arith.constant 0 : index
    %c0_0 = arith.constant 0 : index
    %c0_1 = arith.constant 0 : index
    %0 = vector.load %arg1[%c0, %c0_0, %c0_1] : memref<8x32x128xf32, #tpu.memory_space<vmem>>, vector<8x32x128xf32>
    %1 = vector.shape_cast %0 : vector<8x32x128xf32> to vector<256x128xf32>
    %c0_2 = arith.constant 0 : index
    %c0_3 = arith.constant 0 : index
    %2 = vector.load %arg3[%c0_2, %c0_3] : memref<128x128xf32, #tpu.memory_space<vmem>>, vector<128x128xf32>
    %cst = arith.constant dense<0.000000e+00> : vector<256x128xf32>
    %3 = tpu.matmul %1, %2, %cst {dimension_numbers = #tpu.dot_dimension_numbers<[1], [0], [0], [1], [0, 0, 1, 1], [], []>} : vector<256x128xf32>, vector<128x128xf32>, vector<256x128xf32> -> vector<256x128xf32>
    %c0_4 = arith.constant 0 : index
    %c0_5 = arith.constant 0 : index
    %4 = vector.load %arg4[%c0_4, %c0_5] : memref<1x128xf32, #tpu.memory_space<vmem>>, vector<1x128xf32>
    %5 = vector.broadcast %4 : vector<1x128xf32> to vector<256x128xf32>
    %6 = arith.addf %3, %5 : vector<256x128xf32>
    %7 = math.tanh %6 : vector<256x128xf32>
    %8 = vector.shape_cast %7 : vector<256x128xf32> to vector<8x32x128xf32>
    %c0_6 = arith.constant 0 : index
    %c0_7 = arith.constant 0 : index
    %c0_8 = arith.constant 0 : index
    %9 = vector.load %arg5[%c0_6, %c0_7, %c0_8] : memref<1x1x128xf32, #tpu.memory_space<vmem>>, vector<1x1x128xf32>
    %10 = vector.shape_cast %9 : vector<1x1x128xf32> to vector<1x1x128xf32>
    %11 = vector.broadcast %10 : vector<1x1x128xf32> to vector<8x1x128xf32>
    "tpu.trace_start"() <{level = 10 : i32, message = "bqh,bkh->bqk"}> : () -> ()
    %cst_9 = arith.constant dense<0.000000e+00> : vector<8x1x32xf32>
    %12 = tpu.matmul %11, %8, %cst_9 {dimension_numbers = #tpu.dot_dimension_numbers<[2], [2], [1], [1], [0, 0, 0, 1, 1, 1], [0], [0]>} : vector<8x1x128xf32>, vector<8x32x128xf32>, vector<8x1x32xf32> -> vector<8x1x32xf32>
    "tpu.trace_stop"() : () -> ()
    %13 = math.exp %12 : vector<8x1x32xf32>
    %c0_10 = arith.constant 0 : index
    %c0_11 = arith.constant 0 : index
    %c0_12 = arith.constant 0 : index
    %14 = vector.load %arg2[%c0_10, %c0_11, %c0_12] : memref<8x1x32xf32, #tpu.memory_space<vmem>>, vector<8x1x32xf32>
    %15 = arith.mulf %13, %14 : vector<8x1x32xf32>
    %cst_13 = arith.constant dense<0.000000e+00> : vector<8x1xf32>
    %16 = vector.multi_reduction <add>, %15, %cst_13 [2] : vector<8x1x32xf32> to vector<8x1xf32>
    %17 = vector.shape_cast %16 : vector<8x1xf32> to vector<8x1x1xf32>
    %cst_14 = arith.constant 1.1920929E-7 : f32
    %18 = vector.broadcast %cst_14 : f32 to vector<8x1x1xf32>
    %19 = arith.addf %17, %18 : vector<8x1x1xf32>
    %20 = tpu.reciprocal %19 {approx = true} : vector<8x1x1xf32> -> vector<8x1x1xf32>
    %21 = arith.mulf %19, %20 : vector<8x1x1xf32>
    %cst_15 = arith.constant 2.000000e+00 : f32
    %22 = vector.broadcast %cst_15 : f32 to vector<8x1x1xf32>
    %23 = arith.subf %22, %21 : vector<8x1x1xf32>
    %24 = arith.mulf %20, %23 : vector<8x1x1xf32>
    "tpu.trace_start"() <{level = 10 : i32, message = "bqk,bkd->bqd"}> : () -> ()
    %cst_16 = arith.constant dense<0.000000e+00> : vector<8x1x128xf32>
    %25 = tpu.matmul %15, %0, %cst_16 {dimension_numbers = #tpu.dot_dimension_numbers<[2], [1], [1], [2], [0, 0, 0, 1, 1, 2], [0], [0]>, precision = #tpu.contract_precision<fp32>} : vector<8x1x32xf32>, vector<8x32x128xf32>, vector<8x1x128xf32> -> vector<8x1x128xf32>
    "tpu.trace_stop"() : () -> ()
    %26 = vector.broadcast %24 : vector<8x1x1xf32> to vector<8x1x128xf32>
    %27 = arith.mulf %25, %26 : vector<8x1x128xf32>
    %c0_17 = arith.constant 0 : index
    %c0_18 = arith.constant 0 : index
    %c0_19 = arith.constant 0 : index
    %28 = vector.load %arg6[%c0_17, %c0_18, %c0_19] : memref<8x1x128xf32, #tpu.memory_space<vmem>>, vector<8x1x128xf32>
    tpu.vector_store %arg6[%c0_17, %c0_18, %c0_19], %27 {strides = array<i32>} : memref<8x1x128xf32, #tpu.memory_space<vmem>>, vector<8x1x128xf32>,
    return
  }
  func.func @transform_0(%arg0: i32) -> (i32, i32, i32) {
    %c0_i32 = arith.constant 0 : i32
    %c0_i32_0 = arith.constant 0 : i32
    %c0_i32_1 = arith.constant 0 : i32
    return %arg0, %c0_i32, %c0_i32_0 : i32, i32, i32
  }
  func.func @transform_1(%arg0: i32) -> (i32, i32, i32) {
    %c0_i32 = arith.constant 0 : i32
    %c0_i32_0 = arith.constant 0 : i32
    %c0_i32_1 = arith.constant 0 : i32
    return %arg0, %c0_i32, %c0_i32_0 : i32, i32, i32
  }
  func.func @transform_2(%arg0: i32) -> (i32, i32) {
    %c0_i32 = arith.constant 0 : i32
    %c0_i32_0 = arith.constant 0 : i32
    %c0_i32_1 = arith.constant 0 : i32
    return %c0_i32, %c0_i32_0 : i32, i32
  }
  func.func @transform_3(%arg0: i32) -> (i32, i32) {
    %c0_i32 = arith.constant 0 : i32
    %c0_i32_0 = arith.constant 0 : i32
    %c0_i32_1 = arith.constant 0 : i32
    return %c0_i32, %c0_i32_0 : i32, i32
  }
  func.func @transform_4(%arg0: i32) -> (i32, i32, i32) {
    %c0_i32 = arith.constant 0 : i32
    %c0_i32_0 = arith.constant 0 : i32
    %c0_i32_1 = arith.constant 0 : i32
    %c0_i32_2 = arith.constant 0 : i32
    return %c0_i32, %c0_i32_0, %c0_i32_1 : i32, i32, i32
  }
  func.func @transform_5(%arg0: i32) -> (i32, i32, i32) {
    %c0_i32 = arith.constant 0 : i32
    %c0_i32_0 = arith.constant 0 : i32
    %c0_i32_1 = arith.constant 0 : i32
    return %arg0, %c0_i32, %c0_i32_0 : i32, i32, i32
  }
}

</mosaic_0001>

<bundles_post_ra>
// kernel: tpu_custom_call.1
= control target key start
LH: loop header
LB: loop body
LE: loop exit
PB: predicated region body
PF: predicated region fallthrough
CT: control target
= control target key end

     0   :  { %s3636_s0 = inlined_call_operand.hbm [shape: f32[16,32,128], index: 0, kind: input, shape index: {}]   ;;  %s3637_s1 = inlined_call_operand.hbm [shape: f32[16,1,32], index: 1, kind: input, shape index: {}]   ;;  %s3638_s2 = inlined_call_operand.hbm [shape: f32[128,128], index: 2, kind: input, shape index: {}]   ;;  %s3639_s3 = inlined_call_operand.vmem [shape: f32[1,128], index: 3, kind: input, shape index: {}]   ;;  %s3640_s4 = inlined_call_operand.vmem [shape: f32[1,1,128], index: 4, kind: input, shape index: {}]   ;;  %s3641_s5 = inlined_call_operand.hbm [shape: f32[16,128], index: 5, kind: output, shape index: {}]  }
   0x1   :  { %3647 = sst [smem:[#allocation16_spill]] %s3638_s2 }
   0x2   :  { %10 = vsyncpa [#allocation3], 0 }
   0x3   :  { %12 = vsyncpa [#allocation3 + $0x1], 0 }
   0x4   :  { %13 = vsyncpa [#allocation6], 0 }
   0x5   :  { %15 = vsyncpa [#allocation6 + $0x1], 0 }
   0x6   :  { %16 = vsyncpa [#allocation4], 0 }
   0x7   :  { %18 = vsyncpa [#allocation4 + $0x1], 0  ;;  %s2863_s18 = smov 0   ;;  %s2865_s19 = smov 0  }
   0x8   :  { %s2867_s20 = smov 0   ;;  %s2869_s21 = smov 0  }
   0x9 LB: > { %3648 = sst [smem:[#allocation13_spill]] %s2822_s20  ;;  %s2884_s22 = sadd.s32 4294967295, %s2826_s21   ;;  %s2826_s21 = sphi %s2869_s21, %s3660_s21   ;;  %s2822_s20 = sphi %s2867_s20, %s3662_s20   ;;  %s2818_s19 = sphi %s2865_s19, %s3664_s19   ;;  %s2814_s18 = sphi %s2863_s18, %s3663_s18  }
   0xa   : > { %s2422_s23 = sadd.s32 4294967294, %s2826_s21   ;;  %p44_p0 = scmp.ne.s32.totalorder %s2818_s19, %s2814_s18 }
   0xb   : > { %p45_p1 = scmp.eq.s32.totalorder %s2884_s22, 0  ;;  %p157_p2 = scmp.eq.s32.totalorder %s2884_s22, 1 }
   0xc   : > { %p163_p3 = scmp.eq.s32.totalorder %s2422_s23, 1  ;;  %p2423_p5 = scmp.ge.s32.totalorder %s2826_s21, 1 }
   0xd   : > { %p2893_p4 = por %p45_p1, %p44_p0  ;;  %p170_p7 = scmp.lt.s32.totalorder %s2826_s21, 3 }
   0xe   : > { %p2898_p6 = por %p163_p3, %p44_p0  ;;  %s3651_s2 = sld [smem:[#allocation16_spill]] }
   0xf   : > { %p2906_p8 = pnand %p2423_p5, %p170_p7  ;;  %s2828_s30 = smov [#allocation7]  }
  0x10   : > { %s183_s6 = sshll.u32 %s2828_s30, 4  ;;  %s2916_s7 = sadd.s32 1, %s2826_s21   ;;  %s184_s6 = int_to_ptr.vmem [resolvable:$true] %s183_s6 }
  0x11   : > { %p2501_p9 = pneg %p2906_p8  ;;  %3653 = sst [smem:[#allocation14_spill]] %s2916_s7 }
  0x12   : > { %s3642_s8 = smov 128   ;;  %s3643_s9 = smov 8  }
  0x13   : > { %p2502_p10 = pnand %p2501_p9, %p45_p1  ;;  %s28_s10 = ssub.s32 %s2826_s21, %s2916_s7 }
  0x14   : > { %s181_s28 = sshll.u32 %s3651_s2, 4  ;;  %s31_s11 = sadd.s32 1, %s2822_s20  ;;  %s182_s28 = int_to_ptr.hbm [resolvable:$true] %s181_s28 }
  0x15   : > { %2504 = dma.hbm_to_vmem [thread:$0]  (!%p2502_p10), %s182_s28, 2048, %s184_s6, [#allocation6], %s3642_s8, %s3642_s8, %s3643_s9  }
  0x16   : > { %p29_p12 = scmp.eq.s32.totalorder %s28_s10, 0  ;;  %p38_p13 = scmp.ne.s32.totalorder %s2822_s20, %s2818_s19 }
  0x17   : > { %p39_p0 = scmp.eq.s32.totalorder %s2826_s21, 0  ;;  %p2517_p3 = scmp.lt.s32.totalorder %s2826_s21, 2 }
  0x18   : > { %s2929_s12 = scalar_select %p29_p12, %s2822_s20, %s31_s11  }
  0x19   : > { %p40_p5 = por %p39_p0, %p38_p13  ;;  %p2933_p7 = por %p157_p2, %p38_p13 }
  0x1a   : > { %3654 = sst [smem:[#allocation15_spill]] %s2929_s12  ;;  %s2938_s14 = sand.u32 1, %s2822_s20  }
  0x1b   : > { %s2442_s15 = sshll.u32 %s2826_s21, 8  ;;  %s2426_s16 = sshll.u32 %s2938_s14, 8 }
  0x1c   : > { %s213_s26 = scalar_lea.hbm %s3636_s0, %s2442_s15  ;;  %s207_s28 = scalar_lea.vmem [#allocation2], %s2426_s16 }
  0x1d   : > { %s214_s27 = sshll.u32 %s213_s26, 4  ;;  %s216_s30 = sshll.u32 %s207_s28, 4  ;;  %s215_s27 = int_to_ptr.hbm [resolvable:$true] %s214_s27  ;;  %s217_s30 = int_to_ptr.vmem [resolvable:$true] %s216_s30 }
  0x1e   : > { %p2947_p2 = pnand %p2517_p3, %p40_p5  ;;  %s226_s10 = sand.u32 1, %s2826_s21  }
  0x1f   : > { %s2430_s11 = sshll.u32 %s2938_s14, 3  ;;  %s204_s8 = scalar_lea.sflag [#allocation3], %s2938_s14 }
  0x20   : > { %s2692_s9 = sshra.s32 %s215_s27, 4  ;;  %p2696_p10 = pneg %p2947_p2  ;;  %s2693_s9 = int_to_ptr.hbm [resolvable:$true] %s2692_s9 }
  0x21   : > { %s2694_s2 = scalar_lea.hbm %s2693_s9, 256  ;;  %s2699_s17 = scalar_lea.hbm %s3636_s0, 512 }
  0x22   : > { %p2695_p9 = scmp.ne.s32.totalorder %s2693_s9, %s2694_s2  ;;  %p2700_p0 = scmp.lt.s32.totalorder %s2693_s9, %s3636_s0 }
  0x23   : > { %p2701_p3 = scmp.lt.s32.totalorder %s2699_s17, %s2694_s2 }
  0x24   : > { %p2697_p12 = pnand %p2696_p10, %p2695_p9 }
  0x25   : > { %p2702_p5 = por %p2701_p3, %p2700_p0 }
  0x26   : > { %p2698_p13 = pneg %p2697_p12 }
  0x28   : > { %p2703_p11 = pnand %p2702_p5, %p2698_p13 }
  0x2a   : > { %2706 = shalt.err (!%p2703_p11)
}
  0x2b   : > { %s3657_s14 = smov 8   ;;  %s3658_s28 = smov 128  }
  0x2c   : > { %2508 = dma.hbm_to_vmem [thread:$0]  (!%p2947_p2), %s215_s27, 4096, %s217_s30, %s204_s8, %s3658_s28, %s3658_s28, %s3657_s14  }
  0x2d   : > { %s2431_s12 = sshll.u32 %s2826_s21, 3  ;;  %s230_s20 = scalar_lea.vmem [#allocation5], %s2430_s11 }
  0x2e   : > { %s237_s15 = sshll.u32 %s230_s20, 4  ;;  %s234_s23 = scalar_lea.hbm %s3637_s1, %s2431_s12  ;;  %s238_s15 = int_to_ptr.vmem [resolvable:$true] %s237_s15 }
  0x2f   : > { %s235_s2 = sshll.u32 %s234_s23, 4  ;;  %s227_s9 = scalar_lea.sflag [#allocation6], %s226_s10  ;;  %s236_s2 = int_to_ptr.hbm [resolvable:$true] %s235_s2 }
  0x30   : > { %s2722_s17 = sshra.s32 %s236_s2, 4  ;;  %s2729_s20 = scalar_lea.hbm %s3637_s1, 16  ;;  %s2723_s17 = int_to_ptr.hbm [resolvable:$true] %s2722_s17 }
  0x31   : > { %s2724_s26 = scalar_lea.hbm %s2723_s17, 8  ;;  %p2730_p13 = scmp.lt.s32.totalorder %s2723_s17, %s3637_s1 }
  0x32   : > { %p2725_p11 = scmp.ne.s32.totalorder %s2723_s17, %s2724_s26  ;;  %p2731_p0 = scmp.lt.s32.totalorder %s2729_s20, %s2724_s26 }
  0x34   : > { %p2727_p9 = pnand %p2725_p11, %p2696_p10  ;;  %p2732_p3 = por %p2731_p0, %p2730_p13 }
  0x36   : > { %p2728_p12 = pneg %p2727_p9 }
  0x38   : > { %p2733_p5 = pnand %p2732_p3, %p2728_p12 }
  0x3a   : > { %2736 = shalt.err (!%p2733_p5)
}
  0x3b   : > { %s2831_s7 = smov 16   ;;  %s2832_s12 = smov 1  }
  0x3c   : > { %2511 = dma.hbm_to_vmem [thread:$0]  (!%p2947_p2), %s236_s2, 128, %s238_s15, %s227_s9, %s2831_s7, %s2831_s7, %s2832_s12  }
  0x3d   : > { %249 = sbr.rel (%p2906_p8) target bundleno = 767 (0x2ff), region = 40  ;;  %s2988_s10 = sand.u32 (!%p2906_p8), 1, %s2818_s19  }
  0x3e   : > { %s2433_s14 = sshll.u32 (!%p2906_p8), %s2988_s10, 8  ;;  %s252_s28 = scalar_lea.sflag (!%p2906_p8), [#allocation3], %s2988_s10 }
  0x3f   : > { %s2992_s16 = scalar_lea.vmem (!%p2906_p8), [#allocation2], %s2433_s14 }
  0x42   : > { %2797 = dma.done.wait (%p2893_p4), %s252_s28, 4096  }
  0x43   : > { %2799 = vsyncadd (%p2893_p4), %s252_s28, 4294963200  ;;  %s261_s29 = sand.u32 1, %s2884_s22   ;;  %s2434_s6 = sshll.u32 %s2988_s10, 3 }
  0x44   : > { %s262_s15 = scalar_lea.sflag [#allocation6], %s261_s29  ;;  %s3002_s23 = scalar_lea.vmem [#allocation5], %s2434_s6 }
  0x45   : > { %2801 = dma.done.wait (%p2893_p4), %s262_s15, 128  }
  0x46   : > { %2803 = vsyncadd (%p2893_p4), %s262_s15, 4294967168 }
  0x47   : > { %2805 = dma.done.wait (%p45_p1), [#allocation6], 2048  }
  0x48   : > { %2807 = vsyncadd (%p45_p1), [#allocation6], 4294965248  ;;  %v352_v0 = vld [vmem:[#allocation7 + $0x78] sm:$0xff]  ;;  %v351_v1 = vld [vmem:[#allocation7 + $0x70] sm:$0xff]  ;;  %vm760_vm0 = vcmask 261120   ;;  %vm695_vm1 = vcmask 253952  }
  0x49   : > { %357 = vmatpush.msra.mxu0 %v352_v0  ;;  %2445 = vmatpush.msra.mxu3 %v352_v0  ;;  %v350_v2 = vld [vmem:[#allocation7 + $0x68] sm:$0xff]  ;;  %v349_v3 = vld [vmem:[#allocation7 + $0x60] sm:$0xff]  ;;  %v348_v4 = vld [vmem:[#allocation7 + $0x58] sm:$0xff]  ;;  %vm2282_vm2 = vcmask 1041409   ;;  %vm2285_vm3 = vcmask 1042434   ;;  %vm2288_vm4 = vcmask 1043459  }
  0x4a   : > { %2444 = vmatpush.msra.mxu2 %v352_v0  ;;  %2443 = vmatpush.msra.mxu1 %v352_v0  ;;  %v347_v5 = vld [vmem:[#allocation7 + $0x50] sm:$0xff]  ;;  %v346_v6 = vld [vmem:[#allocation7 + $0x48] sm:$0xff]  ;;  %v345_v7 = vld [vmem:[#allocation7 + $0x40] sm:$0xff]  ;;  %s2438_s26 = sshll.u32 %s2884_s22, 3  ;;  %vm2291_vm5 = vcmask 1044484   ;;  %vm2294_vm6 = vcmask 1045509  }
  0x4b   : > { %358 = vmatpush.msra.mxu0 %v351_v1  ;;  %2448 = vmatpush.msra.mxu3 %v351_v1  ;;  %v344_v8 = vld [vmem:[#allocation7 + $0x38] sm:$0xff]  ;;  %v343_v9 = vld [vmem:[#allocation7 + $0x30] sm:$0xff]  ;;  %v342_v10 = vld [vmem:[#allocation7 + $0x28] sm:$0xff]  ;;  %s2315_s20 = scalar_lea.hbm %s3641_s5, %s2438_s26  ;;  %vm2297_vm7 = vcmask 1046534   ;;  %s302_s22 = scalar_lea.vmem [#allocation8], %s2434_s6  ;;  %vm2300_vm8 = vcmask 1047559  }
  0x4c   : > { %2447 = vmatpush.msra.mxu2 %v351_v1  ;;  %2446 = vmatpush.msra.mxu1 %v351_v1  ;;  %v341_v11 = vld [vmem:[#allocation7 + $0x20] sm:$0xff]  ;;  %v340_v12 = vld [vmem:[#allocation7 + $0x18] sm:$0xff]  ;;  %v339_v13 = vld [vmem:[#allocation7 + $0x10] sm:$0xff]  ;;  %s2317_s30 = sshll.u32 %s302_s22, 4  ;;  %s2319_s11 = sshll.u32 %s2315_s20, 4  ;;  %s2318_s30 = int_to_ptr.vmem [resolvable:$true] %s2317_s30  ;;  %s2320_s11 = int_to_ptr.hbm [resolvable:$true] %s2319_s11 }
  0x4d   : > { %359 = vmatpush.msra.mxu0 %v350_v2  ;;  %2451 = vmatpush.msra.mxu3 %v350_v2  ;;  %v338_v14 = vld [vmem:[#allocation7 + $0x8] sm:$0xff]  ;;  %v337_v15 = vld [vmem:[#allocation7] sm:$0xff]  ;;  %v3013_v16 = vld [vmem:[%s2992_s16] sm:$0xff]  ;;  %s2305_s7 = scalar_lea.sflag [#allocation4], %s2988_s10  ;;  %s2766_s12 = sshra.s32 %s2320_s11, 4  ;;  %s2767_s12 = int_to_ptr.hbm [resolvable:$true] %s2766_s12 }
  0x4e   : > { %2450 = vmatpush.msra.mxu2 %v350_v2  ;;  %2449 = vmatpush.msra.mxu1 %v350_v2  ;;  %v3017_v17 = vld [vmem:[%s2992_s16 + $0x8] sm:$0xff]  ;;  %v3021_v18 = vld [vmem:[%s2992_s16 + $0x10] sm:$0xff]  ;;  %v3025_v19 = vld [vmem:[%s2992_s16 + $0x18] sm:$0xff]  ;;  %s2768_s14 = scalar_lea.hbm %s2767_s12, 8  ;;  %s2772_s29 = scalar_lea.hbm %s3641_s5, 16 }
  0x4f   : > { %360 = vmatpush.msra.mxu0 %v349_v3  ;;  %2454 = vmatpush.msra.mxu3 %v349_v3  ;;  %v3029_v20 = vld [vmem:[%s2992_s16 + $0x20] sm:$0xff]  ;;  %v3033_v21 = vld [vmem:[%s2992_s16 + $0x28] sm:$0xff]  ;;  %v3037_v22 = vld [vmem:[%s2992_s16 + $0x30] sm:$0xff]  ;;  %p2769_p1 = scmp.ne.s32.totalorder %s2767_s12, %s2768_s14  ;;  %p2773_p2 = scmp.lt.s32.totalorder %s2767_s12, %s3641_s5 }
  0x50   : > { %2453 = vmatpush.msra.mxu2 %v349_v3  ;;  %2452 = vmatpush.msra.mxu1 %v349_v3  ;;  %v3041_v23 = vld [vmem:[%s2992_s16 + $0x38] sm:$0xff]  ;;  %v3045_v24 = vld [vmem:[%s2992_s16 + $0x40] sm:$0xff]  ;;  %v3049_v25 = vld [vmem:[%s2992_s16 + $0x48] sm:$0xff]  ;;  %p2774_p10 = scmp.lt.s32.totalorder %s2772_s29, %s2768_s14 }
  0x51   : > { %361 = vmatpush.msra.mxu0 %v348_v4  ;;  %2457 = vmatpush.msra.mxu3 %v348_v4  ;;  %v3053_v26 = vld [vmem:[%s2992_s16 + $0x50] sm:$0xff]  ;;  %v3057_v27 = vld [vmem:[%s2992_s16 + $0x58] sm:$0xff]  ;;  %v3061_v28 = vld [vmem:[%s2992_s16 + $0x60] sm:$0xff]  ;;  %p2770_p4 = pnand %p2769_p1, %p2933_p7 }
  0x52   : > { %2456 = vmatpush.msra.mxu2 %v348_v4  ;;  %2455 = vmatpush.msra.mxu1 %v348_v4  ;;  %v3065_v29 = vld [vmem:[%s2992_s16 + $0x68] sm:$0xff]  ;;  %v333_v30 = vld [vmem:[%s2992_s16 + $0xe0] sm:$0xff]  ;;  %v3070_v31 = vld [vmem:[%s2992_s16 + $0x70] sm:$0xff]  ;;  %p2775_p11 = por %p2774_p10, %p2773_p2 }
  0x53   : > { %362 = vmatpush.msra.mxu0 %v347_v5  ;;  %2460 = vmatpush.msra.mxu3 %v347_v5  ;;  %v334_v32 = vld [vmem:[%s2992_s16 + $0xe8] sm:$0xff]  ;;  %v3076_v34 = vld [vmem:[%s2992_s16 + $0x78] sm:$0xff]  ;;  %v335_v35 = vld [vmem:[%s2992_s16 + $0xf0] sm:$0xff]  ;;  %p2771_p8 = pneg %p2770_p4 }
  0x54   : > { %2459 = vmatpush.msra.mxu2 %v347_v5  ;;  %2458 = vmatpush.msra.mxu1 %v347_v5  ;;  %v330_v33 = vld [vmem:[%s2992_s16 + $0xc8] sm:$0xff]  ;;  %v331_v36 = vld [vmem:[%s2992_s16 + $0xd0] sm:$0xff]  ;;  %v3082_v38 = vld [vmem:[%s2992_s16 + $0x80] sm:$0xff] }
  0x55   : > { %363 = vmatpush.msra.mxu0 %v346_v6  ;;  %2463 = vmatpush.msra.mxu3 %v346_v6  ;;  %v336_v39 = vld [vmem:[%s2992_s16 + $0xf8] sm:$0xff]  ;;  %v3088_v42 = vld [vmem:[%s2992_s16 + $0x88] sm:$0xff]  ;;  %v3096_v45 = vld [vmem:[%s2992_s16 + $0x90] sm:$0xff]  ;;  %p2776_p9 = pnand %p2775_p11, %p2771_p8 }
  0x56   : > { %2462 = vmatpush.msra.mxu2 %v346_v6  ;;  %2461 = vmatpush.msra.mxu1 %v346_v6  ;;  %v332_v40 = vld [vmem:[%s2992_s16 + $0xd8] sm:$0xff]  ;;  %v3102_v46 = vld [vmem:[%s3639_s3] ss:$0 sm:$0xff]  ;;  %v3118_v59 = vld [vmem:[%s2992_s16 + $0xa8] sm:$0xff] }
  0x57   : > { %364 = vmatpush.msra.mxu0 %v345_v7  ;;  %2466 = vmatpush.msra.mxu3 %v345_v7  ;;  %v3092_v43 = vld [vmem:[%s2992_s16 + $0xb8] sm:$0xff]  ;;  %v329_v49 = vld [vmem:[%s2992_s16 + $0xc0] sm:$0xff]  ;;  %v3127_v0 = vld [vmem:[%s2992_s16 + $0xb0] sm:$0xff] }
  0x58   : > { %2465 = vmatpush.msra.mxu2 %v345_v7  ;;  %2464 = vmatpush.msra.mxu1 %v345_v7  ;;  %v3105_v48 = vld [vmem:[%s2992_s16 + $0x98] sm:$0xff]  ;;  %v3113_v54 = vld [vmem:[%s2992_s16 + $0xa0] sm:$0xff] }
  0x59   : > { %365 = vmatpush.msra.mxu0 %v344_v8  ;;  %2469 = vmatpush.msra.mxu3 %v344_v8  ;;  %v3124_v62 = vld [vmem:[%s3640_s4] sm:$0x1] }
  0x5a   : > { %2468 = vmatpush.msra.mxu2 %v344_v8  ;;  %2467 = vmatpush.msra.mxu1 %v344_v8 }
  0x5b   : > { %366 = vmatpush.msra.mxu0 %v343_v9  ;;  %2472 = vmatpush.msra.mxu3 %v343_v9 }
  0x5c   : > { %2471 = vmatpush.msra.mxu2 %v343_v9  ;;  %2470 = vmatpush.msra.mxu1 %v343_v9 }
  0x5d   : > { %367 = vmatpush.msra.mxu0 %v342_v10  ;;  %2475 = vmatpush.msra.mxu3 %v342_v10 }
  0x5e   : > { %2474 = vmatpush.msra.mxu2 %v342_v10  ;;  %2473 = vmatpush.msra.mxu1 %v342_v10 }
  0x5f   : > { %368 = vmatpush.msra.mxu0 %v341_v11  ;;  %2478 = vmatpush.msra.mxu3 %v341_v11 }
  0x60   : > { %2477 = vmatpush.msra.mxu2 %v341_v11  ;;  %2476 = vmatpush.msra.mxu1 %v341_v11 }
  0x61   : > { %369 = vmatpush.msra.mxu0 %v340_v12  ;;  %2481 = vmatpush.msra.mxu3 %v340_v12 }
  0x62   : > { %2480 = vmatpush.msra.mxu2 %v340_v12  ;;  %2479 = vmatpush.msra.mxu1 %v340_v12 }
  0x63   : > { %370 = vmatpush.msra.mxu0 %v339_v13  ;;  %2484 = vmatpush.msra.mxu3 %v339_v13 }
  0x64   : > { %2483 = vmatpush.msra.mxu2 %v339_v13  ;;  %2482 = vmatpush.msra.mxu1 %v339_v13 }
  0x65   : > { %371 = vmatpush.msra.mxu0 %v338_v14  ;;  %2487 = vmatpush.msra.mxu3 %v338_v14 }
  0x66   : > { %2486 = vmatpush.msra.mxu2 %v338_v14  ;;  %2485 = vmatpush.msra.mxu1 %v338_v14 }
  0x67   : > { %372 = vmatpush.msra.mxu0 %v337_v15  ;;  %2490 = vmatpush.msra.mxu3 %v337_v15 }
  0x68   : > { %373 = vmatmul.f32.vlgmr.msra.gmra.mxu0 %v3013_v16  ;;  %2489 = vmatpush.msra.mxu2 %v337_v15 }
  0x69   : > { %2488 = vmatpush.msra.mxu1 %v337_v15  ;;  %457 = vmatmul.f32.vlgmr.msra.gmra.mxu3 %v333_v30 }
  0x6a   : > { %448 = vmatmul.f32.vlgmr.msra.gmra.mxu2 %v330_v33  ;;  %442 = vmatmul.f32.vlgmr.msra.gmra.mxu1 %v3092_v43 }
  0x70   : > { %376 = vmatmul.f32.gmra.mxu0 %v3017_v17 }
  0x71   : > { %460 = vmatmul.f32.gmra.mxu3 %v334_v32 }
  0x72   : > { %451 = vmatmul.f32.gmra.mxu2 %v331_v36  ;;  %445 = vmatmul.f32.gmra.mxu1 %v329_v49 }
  0x78   : > { %379 = vmatmul.f32.gmra.mxu0 %v3021_v18 }
  0x79   : > { %463 = vmatmul.f32.gmra.mxu3 %v335_v35 }
  0x7a   : > { %454 = vmatmul.f32.gmra.mxu2 %v332_v40 }
  0x80   : > { %382 = vmatmul.f32.gmra.mxu0 %v3025_v19 }
  0x81   : > { %466 = vmatmul.f32.gmra.mxu3 %v336_v39 }
  0x88   : > { %385 = vmatmul.f32.gmra.mxu0 %v3029_v20 }
  0x90   : > { %388 = vmatmul.f32.gmra.mxu0 %v3033_v21 }
  0x98   : > { %391 = vmatmul.f32.gmra.mxu0 %v3037_v22 }
  0xa0   : > { %394 = vmatmul.f32.gmra.mxu0 %v3041_v23 }
  0xa8   : > { %397 = vmatmul.f32.gmra.mxu0 %v3045_v24 }
  0xb0   : > { %400 = vmatmul.f32.gmra.mxu0 %v3049_v25 }
  0xb8   : > { %403 = vmatmul.f32.gmra.mxu0 %v3053_v26 }
  0xc0   : > { %406 = vmatmul.f32.gmra.mxu0 %v3057_v27 }
  0xc8   : > { %409 = vmatmul.f32.gmra.mxu0 %v3061_v28 }
  0xd0   : > { %412 = vmatmul.f32.gmra.mxu0 %v3065_v29 }
  0xd8   : > { %415 = vmatmul.f32.gmra.mxu0 %v3070_v31 }
  0xe0   : > { %418 = vmatmul.f32.gmra.mxu0 %v3076_v34 }
  0xe5   : > { %v374_v37 = vpop.f32.mrf.mxu0 }
  0xe6   : > { %v375_v56 = vadd.f32 %v3102_v46, %v374_v37 }
  0xe8   : > { %421 = vmatmul.f32.gmra.mxu0 %v3082_v38 }
  0xed   : > { %v377_v41 = vpop.f32.mrf.mxu0  ;;  %v449_v49 = vpop.f32.mrf.mxu2 }
  0xee   : > { %v378_v52 = vadd.f32 %v3102_v46, %v377_v41 }
  0xf0   : > { %424 = vmatmul.f32.gmra.mxu0 %v3088_v42 }
  0xf5   : > { %v380_v44 = vpop.f32.mrf.mxu0 }
  0xf6   : > { %v381_v51 = vadd.f32 %v3102_v46, %v380_v44 }
  0xf8   : > { %427 = vmatmul.f32.gmra.mxu0 %v3096_v45 }
  0xfd   : > { %v383_v47 = vpop.f32.mrf.mxu0 }
  0xfe   : > { %v384_v50 = vadd.f32 %v3102_v46, %v383_v47 }
 0x100   : > { %2558 = vtanh.f32 %v384_v50  ;;  %430 = vmatmul.f32.gmra.mxu0 %v3105_v48 }
 0x101   : > { %2560 = vtanh.f32 %v381_v51 }
 0x102   : > { %2562 = vtanh.f32 %v378_v52 }
 0x103   : > { %2564 = vtanh.f32 %v375_v56  ;;  %v452_v56 = vpop.f32.mrf.mxu2 }
 0x105   : > { %v386_v53 = vpop.f32.mrf.mxu0 }
 0x106   : > { %v2559_v55 = vpop.eup %2558  ;;  %v387_v7 = vadd.f32 %v3102_v46, %v386_v53 }
 0x107   : > { %515 = vmatpush.xpose.msrb.mxu1 %v2559_v55  ;;  %v2561_v57 = vpop.eup %2560  ;;  %v3144_v55 = vpop.f32.mrf.mxu3 }
 0x108   : > { %433 = vmatmul.f32.gmra.mxu0 %v3113_v54  ;;  %v2563_v60 = vpop.eup %2562 }
 0x109   : > { %v2565_v61 = vpop.eup %2564 }
 0x10b   : > { %516 = vmatpush.xpose.msrb.mxu1 %v2561_v57 }
 0x10d   : > { %v389_v58 = vpop.f32.mrf.mxu0 }
 0x10e   : > { %v390_v4 = vadd.f32 %v3102_v46, %v389_v58 }
 0x10f   : > { %517 = vmatpush.xpose.msrb.mxu1 %v2563_v60 }
 0x110   : > { %436 = vmatmul.f32.gmra.mxu0 %v3118_v59 }
 0x113   : > { %518 = vmatpush.xpose.msrb.mxu1 %v2565_v61 }
 0x115   : > { %v392_v63 = vpop.f32.mrf.mxu0 }
 0x116   : > { %519 = vmatmul.f32.vlgmr.msrb.gmra.mxu1 %v3124_v62  ;;  %v393_v3 = vadd.f32 %v3102_v46, %v392_v63  ;;  %v453_v63 = vadd.f32 %v3102_v46, %v452_v56 }
 0x118   : > { %439 = vmatmul.f32.gmra.mxu0 %v3127_v0 }
 0x11d   : > { %v395_v1 = vpop.f32.mrf.mxu0 }
 0x11e   : > { %v396_v2 = vadd.f32 %v3102_v46, %v395_v1  ;;  %v455_v1 = vpop.f32.mrf.mxu2 }
 0x120   : > { %2566 = vtanh.f32 %v396_v2  ;;  %v461_v2 = vpop.f32.mrf.mxu3 }
 0x121   : > { %2568 = vtanh.f32 %v393_v3  ;;  %v456_v3 = vadd.f32 %v3102_v46, %v455_v1 }
 0x122   : > { %2570 = vtanh.f32 %v390_v4  ;;  %v443_v4 = vpop.f32.mrf.mxu1 }
 0x123   : > { %2572 = vtanh.f32 %v387_v7  ;;  %v450_v7 = vadd.f32 %v3102_v46, %v449_v49 }
 0x125   : > { %v398_v5 = vpop.f32.mrf.mxu0 }
 0x126   : > { %v2567_v6 = vpop.eup %2566  ;;  %v399_v35 = vadd.f32 %v3102_v46, %v398_v5 }
 0x127   : > { %535 = vmatpush.xpose.msrb.mxu2 %v2567_v6  ;;  %v2569_v8 = vpop.eup %2568  ;;  %v444_v6 = vadd.f32 %v3102_v46, %v443_v4 }
 0x128   : > { %v2571_v10 = vpop.eup %2570 }
 0x129   : > { %v2573_v11 = vpop.eup %2572 }
 0x12b   : > { %536 = vmatpush.xpose.msrb.mxu2 %v2569_v8 }
 0x12d   : > { %v401_v9 = vpop.f32.mrf.mxu0 }
 0x12e   : > { %v402_v30 = vadd.f32 %v3102_v46, %v401_v9 }
 0x12f   : > { %537 = vmatpush.xpose.msrb.mxu2 %v2571_v10 }
 0x133   : > { %538 = vmatpush.xpose.msrb.mxu2 %v2573_v11 }
 0x135   : > { %v404_v12 = vpop.f32.mrf.mxu0 }
 0x136   : > { %539 = vmatmul.f32.vlgmr.msrb.gmra.mxu2 %v3124_v62  ;;  %v405_v15 = vadd.f32 %v3102_v46, %v404_v12  ;;  %v464_v12 = vpop.f32.mrf.mxu3 }
 0x13d   : > { %v407_v13 = vpop.f32.mrf.mxu0 }
 0x13e   : > { %v408_v14 = vadd.f32 %v3102_v46, %v407_v13  ;;  %v446_v13 = vpop.f32.mrf.mxu1 }
 0x140   : > { %2574 = vtanh.f32 %v408_v14  ;;  %v447_v14 = vadd.f32 %v3102_v46, %v446_v13  ;;  %v964_v13 = vand.u32 4294901760, %v3041_v23 }
 0x141   : > { %2576 = vtanh.f32 %v405_v15 }
 0x142   : > { %2578 = vtanh.f32 %v402_v30 }
 0x143   : > { %2580 = vtanh.f32 %v399_v35 }
 0x145   : > { %v410_v32 = vpop.f32.mrf.mxu0 }
 0x146   : > { %v2575_v33 = vpop.eup %2574  ;;  %v411_v57 = vadd.f32 %v3102_v46, %v410_v32 }
 0x147   : > { %555 = vmatpush.xpose.msrb.mxu3 %v2575_v33  ;;  %v2577_v36 = vpop.eup %2576  ;;  %v3155_v33 = vand.u32 4294901760, %v3025_v19 }
 0x148   : > { %v2579_v39 = vpop.eup %2578 }
 0x149   : > { %v2581_v40 = vpop.eup %2580 }
 0x14b   : > { %556 = vmatpush.xpose.msrb.mxu3 %v2577_v36  ;;  %v3159_v36 = vand.u32 4294901760, %v3021_v18 }
 0x14d   : > { %v413_v37 = vpop.f32.mrf.mxu0 }
 0x14e   : > { %v414_v51 = vadd.f32 %v3102_v46, %v413_v37 }
 0x14f   : > { %557 = vmatpush.xpose.msrb.mxu3 %v2579_v39  ;;  %v3163_v39 = vsub.f32 %v3025_v19, %v3155_v33 }
 0x153   : > { %558 = vmatpush.xpose.msrb.mxu3 %v2581_v40 }
 0x155   : > { %v416_v41 = vpop.f32.mrf.mxu0 }
 0x156   : > { %559 = vmatmul.f32.vlgmr.msrb.gmra.mxu3 %v3124_v62  ;;  %v417_v50 = vadd.f32 %v3102_v46, %v416_v41  ;;  %v467_v41 = vpop.f32.mrf.mxu3 }
 0x157   : > { %v468_v19 = vadd.f32 %v3102_v46, %v467_v41 }
 0x15d   : > { %v419_v44 = vpop.f32.mrf.mxu0 }
 0x15e   : > { %v420_v47 = vadd.f32 %v3102_v46, %v419_v44  ;;  %v3167_v44 = vand.u32 4294901760, %v3017_v17 }
 0x160   : > { %2582 = vtanh.f32 %v420_v47  ;;  %v3182_v56 = vsub.f32 %v3017_v17, %v3167_v44  ;;  %v462_v17 = vadd.f32 %v3102_v46, %v461_v2 }
 0x161   : > { %2584 = vtanh.f32 %v417_v50  ;;  %v3171_v50 = vand.u32 4294901760, %v3013_v16 }
 0x162   : > { %2586 = vtanh.f32 %v414_v51  ;;  %v3175_v51 = vsub.f32 %v3021_v18, %v3159_v36  ;;  %v465_v18 = vadd.f32 %v3102_v46, %v464_v12 }
 0x163   : > { %2588 = vtanh.f32 %v411_v57 }
 0x164   : > { %2590 = vtanh.f32 %v456_v3 }
 0x165   : > { %v422_v52 = vpop.f32.mrf.mxu0  ;;  %2592 = vtanh.f32 %v453_v63  ;;  %v459_v63 = vadd.f32 %v3102_v46, %v3144_v55 }
 0x166   : > { %v2583_v53 = vpop.eup %2582  ;;  %2594 = vtanh.f32 %v444_v6 }
 0x167   : > { %575 = vmatpush.xpose.msra.mxu1 %v2583_v53  ;;  %v2585_v58 = vpop.eup %2584  ;;  %2596 = vtanh.f32 %v450_v7  ;;  %v423_v53 = vadd.f32 %v3102_v46, %v422_v52  ;;  %v679_v7 = vld [vmem:[%s3002_s23] sm:$0x1] }
 0x168   : > { %v2587_v61 = vpop.eup %2586  ;;  %2598 = vtanh.f32 %v447_v14 }
 0x169   : > { %v2589_v5 = vpop.eup %2588 }
 0x16a   : > { %v2591_v9 = vpop.eup %2590 }
 0x16b   : > { %576 = vmatpush.xpose.msra.mxu1 %v2585_v58  ;;  %v2593_v10 = vpop.eup %2592  ;;  %v3187_v58 = vsub.f32 %v3013_v16, %v3171_v50 }
 0x16c   : > { %v2595_v11 = vpop.eup %2594 }
 0x16d   : > { %v425_v60 = vpop.f32.mrf.mxu0  ;;  %615 = vmatpush.xpose.msra.mxu3 %v2595_v11  ;;  %v2597_v30 = vpop.eup %2596 }
 0x16e   : > { %v2599_v37 = vpop.eup %2598  ;;  %v426_v40 = vadd.f32 %v3102_v46, %v425_v60 }
 0x16f   : > { %577 = vmatpush.xpose.msra.mxu1 %v2587_v61 }
 0x173   : > { %578 = vmatpush.xpose.msra.mxu1 %v2589_v5 }
 0x175   : > { %v428_v8 = vpop.f32.mrf.mxu0 }
 0x176   : > { %579 = vmatmul.f32.vlgmr.msra.gmra.mxu1 %v3124_v62  ;;  %v429_v35 = vadd.f32 %v3102_v46, %v428_v8 }
 0x177   : > { %635 = vmatpush.xpose.msrb.mxu1 %v2591_v9 }
 0x17b   : > { %636 = vmatpush.xpose.msrb.mxu1 %v2593_v10 }
 0x17d   : > { %v431_v15 = vpop.f32.mrf.mxu0 }
 0x17e   : > { %v432_v32 = vadd.f32 %v3102_v46, %v431_v15 }
 0x17f   : > { %637 = vmatpush.xpose.msrb.mxu1 %v2597_v30  ;;  %v966_v30 = vand.u32 4294901760, %v3037_v22 }
 0x180   : > { %2600 = vtanh.f32 %v432_v32 }
 0x181   : > { %2602 = vtanh.f32 %v429_v35  ;;  %v968_v35 = vand.u32 4294901760, %v3033_v21  ;;  %v3222_v41 = vsub.f32 %v3037_v22, %v966_v30 }
 0x182   : > { %2604 = vtanh.f32 %v426_v40  ;;  %v807_v40 = vand.u32 4294901760, %v3163_v39 }
 0x183   : > { %638 = vmatpush.xpose.msrb.mxu1 %v2599_v37  ;;  %2606 = vtanh.f32 %v468_v19  ;;  %v3216_v37 = vsub.f32 %v3041_v23, %v964_v13  ;;  %v970_v23 = vand.u32 4294901760, %v3029_v20  ;;  %v3228_v19 = vsub.f32 %v3033_v21, %v968_v35 }
 0x184   : > { %2608 = vtanh.f32 %v423_v53  ;;  %v813_v53 = vand.u32 4294901760, %v3175_v51  ;;  %v808_v22 = vsub.f32 %v3163_v39, %v807_v40 }
 0x185   : > { %v434_v47 = vpop.f32.mrf.mxu0  ;;  %2610 = vtanh.f32 %v465_v18  ;;  %v3239_v18 = vsub.f32 %v3029_v20, %v970_v23 }
 0x186   : > { %v2601_v49 = vpop.eup %2600  ;;  %639 = vmatmul.f32.vlgmr.msrb.gmra.mxu1 %v3124_v62  ;;  %2612 = vtanh.f32 %v462_v17  ;;  %v435_v9 = vadd.f32 %v3102_v46, %v434_v47 }
 0x187   : > { %848 = vmatpush.msra.mxu1 %v3163_v39  ;;  %595 = vmatpush.xpose.msra.mxu2 %v2601_v49  ;;  %v2603_v57 = vpop.eup %2602  ;;  %v809_v39 = vand.u32 4294901760, %v808_v22 }
 0x188   : > { %v2605_v60 = vpop.eup %2604 }
 0x189   : > { %851 = vmatpush.msra.mxu1 %v3175_v51  ;;  %v2607_v16 = vpop.eup %2606 }
 0x18a   : > { %v2609_v61 = vpop.eup %2608 }
 0x18b   : > { %596 = vmatpush.xpose.msra.mxu2 %v2603_v57  ;;  %854 = vmatpush.msra.mxu1 %v3182_v56  ;;  %v2611_v2 = vpop.eup %2610  ;;  %v819_v57 = vand.u32 4294901760, %v3182_v56 }
 0x18c   : > { %v2613_v55 = vpop.eup %2612 }
 0x18d   : > { %v437_v52 = vpop.f32.mrf.mxu0  ;;  %857 = vmatpush.msra.mxu1 %v3187_v58 }
 0x18e   : > { %v438_v6 = vadd.f32 %v3102_v46, %v437_v52  ;;  %v814_v52 = vsub.f32 %v3175_v51, %v813_v53 }
 0x18f   : > { %937 = vmatpush.msrb.mxu1 %v3155_v33  ;;  %597 = vmatpush.xpose.msra.mxu2 %v2605_v60  ;;  %v820_v60 = vsub.f32 %v3182_v56, %v819_v57  ;;  %v995_v56 = vand.u32 4294901760, %v3216_v37 }
 0x190   : > { %v815_v20 = vand.u32 4294901760, %v814_v52 }
 0x191   : > { %939 = vmatpush.msrb.mxu1 %v3159_v36  ;;  %v821_v51 = vand.u32 4294901760, %v820_v60  ;;  %v3295_v60 = vand.u32 4294901760, %v3070_v31 }
 0x193   : > { %941 = vmatpush.msrb.mxu1 %v3167_v44  ;;  %598 = vmatpush.xpose.msra.mxu2 %v2609_v61  ;;  %v520_v1 = vpop.f32.mrf.mxu1 }
 0x194   : > { %v663_v3 = vmul.f32 1.442695, %v520_v1  ;;  %v1013_v1 = vand.u32 4294901760, %v3239_v18 }
 0x195   : > { %943 = vmatpush.msrb.mxu1 %v3171_v50  ;;  %v440_v4 = vpop.f32.mrf.mxu0 }
 0x196   : > { %v441_v5 = vadd.f32 %v3102_v46, %v440_v4  ;;  %599 = vmatmul.f32.vlgmr.msra.gmra.mxu2 %v3124_v62  ;;  %2614 = vpow2.f32 %v663_v3  ;;  %v3258_v3 = vand.u32 4294901760, %v3057_v27 }
 0x197   : > { %655 = vmatpush.xpose.msrb.mxu2 %v2607_v16  ;;  %2616 = vtanh.f32 %v459_v63  ;;  %v1007_v16 = vand.u32 4294901760, %v3228_v19 }
 0x198   : > { %2618 = vtanh.f32 %v441_v5 }
 0x199   : > { %2620 = vtanh.f32 %v438_v6  ;;  %v1008_v5 = vsub.f32 %v3228_v19, %v1007_v16  ;;  %v3264_v6 = vand.u32 4294901760, %v3053_v26 }
 0x19a   : > { %2622 = vtanh.f32 %v435_v9  ;;  %v680_v9 = vld [vmem:[%s3002_s23 + $0x1] sm:$0x1] }
 0x19b   : > { %656 = vmatpush.xpose.msrb.mxu2 %v2611_v2 }
 0x19c   : > { %v2615_v8 = vpop.eup %2614 }
 0x19d   : > { %v2617_v10 = vpop.eup %2616  ;;  %v3204_v11 = vmul.f32 %v2615_v8, %v679_v7  ;;  %v1014_v7 = vsub.f32 %v3239_v18, %v1013_v1  ;;  %v1182_v8 = vsub.f32 %v3057_v27, %v3258_v3 }
 0x19e   : > { %v2619_v12 = vpop.eup %2618 }
 0x19f   : > { %657 = vmatpush.xpose.msrb.mxu2 %v2613_v55  ;;  %616 = vmatpush.xpose.msra.mxu3 %v2619_v12  ;;  %v762_v14 = vsel %vm760_vm0, %v3204_v11, 0  ;;  %v2621_v46 = vpop.eup %2620  ;;  %v696_v4 = vsel %vm695_vm1, %v3204_v11, 0.0  ;;  %v1009_v11 = vand.u32 4294901760, %v1008_v5 }
 0x1a0   : > { %v3209_v15 = vand.u32 4294901760, %v762_v14  ;;  %v2623_v47 = vpop.eup %2622  ;;  %697 = vadd.xlane.f32.xlu1 %v696_v4 }
 0x1a2   : > { %v785_v32 = vsub.f32 %v762_v14, %v3209_v15  ;;  %v1188_v14 = vsub.f32 %v3053_v26, %v3264_v6 }
 0x1a3   : > { %658 = vmatpush.xpose.msrb.mxu2 %v2617_v10  ;;  %617 = vmatpush.xpose.msra.mxu3 %v2621_v46  ;;  %v3271_v10 = vand.u32 4294901760, %v3049_v25  ;;  %v1015_v46 = vand.u32 4294901760, %v1014_v7 }
 0x1a4   : > { %860 = vmatmul.f32.vlgmr.msra.gmra.mxu1 %v785_v32  ;;  %v786_v49 = vand.u32 4294901760, %v785_v32 }
 0x1a5   : > { %1036 = vmatpush.msra.mxu1 %v3216_v37  ;;  %v1194_v27 = vsub.f32 %v3049_v25, %v3271_v10 }
 0x1a6   : > { %659 = vmatmul.f32.vlgmr.msrb.gmra.mxu2 %v3124_v62  ;;  %v787_v21 = vsub.f32 %v785_v32, %v786_v49  ;;  %v1183_v32 = vand.u32 4294901760, %v1182_v8 }
 0x1a7   : > { %877 = vmatpush.msra.mxu2 %v3155_v33  ;;  %618 = vmatpush.xpose.msra.mxu3 %v2623_v47 }
 0x1a8   : > { %1039 = vmatpush.msra.mxu1 %v3222_v41  ;;  %v1184_v47 = vsub.f32 %v1182_v8, %v1183_v32 }
 0x1a9   : > { %879 = vmatpush.msra.mxu2 %v3159_v36 }
 0x1aa   : > { %1042 = vmatpush.msra.mxu1 %v3228_v19  ;;  %619 = vmatmul.f32.vlgmr.msra.gmra.mxu3 %v3124_v62  ;;  %v788_v62 = vand.u32 4294901760, %v787_v21  ;;  %v1185_v22 = vand.u32 4294901760, %v1184_v47 }
 0x1ab   : > { %881 = vmatpush.msra.mxu2 %v3167_v44  ;;  %777 = vmatpush.msrb.mxu3 %v3155_v33  ;;  %v825_v33 = vand.u32 4294901760, %v3187_v58 }
 0x1ac   : > { %945 = vmatmul.f32.vlgmr.msrb.gmra.mxu1 %v3209_v15 }
 0x1ad   : > { %883 = vmatpush.msra.mxu2 %v3171_v50  ;;  %779 = vmatpush.msrb.mxu3 %v3159_v36  ;;  %v826_v36 = vsub.f32 %v3187_v58, %v825_v33  ;;  %v996_v58 = vsub.f32 %v3216_v37, %v995_v56 }
 0x1ae   : > { %887 = vmatmul.f32.vlgmr.msra.gmra.mxu2 %v786_v49  ;;  %1045 = vmatpush.msra.mxu1 %v3239_v18  ;;  %v1195_v49 = vand.u32 4294901760, %v1194_v27 }
 0x1af   : > { %965 = vmatpush.msrb.mxu2 %v964_v13  ;;  %781 = vmatpush.msrb.mxu3 %v3167_v44  ;;  %v827_v44 = vand.u32 4294901760, %v826_v36  ;;  %v997_v2 = vand.u32 4294901760, %v996_v58  ;;  %v3302_v36 = vand.u32 4294901760, %v3065_v29  ;;  %v681_v58 = vld [vmem:[%s3002_s23 + $0x2] sm:$0x1] }
 0x1b0   : > { %1125 = vmatpush.msrb.mxu1 %v964_v13 }
 0x1b1   : > { %967 = vmatpush.msrb.mxu2 %v966_v30  ;;  %783 = vmatpush.msrb.mxu3 %v3171_v50  ;;  %v1001_v50 = vand.u32 4294901760, %v3222_v41 }
 0x1b2   : > { %1127 = vmatpush.msrb.mxu1 %v966_v30  ;;  %789 = vmatmul.f32.vlgmr.msrb.gmra.mxu3 %v788_v62 }
 0x1b3   : > { %969 = vmatpush.msrb.mxu2 %v968_v35  ;;  %810 = vmatpush.msra.mxu3 %v809_v39  ;;  %v1002_v63 = vsub.f32 %v3222_v41, %v1001_v50  ;;  %v1189_v41 = vand.u32 4294901760, %v1188_v14  ;;  %v3289_v39 = vand.u32 4294901760, %v3076_v34 }
 0x1b4   : > { %1129 = vmatpush.msrb.mxu1 %v968_v35 }
 0x1b5   : > { %971 = vmatpush.msrb.mxu2 %v970_v23  ;;  %816 = vmatpush.msra.mxu3 %v815_v20  ;;  %v1003_v55 = vand.u32 4294901760, %v1002_v63  ;;  %v1190_v25 = vsub.f32 %v1188_v14, %v1189_v41  ;;  %v1370_v62 = vsub.f32 %v3076_v34, %v3289_v39  ;;  %v1376_v34 = vsub.f32 %v3070_v31, %v3295_v60 }
 0x1b6   : > { %1131 = vmatpush.msrb.mxu1 %v970_v23 }
 0x1b7   : > { %1065 = vmatpush.msra.mxu2 %v964_v13  ;;  %822 = vmatpush.msra.mxu3 %v821_v51  ;;  %v3275_v13 = vand.u32 4294901760, %v3045_v24 }
 0x1b9   : > { %1067 = vmatpush.msra.mxu2 %v966_v30  ;;  %828 = vmatpush.msra.mxu3 %v827_v44  ;;  %v540_v17 = vpop.f32.mrf.mxu2  ;;  %v3307_v44 = vand.u32 4294901760, %v3061_v28 }
 0x1ba   : > { %v665_v61 = vmul.f32 1.442695, %v540_v17  ;;  %830 = vmatmul.f32.vlgmr.msra.gmra.mxu3 %v3209_v15 }
 0x1bb   : > { %1069 = vmatpush.msra.mxu2 %v968_v35  ;;  %906 = vmatpush.msrb.mxu3 %v807_v40  ;;  %v1388_v17 = vsub.f32 %v3061_v28, %v3307_v44 }
 0x1bc   : > { %2624 = vpow2.f32 %v665_v61  ;;  %v1377_v61 = vand.u32 4294901760, %v1376_v34 }
 0x1bd   : > { %1071 = vmatpush.msra.mxu2 %v970_v23  ;;  %910 = vmatpush.msrb.mxu3 %v813_v53 }
 0x1bf   : > { %914 = vmatpush.msrb.mxu3 %v819_v57  ;;  %v1196_v57 = vsub.f32 %v1194_v27, %v1195_v49 }
 0x1c1   : > { %918 = vmatpush.msrb.mxu3 %v825_v33  ;;  %v1197_v52 = vand.u32 4294901760, %v1196_v57 }
 0x1c2   : > { %v2625_v12 = vpop.eup %2624  ;;  %920 = vmatmul.f32.vlgmr.msrb.gmra.mxu3 %v3209_v15  ;;  %v1200_v15 = vsub.f32 %v3045_v24, %v3275_v13  ;;  %v1191_v24 = vand.u32 4294901760, %v1190_v25 }
 0x1c3   : > { %998 = vmatpush.msra.mxu3 %v997_v2  ;;  %v688_v30 = vmul.f32 %v2625_v12, %v680_v9  ;;  %v1378_v2 = vsub.f32 %v1376_v34, %v1377_v61 }
 0x1c4   : > { %v1201_v19 = vand.u32 4294901760, %v1200_v15 }
 0x1c5   : > { %1004 = vmatpush.msra.mxu3 %v1003_v55  ;;  %v950_v35 = vsel %vm760_vm0, %v688_v30, 0  ;;  %v699_v37 = vsel %vm695_vm1, %v688_v30, 0.0  ;;  %v1379_v7 = vand.u32 4294901760, %v1378_v2 }
 0x1c6   : > { %v972_v40 = vand.u32 4294901760, %v950_v35  ;;  %700 = vadd.xlane.f32.xlu0 %v699_v37  ;;  %v1202_v18 = vsub.f32 %v1200_v15, %v1201_v19 }
 0x1c7   : > { %1010 = vmatpush.msra.mxu3 %v1009_v11 }
 0x1c8   : > { %v973_v26 = vsub.f32 %v950_v35, %v972_v40  ;;  %v1203_v33 = vand.u32 4294901760, %v1202_v18 }
 0x1c9   : > { %1016 = vmatpush.msra.mxu3 %v1015_v46  ;;  %v3326_v46 = vand.u32 4294901760, %v3088_v42 }
 0x1ca   : > { %v974_v23 = vand.u32 4294901760, %v973_v26  ;;  %1018 = vmatmul.f32.vlgmr.msra.gmra.mxu3 %v972_v40  ;;  %1048 = vmatmul.f32.vlgmr.msra.gmra.mxu1 %v973_v26 }
 0x1cb   : > { %1094 = vmatpush.msrb.mxu3 %v995_v56  ;;  %1224 = vmatpush.msra.mxu1 %v1182_v8  ;;  %v1371_v56 = vand.u32 4294901760, %v1370_v62  ;;  %v1570_v37 = vsub.f32 %v3088_v42, %v3326_v46 }
 0x1cc   : > { %v975_v53 = vsub.f32 %v973_v26, %v974_v23 }
 0x1cd   : > { %1098 = vmatpush.msrb.mxu3 %v1001_v50  ;;  %1227 = vmatpush.msra.mxu1 %v1188_v14  ;;  %v1382_v50 = vsub.f32 %v3065_v29, %v3302_v36  ;;  %v1389_v29 = vand.u32 4294901760, %v1388_v17  ;;  %v3321_v14 = vand.u32 4294901760, %v3105_v48 }
 0x1ce   : > { %v976_v21 = vand.u32 4294901760, %v975_v53 }
 0x1cf   : > { %1102 = vmatpush.msrb.mxu3 %v1007_v16  ;;  %1230 = vmatpush.msra.mxu1 %v1194_v27  ;;  %v1372_v16 = vsub.f32 %v1370_v62, %v1371_v56  ;;  %v1390_v8 = vsub.f32 %v1388_v17, %v1389_v29  ;;  %v1558_v27 = vsub.f32 %v3105_v48, %v3321_v14  ;;  %v3342_v48 = vand.u32 4294901760, %v3082_v38 }
 0x1d0   : > { %977 = vmatmul.f32.vlgmr.msrb.gmra.mxu2 %v976_v21 }
 0x1d1   : > { %1106 = vmatpush.msrb.mxu3 %v1013_v1  ;;  %1153 = vmatpush.msrb.mxu2 %v3258_v3  ;;  %v1383_v1 = vand.u32 4294901760, %v1382_v50  ;;  %v1373_v31 = vand.u32 4294901760, %v1372_v16  ;;  %v1391_v11 = vand.u32 4294901760, %v1390_v8  ;;  %v3381_v16 = vand.u32 4294901760, %v3113_v54 }
 0x1d2   : > { %1233 = vmatpush.msra.mxu1 %v1200_v15  ;;  %1108 = vmatmul.f32.vlgmr.msrb.gmra.mxu3 %v972_v40  ;;  %v1559_v15 = vand.u32 4294901760, %v1558_v27 }
 0x1d3   : > { %1186 = vmatpush.msra.mxu3 %v1185_v22  ;;  %1133 = vmatmul.f32.vlgmr.msrb.gmra.mxu1 %v972_v40  ;;  %v3395_v2 = vsub.f32 %v3113_v54, %v3381_v16 }
 0x1d4   : > { %1155 = vmatpush.msrb.mxu2 %v3264_v6  ;;  %1313 = vmatpush.msrb.mxu1 %v3258_v3  ;;  %v1560_v42 = vsub.f32 %v1558_v27, %v1559_v15 }
 0x1d5   : > { %1192 = vmatpush.msra.mxu3 %v1191_v24 }
 0x1d6   : > { %1157 = vmatpush.msrb.mxu2 %v3271_v10  ;;  %1315 = vmatpush.msrb.mxu1 %v3264_v6  ;;  %v1561_v22 = vand.u32 4294901760, %v1560_v42 }
 0x1d7   : > { %1198 = vmatpush.msra.mxu3 %v1197_v52 }
 0x1d8   : > { %1159 = vmatpush.msrb.mxu2 %v3275_v13  ;;  %1317 = vmatpush.msrb.mxu1 %v3271_v10 }
 0x1d9   : > { %1204 = vmatpush.msra.mxu3 %v1203_v33  ;;  %1075 = vmatmul.f32.vlgmr.msra.gmra.mxu2 %v974_v23  ;;  %v560_v20 = vpop.f32.mrf.mxu3 }
 0x1da   : > { %1253 = vmatpush.msra.mxu2 %v3258_v3  ;;  %v667_v51 = vmul.f32 1.442695, %v560_v20  ;;  %1319 = vmatpush.msrb.mxu1 %v3275_v13 }
 0x1db   : > { %1282 = vmatpush.msrb.mxu3 %v1183_v32  ;;  %v3329_v32 = vand.u32 4294901760, %v3096_v45 }
 0x1dc   : > { %1255 = vmatpush.msra.mxu2 %v3264_v6  ;;  %2626 = vpow2.f32 %v667_v51  ;;  %v1384_v6 = vsub.f32 %v1382_v50, %v1383_v1 }
 0x1dd   : > { %1286 = vmatpush.msrb.mxu3 %v1189_v41  ;;  %v1564_v40 = vsub.f32 %v3096_v45, %v3329_v32  ;;  %v682_v41 = vld [vmem:[%s3002_s23 + $0x3] sm:$0x1]  ;;  %v1571_v45 = vand.u32 4294901760, %v1570_v37 }
 0x1de   : > { %1257 = vmatpush.msra.mxu2 %v3271_v10  ;;  %v1385_v28 = vand.u32 4294901760, %v1384_v6 }
 0x1df   : > { %1290 = vmatpush.msrb.mxu3 %v1195_v49  ;;  %v1565_v47 = vand.u32 4294901760, %v1564_v40  ;;  %v1576_v49 = vsub.f32 %v3082_v38, %v3342_v48  ;;  %v1572_v57 = vsub.f32 %v1570_v37, %v1571_v45 }
 0x1e0   : > { %1259 = vmatpush.msra.mxu2 %v3275_v13 }
 0x1e1   : > { %1294 = vmatpush.msrb.mxu3 %v1201_v19  ;;  %v1566_v25 = vsub.f32 %v1564_v40, %v1565_v47  ;;  %v1577_v18 = vand.u32 4294901760, %v1576_v49  ;;  %v1573_v38 = vand.u32 4294901760, %v1572_v57  ;;  %v686_v57 = vld [vmem:[%s3002_s23 + $0x7] sm:$0x1] }
 0x1e2   : > { %v2627_v63 = vpop.eup %2626 }
 0x1e3   : > { %v689_v3 = vmul.f32 %v2627_v63, %v681_v58  ;;  %v1567_v24 = vand.u32 4294901760, %v1566_v25  ;;  %v1578_v33 = vsub.f32 %v1576_v49, %v1577_v18 }
 0x1e5   : > { %v1138_v4 = vsel %vm760_vm0, %v689_v3, 0  ;;  %v702_v5 = vsel %vm695_vm1, %v689_v3, 0.0  ;;  %v685_v3 = vld [vmem:[%s3002_s23 + $0x6] sm:$0x1] }
 0x1e6   : > { %v1160_v55 = vand.u32 4294901760, %v1138_v4  ;;  %703 = vadd.xlane.f32.xlu0 %v702_v5  ;;  %v683_v5 = vld [vmem:[%s3002_s23 + $0x4] sm:$0x1] }
 0x1e8   : > { %v1161_v9 = vsub.f32 %v1138_v4, %v1160_v55  ;;  %1206 = vmatmul.f32.vlgmr.msra.gmra.mxu3 %v1160_v55 }
 0x1e9   : > { %1374 = vmatpush.msra.mxu3 %v1373_v31 }
 0x1ea   : > { %v1162_v10 = vand.u32 4294901760, %v1161_v9  ;;  %1236 = vmatmul.f32.vlgmr.msra.gmra.mxu1 %v1161_v9 }
 0x1eb   : > { %1380 = vmatpush.msra.mxu3 %v1379_v7  ;;  %1412 = vmatpush.msra.mxu1 %v1370_v62  ;;  %v1765_v7 = vand.u32 4294901760, %v3395_v2 }
 0x1ec   : > { %v1163_v12 = vsub.f32 %v1161_v9, %v1162_v10 }
 0x1ed   : > { %1386 = vmatpush.msra.mxu3 %v1385_v28  ;;  %1415 = vmatpush.msra.mxu1 %v1376_v34  ;;  %v3369_v34 = vand.u32 4294901760, %v3127_v0 }
 0x1ee   : > { %v1164_v13 = vand.u32 4294901760, %v1163_v12 }
 0x1ef   : > { %1392 = vmatpush.msra.mxu3 %v1391_v11  ;;  %1418 = vmatpush.msra.mxu1 %v1382_v50 }
 0x1f0   : > { %1165 = vmatmul.f32.vlgmr.msrb.gmra.mxu2 %v1164_v13  ;;  %1296 = vmatmul.f32.vlgmr.msrb.gmra.mxu3 %v1160_v55 }
 0x1f1   : > { %1341 = vmatpush.msrb.mxu2 %v3289_v39  ;;  %1470 = vmatpush.msrb.mxu3 %v1371_v56  ;;  %v3373_v56 = vand.u32 4294901760, %v3118_v59 }
 0x1f2   : > { %1321 = vmatmul.f32.vlgmr.msrb.gmra.mxu1 %v1160_v55 }
 0x1f3   : > { %v580_v30 = vpop.f32.mrf.mxu1  ;;  %1343 = vmatpush.msrb.mxu2 %v3295_v60  ;;  %1474 = vmatpush.msrb.mxu3 %v1377_v61  ;;  %v3385_v61 = vsub.f32 %v3127_v0, %v3369_v34 }
 0x1f4   : > { %v669_v35 = vmul.f32 1.442695, %v580_v30  ;;  %1421 = vmatpush.msra.mxu1 %v1388_v17 }
 0x1f5   : > { %1345 = vmatpush.msrb.mxu2 %v3302_v36  ;;  %1478 = vmatpush.msrb.mxu3 %v1383_v1  ;;  %v3389_v1 = vsub.f32 %v3118_v59, %v3373_v56  ;;  %v1753_v31 = vand.u32 4294901760, %v3385_v61 }
 0x1f6   : > { %2628 = vpow2.f32 %v669_v35  ;;  %1501 = vmatpush.msrb.mxu1 %v3289_v39 }
 0x1f7   : > { %1347 = vmatpush.msrb.mxu2 %v3307_v44  ;;  %1482 = vmatpush.msrb.mxu3 %v1389_v29  ;;  %v1759_v6 = vand.u32 4294901760, %v3389_v1  ;;  %v1754_v54 = vsub.f32 %v3385_v61, %v1753_v31 }
 0x1f8   : > { %1263 = vmatmul.f32.vlgmr.msra.gmra.mxu2 %v1162_v10  ;;  %1503 = vmatpush.msrb.mxu1 %v3295_v60 }
 0x1f9   : > { %1441 = vmatpush.msra.mxu2 %v3289_v39  ;;  %v1760_v10 = vsub.f32 %v3389_v1, %v1759_v6  ;;  %v1755_v13 = vand.u32 4294901760, %v1754_v54 }
 0x1fa   : > { %1505 = vmatpush.msrb.mxu1 %v3302_v36 }
 0x1fb   : > { %1443 = vmatpush.msra.mxu2 %v3295_v60  ;;  %v1579_v60 = vand.u32 4294901760, %v1578_v33  ;;  %v1761_v35 = vand.u32 4294901760, %v1760_v10 }
 0x1fc   : > { %v2629_v26 = vpop.eup %2628  ;;  %1507 = vmatpush.msrb.mxu1 %v3307_v44 }
 0x1fd   : > { %v690_v23 = vmul.f32 %v2629_v26, %v682_v41  ;;  %1445 = vmatpush.msra.mxu2 %v3302_v36  ;;  %v2656_v26 = vld [vmem:[%s2992_s16 + $0xc8] sm:$0xff] }
 0x1fe   : > { %v3425_v42 = vand.u32 4294901760, %v2656_v26 }
 0x1ff   : > { %v1326_v19 = vsel %vm760_vm0, %v690_v23, 0  ;;  %1447 = vmatpush.msra.mxu2 %v3307_v44  ;;  %v705_v53 = vsel %vm695_vm1, %v690_v23, 0.0  ;;  %v3365_v44 = vand.u32 4294901760, %v3092_v43 }
 0x200   : > { %v1348_v21 = vand.u32 4294901760, %v1326_v19  ;;  %706 = vadd.xlane.f32.xlu1 %v705_v53  ;;  %v2657_v53 = vld [vmem:[%s2992_s16 + $0xc0] sm:$0xff] }
 0x201   : > { %v3377_v50 = vsub.f32 %v3092_v43, %v3365_v44 }
 0x202   : > { %v1349_v52 = vsub.f32 %v1326_v19, %v1348_v21  ;;  %1394 = vmatmul.f32.vlgmr.msra.gmra.mxu3 %v1348_v21 }
 0x203   : > { %1562 = vmatpush.msra.mxu3 %v1561_v22  ;;  %v640_v36 = vpop.f32.mrf.mxu1  ;;  %v1747_v43 = vand.u32 4294901760, %v3377_v50  ;;  %v3435_v22 = vand.u32 4294901760, %v2657_v53 }
 0x204   : > { %v1350_v39 = vand.u32 4294901760, %v1349_v52  ;;  %1424 = vmatmul.f32.vlgmr.msra.gmra.mxu1 %v1349_v52  ;;  %v675_v51 = vmul.f32 1.442695, %v640_v36 }
 0x205   : > { %1568 = vmatpush.msra.mxu3 %v1567_v24  ;;  %1600 = vmatpush.msra.mxu1 %v1558_v27  ;;  %v1748_v0 = vsub.f32 %v3377_v50, %v1747_v43  ;;  %v3442_v24 = vsub.f32 %v2656_v26, %v3425_v42 }
 0x206   : > { %v1351_v62 = vsub.f32 %v1349_v52, %v1350_v39  ;;  %2630 = vpow2.f32 %v675_v51 }
 0x207   : > { %1574 = vmatpush.msra.mxu3 %v1573_v38  ;;  %1603 = vmatpush.msra.mxu1 %v1564_v40  ;;  %v1749_v28 = vand.u32 4294901760, %v1748_v0  ;;  %v2655_v40 = vld [vmem:[%s2992_s16 + $0xd0] sm:$0xff]  ;;  %v3450_v38 = vsub.f32 %v2657_v53, %v3435_v22 }
 0x208   : > { %v1352_v20 = vand.u32 4294901760, %v1351_v62 }
 0x209   : > { %1580 = vmatpush.msra.mxu3 %v1579_v60  ;;  %1606 = vmatpush.msra.mxu1 %v1570_v37 }
 0x20a   : > { %1353 = vmatmul.f32.vlgmr.msrb.gmra.mxu2 %v1352_v20  ;;  %1484 = vmatmul.f32.vlgmr.msrb.gmra.mxu3 %v1348_v21  ;;  %v1947_v20 = vand.u32 4294901760, %v3442_v24 }
 0x20b   : > { %1529 = vmatpush.msrb.mxu2 %v3321_v14  ;;  %1609 = vmatpush.msra.mxu1 %v1576_v49 }
 0x20c   : > { %1509 = vmatmul.f32.vlgmr.msrb.gmra.mxu1 %v1348_v21  ;;  %1658 = vmatpush.msrb.mxu3 %v1559_v15  ;;  %v2631_v63 = vpop.eup %2630  ;;  %v3421_v15 = vand.u32 4294901760, %v2655_v40 }
 0x20d   : > { %1531 = vmatpush.msrb.mxu2 %v3329_v32  ;;  %1689 = vmatpush.msrb.mxu1 %v3321_v14  ;;  %v3398_v4 = vmul.f32 %v2631_v63, %v685_v3 }
 0x20e   : > { %1662 = vmatpush.msrb.mxu3 %v1565_v47  ;;  %v3432_v19 = vsub.f32 %v2655_v40, %v3421_v15 }
 0x20f   : > { %1533 = vmatpush.msrb.mxu2 %v3326_v46  ;;  %1691 = vmatpush.msrb.mxu1 %v3329_v32  ;;  %v714_v59 = vsel %vm695_vm1, %v3398_v4, 0.0 }
 0x210   : > { %1666 = vmatpush.msrb.mxu3 %v1571_v45  ;;  %715 = vadd.xlane.f32.xlu0 %v714_v59  ;;  %v1941_v33 = vand.u32 4294901760, %v3432_v19  ;;  %v2660_v59 = vld [vmem:[%s2992_s16 + $0xe8] sm:$0xff] }
 0x211   : > { %1535 = vmatpush.msrb.mxu2 %v3342_v48  ;;  %1693 = vmatpush.msrb.mxu1 %v3326_v46 }
 0x212   : > { %1451 = vmatmul.f32.vlgmr.msra.gmra.mxu2 %v1350_v39  ;;  %1670 = vmatpush.msrb.mxu3 %v1577_v18  ;;  %v684_v39 = vld [vmem:[%s3002_s23 + $0x5] sm:$0x1] }
 0x213   : > { %1629 = vmatpush.msra.mxu2 %v3321_v14  ;;  %1695 = vmatpush.msrb.mxu1 %v3342_v48  ;;  %v1766_v14 = vsub.f32 %v3395_v2, %v1765_v7 }
 0x215   : > { %1631 = vmatpush.msra.mxu2 %v3329_v32  ;;  %v2654_v32 = vld [vmem:[%s2992_s16 + $0xd8] sm:$0xff] }
 0x216   : > { %v3418_v27 = vand.u32 4294901760, %v2654_v32 }
 0x217   : > { %1633 = vmatpush.msra.mxu2 %v3326_v46 }
 0x218   : > { %v3428_v47 = vsub.f32 %v2654_v32, %v3418_v27 }
 0x219   : > { %v600_v58 = vpop.f32.mrf.mxu2  ;;  %1635 = vmatpush.msra.mxu2 %v3342_v48  ;;  %v1767_v48 = vand.u32 4294901760, %v1766_v14 }
 0x21a   : > { %v671_v17 = vmul.f32 1.442695, %v600_v58  ;;  %v1935_v18 = vand.u32 4294901760, %v3428_v47  ;;  %v1953_v58 = vand.u32 4294901760, %v3450_v38 }
 0x21c   : > { %2632 = vpow2.f32 %v671_v17  ;;  %v1936_v62 = vsub.f32 %v3428_v47, %v1935_v18 }
 0x21e   : > { %v1937_v63 = vand.u32 4294901760, %v1936_v62 }
 0x221   : > { %v861_v54 = vpop.f32.mrf.mxu1 }
 0x222   : > { %v2633_v29 = vpop.eup %2632 }
 0x223   : > { %v691_v55 = vmul.f32 %v2633_v29, %v683_v5  ;;  %v1954_v5 = vsub.f32 %v3450_v38, %v1953_v58  ;;  %v3494_v29 = vand.u32 4294901760, %v2660_v59 }
 0x225   : > { %v708_v8 = vsel %vm695_vm1, %v691_v55, 0.0  ;;  %v1514_v9 = vsel %vm760_vm0, %v691_v55, 0  ;;  %v1955_v10 = vand.u32 4294901760, %v1954_v5 }
 0x226   : > { %v1536_v11 = vand.u32 4294901760, %v1514_v9  ;;  %709 = vadd.xlane.f32.xlu2 %v708_v8 }
 0x228   : > { %v1537_v46 = vsub.f32 %v1514_v9, %v1536_v11  ;;  %1582 = vmatmul.f32.vlgmr.msra.gmra.mxu3 %v1536_v11 }
 0x229   : > { %v660_v12 = vpop.f32.mrf.mxu2  ;;  %1750 = vmatpush.msra.mxu3 %v1749_v28  ;;  %v1890_v28 = vsel %vm760_vm0, %v3398_v4, 0 }
 0x22a   : > { %v677_v30 = vmul.f32 1.442695, %v660_v12  ;;  %v1538_v37 = vand.u32 4294901760, %v1537_v46  ;;  %1612 = vmatmul.f32.vlgmr.msra.gmra.mxu1 %v1537_v46  ;;  %v3518_v32 = vand.u32 4294901760, %v1890_v28 }
 0x22b   : > { %1756 = vmatpush.msra.mxu3 %v1755_v13  ;;  %1788 = vmatpush.msra.mxu1 %v3377_v50  ;;  %v1942_v50 = vsub.f32 %v3432_v19, %v1941_v33  ;;  %v2661_v13 = vld [vmem:[%s2992_s16 + $0xe0] sm:$0xff] }
 0x22c   : > { %2634 = vpow2.f32 %v677_v30  ;;  %v1539_v41 = vsub.f32 %v1537_v46, %v1538_v37  ;;  %v3511_v14 = vand.u32 4294901760, %v2661_v13  ;;  %v3514_v30 = vsub.f32 %v2660_v59, %v3494_v29 }
 0x22d   : > { %v620_v45 = vpop.f32.mrf.mxu3  ;;  %1762 = vmatpush.msra.mxu3 %v1761_v35  ;;  %1791 = vmatpush.msra.mxu1 %v3385_v61 }
 0x22e   : > { %v673_v49 = vmul.f32 1.442695, %v620_v45  ;;  %v1540_v23 = vand.u32 4294901760, %v1539_v41  ;;  %v3523_v40 = vsub.f32 %v2661_v13, %v3511_v14  ;;  %v3528_v41 = vsub.f32 %v1890_v28, %v3518_v32 }
 0x22f   : > { %1768 = vmatpush.msra.mxu3 %v1767_v48  ;;  %1794 = vmatpush.msra.mxu1 %v3389_v1  ;;  %v1948_v1 = vsub.f32 %v3442_v24, %v1947_v20 }
 0x230   : > { %2636 = vpow2.f32 %v673_v49  ;;  %1541 = vmatmul.f32.vlgmr.msrb.gmra.mxu2 %v1540_v23  ;;  %1672 = vmatmul.f32.vlgmr.msrb.gmra.mxu3 %v1536_v11  ;;  %v2135_v23 = vand.u32 4294901760, %v3514_v30 }
 0x231   : > { %1717 = vmatpush.msrb.mxu2 %v3365_v44  ;;  %1797 = vmatpush.msra.mxu1 %v3395_v2  ;;  %v1943_v2 = vand.u32 4294901760, %v1942_v50  ;;  %v888_v4 = vpop.f32.mrf.mxu2 }
 0x232   : > { %v2635_v25 = vpop.eup %2634  ;;  %1697 = vmatmul.f32.vlgmr.msrb.gmra.mxu1 %v1536_v11  ;;  %1846 = vmatpush.msrb.mxu3 %v1747_v43  ;;  %v2658_v43 = vld [vmem:[%s2992_s16 + $0xf8] sm:$0xff] }
 0x233   : > { %v3439_v21 = vmul.f32 %v2635_v25, %v686_v57  ;;  %1719 = vmatpush.msrb.mxu2 %v3369_v34  ;;  %1877 = vmatpush.msrb.mxu1 %v3365_v44  ;;  %v3482_v3 = vand.u32 4294901760, %v2658_v43  ;;  %v946_v25 = vpop.f32.mrf.mxu1  ;;  %v698_v57 = vpop.xlane.xlu1 %697 }
 0x234   : > { %1850 = vmatpush.msrb.mxu3 %v1753_v31 }
 0x235   : > { %v717_v52 = vsel %vm695_vm1, %v3439_v21, 0.0  ;;  %v790_v60 = vpop.f32.mrf.mxu3  ;;  %1721 = vmatpush.msrb.mxu2 %v3373_v56  ;;  %1879 = vmatpush.msrb.mxu1 %v3369_v34 }
 0x236   : > { %718 = vadd.xlane.f32.xlu1 %v717_v52  ;;  %v2637_v36 = vpop.eup %2636  ;;  %1854 = vmatpush.msrb.mxu3 %v1759_v6  ;;  %v2141_v52 = vand.u32 4294901760, %v3523_v40 }
 0x237   : > { %v692_v51 = vmul.f32 %v2637_v36, %v684_v39  ;;  %1723 = vmatpush.msrb.mxu2 %v3381_v16  ;;  %1881 = vmatpush.msrb.mxu1 %v3373_v56  ;;  %v1914_v39 = vand.u32 4294901760, %v3528_v41 }
 0x238   : > { %1639 = vmatmul.f32.vlgmr.msra.gmra.mxu2 %v1538_v37  ;;  %1858 = vmatpush.msrb.mxu3 %v1765_v7  ;;  %v3498_v7 = vsub.f32 %v2658_v43, %v3482_v3 }
 0x239   : > { %v711_v17 = vsel %vm695_vm1, %v692_v51, 0.0  ;;  %v1702_v61 = vsel %vm760_vm0, %v692_v51, 0  ;;  %1817 = vmatpush.msra.mxu2 %v3365_v44  ;;  %1883 = vmatpush.msrb.mxu1 %v3381_v16  ;;  %v2659_v44 = vld [vmem:[%s2992_s16 + $0xf0] sm:$0xff]  ;;  %v701_v45 = vpop.xlane.xlu0 %700  ;;  %v2078_v51 = vsel %vm760_vm0, %v3439_v21, 0 }
 0x23a   : > { %v1724_v31 = vand.u32 4294901760, %v1702_v61  ;;  %712 = vadd.xlane.f32.xlu2 %v711_v17  ;;  %v3489_v0 = vand.u32 4294901760, %v2659_v44  ;;  %v2123_v46 = vand.u32 4294901760, %v3498_v7  ;;  %v2100_v50 = vand.u32 4294901760, %v2078_v51 }
 0x23b   : > { %1819 = vmatpush.msra.mxu2 %v3369_v34  ;;  %v1949_v34 = vand.u32 4294901760, %v1948_v1 }
 0x23c   : > { %v3491_v6 = vsub.f32 %v1702_v61, %v1724_v31  ;;  %1770 = vmatmul.f32.vlgmr.msra.gmra.mxu3 %v1724_v31  ;;  %v3506_v11 = vsub.f32 %v2659_v44, %v3489_v0  ;;  %v2124_v49 = vsub.f32 %v3498_v7, %v2123_v46  ;;  %v2101_v1 = vsub.f32 %v2078_v51, %v2100_v50 }
 0x23d   : > { %v831_v55 = vpop.f32.mrf.mxu3  ;;  %1938 = vmatpush.msra.mxu3 %v1937_v63  ;;  %1821 = vmatpush.msra.mxu2 %v3373_v56 }
 0x23e   : > { %1800 = vmatmul.f32.vlgmr.msra.gmra.mxu1 %v3491_v6  ;;  %v1726_v8 = vand.u32 4294901760, %v3491_v6  ;;  %v832_v9 = vadd.f32 %v831_v55, %v790_v60  ;;  %v2125_v60 = vand.u32 4294901760, %v2124_v49 }
 0x23f   : > { %1944 = vmatpush.msra.mxu3 %v1943_v2  ;;  %1976 = vmatpush.msra.mxu1 %v3428_v47  ;;  %v2102_v2 = vand.u32 4294901760, %v2101_v1 }
 0x240   : > { %v1727_v56 = vsub.f32 %v3491_v6, %v1726_v8  ;;  %v862_v12 = vadd.f32 %v861_v54, %v832_v9  ;;  %1823 = vmatpush.msra.mxu2 %v3381_v16  ;;  %v2129_v16 = vand.u32 4294901760, %v3506_v11 }
 0x241   : > { %1950 = vmatpush.msra.mxu3 %v1949_v34  ;;  %1979 = vmatpush.msra.mxu1 %v3432_v19  ;;  %v2136_v19 = vsub.f32 %v3514_v30, %v2135_v23 }
 0x242   : > { %v1728_v35 = vand.u32 4294901760, %v1727_v56  ;;  %v889_v37 = vadd.f32 %v888_v4, %v862_v12  ;;  %v2130_v47 = vsub.f32 %v3506_v11, %v2129_v16 }
 0x243   : > { %1956 = vmatpush.msra.mxu3 %v1955_v10  ;;  %1982 = vmatpush.msra.mxu1 %v3442_v24  ;;  %v2142_v24 = vsub.f32 %v3523_v40, %v2141_v52  ;;  %v2137_v36 = vand.u32 4294901760, %v2136_v19 }
 0x244   : > { %1729 = vmatmul.f32.vlgmr.msrb.gmra.mxu2 %v1728_v35  ;;  %1860 = vmatmul.f32.vlgmr.msrb.gmra.mxu3 %v1724_v31  ;;  %v2131_v62 = vand.u32 4294901760, %v2130_v47 }
 0x245   : > { %1905 = vmatpush.msrb.mxu2 %v3418_v27  ;;  %v921_v48 = vpop.f32.mrf.mxu3  ;;  %1985 = vmatpush.msra.mxu1 %v3450_v38  ;;  %v2143_v38 = vand.u32 4294901760, %v2142_v24 }
 0x246   : > { %1885 = vmatmul.f32.vlgmr.msrb.gmra.mxu1 %v1724_v31  ;;  %v922_v26 = vadd.f32 %v921_v48, %v889_v37  ;;  %2034 = vmatpush.msrb.mxu3 %v1935_v18  ;;  %v721_v18 = vadd.f32 1.1920929e-07, %v701_v45 }
 0x247   : > { %1907 = vmatpush.msrb.mxu2 %v3421_v15  ;;  %2065 = vmatpush.msrb.mxu1 %v3418_v27  ;;  %v1049_v63 = vpop.f32.mrf.mxu1 }
 0x248   : > { %v3538_v53 = vadd.f32 %v946_v25, %v922_v26  ;;  %2038 = vmatpush.msrb.mxu3 %v1941_v33  ;;  %v720_v33 = vadd.f32 1.1920929e-07, %v698_v57  ;;  %2638 = vrcp.f32 %v721_v18 }
 0x249   : > { %1909 = vmatpush.msrb.mxu2 %v3425_v42  ;;  %2067 = vmatpush.msrb.mxu1 %v3421_v15 }
 0x24a   : > { %2042 = vmatpush.msrb.mxu3 %v1947_v20  ;;  %v1915_v20 = vsub.f32 %v3528_v41, %v1914_v39  ;;  %2640 = vrcp.f32 %v720_v33 }
 0x24b   : > { %1911 = vmatpush.msrb.mxu2 %v3435_v22  ;;  %2069 = vmatpush.msrb.mxu1 %v3425_v42 }
 0x24c   : > { %1827 = vmatmul.f32.vlgmr.msra.gmra.mxu2 %v1726_v8  ;;  %1958 = vmatmul.f32.vlgmr.msra.gmra.mxu3 %v3518_v32 }
 0x24d   : > { %2046 = vmatpush.msrb.mxu3 %v1953_v58  ;;  %2005 = vmatpush.msra.mxu2 %v3418_v27  ;;  %v1019_v27 = vpop.f32.mrf.mxu3  ;;  %v1916_v58 = vand.u32 4294901760, %v1915_v20 }
 0x24e   : > { %1988 = vmatmul.f32.vlgmr.msra.gmra.mxu1 %v3528_v41  ;;  %v2639_v17 = vpop.eup %2638 }
 0x24f   : > { %2126 = vmatpush.msra.mxu3 %v2125_v60  ;;  %2071 = vmatpush.msrb.mxu1 %v3435_v22 }
 0x250   : > { %2007 = vmatpush.msra.mxu2 %v3421_v15  ;;  %v2641_v21 = vpop.eup %2640  ;;  %v1134_v55 = vpop.f32.mrf.mxu1 }
 0x251   : > { %2132 = vmatpush.msra.mxu3 %v2131_v62  ;;  %2164 = vmatpush.msra.mxu1 %v3498_v7  ;;  %v2103_v7 = vsub.f32 %v2101_v1, %v2102_v2 }
 0x252   : > { %2009 = vmatpush.msra.mxu2 %v3425_v42  ;;  %v737_v42 = vmul.f32 %v2639_v17, %v721_v18 }
 0x253   : > { %2138 = vmatpush.msra.mxu3 %v2137_v36  ;;  %2167 = vmatpush.msra.mxu1 %v3506_v11  ;;  %v978_v61 = vpop.f32.mrf.mxu2  ;;  %v2104_v10 = vand.u32 4294901760, %v2103_v7 }
 0x254   : > { %2011 = vmatpush.msra.mxu2 %v3435_v22  ;;  %2048 = vmatmul.f32.vlgmr.msrb.gmra.mxu3 %v3518_v32  ;;  %v1020_v15 = vadd.f32 %v1019_v27, %v978_v61  ;;  %v736_v22 = vmul.f32 %v2641_v21, %v720_v33  ;;  %v745_v31 = vsub.f32 2.0, %v737_v42 }
 0x255   : > { %1917 = vmatmul.f32.vlgmr.msrb.gmra.mxu2 %v1916_v58  ;;  %2144 = vmatpush.msra.mxu3 %v2143_v38  ;;  %v1109_v44 = vpop.f32.mrf.mxu3 }
 0x256   : > { %2170 = vmatpush.msra.mxu1 %v3514_v30  ;;  %v1050_v43 = vadd.f32 %v1049_v63, %v1020_v15  ;;  %2093 = vmatpush.msrb.mxu2 %v3482_v3  ;;  %v744_v6 = vsub.f32 2.0, %v736_v22  ;;  %v753_v34 = vmul.f32 %v2639_v17, %v745_v31 }
 0x257   : > { %2073 = vmatmul.f32.vlgmr.msrb.gmra.mxu1 %v3518_v32  ;;  %2222 = vmatpush.msrb.mxu3 %v2123_v46 }
 0x258   : > { %2173 = vmatpush.msra.mxu1 %v3523_v40  ;;  %2095 = vmatpush.msrb.mxu2 %v3489_v0  ;;  %v752_v8 = vmul.f32 %v2641_v21, %v744_v6 }
 0x259   : > { %2226 = vmatpush.msrb.mxu3 %v2129_v16  ;;  %v704_v12 = vpop.xlane.xlu0 %703 }
 0x25a   : > { %2253 = vmatpush.msrb.mxu1 %v3482_v3  ;;  %2097 = vmatpush.msrb.mxu2 %v3494_v29  ;;  %v2265_v11 = vmul.f32 %v3538_v53, %v752_v8  ;;  %v722_v13 = vadd.f32 1.1920929e-07, %v704_v12 }
 0x25b   : > { %2230 = vmatpush.msrb.mxu3 %v2135_v23 }
 0x25c   : > { %2255 = vmatpush.msrb.mxu1 %v3489_v0  ;;  %v1076_v5 = vpop.f32.mrf.mxu2  ;;  %2146 = vmatmul.f32.vlgmr.msra.gmra.mxu3 %v2100_v50  ;;  %2642 = vrcp.f32 %v722_v13 }
 0x25d   : > { %v1077_v59 = vadd.f32 %v1076_v5, %v1050_v43  ;;  %2015 = vmatmul.f32.vlgmr.msra.gmra.mxu2 %v1914_v39  ;;  %2234 = vmatpush.msrb.mxu3 %v2141_v52 }
 0x25e   : > { %2099 = vmatpush.msrb.mxu2 %v3511_v14  ;;  %2257 = vmatpush.msrb.mxu1 %v3494_v29 }
 0x25f   : > { %v1110_v54 = vadd.f32 %v1109_v44, %v1077_v59  ;;  %2176 = vmatmul.f32.vlgmr.msra.gmra.mxu1 %v2101_v1 }
 0x260   : > { %2193 = vmatpush.msra.mxu2 %v3482_v3  ;;  %2259 = vmatpush.msrb.mxu1 %v3511_v14 }
 0x261   : > { %v1135_v9 = vadd.f32 %v1134_v55, %v1110_v54 }
 0x262   : > { %2195 = vmatpush.msra.mxu2 %v3489_v0  ;;  %v2643_v30 = vpop.eup %2642 }
 0x263   : > { %v2266_v28 = vmul.f32 %v1135_v9, %v753_v34 }
 0x264   : > { %2197 = vmatpush.msra.mxu2 %v3494_v29  ;;  %2236 = vmatmul.f32.vlgmr.msrb.gmra.mxu3 %v2100_v50  ;;  %v738_v29 = vmul.f32 %v2643_v30, %v722_v13 }
 0x265   : > { %v2281_v56 = vrot.slane %v2266_v28, 7  ;;  %2105 = vmatmul.f32.vlgmr.msrb.gmra.mxu2 %v2104_v10 }
 0x266   : > { %2199 = vmatpush.msra.mxu2 %v3511_v14  ;;  %v746_v37 = vsub.f32 2.0, %v738_v29 }
 0x267   : > { %v2283_v3 = vsel %vm2282_vm2, %v2281_v56, %v2265_v11  ;;  %2261 = vmatmul.f32.vlgmr.msrb.gmra.mxu1 %v2100_v50  ;;  %v1237_v46 = vpop.f32.mrf.mxu1 }
 0x268   : > { %v754_v14 = vmul.f32 %v2643_v30, %v746_v37 }
 0x26b   : > { %v1207_v0 = vpop.f32.mrf.mxu3 }
 0x26d   : > { %2203 = vmatmul.f32.vlgmr.msra.gmra.mxu2 %v2102_v2 }
 0x26f   : > { %v1322_v41 = vpop.f32.mrf.mxu1 }
 0x273   : > { %v1166_v4 = vpop.f32.mrf.mxu2  ;;  %v1297_v40 = vpop.f32.mrf.mxu3 }
 0x274   : > { %v1208_v32 = vadd.f32 %v1207_v0, %v1166_v4  ;;  %v707_v23 = vpop.xlane.xlu1 %706 }
 0x275   : > { %v723_v53 = vadd.f32 1.1920929e-07, %v707_v23 }
 0x276   : > { %v1238_v35 = vadd.f32 %v1237_v46, %v1208_v32 }
 0x277   : > { %2644 = vrcp.f32 %v723_v53 }
 0x27b   : > { %v1264_v16 = vpop.f32.mrf.mxu2 }
 0x27c   : > { %v1265_v48 = vadd.f32 %v1264_v16, %v1238_v35 }
 0x27d   : > { %v2645_v60 = vpop.eup %2644 }
 0x27e   : > { %v1298_v26 = vadd.f32 %v1297_v40, %v1265_v48  ;;  %v739_v19 = vmul.f32 %v2645_v60, %v723_v53 }
 0x280   : > { %v1323_v45 = vadd.f32 %v1322_v41, %v1298_v26  ;;  %v747_v20 = vsub.f32 2.0, %v739_v19 }
 0x281   : > { %v1425_v52 = vpop.f32.mrf.mxu1 }
 0x282   : > { %v2267_v49 = vmul.f32 %v1323_v45, %v754_v14  ;;  %v755_v38 = vmul.f32 %v2645_v60, %v747_v20 }
 0x283   : > { %v716_v7 = vpop.xlane.xlu0 %715 }
 0x284   : > { %v2284_v25 = vrot.slane %v2267_v49, 6  ;;  %v726_v10 = vadd.f32 1.1920929e-07, %v716_v7 }
 0x285   : > { %v1395_v47 = vpop.f32.mrf.mxu3 }
 0x286   : > { %v2286_v57 = vsel %vm2285_vm3, %v2284_v25, %v2283_v3 }
 0x289   : > { %v1510_v51 = vpop.f32.mrf.mxu1 }
 0x28d   : > { %v1354_v18 = vpop.f32.mrf.mxu2  ;;  %v1485_v24 = vpop.f32.mrf.mxu3 }
 0x28e   : > { %v1396_v39 = vadd.f32 %v1395_v47, %v1354_v18 }
 0x290   : > { %v1426_v33 = vadd.f32 %v1425_v52, %v1396_v39 }
 0x295   : > { %v1452_v62 = vpop.f32.mrf.mxu2 }
 0x296   : > { %v1453_v36 = vadd.f32 %v1452_v62, %v1426_v33 }
 0x298   : > { %v1486_v27 = vadd.f32 %v1485_v24, %v1453_v36 }
 0x299   : > { %v710_v6 = vpop.xlane.xlu2 %709 }
 0x29a   : > { %v1511_v50 = vadd.f32 %v1510_v51, %v1486_v27  ;;  %v724_v9 = vadd.f32 1.1920929e-07, %v710_v6 }
 0x29c   : > { %v2268_v58 = vmul.f32 %v1511_v50, %v755_v38  ;;  %2646 = vrcp.f32 %v724_v9 }
 0x29e   : > { %v2287_v17 = vrot.slane %v2268_v58, 5 }
 0x2a0   : > { %v3598_v61 = vsel %vm2288_vm4, %v2287_v17, %v2286_v57 }
 0x2a2   : > { %v2647_v32 = vpop.eup %2646 }
 0x2a3   : > { %v740_v41 = vmul.f32 %v2647_v32, %v724_v9 }
 0x2a5   : > { %v748_v47 = vsub.f32 2.0, %v740_v41 }
 0x2a7   : > { %v1613_v15 = vpop.f32.mrf.mxu1  ;;  %v756_v20 = vmul.f32 %v2647_v32, %v748_v47 }
 0x2a9   : > { %v719_v11 = vpop.xlane.xlu1 %718 }
 0x2aa   : > { %v727_v13 = vadd.f32 1.1920929e-07, %v719_v11 }
 0x2ab   : > { %v1583_v63 = vpop.f32.mrf.mxu3 }
 0x2ad   : > { %v713_v34 = vpop.xlane.xlu2 %712 }
 0x2ae   : > { %v725_v28 = vadd.f32 1.1920929e-07, %v713_v34 }
 0x2af   : > { %v1698_v1 = vpop.f32.mrf.mxu1 }
 0x2b0   : > { %2648 = vrcp.f32 %v725_v28 }
 0x2b1   : > { %2650 = vrcp.f32 %v726_v10 }
 0x2b2   : > { %2652 = vrcp.f32 %v727_v13 }
 0x2b3   : > { %v1542_v21 = vpop.f32.mrf.mxu2  ;;  %v1673_v42 = vpop.f32.mrf.mxu3 }
 0x2b4   : > { %v1584_v56 = vadd.f32 %v1583_v63, %v1542_v21 }
 0x2b6   : > { %v1614_v46 = vadd.f32 %v1613_v15, %v1584_v56  ;;  %v2649_v35 = vpop.eup %2648 }
 0x2b7   : > { %v2651_v40 = vpop.eup %2650  ;;  %v741_v14 = vmul.f32 %v2649_v35, %v725_v28 }
 0x2b8   : > { %v742_v45 = vmul.f32 %v2651_v40, %v726_v10  ;;  %v2653_v57 = vpop.eup %2652 }
 0x2b9   : > { %v749_v39 = vsub.f32 2.0, %v741_v14  ;;  %v743_v62 = vmul.f32 %v2653_v57, %v727_v13 }
 0x2ba   : > { %v750_v19 = vsub.f32 2.0, %v742_v45 }
 0x2bb   : > { %v1640_v43 = vpop.f32.mrf.mxu2  ;;  %v1801_v31 = vpop.f32.mrf.mxu1  ;;  %v757_v51 = vmul.f32 %v2649_v35, %v749_v39  ;;  %v751_v17 = vsub.f32 2.0, %v743_v62 }
 0x2bc   : > { %v1641_v37 = vadd.f32 %v1640_v43, %v1614_v46  ;;  %v758_v38 = vmul.f32 %v2651_v40, %v750_v19 }
 0x2be   : > { %v1674_v49 = vadd.f32 %v1673_v42, %v1641_v37 }
 0x2bf   : > { %v1771_v22 = vpop.f32.mrf.mxu3 }
 0x2c0   : > { %v1699_v33 = vadd.f32 %v1698_v1, %v1674_v49  ;;  %v759_v1 = vmul.f32 %v2653_v57, %v751_v17 }
 0x2c2   : > { %v2269_v50 = vmul.f32 %v1699_v33, %v756_v20 }
 0x2c3   : > { %v1886_v44 = vpop.f32.mrf.mxu1 }
 0x2c7   : > { %v1730_v2 = vpop.f32.mrf.mxu2  ;;  %v1861_v5 = vpop.f32.mrf.mxu3 }
 0x2c8   : > { %v1772_v12 = vadd.f32 %v1771_v22, %v1730_v2  ;;  %v2290_v22 = vrot.slane %v2269_v50, 4 }
 0x2ca   : > { %v1802_v29 = vadd.f32 %v1801_v31, %v1772_v12 }
 0x2cb   : > { %v1989_v54 = vpop.f32.mrf.mxu1 }
 0x2cf   : > { %v1828_v59 = vpop.f32.mrf.mxu2  ;;  %v1959_v55 = vpop.f32.mrf.mxu3 }
 0x2d0   : > { %v1829_v48 = vadd.f32 %v1828_v59, %v1802_v29  ;;  %v2292_v59 = vsel %vm2291_vm5, %v2290_v22, %v3598_v61 }
 0x2d2   : > { %v1862_v53 = vadd.f32 %v1861_v5, %v1829_v48 }
 0x2d4   : > { %v2074_v0 = vpop.f32.mrf.mxu1  ;;  %v1887_v24 = vadd.f32 %v1886_v44, %v1862_v53 }
 0x2d6   : > { %v2270_v63 = vmul.f32 %v1887_v24, %v757_v51 }
 0x2d7   : > { %v2049_v3 = vpop.f32.mrf.mxu3 }
 0x2d8   : > { %v1918_v8 = vpop.f32.mrf.mxu2  ;;  %v2293_v2 = vrot.slane %v2270_v63, 3 }
 0x2d9   : > { %v1960_v30 = vadd.f32 %v1959_v55, %v1918_v8 }
 0x2da   : > { %v2295_v55 = vsel %vm2294_vm6, %v2293_v2, %v2292_v59 }
 0x2db   : > { %v1990_v16 = vadd.f32 %v1989_v54, %v1960_v30 }
 0x2dc   : > { %v2177_v18 = vpop.f32.mrf.mxu1 }
 0x2df   : > { %v2147_v23 = vpop.f32.mrf.mxu3 }
 0x2e0   : > { %v2016_v4 = vpop.f32.mrf.mxu2 }
 0x2e1   : > { %v2017_v26 = vadd.f32 %v2016_v4, %v1990_v16 }
 0x2e3   : > { %v2050_v52 = vadd.f32 %v2049_v3, %v2017_v26 }
 0x2e4   : > { %v2262_v31 = vpop.f32.mrf.mxu1 }
 0x2e5   : > { %v2075_v36 = vadd.f32 %v2074_v0, %v2050_v52 }
 0x2e7   : > { %v2271_v21 = vmul.f32 %v2075_v36, %v758_v38  ;;  %v2237_v42 = vpop.f32.mrf.mxu3 }
 0x2e8   : > { %v2106_v25 = vpop.f32.mrf.mxu2 }
 0x2e9   : > { %v2148_v60 = vadd.f32 %v2147_v23, %v2106_v25  ;;  %v2296_v44 = vrot.slane %v2271_v21, 2 }
 0x2eb   : > { %v2178_v27 = vadd.f32 %v2177_v18, %v2148_v60  ;;  %v2298_v34 = vsel %vm2297_vm7, %v2296_v44, %v2295_v55 }
 0x2f0   : > { %v2204_v58 = vpop.f32.mrf.mxu2 }
 0x2f1   : > { %v2205_v15 = vadd.f32 %v2204_v58, %v2178_v27 }
 0x2f3   : > { %v2238_v43 = vadd.f32 %v2237_v42, %v2205_v15 }
 0x2f5   : > { %v2263_v5 = vadd.f32 %v2262_v31, %v2238_v43 }
 0x2f7   : > { %v2272_v6 = vmul.f32 %v2263_v5, %v759_v1 }
 0x2f9   : > { %v2299_v54 = vrot.slane %v2272_v6, 1 }
 0x2fb   : > { %v2301_v7 = vsel %vm2300_vm8, %v2299_v54, %v2298_v34 }
 0x2fc   : > { %2303 = vst [vmem:[%s302_s22] sm:$0xff] %v2301_v7 }
 0x2fd   : > { %2779 = shalt.err (!%p2776_p9)
}
 0x2fe   : > { %2499 = dma.vmem_to_hbm [thread:$0]  (%p2933_p7), %s2318_s30, 128, %s2320_s11, %s2305_s7  }
 0x2ff PF: > { %s2331_s10 = sand.u32 1, %s2814_s18   ;;  %p3659_p12 = scmp.ge.s32.totalorder %s2826_s21, 2 }
 0x300   : > { %s2332_s23 = scalar_lea.sflag [#allocation4], %s2331_s10 }
 0x301   : > { %p2513_p13 = pnand %p3659_p12, %p2898_p6 }
 0x303   : > { %p2514_p0 = pneg %p2513_p13 }
 0x305   : > { %2809 = dma.done.wait (%p2514_p0), %s2332_s23, 128  }
 0x306   : > { %2811 = vsyncadd (%p2514_p0), %s2332_s23, 4294967168  ;;  %s3660_s21 = sld [smem:[#allocation14_spill]]  ;;  %s3663_s18 = smov %s2818_s19 }
 0x307   : > { %s3661_s24 = sld [smem:[#allocation13_spill]] }
 0x308   : > { %s3662_s20 = sld [smem:[#allocation15_spill]] }
 0x30c   : > { %p21_p3 = scmp.ge.s32.totalorder %s3660_s21, 4  }
 0x30d   : > { %s3664_s19 = smov %s3661_s24 }
 0x30e   :  { %23 = sbr.rel (!%p21_p3) target bundleno = 9 (0x9), region = 102 }
 0x313   :  { %2338 = vsyncpa [#allocation3], 1 }
 0x314   :  { %2340 = vsyncpa [#allocation3 + $0x1], 1 }
 0x315   :  { %2341 = vsyncpa [#allocation6], 1 }
 0x316   :  { %2343 = vsyncpa [#allocation6 + $0x1], 1 }
 0x317   :  { %2344 = vsyncpa [#allocation4], 1 }
 0x318   :  { %2346 = vsyncpa [#allocation4 + $0x1], 1 }

// kernel: tpu_custom_call.1
= control target key start
LH: loop header
LB: loop body
LE: loop exit
PB: predicated region body
PF: predicated region fallthrough
CT: control target
= control target key end

     0   :  { %s3636_s0 = inlined_call_operand.hbm [shape: f32[16,32,128], index: 0, kind: input, shape index: {}]   ;;  %s3637_s1 = inlined_call_operand.hbm [shape: f32[16,1,32], index: 1, kind: input, shape index: {}]   ;;  %s3638_s2 = inlined_call_operand.hbm [shape: f32[128,128], index: 2, kind: input, shape index: {}]   ;;  %s3639_s3 = inlined_call_operand.vmem [shape: f32[1,128], index: 3, kind: input, shape index: {}]   ;;  %s3640_s4 = inlined_call_operand.vmem [shape: f32[1,1,128], index: 4, kind: input, shape index: {}]   ;;  %s3641_s5 = inlined_call_operand.hbm [shape: f32[16,128], index: 5, kind: output, shape index: {}]  }
   0x1   :  { %3647 = sst [smem:[#allocation16_spill]] %s3638_s2 }
   0x2   :  { %10 = vsyncpa [#allocation3], 0 }
   0x3   :  { %12 = vsyncpa [#allocation3 + $0x1], 0 }
   0x4   :  { %13 = vsyncpa [#allocation6], 0 }
   0x5   :  { %15 = vsyncpa [#allocation6 + $0x1], 0 }
   0x6   :  { %16 = vsyncpa [#allocation4], 0 }
   0x7   :  { %18 = vsyncpa [#allocation4 + $0x1], 0  ;;  %s2863_s18 = smov 0   ;;  %s2865_s19 = smov 0  }
   0x8   :  { %s2867_s20 = smov 0   ;;  %s2869_s21 = smov 0  }
   0x9 LB: > { %3648 = sst [smem:[#allocation13_spill]] %s2822_s20  ;;  %s2884_s22 = sadd.s32 4294967295, %s2826_s21   ;;  %s2826_s21 = sphi %s2869_s21, %s3660_s21   ;;  %s2822_s20 = sphi %s2867_s20, %s3662_s20   ;;  %s2818_s19 = sphi %s2865_s19, %s3664_s19   ;;  %s2814_s18 = sphi %s2863_s18, %s3663_s18  }
   0xa   : > { %s2422_s23 = sadd.s32 4294967294, %s2826_s21   ;;  %p44_p0 = scmp.ne.s32.totalorder %s2818_s19, %s2814_s18 }
   0xb   : > { %p45_p1 = scmp.eq.s32.totalorder %s2884_s22, 0  ;;  %p157_p2 = scmp.eq.s32.totalorder %s2884_s22, 1 }
   0xc   : > { %p163_p3 = scmp.eq.s32.totalorder %s2422_s23, 1  ;;  %p2423_p5 = scmp.ge.s32.totalorder %s2826_s21, 1 }
   0xd   : > { %p2893_p4 = por %p45_p1, %p44_p0  ;;  %p170_p7 = scmp.lt.s32.totalorder %s2826_s21, 3 }
   0xe   : > { %p2898_p6 = por %p163_p3, %p44_p0  ;;  %s3651_s2 = sld [smem:[#allocation16_spill]] }
   0xf   : > { %p2906_p8 = pnand %p2423_p5, %p170_p7  ;;  %s2828_s30 = smov [#allocation7]  }
  0x10   : > { %s183_s6 = sshll.u32 %s2828_s30, 4  ;;  %s2916_s7 = sadd.s32 1, %s2826_s21   ;;  %s184_s6 = int_to_ptr.vmem [resolvable:$true] %s183_s6 }
  0x11   : > { %p2501_p9 = pneg %p2906_p8  ;;  %3653 = sst [smem:[#allocation14_spill]] %s2916_s7 }
  0x12   : > { %s3642_s8 = smov 128   ;;  %s3643_s9 = smov 8  }
  0x13   : > { %p2502_p10 = pnand %p2501_p9, %p45_p1  ;;  %s28_s10 = ssub.s32 %s2826_s21, %s2916_s7 }
  0x14   : > { %s181_s28 = sshll.u32 %s3651_s2, 4  ;;  %s31_s11 = sadd.s32 1, %s2822_s20  ;;  %s182_s28 = int_to_ptr.hbm [resolvable:$true] %s181_s28 }
  0x15   : > { %2504 = dma.hbm_to_vmem [thread:$0]  (!%p2502_p10), %s182_s28, 2048, %s184_s6, [#allocation6], %s3642_s8, %s3642_s8, %s3643_s9  }
  0x16   : > { %p29_p12 = scmp.eq.s32.totalorder %s28_s10, 0  ;;  %p38_p13 = scmp.ne.s32.totalorder %s2822_s20, %s2818_s19 }
  0x17   : > { %p39_p0 = scmp.eq.s32.totalorder %s2826_s21, 0  ;;  %p2517_p3 = scmp.lt.s32.totalorder %s2826_s21, 2 }
  0x18   : > { %s2929_s12 = scalar_select %p29_p12, %s2822_s20, %s31_s11  }
  0x19   : > { %p40_p5 = por %p39_p0, %p38_p13  ;;  %p2933_p7 = por %p157_p2, %p38_p13 }
  0x1a   : > { %3654 = sst [smem:[#allocation15_spill]] %s2929_s12  ;;  %s2938_s14 = sand.u32 1, %s2822_s20  }
  0x1b   : > { %s2442_s15 = sshll.u32 %s2826_s21, 8  ;;  %s2426_s16 = sshll.u32 %s2938_s14, 8 }
  0x1c   : > { %s213_s26 = scalar_lea.hbm %s3636_s0, %s2442_s15  ;;  %s207_s28 = scalar_lea.vmem [#allocation2], %s2426_s16 }
  0x1d   : > { %s214_s27 = sshll.u32 %s213_s26, 4  ;;  %s216_s30 = sshll.u32 %s207_s28, 4  ;;  %s215_s27 = int_to_ptr.hbm [resolvable:$true] %s214_s27  ;;  %s217_s30 = int_to_ptr.vmem [resolvable:$true] %s216_s30 }
  0x1e   : > { %p2947_p2 = pnand %p2517_p3, %p40_p5  ;;  %s226_s10 = sand.u32 1, %s2826_s21  }
  0x1f   : > { %s2430_s11 = sshll.u32 %s2938_s14, 3  ;;  %s204_s8 = scalar_lea.sflag [#allocation3], %s2938_s14 }
  0x20   : > { %s2692_s9 = sshra.s32 %s215_s27, 4  ;;  %p2696_p10 = pneg %p2947_p2  ;;  %s2693_s9 = int_to_ptr.hbm [resolvable:$true] %s2692_s9 }
  0x21   : > { %s2694_s2 = scalar_lea.hbm %s2693_s9, 256  ;;  %s2699_s17 = scalar_lea.hbm %s3636_s0, 512 }
  0x22   : > { %p2695_p9 = scmp.ne.s32.totalorder %s2693_s9, %s2694_s2  ;;  %p2700_p0 = scmp.lt.s32.totalorder %s2693_s9, %s3636_s0 }
  0x23   : > { %p2701_p3 = scmp.lt.s32.totalorder %s2699_s17, %s2694_s2 }
  0x24   : > { %p2697_p12 = pnand %p2696_p10, %p2695_p9 }
  0x25   : > { %p2702_p5 = por %p2701_p3, %p2700_p0 }
  0x26   : > { %p2698_p13 = pneg %p2697_p12 }
  0x28   : > { %p2703_p11 = pnand %p2702_p5, %p2698_p13 }
  0x2a   : > { %2706 = shalt.err (!%p2703_p11)
}
  0x2b   : > { %s3657_s14 = smov 8   ;;  %s3658_s28 = smov 128  }
  0x2c   : > { %2508 = dma.hbm_to_vmem [thread:$0]  (!%p2947_p2), %s215_s27, 4096, %s217_s30, %s204_s8, %s3658_s28, %s3658_s28, %s3657_s14  }
  0x2d   : > { %s2431_s12 = sshll.u32 %s2826_s21, 3  ;;  %s230_s20 = scalar_lea.vmem [#allocation5], %s2430_s11 }
  0x2e   : > { %s237_s15 = sshll.u32 %s230_s20, 4  ;;  %s234_s23 = scalar_lea.hbm %s3637_s1, %s2431_s12  ;;  %s238_s15 = int_to_ptr.vmem [resolvable:$true] %s237_s15 }
  0x2f   : > { %s235_s2 = sshll.u32 %s234_s23, 4  ;;  %s227_s9 = scalar_lea.sflag [#allocation6], %s226_s10  ;;  %s236_s2 = int_to_ptr.hbm [resolvable:$true] %s235_s2 }
  0x30   : > { %s2722_s17 = sshra.s32 %s236_s2, 4  ;;  %s2729_s20 = scalar_lea.hbm %s3637_s1, 16  ;;  %s2723_s17 = int_to_ptr.hbm [resolvable:$true] %s2722_s17 }
  0x31   : > { %s2724_s26 = scalar_lea.hbm %s2723_s17, 8  ;;  %p2730_p13 = scmp.lt.s32.totalorder %s2723_s17, %s3637_s1 }
  0x32   : > { %p2725_p11 = scmp.ne.s32.totalorder %s2723_s17, %s2724_s26  ;;  %p2731_p0 = scmp.lt.s32.totalorder %s2729_s20, %s2724_s26 }
  0x34   : > { %p2727_p9 = pnand %p2725_p11, %p2696_p10  ;;  %p2732_p3 = por %p2731_p0, %p2730_p13 }
  0x36   : > { %p2728_p12 = pneg %p2727_p9 }
  0x38   : > { %p2733_p5 = pnand %p2732_p3, %p2728_p12 }
  0x3a   : > { %2736 = shalt.err (!%p2733_p5)
}
  0x3b   : > { %s2831_s7 = smov 16   ;;  %s2832_s12 = smov 1  }
  0x3c   : > { %2511 = dma.hbm_to_vmem [thread:$0]  (!%p2947_p2), %s236_s2, 128, %s238_s15, %s227_s9, %s2831_s7, %s2831_s7, %s2832_s12  }
  0x3d   : > { %249 = sbr.rel (%p2906_p8) target bundleno = 767 (0x2ff), region = 40  ;;  %s2988_s10 = sand.u32 (!%p2906_p8), 1, %s2818_s19  }
  0x3e   : > { %s2433_s14 = sshll.u32 (!%p2906_p8), %s2988_s10, 8  ;;  %s252_s28 = scalar_lea.sflag (!%p2906_p8), [#allocation3], %s2988_s10 }
  0x3f   : > { %s2992_s16 = scalar_lea.vmem (!%p2906_p8), [#allocation2], %s2433_s14 }
  0x42   : > { %2797 = dma.done.wait (%p2893_p4), %s252_s28, 4096  }
  0x43   : > { %2799 = vsyncadd (%p2893_p4), %s252_s28, 4294963200  ;;  %s261_s29 = sand.u32 1, %s2884_s22   ;;  %s2434_s6 = sshll.u32 %s2988_s10, 3 }
  0x44   : > { %s262_s15 = scalar_lea.sflag [#allocation6], %s261_s29  ;;  %s3002_s23 = scalar_lea.vmem [#allocation5], %s2434_s6 }
  0x45   : > { %2801 = dma.done.wait (%p2893_p4), %s262_s15, 128  }
  0x46   : > { %2803 = vsyncadd (%p2893_p4), %s262_s15, 4294967168 }
  0x47   : > { %2805 = dma.done.wait (%p45_p1), [#allocation6], 2048  }
  0x48   : > { %2807 = vsyncadd (%p45_p1), [#allocation6], 4294965248  ;;  %v352_v0 = vld [vmem:[#allocation7 + $0x78] sm:$0xff]  ;;  %v351_v1 = vld [vmem:[#allocation7 + $0x70] sm:$0xff]  ;;  %vm760_vm0 = vcmask 261120   ;;  %vm695_vm1 = vcmask 253952  }
  0x49   : > { %357 = vmatpush.msra.mxu0 %v352_v0  ;;  %2445 = vmatpush.msra.mxu3 %v352_v0  ;;  %v350_v2 = vld [vmem:[#allocation7 + $0x68] sm:$0xff]  ;;  %v349_v3 = vld [vmem:[#allocation7 + $0x60] sm:$0xff]  ;;  %v348_v4 = vld [vmem:[#allocation7 + $0x58] sm:$0xff]  ;;  %vm2282_vm2 = vcmask 1041409   ;;  %vm2285_vm3 = vcmask 1042434   ;;  %vm2288_vm4 = vcmask 1043459  }
  0x4a   : > { %2444 = vmatpush.msra.mxu2 %v352_v0  ;;  %2443 = vmatpush.msra.mxu1 %v352_v0  ;;  %v347_v5 = vld [vmem:[#allocation7 + $0x50] sm:$0xff]  ;;  %v346_v6 = vld [vmem:[#allocation7 + $0x48] sm:$0xff]  ;;  %v345_v7 = vld [vmem:[#allocation7 + $0x40] sm:$0xff]  ;;  %s2438_s26 = sshll.u32 %s2884_s22, 3  ;;  %vm2291_vm5 = vcmask 1044484   ;;  %vm2294_vm6 = vcmask 1045509  }
  0x4b   : > { %358 = vmatpush.msra.mxu0 %v351_v1  ;;  %2448 = vmatpush.msra.mxu3 %v351_v1  ;;  %v344_v8 = vld [vmem:[#allocation7 + $0x38] sm:$0xff]  ;;  %v343_v9 = vld [vmem:[#allocation7 + $0x30] sm:$0xff]  ;;  %v342_v10 = vld [vmem:[#allocation7 + $0x28] sm:$0xff]  ;;  %s2315_s20 = scalar_lea.hbm %s3641_s5, %s2438_s26  ;;  %vm2297_vm7 = vcmask 1046534   ;;  %s302_s22 = scalar_lea.vmem [#allocation8], %s2434_s6  ;;  %vm2300_vm8 = vcmask 1047559  }
  0x4c   : > { %2447 = vmatpush.msra.mxu2 %v351_v1  ;;  %2446 = vmatpush.msra.mxu1 %v351_v1  ;;  %v341_v11 = vld [vmem:[#allocation7 + $0x20] sm:$0xff]  ;;  %v340_v12 = vld [vmem:[#allocation7 + $0x18] sm:$0xff]  ;;  %v339_v13 = vld [vmem:[#allocation7 + $0x10] sm:$0xff]  ;;  %s2317_s30 = sshll.u32 %s302_s22, 4  ;;  %s2319_s11 = sshll.u32 %s2315_s20, 4  ;;  %s2318_s30 = int_to_ptr.vmem [resolvable:$true] %s2317_s30  ;;  %s2320_s11 = int_to_ptr.hbm [resolvable:$true] %s2319_s11 }
  0x4d   : > { %359 = vmatpush.msra.mxu0 %v350_v2  ;;  %2451 = vmatpush.msra.mxu3 %v350_v2  ;;  %v338_v14 = vld [vmem:[#allocation7 + $0x8] sm:$0xff]  ;;  %v337_v15 = vld [vmem:[#allocation7] sm:$0xff]  ;;  %v3013_v16 = vld [vmem:[%s2992_s16] sm:$0xff]  ;;  %s2305_s7 = scalar_lea.sflag [#allocation4], %s2988_s10  ;;  %s2766_s12 = sshra.s32 %s2320_s11, 4  ;;  %s2767_s12 = int_to_ptr.hbm [resolvable:$true] %s2766_s12 }
  0x4e   : > { %2450 = vmatpush.msra.mxu2 %v350_v2  ;;  %2449 = vmatpush.msra.mxu1 %v350_v2  ;;  %v3017_v17 = vld [vmem:[%s2992_s16 + $0x8] sm:$0xff]  ;;  %v3021_v18 = vld [vmem:[%s2992_s16 + $0x10] sm:$0xff]  ;;  %v3025_v19 = vld [vmem:[%s2992_s16 + $0x18] sm:$0xff]  ;;  %s2768_s14 = scalar_lea.hbm %s2767_s12, 8  ;;  %s2772_s29 = scalar_lea.hbm %s3641_s5, 16 }
  0x4f   : > { %360 = vmatpush.msra.mxu0 %v349_v3  ;;  %2454 = vmatpush.msra.mxu3 %v349_v3  ;;  %v3029_v20 = vld [vmem:[%s2992_s16 + $0x20] sm:$0xff]  ;;  %v3033_v21 = vld [vmem:[%s2992_s16 + $0x28] sm:$0xff]  ;;  %v3037_v22 = vld [vmem:[%s2992_s16 + $0x30] sm:$0xff]  ;;  %p2769_p1 = scmp.ne.s32.totalorder %s2767_s12, %s2768_s14  ;;  %p2773_p2 = scmp.lt.s32.totalorder %s2767_s12, %s3641_s5 }
  0x50   : > { %2453 = vmatpush.msra.mxu2 %v349_v3  ;;  %2452 = vmatpush.msra.mxu1 %v349_v3  ;;  %v3041_v23 = vld [vmem:[%s2992_s16 + $0x38] sm:$0xff]  ;;  %v3045_v24 = vld [vmem:[%s2992_s16 + $0x40] sm:$0xff]  ;;  %v3049_v25 = vld [vmem:[%s2992_s16 + $0x48] sm:$0xff]  ;;  %p2774_p10 = scmp.lt.s32.totalorder %s2772_s29, %s2768_s14 }
  0x51   : > { %361 = vmatpush.msra.mxu0 %v348_v4  ;;  %2457 = vmatpush.msra.mxu3 %v348_v4  ;;  %v3053_v26 = vld [vmem:[%s2992_s16 + $0x50] sm:$0xff]  ;;  %v3057_v27 = vld [vmem:[%s2992_s16 + $0x58] sm:$0xff]  ;;  %v3061_v28 = vld [vmem:[%s2992_s16 + $0x60] sm:$0xff]  ;;  %p2770_p4 = pnand %p2769_p1, %p2933_p7 }
  0x52   : > { %2456 = vmatpush.msra.mxu2 %v348_v4  ;;  %2455 = vmatpush.msra.mxu1 %v348_v4  ;;  %v3065_v29 = vld [vmem:[%s2992_s16 + $0x68] sm:$0xff]  ;;  %v333_v30 = vld [vmem:[%s2992_s16 + $0xe0] sm:$0xff]  ;;  %v3070_v31 = vld [vmem:[%s2992_s16 + $0x70] sm:$0xff]  ;;  %p2775_p11 = por %p2774_p10, %p2773_p2 }
  0x53   : > { %362 = vmatpush.msra.mxu0 %v347_v5  ;;  %2460 = vmatpush.msra.mxu3 %v347_v5  ;;  %v334_v32 = vld [vmem:[%s2992_s16 + $0xe8] sm:$0xff]  ;;  %v3076_v34 = vld [vmem:[%s2992_s16 + $0x78] sm:$0xff]  ;;  %v335_v35 = vld [vmem:[%s2992_s16 + $0xf0] sm:$0xff]  ;;  %p2771_p8 = pneg %p2770_p4 }
  0x54   : > { %2459 = vmatpush.msra.mxu2 %v347_v5  ;;  %2458 = vmatpush.msra.mxu1 %v347_v5  ;;  %v330_v33 = vld [vmem:[%s2992_s16 + $0xc8] sm:$0xff]  ;;  %v331_v36 = vld [vmem:[%s2992_s16 + $0xd0] sm:$0xff]  ;;  %v3082_v38 = vld [vmem:[%s2992_s16 + $0x80] sm:$0xff] }
  0x55   : > { %363 = vmatpush.msra.mxu0 %v346_v6  ;;  %2463 = vmatpush.msra.mxu3 %v346_v6  ;;  %v336_v39 = vld [vmem:[%s2992_s16 + $0xf8] sm:$0xff]  ;;  %v3088_v42 = vld [vmem:[%s2992_s16 + $0x88] sm:$0xff]  ;;  %v3096_v45 = vld [vmem:[%s2992_s16 + $0x90] sm:$0xff]  ;;  %p2776_p9 = pnand %p2775_p11, %p2771_p8 }
  0x56   : > { %2462 = vmatpush.msra.mxu2 %v346_v6  ;;  %2461 = vmatpush.msra.mxu1 %v346_v6  ;;  %v332_v40 = vld [vmem:[%s2992_s16 + $0xd8] sm:$0xff]  ;;  %v3102_v46 = vld [vmem:[%s3639_s3] ss:$0 sm:$0xff]  ;;  %v3118_v59 = vld [vmem:[%s2992_s16 + $0xa8] sm:$0xff] }
  0x57   : > { %364 = vmatpush.msra.mxu0 %v345_v7  ;;  %2466 = vmatpush.msra.mxu3 %v345_v7  ;;  %v3092_v43 = vld [vmem:[%s2992_s16 + $0xb8] sm:$0xff]  ;;  %v329_v49 = vld [vmem:[%s2992_s16 + $0xc0] sm:$0xff]  ;;  %v3127_v0 = vld [vmem:[%s2992_s16 + $0xb0] sm:$0xff] }
  0x58   : > { %2465 = vmatpush.msra.mxu2 %v345_v7  ;;  %2464 = vmatpush.msra.mxu1 %v345_v7  ;;  %v3105_v48 = vld [vmem:[%s2992_s16 + $0x98] sm:$0xff]  ;;  %v3113_v54 = vld [vmem:[%s2992_s16 + $0xa0] sm:$0xff] }
  0x59   : > { %365 = vmatpush.msra.mxu0 %v344_v8  ;;  %2469 = vmatpush.msra.mxu3 %v344_v8  ;;  %v3124_v62 = vld [vmem:[%s3640_s4] sm:$0x1] }
  0x5a   : > { %2468 = vmatpush.msra.mxu2 %v344_v8  ;;  %2467 = vmatpush.msra.mxu1 %v344_v8 }
  0x5b   : > { %366 = vmatpush.msra.mxu0 %v343_v9  ;;  %2472 = vmatpush.msra.mxu3 %v343_v9 }
  0x5c   : > { %2471 = vmatpush.msra.mxu2 %v343_v9  ;;  %2470 = vmatpush.msra.mxu1 %v343_v9 }
  0x5d   : > { %367 = vmatpush.msra.mxu0 %v342_v10  ;;  %2475 = vmatpush.msra.mxu3 %v342_v10 }
  0x5e   : > { %2474 = vmatpush.msra.mxu2 %v342_v10  ;;  %2473 = vmatpush.msra.mxu1 %v342_v10 }
  0x5f   : > { %368 = vmatpush.msra.mxu0 %v341_v11  ;;  %2478 = vmatpush.msra.mxu3 %v341_v11 }
  0x60   : > { %2477 = vmatpush.msra.mxu2 %v341_v11  ;;  %2476 = vmatpush.msra.mxu1 %v341_v11 }
  0x61   : > { %369 = vmatpush.msra.mxu0 %v340_v12  ;;  %2481 = vmatpush.msra.mxu3 %v340_v12 }
  0x62   : > { %2480 = vmatpush.msra.mxu2 %v340_v12  ;;  %2479 = vmatpush.msra.mxu1 %v340_v12 }
  0x63   : > { %370 = vmatpush.msra.mxu0 %v339_v13  ;;  %2484 = vmatpush.msra.mxu3 %v339_v13 }
  0x64   : > { %2483 = vmatpush.msra.mxu2 %v339_v13  ;;  %2482 = vmatpush.msra.mxu1 %v339_v13 }
  0x65   : > { %371 = vmatpush.msra.mxu0 %v338_v14  ;;  %2487 = vmatpush.msra.mxu3 %v338_v14 }
  0x66   : > { %2486 = vmatpush.msra.mxu2 %v338_v14  ;;  %2485 = vmatpush.msra.mxu1 %v338_v14 }
  0x67   : > { %372 = vmatpush.msra.mxu0 %v337_v15  ;;  %2490 = vmatpush.msra.mxu3 %v337_v15 }
  0x68   : > { %373 = vmatmul.f32.vlgmr.msra.gmra.mxu0 %v3013_v16  ;;  %2489 = vmatpush.msra.mxu2 %v337_v15 }
  0x69   : > { %2488 = vmatpush.msra.mxu1 %v337_v15  ;;  %457 = vmatmul.f32.vlgmr.msra.gmra.mxu3 %v333_v30 }
  0x6a   : > { %448 = vmatmul.f32.vlgmr.msra.gmra.mxu2 %v330_v33  ;;  %442 = vmatmul.f32.vlgmr.msra.gmra.mxu1 %v3092_v43 }
  0x70   : > { %376 = vmatmul.f32.gmra.mxu0 %v3017_v17 }
  0x71   : > { %460 = vmatmul.f32.gmra.mxu3 %v334_v32 }
  0x72   : > { %451 = vmatmul.f32.gmra.mxu2 %v331_v36  ;;  %445 = vmatmul.f32.gmra.mxu1 %v329_v49 }
  0x78   : > { %379 = vmatmul.f32.gmra.mxu0 %v3021_v18 }
  0x79   : > { %463 = vmatmul.f32.gmra.mxu3 %v335_v35 }
  0x7a   : > { %454 = vmatmul.f32.gmra.mxu2 %v332_v40 }
  0x80   : > { %382 = vmatmul.f32.gmra.mxu0 %v3025_v19 }
  0x81   : > { %466 = vmatmul.f32.gmra.mxu3 %v336_v39 }
  0x88   : > { %385 = vmatmul.f32.gmra.mxu0 %v3029_v20 }
  0x90   : > { %388 = vmatmul.f32.gmra.mxu0 %v3033_v21 }
  0x98   : > { %391 = vmatmul.f32.gmra.mxu0 %v3037_v22 }
  0xa0   : > { %394 = vmatmul.f32.gmra.mxu0 %v3041_v23 }
  0xa8   : > { %397 = vmatmul.f32.gmra.mxu0 %v3045_v24 }
  0xb0   : > { %400 = vmatmul.f32.gmra.mxu0 %v3049_v25 }
  0xb8   : > { %403 = vmatmul.f32.gmra.mxu0 %v3053_v26 }
  0xc0   : > { %406 = vmatmul.f32.gmra.mxu0 %v3057_v27 }
  0xc8   : > { %409 = vmatmul.f32.gmra.mxu0 %v3061_v28 }
  0xd0   : > { %412 = vmatmul.f32.gmra.mxu0 %v3065_v29 }
  0xd8   : > { %415 = vmatmul.f32.gmra.mxu0 %v3070_v31 }
  0xe0   : > { %418 = vmatmul.f32.gmra.mxu0 %v3076_v34 }
  0xe5   : > { %v374_v37 = vpop.f32.mrf.mxu0 }
  0xe6   : > { %v375_v56 = vadd.f32 %v3102_v46, %v374_v37 }
  0xe8   : > { %421 = vmatmul.f32.gmra.mxu0 %v3082_v38 }
  0xed   : > { %v377_v41 = vpop.f32.mrf.mxu0  ;;  %v449_v49 = vpop.f32.mrf.mxu2 }
  0xee   : > { %v378_v52 = vadd.f32 %v3102_v46, %v377_v41 }
  0xf0   : > { %424 = vmatmul.f32.gmra.mxu0 %v3088_v42 }
  0xf5   : > { %v380_v44 = vpop.f32.mrf.mxu0 }
  0xf6   : > { %v381_v51 = vadd.f32 %v3102_v46, %v380_v44 }
  0xf8   : > { %427 = vmatmul.f32.gmra.mxu0 %v3096_v45 }
  0xfd   : > { %v383_v47 = vpop.f32.mrf.mxu0 }
  0xfe   : > { %v384_v50 = vadd.f32 %v3102_v46, %v383_v47 }
 0x100   : > { %2558 = vtanh.f32 %v384_v50  ;;  %430 = vmatmul.f32.gmra.mxu0 %v3105_v48 }
 0x101   : > { %2560 = vtanh.f32 %v381_v51 }
 0x102   : > { %2562 = vtanh.f32 %v378_v52 }
 0x103   : > { %2564 = vtanh.f32 %v375_v56  ;;  %v452_v56 = vpop.f32.mrf.mxu2 }
 0x105   : > { %v386_v53 = vpop.f32.mrf.mxu0 }
 0x106   : > { %v2559_v55 = vpop.eup %2558  ;;  %v387_v7 = vadd.f32 %v3102_v46, %v386_v53 }
 0x107   : > { %515 = vmatpush.xpose.msrb.mxu1 %v2559_v55  ;;  %v2561_v57 = vpop.eup %2560  ;;  %v3144_v55 = vpop.f32.mrf.mxu3 }
 0x108   : > { %433 = vmatmul.f32.gmra.mxu0 %v3113_v54  ;;  %v2563_v60 = vpop.eup %2562 }
 0x109   : > { %v2565_v61 = vpop.eup %2564 }
 0x10b   : > { %516 = vmatpush.xpose.msrb.mxu1 %v2561_v57 }
 0x10d   : > { %v389_v58 = vpop.f32.mrf.mxu0 }
 0x10e   : > { %v390_v4 = vadd.f32 %v3102_v46, %v389_v58 }
 0x10f   : > { %517 = vmatpush.xpose.msrb.mxu1 %v2563_v60 }
 0x110   : > { %436 = vmatmul.f32.gmra.mxu0 %v3118_v59 }
 0x113   : > { %518 = vmatpush.xpose.msrb.mxu1 %v2565_v61 }
 0x115   : > { %v392_v63 = vpop.f32.mrf.mxu0 }
 0x116   : > { %519 = vmatmul.f32.vlgmr.msrb.gmra.mxu1 %v3124_v62  ;;  %v393_v3 = vadd.f32 %v3102_v46, %v392_v63  ;;  %v453_v63 = vadd.f32 %v3102_v46, %v452_v56 }
 0x118   : > { %439 = vmatmul.f32.gmra.mxu0 %v3127_v0 }
 0x11d   : > { %v395_v1 = vpop.f32.mrf.mxu0 }
 0x11e   : > { %v396_v2 = vadd.f32 %v3102_v46, %v395_v1  ;;  %v455_v1 = vpop.f32.mrf.mxu2 }
 0x120   : > { %2566 = vtanh.f32 %v396_v2  ;;  %v461_v2 = vpop.f32.mrf.mxu3 }
 0x121   : > { %2568 = vtanh.f32 %v393_v3  ;;  %v456_v3 = vadd.f32 %v3102_v46, %v455_v1 }
 0x122   : > { %2570 = vtanh.f32 %v390_v4  ;;  %v443_v4 = vpop.f32.mrf.mxu1 }
 0x123   : > { %2572 = vtanh.f32 %v387_v7  ;;  %v450_v7 = vadd.f32 %v3102_v46, %v449_v49 }
 0x125   : > { %v398_v5 = vpop.f32.mrf.mxu0 }
 0x126   : > { %v2567_v6 = vpop.eup %2566  ;;  %v399_v35 = vadd.f32 %v3102_v46, %v398_v5 }
 0x127   : > { %535 = vmatpush.xpose.msrb.mxu2 %v2567_v6  ;;  %v2569_v8 = vpop.eup %2568  ;;  %v444_v6 = vadd.f32 %v3102_v46, %v443_v4 }
 0x128   : > { %v2571_v10 = vpop.eup %2570 }
 0x129   : > { %v2573_v11 = vpop.eup %2572 }
 0x12b   : > { %536 = vmatpush.xpose.msrb.mxu2 %v2569_v8 }
 0x12d   : > { %v401_v9 = vpop.f32.mrf.mxu0 }
 0x12e   : > { %v402_v30 = vadd.f32 %v3102_v46, %v401_v9 }
 0x12f   : > { %537 = vmatpush.xpose.msrb.mxu2 %v2571_v10 }
 0x133   : > { %538 = vmatpush.xpose.msrb.mxu2 %v2573_v11 }
 0x135   : > { %v404_v12 = vpop.f32.mrf.mxu0 }
 0x136   : > { %539 = vmatmul.f32.vlgmr.msrb.gmra.mxu2 %v3124_v62  ;;  %v405_v15 = vadd.f32 %v3102_v46, %v404_v12  ;;  %v464_v12 = vpop.f32.mrf.mxu3 }
 0x13d   : > { %v407_v13 = vpop.f32.mrf.mxu0 }
 0x13e   : > { %v408_v14 = vadd.f32 %v3102_v46, %v407_v13  ;;  %v446_v13 = vpop.f32.mrf.mxu1 }
 0x140   : > { %2574 = vtanh.f32 %v408_v14  ;;  %v447_v14 = vadd.f32 %v3102_v46, %v446_v13  ;;  %v964_v13 = vand.u32 4294901760, %v3041_v23 }
 0x141   : > { %2576 = vtanh.f32 %v405_v15 }
 0x142   : > { %2578 = vtanh.f32 %v402_v30 }
 0x143   : > { %2580 = vtanh.f32 %v399_v35 }
 0x145   : > { %v410_v32 = vpop.f32.mrf.mxu0 }
 0x146   : > { %v2575_v33 = vpop.eup %2574  ;;  %v411_v57 = vadd.f32 %v3102_v46, %v410_v32 }
 0x147   : > { %555 = vmatpush.xpose.msrb.mxu3 %v2575_v33  ;;  %v2577_v36 = vpop.eup %2576  ;;  %v3155_v33 = vand.u32 4294901760, %v3025_v19 }
 0x148   : > { %v2579_v39 = vpop.eup %2578 }
 0x149   : > { %v2581_v40 = vpop.eup %2580 }
 0x14b   : > { %556 = vmatpush.xpose.msrb.mxu3 %v2577_v36  ;;  %v3159_v36 = vand.u32 4294901760, %v3021_v18 }
 0x14d   : > { %v413_v37 = vpop.f32.mrf.mxu0 }
 0x14e   : > { %v414_v51 = vadd.f32 %v3102_v46, %v413_v37 }
 0x14f   : > { %557 = vmatpush.xpose.msrb.mxu3 %v2579_v39  ;;  %v3163_v39 = vsub.f32 %v3025_v19, %v3155_v33 }
 0x153   : > { %558 = vmatpush.xpose.msrb.mxu3 %v2581_v40 }
 0x155   : > { %v416_v41 = vpop.f32.mrf.mxu0 }
 0x156   : > { %559 = vmatmul.f32.vlgmr.msrb.gmra.mxu3 %v3124_v62  ;;  %v417_v50 = vadd.f32 %v3102_v46, %v416_v41  ;;  %v467_v41 = vpop.f32.mrf.mxu3 }
 0x157   : > { %v468_v19 = vadd.f32 %v3102_v46, %v467_v41 }
 0x15d   : > { %v419_v44 = vpop.f32.mrf.mxu0 }
 0x15e   : > { %v420_v47 = vadd.f32 %v3102_v46, %v419_v44  ;;  %v3167_v44 = vand.u32 4294901760, %v3017_v17 }
 0x160   : > { %2582 = vtanh.f32 %v420_v47  ;;  %v3182_v56 = vsub.f32 %v3017_v17, %v3167_v44  ;;  %v462_v17 = vadd.f32 %v3102_v46, %v461_v2 }
 0x161   : > { %2584 = vtanh.f32 %v417_v50  ;;  %v3171_v50 = vand.u32 4294901760, %v3013_v16 }
 0x162   : > { %2586 = vtanh.f32 %v414_v51  ;;  %v3175_v51 = vsub.f32 %v3021_v18, %v3159_v36  ;;  %v465_v18 = vadd.f32 %v3102_v46, %v464_v12 }
 0x163   : > { %2588 = vtanh.f32 %v411_v57 }
 0x164   : > { %2590 = vtanh.f32 %v456_v3 }
 0x165   : > { %v422_v52 = vpop.f32.mrf.mxu0  ;;  %2592 = vtanh.f32 %v453_v63  ;;  %v459_v63 = vadd.f32 %v3102_v46, %v3144_v55 }
 0x166   : > { %v2583_v53 = vpop.eup %2582  ;;  %2594 = vtanh.f32 %v444_v6 }
 0x167   : > { %575 = vmatpush.xpose.msra.mxu1 %v2583_v53  ;;  %v2585_v58 = vpop.eup %2584  ;;  %2596 = vtanh.f32 %v450_v7  ;;  %v423_v53 = vadd.f32 %v3102_v46, %v422_v52  ;;  %v679_v7 = vld [vmem:[%s3002_s23] sm:$0x1] }
 0x168   : > { %v2587_v61 = vpop.eup %2586  ;;  %2598 = vtanh.f32 %v447_v14 }
 0x169   : > { %v2589_v5 = vpop.eup %2588 }
 0x16a   : > { %v2591_v9 = vpop.eup %2590 }
 0x16b   : > { %576 = vmatpush.xpose.msra.mxu1 %v2585_v58  ;;  %v2593_v10 = vpop.eup %2592  ;;  %v3187_v58 = vsub.f32 %v3013_v16, %v3171_v50 }
 0x16c   : > { %v2595_v11 = vpop.eup %2594 }
 0x16d   : > { %v425_v60 = vpop.f32.mrf.mxu0  ;;  %615 = vmatpush.xpose.msra.mxu3 %v2595_v11  ;;  %v2597_v30 = vpop.eup %2596 }
 0x16e   : > { %v2599_v37 = vpop.eup %2598  ;;  %v426_v40 = vadd.f32 %v3102_v46, %v425_v60 }
 0x16f   : > { %577 = vmatpush.xpose.msra.mxu1 %v2587_v61 }
 0x173   : > { %578 = vmatpush.xpose.msra.mxu1 %v2589_v5 }
 0x175   : > { %v428_v8 = vpop.f32.mrf.mxu0 }
 0x176   : > { %579 = vmatmul.f32.vlgmr.msra.gmra.mxu1 %v3124_v62  ;;  %v429_v35 = vadd.f32 %v3102_v46, %v428_v8 }
 0x177   : > { %635 = vmatpush.xpose.msrb.mxu1 %v2591_v9 }
 0x17b   : > { %636 = vmatpush.xpose.msrb.mxu1 %v2593_v10 }
 0x17d   : > { %v431_v15 = vpop.f32.mrf.mxu0 }
 0x17e   : > { %v432_v32 = vadd.f32 %v3102_v46, %v431_v15 }
 0x17f   : > { %637 = vmatpush.xpose.msrb.mxu1 %v2597_v30  ;;  %v966_v30 = vand.u32 4294901760, %v3037_v22 }
 0x180   : > { %2600 = vtanh.f32 %v432_v32 }
 0x181   : > { %2602 = vtanh.f32 %v429_v35  ;;  %v968_v35 = vand.u32 4294901760, %v3033_v21  ;;  %v3222_v41 = vsub.f32 %v3037_v22, %v966_v30 }
 0x182   : > { %2604 = vtanh.f32 %v426_v40  ;;  %v807_v40 = vand.u32 4294901760, %v3163_v39 }
 0x183   : > { %638 = vmatpush.xpose.msrb.mxu1 %v2599_v37  ;;  %2606 = vtanh.f32 %v468_v19  ;;  %v3216_v37 = vsub.f32 %v3041_v23, %v964_v13  ;;  %v970_v23 = vand.u32 4294901760, %v3029_v20  ;;  %v3228_v19 = vsub.f32 %v3033_v21, %v968_v35 }
 0x184   : > { %2608 = vtanh.f32 %v423_v53  ;;  %v813_v53 = vand.u32 4294901760, %v3175_v51  ;;  %v808_v22 = vsub.f32 %v3163_v39, %v807_v40 }
 0x185   : > { %v434_v47 = vpop.f32.mrf.mxu0  ;;  %2610 = vtanh.f32 %v465_v18  ;;  %v3239_v18 = vsub.f32 %v3029_v20, %v970_v23 }
 0x186   : > { %v2601_v49 = vpop.eup %2600  ;;  %639 = vmatmul.f32.vlgmr.msrb.gmra.mxu1 %v3124_v62  ;;  %2612 = vtanh.f32 %v462_v17  ;;  %v435_v9 = vadd.f32 %v3102_v46, %v434_v47 }
 0x187   : > { %848 = vmatpush.msra.mxu1 %v3163_v39  ;;  %595 = vmatpush.xpose.msra.mxu2 %v2601_v49  ;;  %v2603_v57 = vpop.eup %2602  ;;  %v809_v39 = vand.u32 4294901760, %v808_v22 }
 0x188   : > { %v2605_v60 = vpop.eup %2604 }
 0x189   : > { %851 = vmatpush.msra.mxu1 %v3175_v51  ;;  %v2607_v16 = vpop.eup %2606 }
 0x18a   : > { %v2609_v61 = vpop.eup %2608 }
 0x18b   : > { %596 = vmatpush.xpose.msra.mxu2 %v2603_v57  ;;  %854 = vmatpush.msra.mxu1 %v3182_v56  ;;  %v2611_v2 = vpop.eup %2610  ;;  %v819_v57 = vand.u32 4294901760, %v3182_v56 }
 0x18c   : > { %v2613_v55 = vpop.eup %2612 }
 0x18d   : > { %v437_v52 = vpop.f32.mrf.mxu0  ;;  %857 = vmatpush.msra.mxu1 %v3187_v58 }
 0x18e   : > { %v438_v6 = vadd.f32 %v3102_v46, %v437_v52  ;;  %v814_v52 = vsub.f32 %v3175_v51, %v813_v53 }
 0x18f   : > { %937 = vmatpush.msrb.mxu1 %v3155_v33  ;;  %597 = vmatpush.xpose.msra.mxu2 %v2605_v60  ;;  %v820_v60 = vsub.f32 %v3182_v56, %v819_v57  ;;  %v995_v56 = vand.u32 4294901760, %v3216_v37 }
 0x190   : > { %v815_v20 = vand.u32 4294901760, %v814_v52 }
 0x191   : > { %939 = vmatpush.msrb.mxu1 %v3159_v36  ;;  %v821_v51 = vand.u32 4294901760, %v820_v60  ;;  %v3295_v60 = vand.u32 4294901760, %v3070_v31 }
 0x193   : > { %941 = vmatpush.msrb.mxu1 %v3167_v44  ;;  %598 = vmatpush.xpose.msra.mxu2 %v2609_v61  ;;  %v520_v1 = vpop.f32.mrf.mxu1 }
 0x194   : > { %v663_v3 = vmul.f32 1.442695, %v520_v1  ;;  %v1013_v1 = vand.u32 4294901760, %v3239_v18 }
 0x195   : > { %943 = vmatpush.msrb.mxu1 %v3171_v50  ;;  %v440_v4 = vpop.f32.mrf.mxu0 }
 0x196   : > { %v441_v5 = vadd.f32 %v3102_v46, %v440_v4  ;;  %599 = vmatmul.f32.vlgmr.msra.gmra.mxu2 %v3124_v62  ;;  %2614 = vpow2.f32 %v663_v3  ;;  %v3258_v3 = vand.u32 4294901760, %v3057_v27 }
 0x197   : > { %655 = vmatpush.xpose.msrb.mxu2 %v2607_v16  ;;  %2616 = vtanh.f32 %v459_v63  ;;  %v1007_v16 = vand.u32 4294901760, %v3228_v19 }
 0x198   : > { %2618 = vtanh.f32 %v441_v5 }
 0x199   : > { %2620 = vtanh.f32 %v438_v6  ;;  %v1008_v5 = vsub.f32 %v3228_v19, %v1007_v16  ;;  %v3264_v6 = vand.u32 4294901760, %v3053_v26 }
 0x19a   : > { %2622 = vtanh.f32 %v435_v9  ;;  %v680_v9 = vld [vmem:[%s3002_s23 + $0x1] sm:$0x1] }
 0x19b   : > { %656 = vmatpush.xpose.msrb.mxu2 %v2611_v2 }
 0x19c   : > { %v2615_v8 = vpop.eup %2614 }
 0x19d   : > { %v2617_v10 = vpop.eup %2616  ;;  %v3204_v11 = vmul.f32 %v2615_v8, %v679_v7  ;;  %v1014_v7 = vsub.f32 %v3239_v18, %v1013_v1  ;;  %v1182_v8 = vsub.f32 %v3057_v27, %v3258_v3 }
 0x19e   : > { %v2619_v12 = vpop.eup %2618 }
 0x19f   : > { %657 = vmatpush.xpose.msrb.mxu2 %v2613_v55  ;;  %616 = vmatpush.xpose.msra.mxu3 %v2619_v12  ;;  %v762_v14 = vsel %vm760_vm0, %v3204_v11, 0  ;;  %v2621_v46 = vpop.eup %2620  ;;  %v696_v4 = vsel %vm695_vm1, %v3204_v11, 0.0  ;;  %v1009_v11 = vand.u32 4294901760, %v1008_v5 }
 0x1a0   : > { %v3209_v15 = vand.u32 4294901760, %v762_v14  ;;  %v2623_v47 = vpop.eup %2622  ;;  %697 = vadd.xlane.f32.xlu1 %v696_v4 }
 0x1a2   : > { %v785_v32 = vsub.f32 %v762_v14, %v3209_v15  ;;  %v1188_v14 = vsub.f32 %v3053_v26, %v3264_v6 }
 0x1a3   : > { %658 = vmatpush.xpose.msrb.mxu2 %v2617_v10  ;;  %617 = vmatpush.xpose.msra.mxu3 %v2621_v46  ;;  %v3271_v10 = vand.u32 4294901760, %v3049_v25  ;;  %v1015_v46 = vand.u32 4294901760, %v1014_v7 }
 0x1a4   : > { %860 = vmatmul.f32.vlgmr.msra.gmra.mxu1 %v785_v32  ;;  %v786_v49 = vand.u32 4294901760, %v785_v32 }
 0x1a5   : > { %1036 = vmatpush.msra.mxu1 %v3216_v37  ;;  %v1194_v27 = vsub.f32 %v3049_v25, %v3271_v10 }
 0x1a6   : > { %659 = vmatmul.f32.vlgmr.msrb.gmra.mxu2 %v3124_v62  ;;  %v787_v21 = vsub.f32 %v785_v32, %v786_v49  ;;  %v1183_v32 = vand.u32 4294901760, %v1182_v8 }
 0x1a7   : > { %877 = vmatpush.msra.mxu2 %v3155_v33  ;;  %618 = vmatpush.xpose.msra.mxu3 %v2623_v47 }
 0x1a8   : > { %1039 = vmatpush.msra.mxu1 %v3222_v41  ;;  %v1184_v47 = vsub.f32 %v1182_v8, %v1183_v32 }
 0x1a9   : > { %879 = vmatpush.msra.mxu2 %v3159_v36 }
 0x1aa   : > { %1042 = vmatpush.msra.mxu1 %v3228_v19  ;;  %619 = vmatmul.f32.vlgmr.msra.gmra.mxu3 %v3124_v62  ;;  %v788_v62 = vand.u32 4294901760, %v787_v21  ;;  %v1185_v22 = vand.u32 4294901760, %v1184_v47 }
 0x1ab   : > { %881 = vmatpush.msra.mxu2 %v3167_v44  ;;  %777 = vmatpush.msrb.mxu3 %v3155_v33  ;;  %v825_v33 = vand.u32 4294901760, %v3187_v58 }
 0x1ac   : > { %945 = vmatmul.f32.vlgmr.msrb.gmra.mxu1 %v3209_v15 }
 0x1ad   : > { %883 = vmatpush.msra.mxu2 %v3171_v50  ;;  %779 = vmatpush.msrb.mxu3 %v3159_v36  ;;  %v826_v36 = vsub.f32 %v3187_v58, %v825_v33  ;;  %v996_v58 = vsub.f32 %v3216_v37, %v995_v56 }
 0x1ae   : > { %887 = vmatmul.f32.vlgmr.msra.gmra.mxu2 %v786_v49  ;;  %1045 = vmatpush.msra.mxu1 %v3239_v18  ;;  %v1195_v49 = vand.u32 4294901760, %v1194_v27 }
 0x1af   : > { %965 = vmatpush.msrb.mxu2 %v964_v13  ;;  %781 = vmatpush.msrb.mxu3 %v3167_v44  ;;  %v827_v44 = vand.u32 4294901760, %v826_v36  ;;  %v997_v2 = vand.u32 4294901760, %v996_v58  ;;  %v3302_v36 = vand.u32 4294901760, %v3065_v29  ;;  %v681_v58 = vld [vmem:[%s3002_s23 + $0x2] sm:$0x1] }
 0x1b0   : > { %1125 = vmatpush.msrb.mxu1 %v964_v13 }
 0x1b1   : > { %967 = vmatpush.msrb.mxu2 %v966_v30  ;;  %783 = vmatpush.msrb.mxu3 %v3171_v50  ;;  %v1001_v50 = vand.u32 4294901760, %v3222_v41 }
 0x1b2   : > { %1127 = vmatpush.msrb.mxu1 %v966_v30  ;;  %789 = vmatmul.f32.vlgmr.msrb.gmra.mxu3 %v788_v62 }
 0x1b3   : > { %969 = vmatpush.msrb.mxu2 %v968_v35  ;;  %810 = vmatpush.msra.mxu3 %v809_v39  ;;  %v1002_v63 = vsub.f32 %v3222_v41, %v1001_v50  ;;  %v1189_v41 = vand.u32 4294901760, %v1188_v14  ;;  %v3289_v39 = vand.u32 4294901760, %v3076_v34 }
 0x1b4   : > { %1129 = vmatpush.msrb.mxu1 %v968_v35 }
 0x1b5   : > { %971 = vmatpush.msrb.mxu2 %v970_v23  ;;  %816 = vmatpush.msra.mxu3 %v815_v20  ;;  %v1003_v55 = vand.u32 4294901760, %v1002_v63  ;;  %v1190_v25 = vsub.f32 %v1188_v14, %v1189_v41  ;;  %v1370_v62 = vsub.f32 %v3076_v34, %v3289_v39  ;;  %v1376_v34 = vsub.f32 %v3070_v31, %v3295_v60 }
 0x1b6   : > { %1131 = vmatpush.msrb.mxu1 %v970_v23 }
 0x1b7   : > { %1065 = vmatpush.msra.mxu2 %v964_v13  ;;  %822 = vmatpush.msra.mxu3 %v821_v51  ;;  %v3275_v13 = vand.u32 4294901760, %v3045_v24 }
 0x1b9   : > { %1067 = vmatpush.msra.mxu2 %v966_v30  ;;  %828 = vmatpush.msra.mxu3 %v827_v44  ;;  %v540_v17 = vpop.f32.mrf.mxu2  ;;  %v3307_v44 = vand.u32 4294901760, %v3061_v28 }
 0x1ba   : > { %v665_v61 = vmul.f32 1.442695, %v540_v17  ;;  %830 = vmatmul.f32.vlgmr.msra.gmra.mxu3 %v3209_v15 }
 0x1bb   : > { %1069 = vmatpush.msra.mxu2 %v968_v35  ;;  %906 = vmatpush.msrb.mxu3 %v807_v40  ;;  %v1388_v17 = vsub.f32 %v3061_v28, %v3307_v44 }
 0x1bc   : > { %2624 = vpow2.f32 %v665_v61  ;;  %v1377_v61 = vand.u32 4294901760, %v1376_v34 }
 0x1bd   : > { %1071 = vmatpush.msra.mxu2 %v970_v23  ;;  %910 = vmatpush.msrb.mxu3 %v813_v53 }
 0x1bf   : > { %914 = vmatpush.msrb.mxu3 %v819_v57  ;;  %v1196_v57 = vsub.f32 %v1194_v27, %v1195_v49 }
 0x1c1   : > { %918 = vmatpush.msrb.mxu3 %v825_v33  ;;  %v1197_v52 = vand.u32 4294901760, %v1196_v57 }
 0x1c2   : > { %v2625_v12 = vpop.eup %2624  ;;  %920 = vmatmul.f32.vlgmr.msrb.gmra.mxu3 %v3209_v15  ;;  %v1200_v15 = vsub.f32 %v3045_v24, %v3275_v13  ;;  %v1191_v24 = vand.u32 4294901760, %v1190_v25 }
 0x1c3   : > { %998 = vmatpush.msra.mxu3 %v997_v2  ;;  %v688_v30 = vmul.f32 %v2625_v12, %v680_v9  ;;  %v1378_v2 = vsub.f32 %v1376_v34, %v1377_v61 }
 0x1c4   : > { %v1201_v19 = vand.u32 4294901760, %v1200_v15 }
 0x1c5   : > { %1004 = vmatpush.msra.mxu3 %v1003_v55  ;;  %v950_v35 = vsel %vm760_vm0, %v688_v30, 0  ;;  %v699_v37 = vsel %vm695_vm1, %v688_v30, 0.0  ;;  %v1379_v7 = vand.u32 4294901760, %v1378_v2 }
 0x1c6   : > { %v972_v40 = vand.u32 4294901760, %v950_v35  ;;  %700 = vadd.xlane.f32.xlu0 %v699_v37  ;;  %v1202_v18 = vsub.f32 %v1200_v15, %v1201_v19 }
 0x1c7   : > { %1010 = vmatpush.msra.mxu3 %v1009_v11 }
 0x1c8   : > { %v973_v26 = vsub.f32 %v950_v35, %v972_v40  ;;  %v1203_v33 = vand.u32 4294901760, %v1202_v18 }
 0x1c9   : > { %1016 = vmatpush.msra.mxu3 %v1015_v46  ;;  %v3326_v46 = vand.u32 4294901760, %v3088_v42 }
 0x1ca   : > { %v974_v23 = vand.u32 4294901760, %v973_v26  ;;  %1018 = vmatmul.f32.vlgmr.msra.gmra.mxu3 %v972_v40  ;;  %1048 = vmatmul.f32.vlgmr.msra.gmra.mxu1 %v973_v26 }
 0x1cb   : > { %1094 = vmatpush.msrb.mxu3 %v995_v56  ;;  %1224 = vmatpush.msra.mxu1 %v1182_v8  ;;  %v1371_v56 = vand.u32 4294901760, %v1370_v62  ;;  %v1570_v37 = vsub.f32 %v3088_v42, %v3326_v46 }
 0x1cc   : > { %v975_v53 = vsub.f32 %v973_v26, %v974_v23 }
 0x1cd   : > { %1098 = vmatpush.msrb.mxu3 %v1001_v50  ;;  %1227 = vmatpush.msra.mxu1 %v1188_v14  ;;  %v1382_v50 = vsub.f32 %v3065_v29, %v3302_v36  ;;  %v1389_v29 = vand.u32 4294901760, %v1388_v17  ;;  %v3321_v14 = vand.u32 4294901760, %v3105_v48 }
 0x1ce   : > { %v976_v21 = vand.u32 4294901760, %v975_v53 }
 0x1cf   : > { %1102 = vmatpush.msrb.mxu3 %v1007_v16  ;;  %1230 = vmatpush.msra.mxu1 %v1194_v27  ;;  %v1372_v16 = vsub.f32 %v1370_v62, %v1371_v56  ;;  %v1390_v8 = vsub.f32 %v1388_v17, %v1389_v29  ;;  %v1558_v27 = vsub.f32 %v3105_v48, %v3321_v14  ;;  %v3342_v48 = vand.u32 4294901760, %v3082_v38 }
 0x1d0   : > { %977 = vmatmul.f32.vlgmr.msrb.gmra.mxu2 %v976_v21 }
 0x1d1   : > { %1106 = vmatpush.msrb.mxu3 %v1013_v1  ;;  %1153 = vmatpush.msrb.mxu2 %v3258_v3  ;;  %v1383_v1 = vand.u32 4294901760, %v1382_v50  ;;  %v1373_v31 = vand.u32 4294901760, %v1372_v16  ;;  %v1391_v11 = vand.u32 4294901760, %v1390_v8  ;;  %v3381_v16 = vand.u32 4294901760, %v3113_v54 }
 0x1d2   : > { %1233 = vmatpush.msra.mxu1 %v1200_v15  ;;  %1108 = vmatmul.f32.vlgmr.msrb.gmra.mxu3 %v972_v40  ;;  %v1559_v15 = vand.u32 4294901760, %v1558_v27 }
 0x1d3   : > { %1186 = vmatpush.msra.mxu3 %v1185_v22  ;;  %1133 = vmatmul.f32.vlgmr.msrb.gmra.mxu1 %v972_v40  ;;  %v3395_v2 = vsub.f32 %v3113_v54, %v3381_v16 }
 0x1d4   : > { %1155 = vmatpush.msrb.mxu2 %v3264_v6  ;;  %1313 = vmatpush.msrb.mxu1 %v3258_v3  ;;  %v1560_v42 = vsub.f32 %v1558_v27, %v1559_v15 }
 0x1d5   : > { %1192 = vmatpush.msra.mxu3 %v1191_v24 }
 0x1d6   : > { %1157 = vmatpush.msrb.mxu2 %v3271_v10  ;;  %1315 = vmatpush.msrb.mxu1 %v3264_v6  ;;  %v1561_v22 = vand.u32 4294901760, %v1560_v42 }
 0x1d7   : > { %1198 = vmatpush.msra.mxu3 %v1197_v52 }
 0x1d8   : > { %1159 = vmatpush.msrb.mxu2 %v3275_v13  ;;  %1317 = vmatpush.msrb.mxu1 %v3271_v10 }
 0x1d9   : > { %1204 = vmatpush.msra.mxu3 %v1203_v33  ;;  %1075 = vmatmul.f32.vlgmr.msra.gmra.mxu2 %v974_v23  ;;  %v560_v20 = vpop.f32.mrf.mxu3 }
 0x1da   : > { %1253 = vmatpush.msra.mxu2 %v3258_v3  ;;  %v667_v51 = vmul.f32 1.442695, %v560_v20  ;;  %1319 = vmatpush.msrb.mxu1 %v3275_v13 }
 0x1db   : > { %1282 = vmatpush.msrb.mxu3 %v1183_v32  ;;  %v3329_v32 = vand.u32 4294901760, %v3096_v45 }
 0x1dc   : > { %1255 = vmatpush.msra.mxu2 %v3264_v6  ;;  %2626 = vpow2.f32 %v667_v51  ;;  %v1384_v6 = vsub.f32 %v1382_v50, %v1383_v1 }
 0x1dd   : > { %1286 = vmatpush.msrb.mxu3 %v1189_v41  ;;  %v1564_v40 = vsub.f32 %v3096_v45, %v3329_v32  ;;  %v682_v41 = vld [vmem:[%s3002_s23 + $0x3] sm:$0x1]  ;;  %v1571_v45 = vand.u32 4294901760, %v1570_v37 }
 0x1de   : > { %1257 = vmatpush.msra.mxu2 %v3271_v10  ;;  %v1385_v28 = vand.u32 4294901760, %v1384_v6 }
 0x1df   : > { %1290 = vmatpush.msrb.mxu3 %v1195_v49  ;;  %v1565_v47 = vand.u32 4294901760, %v1564_v40  ;;  %v1576_v49 = vsub.f32 %v3082_v38, %v3342_v48  ;;  %v1572_v57 = vsub.f32 %v1570_v37, %v1571_v45 }
 0x1e0   : > { %1259 = vmatpush.msra.mxu2 %v3275_v13 }
 0x1e1   : > { %1294 = vmatpush.msrb.mxu3 %v1201_v19  ;;  %v1566_v25 = vsub.f32 %v1564_v40, %v1565_v47  ;;  %v1577_v18 = vand.u32 4294901760, %v1576_v49  ;;  %v1573_v38 = vand.u32 4294901760, %v1572_v57  ;;  %v686_v57 = vld [vmem:[%s3002_s23 + $0x7] sm:$0x1] }
 0x1e2   : > { %v2627_v63 = vpop.eup %2626 }
 0x1e3   : > { %v689_v3 = vmul.f32 %v2627_v63, %v681_v58  ;;  %v1567_v24 = vand.u32 4294901760, %v1566_v25  ;;  %v1578_v33 = vsub.f32 %v1576_v49, %v1577_v18 }
 0x1e5   : > { %v1138_v4 = vsel %vm760_vm0, %v689_v3, 0  ;;  %v702_v5 = vsel %vm695_vm1, %v689_v3, 0.0  ;;  %v685_v3 = vld [vmem:[%s3002_s23 + $0x6] sm:$0x1] }
 0x1e6   : > { %v1160_v55 = vand.u32 4294901760, %v1138_v4  ;;  %703 = vadd.xlane.f32.xlu0 %v702_v5  ;;  %v683_v5 = vld [vmem:[%s3002_s23 + $0x4] sm:$0x1] }
 0x1e8   : > { %v1161_v9 = vsub.f32 %v1138_v4, %v1160_v55  ;;  %1206 = vmatmul.f32.vlgmr.msra.gmra.mxu3 %v1160_v55 }
 0x1e9   : > { %1374 = vmatpush.msra.mxu3 %v1373_v31 }
 0x1ea   : > { %v1162_v10 = vand.u32 4294901760, %v1161_v9  ;;  %1236 = vmatmul.f32.vlgmr.msra.gmra.mxu1 %v1161_v9 }
 0x1eb   : > { %1380 = vmatpush.msra.mxu3 %v1379_v7  ;;  %1412 = vmatpush.msra.mxu1 %v1370_v62  ;;  %v1765_v7 = vand.u32 4294901760, %v3395_v2 }
 0x1ec   : > { %v1163_v12 = vsub.f32 %v1161_v9, %v1162_v10 }
 0x1ed   : > { %1386 = vmatpush.msra.mxu3 %v1385_v28  ;;  %1415 = vmatpush.msra.mxu1 %v1376_v34  ;;  %v3369_v34 = vand.u32 4294901760, %v3127_v0 }
 0x1ee   : > { %v1164_v13 = vand.u32 4294901760, %v1163_v12 }
 0x1ef   : > { %1392 = vmatpush.msra.mxu3 %v1391_v11  ;;  %1418 = vmatpush.msra.mxu1 %v1382_v50 }
 0x1f0   : > { %1165 = vmatmul.f32.vlgmr.msrb.gmra.mxu2 %v1164_v13  ;;  %1296 = vmatmul.f32.vlgmr.msrb.gmra.mxu3 %v1160_v55 }
 0x1f1   : > { %1341 = vmatpush.msrb.mxu2 %v3289_v39  ;;  %1470 = vmatpush.msrb.mxu3 %v1371_v56  ;;  %v3373_v56 = vand.u32 4294901760, %v3118_v59 }
 0x1f2   : > { %1321 = vmatmul.f32.vlgmr.msrb.gmra.mxu1 %v1160_v55 }
 0x1f3   : > { %v580_v30 = vpop.f32.mrf.mxu1  ;;  %1343 = vmatpush.msrb.mxu2 %v3295_v60  ;;  %1474 = vmatpush.msrb.mxu3 %v1377_v61  ;;  %v3385_v61 = vsub.f32 %v3127_v0, %v3369_v34 }
 0x1f4   : > { %v669_v35 = vmul.f32 1.442695, %v580_v30  ;;  %1421 = vmatpush.msra.mxu1 %v1388_v17 }
 0x1f5   : > { %1345 = vmatpush.msrb.mxu2 %v3302_v36  ;;  %1478 = vmatpush.msrb.mxu3 %v1383_v1  ;;  %v3389_v1 = vsub.f32 %v3118_v59, %v3373_v56  ;;  %v1753_v31 = vand.u32 4294901760, %v3385_v61 }
 0x1f6   : > { %2628 = vpow2.f32 %v669_v35  ;;  %1501 = vmatpush.msrb.mxu1 %v3289_v39 }
 0x1f7   : > { %1347 = vmatpush.msrb.mxu2 %v3307_v44  ;;  %1482 = vmatpush.msrb.mxu3 %v1389_v29  ;;  %v1759_v6 = vand.u32 4294901760, %v3389_v1  ;;  %v1754_v54 = vsub.f32 %v3385_v61, %v1753_v31 }
 0x1f8   : > { %1263 = vmatmul.f32.vlgmr.msra.gmra.mxu2 %v1162_v10  ;;  %1503 = vmatpush.msrb.mxu1 %v3295_v60 }
 0x1f9   : > { %1441 = vmatpush.msra.mxu2 %v3289_v39  ;;  %v1760_v10 = vsub.f32 %v3389_v1, %v1759_v6  ;;  %v1755_v13 = vand.u32 4294901760, %v1754_v54 }
 0x1fa   : > { %1505 = vmatpush.msrb.mxu1 %v3302_v36 }
 0x1fb   : > { %1443 = vmatpush.msra.mxu2 %v3295_v60  ;;  %v1579_v60 = vand.u32 4294901760, %v1578_v33  ;;  %v1761_v35 = vand.u32 4294901760, %v1760_v10 }
 0x1fc   : > { %v2629_v26 = vpop.eup %2628  ;;  %1507 = vmatpush.msrb.mxu1 %v3307_v44 }
 0x1fd   : > { %v690_v23 = vmul.f32 %v2629_v26, %v682_v41  ;;  %1445 = vmatpush.msra.mxu2 %v3302_v36  ;;  %v2656_v26 = vld [vmem:[%s2992_s16 + $0xc8] sm:$0xff] }
 0x1fe   : > { %v3425_v42 = vand.u32 4294901760, %v2656_v26 }
 0x1ff   : > { %v1326_v19 = vsel %vm760_vm0, %v690_v23, 0  ;;  %1447 = vmatpush.msra.mxu2 %v3307_v44  ;;  %v705_v53 = vsel %vm695_vm1, %v690_v23, 0.0  ;;  %v3365_v44 = vand.u32 4294901760, %v3092_v43 }
 0x200   : > { %v1348_v21 = vand.u32 4294901760, %v1326_v19  ;;  %706 = vadd.xlane.f32.xlu1 %v705_v53  ;;  %v2657_v53 = vld [vmem:[%s2992_s16 + $0xc0] sm:$0xff] }
 0x201   : > { %v3377_v50 = vsub.f32 %v3092_v43, %v3365_v44 }
 0x202   : > { %v1349_v52 = vsub.f32 %v1326_v19, %v1348_v21  ;;  %1394 = vmatmul.f32.vlgmr.msra.gmra.mxu3 %v1348_v21 }
 0x203   : > { %1562 = vmatpush.msra.mxu3 %v1561_v22  ;;  %v640_v36 = vpop.f32.mrf.mxu1  ;;  %v1747_v43 = vand.u32 4294901760, %v3377_v50  ;;  %v3435_v22 = vand.u32 4294901760, %v2657_v53 }
 0x204   : > { %v1350_v39 = vand.u32 4294901760, %v1349_v52  ;;  %1424 = vmatmul.f32.vlgmr.msra.gmra.mxu1 %v1349_v52  ;;  %v675_v51 = vmul.f32 1.442695, %v640_v36 }
 0x205   : > { %1568 = vmatpush.msra.mxu3 %v1567_v24  ;;  %1600 = vmatpush.msra.mxu1 %v1558_v27  ;;  %v1748_v0 = vsub.f32 %v3377_v50, %v1747_v43  ;;  %v3442_v24 = vsub.f32 %v2656_v26, %v3425_v42 }
 0x206   : > { %v1351_v62 = vsub.f32 %v1349_v52, %v1350_v39  ;;  %2630 = vpow2.f32 %v675_v51 }
 0x207   : > { %1574 = vmatpush.msra.mxu3 %v1573_v38  ;;  %1603 = vmatpush.msra.mxu1 %v1564_v40  ;;  %v1749_v28 = vand.u32 4294901760, %v1748_v0  ;;  %v2655_v40 = vld [vmem:[%s2992_s16 + $0xd0] sm:$0xff]  ;;  %v3450_v38 = vsub.f32 %v2657_v53, %v3435_v22 }
 0x208   : > { %v1352_v20 = vand.u32 4294901760, %v1351_v62 }
 0x209   : > { %1580 = vmatpush.msra.mxu3 %v1579_v60  ;;  %1606 = vmatpush.msra.mxu1 %v1570_v37 }
 0x20a   : > { %1353 = vmatmul.f32.vlgmr.msrb.gmra.mxu2 %v1352_v20  ;;  %1484 = vmatmul.f32.vlgmr.msrb.gmra.mxu3 %v1348_v21  ;;  %v1947_v20 = vand.u32 4294901760, %v3442_v24 }
 0x20b   : > { %1529 = vmatpush.msrb.mxu2 %v3321_v14  ;;  %1609 = vmatpush.msra.mxu1 %v1576_v49 }
 0x20c   : > { %1509 = vmatmul.f32.vlgmr.msrb.gmra.mxu1 %v1348_v21  ;;  %1658 = vmatpush.msrb.mxu3 %v1559_v15  ;;  %v2631_v63 = vpop.eup %2630  ;;  %v3421_v15 = vand.u32 4294901760, %v2655_v40 }
 0x20d   : > { %1531 = vmatpush.msrb.mxu2 %v3329_v32  ;;  %1689 = vmatpush.msrb.mxu1 %v3321_v14  ;;  %v3398_v4 = vmul.f32 %v2631_v63, %v685_v3 }
 0x20e   : > { %1662 = vmatpush.msrb.mxu3 %v1565_v47  ;;  %v3432_v19 = vsub.f32 %v2655_v40, %v3421_v15 }
 0x20f   : > { %1533 = vmatpush.msrb.mxu2 %v3326_v46  ;;  %1691 = vmatpush.msrb.mxu1 %v3329_v32  ;;  %v714_v59 = vsel %vm695_vm1, %v3398_v4, 0.0 }
 0x210   : > { %1666 = vmatpush.msrb.mxu3 %v1571_v45  ;;  %715 = vadd.xlane.f32.xlu0 %v714_v59  ;;  %v1941_v33 = vand.u32 4294901760, %v3432_v19  ;;  %v2660_v59 = vld [vmem:[%s2992_s16 + $0xe8] sm:$0xff] }
 0x211   : > { %1535 = vmatpush.msrb.mxu2 %v3342_v48  ;;  %1693 = vmatpush.msrb.mxu1 %v3326_v46 }
 0x212   : > { %1451 = vmatmul.f32.vlgmr.msra.gmra.mxu2 %v1350_v39  ;;  %1670 = vmatpush.msrb.mxu3 %v1577_v18  ;;  %v684_v39 = vld [vmem:[%s3002_s23 + $0x5] sm:$0x1] }
 0x213   : > { %1629 = vmatpush.msra.mxu2 %v3321_v14  ;;  %1695 = vmatpush.msrb.mxu1 %v3342_v48  ;;  %v1766_v14 = vsub.f32 %v3395_v2, %v1765_v7 }
 0x215   : > { %1631 = vmatpush.msra.mxu2 %v3329_v32  ;;  %v2654_v32 = vld [vmem:[%s2992_s16 + $0xd8] sm:$0xff] }
 0x216   : > { %v3418_v27 = vand.u32 4294901760, %v2654_v32 }
 0x217   : > { %1633 = vmatpush.msra.mxu2 %v3326_v46 }
 0x218   : > { %v3428_v47 = vsub.f32 %v2654_v32, %v3418_v27 }
 0x219   : > { %v600_v58 = vpop.f32.mrf.mxu2  ;;  %1635 = vmatpush.msra.mxu2 %v3342_v48  ;;  %v1767_v48 = vand.u32 4294901760, %v1766_v14 }
 0x21a   : > { %v671_v17 = vmul.f32 1.442695, %v600_v58  ;;  %v1935_v18 = vand.u32 4294901760, %v3428_v47  ;;  %v1953_v58 = vand.u32 4294901760, %v3450_v38 }
 0x21c   : > { %2632 = vpow2.f32 %v671_v17  ;;  %v1936_v62 = vsub.f32 %v3428_v47, %v1935_v18 }
 0x21e   : > { %v1937_v63 = vand.u32 4294901760, %v1936_v62 }
 0x221   : > { %v861_v54 = vpop.f32.mrf.mxu1 }
 0x222   : > { %v2633_v29 = vpop.eup %2632 }
 0x223   : > { %v691_v55 = vmul.f32 %v2633_v29, %v683_v5  ;;  %v1954_v5 = vsub.f32 %v3450_v38, %v1953_v58  ;;  %v3494_v29 = vand.u32 4294901760, %v2660_v59 }
 0x225   : > { %v708_v8 = vsel %vm695_vm1, %v691_v55, 0.0  ;;  %v1514_v9 = vsel %vm760_vm0, %v691_v55, 0  ;;  %v1955_v10 = vand.u32 4294901760, %v1954_v5 }
 0x226   : > { %v1536_v11 = vand.u32 4294901760, %v1514_v9  ;;  %709 = vadd.xlane.f32.xlu2 %v708_v8 }
 0x228   : > { %v1537_v46 = vsub.f32 %v1514_v9, %v1536_v11  ;;  %1582 = vmatmul.f32.vlgmr.msra.gmra.mxu3 %v1536_v11 }
 0x229   : > { %v660_v12 = vpop.f32.mrf.mxu2  ;;  %1750 = vmatpush.msra.mxu3 %v1749_v28  ;;  %v1890_v28 = vsel %vm760_vm0, %v3398_v4, 0 }
 0x22a   : > { %v677_v30 = vmul.f32 1.442695, %v660_v12  ;;  %v1538_v37 = vand.u32 4294901760, %v1537_v46  ;;  %1612 = vmatmul.f32.vlgmr.msra.gmra.mxu1 %v1537_v46  ;;  %v3518_v32 = vand.u32 4294901760, %v1890_v28 }
 0x22b   : > { %1756 = vmatpush.msra.mxu3 %v1755_v13  ;;  %1788 = vmatpush.msra.mxu1 %v3377_v50  ;;  %v1942_v50 = vsub.f32 %v3432_v19, %v1941_v33  ;;  %v2661_v13 = vld [vmem:[%s2992_s16 + $0xe0] sm:$0xff] }
 0x22c   : > { %2634 = vpow2.f32 %v677_v30  ;;  %v1539_v41 = vsub.f32 %v1537_v46, %v1538_v37  ;;  %v3511_v14 = vand.u32 4294901760, %v2661_v13  ;;  %v3514_v30 = vsub.f32 %v2660_v59, %v3494_v29 }
 0x22d   : > { %v620_v45 = vpop.f32.mrf.mxu3  ;;  %1762 = vmatpush.msra.mxu3 %v1761_v35  ;;  %1791 = vmatpush.msra.mxu1 %v3385_v61 }
 0x22e   : > { %v673_v49 = vmul.f32 1.442695, %v620_v45  ;;  %v1540_v23 = vand.u32 4294901760, %v1539_v41  ;;  %v3523_v40 = vsub.f32 %v2661_v13, %v3511_v14  ;;  %v3528_v41 = vsub.f32 %v1890_v28, %v3518_v32 }
 0x22f   : > { %1768 = vmatpush.msra.mxu3 %v1767_v48  ;;  %1794 = vmatpush.msra.mxu1 %v3389_v1  ;;  %v1948_v1 = vsub.f32 %v3442_v24, %v1947_v20 }
 0x230   : > { %2636 = vpow2.f32 %v673_v49  ;;  %1541 = vmatmul.f32.vlgmr.msrb.gmra.mxu2 %v1540_v23  ;;  %1672 = vmatmul.f32.vlgmr.msrb.gmra.mxu3 %v1536_v11  ;;  %v2135_v23 = vand.u32 4294901760, %v3514_v30 }
 0x231   : > { %1717 = vmatpush.msrb.mxu2 %v3365_v44  ;;  %1797 = vmatpush.msra.mxu1 %v3395_v2  ;;  %v1943_v2 = vand.u32 4294901760, %v1942_v50  ;;  %v888_v4 = vpop.f32.mrf.mxu2 }
 0x232   : > { %v2635_v25 = vpop.eup %2634  ;;  %1697 = vmatmul.f32.vlgmr.msrb.gmra.mxu1 %v1536_v11  ;;  %1846 = vmatpush.msrb.mxu3 %v1747_v43  ;;  %v2658_v43 = vld [vmem:[%s2992_s16 + $0xf8] sm:$0xff] }
 0x233   : > { %v3439_v21 = vmul.f32 %v2635_v25, %v686_v57  ;;  %1719 = vmatpush.msrb.mxu2 %v3369_v34  ;;  %1877 = vmatpush.msrb.mxu1 %v3365_v44  ;;  %v3482_v3 = vand.u32 4294901760, %v2658_v43  ;;  %v946_v25 = vpop.f32.mrf.mxu1  ;;  %v698_v57 = vpop.xlane.xlu1 %697 }
 0x234   : > { %1850 = vmatpush.msrb.mxu3 %v1753_v31 }
 0x235   : > { %v717_v52 = vsel %vm695_vm1, %v3439_v21, 0.0  ;;  %v790_v60 = vpop.f32.mrf.mxu3  ;;  %1721 = vmatpush.msrb.mxu2 %v3373_v56  ;;  %1879 = vmatpush.msrb.mxu1 %v3369_v34 }
 0x236   : > { %718 = vadd.xlane.f32.xlu1 %v717_v52  ;;  %v2637_v36 = vpop.eup %2636  ;;  %1854 = vmatpush.msrb.mxu3 %v1759_v6  ;;  %v2141_v52 = vand.u32 4294901760, %v3523_v40 }
 0x237   : > { %v692_v51 = vmul.f32 %v2637_v36, %v684_v39  ;;  %1723 = vmatpush.msrb.mxu2 %v3381_v16  ;;  %1881 = vmatpush.msrb.mxu1 %v3373_v56  ;;  %v1914_v39 = vand.u32 4294901760, %v3528_v41 }
 0x238   : > { %1639 = vmatmul.f32.vlgmr.msra.gmra.mxu2 %v1538_v37  ;;  %1858 = vmatpush.msrb.mxu3 %v1765_v7  ;;  %v3498_v7 = vsub.f32 %v2658_v43, %v3482_v3 }
 0x239   : > { %v711_v17 = vsel %vm695_vm1, %v692_v51, 0.0  ;;  %v1702_v61 = vsel %vm760_vm0, %v692_v51, 0  ;;  %1817 = vmatpush.msra.mxu2 %v3365_v44  ;;  %1883 = vmatpush.msrb.mxu1 %v3381_v16  ;;  %v2659_v44 = vld [vmem:[%s2992_s16 + $0xf0] sm:$0xff]  ;;  %v701_v45 = vpop.xlane.xlu0 %700  ;;  %v2078_v51 = vsel %vm760_vm0, %v3439_v21, 0 }
 0x23a   : > { %v1724_v31 = vand.u32 4294901760, %v1702_v61  ;;  %712 = vadd.xlane.f32.xlu2 %v711_v17  ;;  %v3489_v0 = vand.u32 4294901760, %v2659_v44  ;;  %v2123_v46 = vand.u32 4294901760, %v3498_v7  ;;  %v2100_v50 = vand.u32 4294901760, %v2078_v51 }
 0x23b   : > { %1819 = vmatpush.msra.mxu2 %v3369_v34  ;;  %v1949_v34 = vand.u32 4294901760, %v1948_v1 }
 0x23c   : > { %v3491_v6 = vsub.f32 %v1702_v61, %v1724_v31  ;;  %1770 = vmatmul.f32.vlgmr.msra.gmra.mxu3 %v1724_v31  ;;  %v3506_v11 = vsub.f32 %v2659_v44, %v3489_v0  ;;  %v2124_v49 = vsub.f32 %v3498_v7, %v2123_v46  ;;  %v2101_v1 = vsub.f32 %v2078_v51, %v2100_v50 }
 0x23d   : > { %v831_v55 = vpop.f32.mrf.mxu3  ;;  %1938 = vmatpush.msra.mxu3 %v1937_v63  ;;  %1821 = vmatpush.msra.mxu2 %v3373_v56 }
 0x23e   : > { %1800 = vmatmul.f32.vlgmr.msra.gmra.mxu1 %v3491_v6  ;;  %v1726_v8 = vand.u32 4294901760, %v3491_v6  ;;  %v832_v9 = vadd.f32 %v831_v55, %v790_v60  ;;  %v2125_v60 = vand.u32 4294901760, %v2124_v49 }
 0x23f   : > { %1944 = vmatpush.msra.mxu3 %v1943_v2  ;;  %1976 = vmatpush.msra.mxu1 %v3428_v47  ;;  %v2102_v2 = vand.u32 4294901760, %v2101_v1 }
 0x240   : > { %v1727_v56 = vsub.f32 %v3491_v6, %v1726_v8  ;;  %v862_v12 = vadd.f32 %v861_v54, %v832_v9  ;;  %1823 = vmatpush.msra.mxu2 %v3381_v16  ;;  %v2129_v16 = vand.u32 4294901760, %v3506_v11 }
 0x241   : > { %1950 = vmatpush.msra.mxu3 %v1949_v34  ;;  %1979 = vmatpush.msra.mxu1 %v3432_v19  ;;  %v2136_v19 = vsub.f32 %v3514_v30, %v2135_v23 }
 0x242   : > { %v1728_v35 = vand.u32 4294901760, %v1727_v56  ;;  %v889_v37 = vadd.f32 %v888_v4, %v862_v12  ;;  %v2130_v47 = vsub.f32 %v3506_v11, %v2129_v16 }
 0x243   : > { %1956 = vmatpush.msra.mxu3 %v1955_v10  ;;  %1982 = vmatpush.msra.mxu1 %v3442_v24  ;;  %v2142_v24 = vsub.f32 %v3523_v40, %v2141_v52  ;;  %v2137_v36 = vand.u32 4294901760, %v2136_v19 }
 0x244   : > { %1729 = vmatmul.f32.vlgmr.msrb.gmra.mxu2 %v1728_v35  ;;  %1860 = vmatmul.f32.vlgmr.msrb.gmra.mxu3 %v1724_v31  ;;  %v2131_v62 = vand.u32 4294901760, %v2130_v47 }
 0x245   : > { %1905 = vmatpush.msrb.mxu2 %v3418_v27  ;;  %v921_v48 = vpop.f32.mrf.mxu3  ;;  %1985 = vmatpush.msra.mxu1 %v3450_v38  ;;  %v2143_v38 = vand.u32 4294901760, %v2142_v24 }
 0x246   : > { %1885 = vmatmul.f32.vlgmr.msrb.gmra.mxu1 %v1724_v31  ;;  %v922_v26 = vadd.f32 %v921_v48, %v889_v37  ;;  %2034 = vmatpush.msrb.mxu3 %v1935_v18  ;;  %v721_v18 = vadd.f32 1.1920929e-07, %v701_v45 }
 0x247   : > { %1907 = vmatpush.msrb.mxu2 %v3421_v15  ;;  %2065 = vmatpush.msrb.mxu1 %v3418_v27  ;;  %v1049_v63 = vpop.f32.mrf.mxu1 }
 0x248   : > { %v3538_v53 = vadd.f32 %v946_v25, %v922_v26  ;;  %2038 = vmatpush.msrb.mxu3 %v1941_v33  ;;  %v720_v33 = vadd.f32 1.1920929e-07, %v698_v57  ;;  %2638 = vrcp.f32 %v721_v18 }
 0x249   : > { %1909 = vmatpush.msrb.mxu2 %v3425_v42  ;;  %2067 = vmatpush.msrb.mxu1 %v3421_v15 }
 0x24a   : > { %2042 = vmatpush.msrb.mxu3 %v1947_v20  ;;  %v1915_v20 = vsub.f32 %v3528_v41, %v1914_v39  ;;  %2640 = vrcp.f32 %v720_v33 }
 0x24b   : > { %1911 = vmatpush.msrb.mxu2 %v3435_v22  ;;  %2069 = vmatpush.msrb.mxu1 %v3425_v42 }
 0x24c   : > { %1827 = vmatmul.f32.vlgmr.msra.gmra.mxu2 %v1726_v8  ;;  %1958 = vmatmul.f32.vlgmr.msra.gmra.mxu3 %v3518_v32 }
 0x24d   : > { %2046 = vmatpush.msrb.mxu3 %v1953_v58  ;;  %2005 = vmatpush.msra.mxu2 %v3418_v27  ;;  %v1019_v27 = vpop.f32.mrf.mxu3  ;;  %v1916_v58 = vand.u32 4294901760, %v1915_v20 }
 0x24e   : > { %1988 = vmatmul.f32.vlgmr.msra.gmra.mxu1 %v3528_v41  ;;  %v2639_v17 = vpop.eup %2638 }
 0x24f   : > { %2126 = vmatpush.msra.mxu3 %v2125_v60  ;;  %2071 = vmatpush.msrb.mxu1 %v3435_v22 }
 0x250   : > { %2007 = vmatpush.msra.mxu2 %v3421_v15  ;;  %v2641_v21 = vpop.eup %2640  ;;  %v1134_v55 = vpop.f32.mrf.mxu1 }
 0x251   : > { %2132 = vmatpush.msra.mxu3 %v2131_v62  ;;  %2164 = vmatpush.msra.mxu1 %v3498_v7  ;;  %v2103_v7 = vsub.f32 %v2101_v1, %v2102_v2 }
 0x252   : > { %2009 = vmatpush.msra.mxu2 %v3425_v42  ;;  %v737_v42 = vmul.f32 %v2639_v17, %v721_v18 }
 0x253   : > { %2138 = vmatpush.msra.mxu3 %v2137_v36  ;;  %2167 = vmatpush.msra.mxu1 %v3506_v11  ;;  %v978_v61 = vpop.f32.mrf.mxu2  ;;  %v2104_v10 = vand.u32 4294901760, %v2103_v7 }
 0x254   : > { %2011 = vmatpush.msra.mxu2 %v3435_v22  ;;  %2048 = vmatmul.f32.vlgmr.msrb.gmra.mxu3 %v3518_v32  ;;  %v1020_v15 = vadd.f32 %v1019_v27, %v978_v61  ;;  %v736_v22 = vmul.f32 %v2641_v21, %v720_v33  ;;  %v745_v31 = vsub.f32 2.0, %v737_v42 }
 0x255   : > { %1917 = vmatmul.f32.vlgmr.msrb.gmra.mxu2 %v1916_v58  ;;  %2144 = vmatpush.msra.mxu3 %v2143_v38  ;;  %v1109_v44 = vpop.f32.mrf.mxu3 }
 0x256   : > { %2170 = vmatpush.msra.mxu1 %v3514_v30  ;;  %v1050_v43 = vadd.f32 %v1049_v63, %v1020_v15  ;;  %2093 = vmatpush.msrb.mxu2 %v3482_v3  ;;  %v744_v6 = vsub.f32 2.0, %v736_v22  ;;  %v753_v34 = vmul.f32 %v2639_v17, %v745_v31 }
 0x257   : > { %2073 = vmatmul.f32.vlgmr.msrb.gmra.mxu1 %v3518_v32  ;;  %2222 = vmatpush.msrb.mxu3 %v2123_v46 }
 0x258   : > { %2173 = vmatpush.msra.mxu1 %v3523_v40  ;;  %2095 = vmatpush.msrb.mxu2 %v3489_v0  ;;  %v752_v8 = vmul.f32 %v2641_v21, %v744_v6 }
 0x259   : > { %2226 = vmatpush.msrb.mxu3 %v2129_v16  ;;  %v704_v12 = vpop.xlane.xlu0 %703 }
 0x25a   : > { %2253 = vmatpush.msrb.mxu1 %v3482_v3  ;;  %2097 = vmatpush.msrb.mxu2 %v3494_v29  ;;  %v2265_v11 = vmul.f32 %v3538_v53, %v752_v8  ;;  %v722_v13 = vadd.f32 1.1920929e-07, %v704_v12 }
 0x25b   : > { %2230 = vmatpush.msrb.mxu3 %v2135_v23 }
 0x25c   : > { %2255 = vmatpush.msrb.mxu1 %v3489_v0  ;;  %v1076_v5 = vpop.f32.mrf.mxu2  ;;  %2146 = vmatmul.f32.vlgmr.msra.gmra.mxu3 %v2100_v50  ;;  %2642 = vrcp.f32 %v722_v13 }
 0x25d   : > { %v1077_v59 = vadd.f32 %v1076_v5, %v1050_v43  ;;  %2015 = vmatmul.f32.vlgmr.msra.gmra.mxu2 %v1914_v39  ;;  %2234 = vmatpush.msrb.mxu3 %v2141_v52 }
 0x25e   : > { %2099 = vmatpush.msrb.mxu2 %v3511_v14  ;;  %2257 = vmatpush.msrb.mxu1 %v3494_v29 }
 0x25f   : > { %v1110_v54 = vadd.f32 %v1109_v44, %v1077_v59  ;;  %2176 = vmatmul.f32.vlgmr.msra.gmra.mxu1 %v2101_v1 }
 0x260   : > { %2193 = vmatpush.msra.mxu2 %v3482_v3  ;;  %2259 = vmatpush.msrb.mxu1 %v3511_v14 }
 0x261   : > { %v1135_v9 = vadd.f32 %v1134_v55, %v1110_v54 }
 0x262   : > { %2195 = vmatpush.msra.mxu2 %v3489_v0  ;;  %v2643_v30 = vpop.eup %2642 }
 0x263   : > { %v2266_v28 = vmul.f32 %v1135_v9, %v753_v34 }
 0x264   : > { %2197 = vmatpush.msra.mxu2 %v3494_v29  ;;  %2236 = vmatmul.f32.vlgmr.msrb.gmra.mxu3 %v2100_v50  ;;  %v738_v29 = vmul.f32 %v2643_v30, %v722_v13 }
 0x265   : > { %v2281_v56 = vrot.slane %v2266_v28, 7  ;;  %2105 = vmatmul.f32.vlgmr.msrb.gmra.mxu2 %v2104_v10 }
 0x266   : > { %2199 = vmatpush.msra.mxu2 %v3511_v14  ;;  %v746_v37 = vsub.f32 2.0, %v738_v29 }
 0x267   : > { %v2283_v3 = vsel %vm2282_vm2, %v2281_v56, %v2265_v11  ;;  %2261 = vmatmul.f32.vlgmr.msrb.gmra.mxu1 %v2100_v50  ;;  %v1237_v46 = vpop.f32.mrf.mxu1 }
 0x268   : > { %v754_v14 = vmul.f32 %v2643_v30, %v746_v37 }
 0x26b   : > { %v1207_v0 = vpop.f32.mrf.mxu3 }
 0x26d   : > { %2203 = vmatmul.f32.vlgmr.msra.gmra.mxu2 %v2102_v2 }
 0x26f   : > { %v1322_v41 = vpop.f32.mrf.mxu1 }
 0x273   : > { %v1166_v4 = vpop.f32.mrf.mxu2  ;;  %v1297_v40 = vpop.f32.mrf.mxu3 }
 0x274   : > { %v1208_v32 = vadd.f32 %v1207_v0, %v1166_v4  ;;  %v707_v23 = vpop.xlane.xlu1 %706 }
 0x275   : > { %v723_v53 = vadd.f32 1.1920929e-07, %v707_v23 }
 0x276   : > { %v1238_v35 = vadd.f32 %v1237_v46, %v1208_v32 }
 0x277   : > { %2644 = vrcp.f32 %v723_v53 }
 0x27b   : > { %v1264_v16 = vpop.f32.mrf.mxu2 }
 0x27c   : > { %v1265_v48 = vadd.f32 %v1264_v16, %v1238_v35 }
 0x27d   : > { %v2645_v60 = vpop.eup %2644 }
 0x27e   : > { %v1298_v26 = vadd.f32 %v1297_v40, %v1265_v48  ;;  %v739_v19 = vmul.f32 %v2645_v60, %v723_v53 }
 0x280   : > { %v1323_v45 = vadd.f32 %v1322_v41, %v1298_v26  ;;  %v747_v20 = vsub.f32 2.0, %v739_v19 }
 0x281   : > { %v1425_v52 = vpop.f32.mrf.mxu1 }
 0x282   : > { %v2267_v49 = vmul.f32 %v1323_v45, %v754_v14  ;;  %v755_v38 = vmul.f32 %v2645_v60, %v747_v20 }
 0x283   : > { %v716_v7 = vpop.xlane.xlu0 %715 }
 0x284   : > { %v2284_v25 = vrot.slane %v2267_v49, 6  ;;  %v726_v10 = vadd.f32 1.1920929e-07, %v716_v7 }
 0x285   : > { %v1395_v47 = vpop.f32.mrf.mxu3 }
 0x286   : > { %v2286_v57 = vsel %vm2285_vm3, %v2284_v25, %v2283_v3 }
 0x289   : > { %v1510_v51 = vpop.f32.mrf.mxu1 }
 0x28d   : > { %v1354_v18 = vpop.f32.mrf.mxu2  ;;  %v1485_v24 = vpop.f32.mrf.mxu3 }
 0x28e   : > { %v1396_v39 = vadd.f32 %v1395_v47, %v1354_v18 }
 0x290   : > { %v1426_v33 = vadd.f32 %v1425_v52, %v1396_v39 }
 0x295   : > { %v1452_v62 = vpop.f32.mrf.mxu2 }
 0x296   : > { %v1453_v36 = vadd.f32 %v1452_v62, %v1426_v33 }
 0x298   : > { %v1486_v27 = vadd.f32 %v1485_v24, %v1453_v36 }
 0x299   : > { %v710_v6 = vpop.xlane.xlu2 %709 }
 0x29a   : > { %v1511_v50 = vadd.f32 %v1510_v51, %v1486_v27  ;;  %v724_v9 = vadd.f32 1.1920929e-07, %v710_v6 }
 0x29c   : > { %v2268_v58 = vmul.f32 %v1511_v50, %v755_v38  ;;  %2646 = vrcp.f32 %v724_v9 }
 0x29e   : > { %v2287_v17 = vrot.slane %v2268_v58, 5 }
 0x2a0   : > { %v3598_v61 = vsel %vm2288_vm4, %v2287_v17, %v2286_v57 }
 0x2a2   : > { %v2647_v32 = vpop.eup %2646 }
 0x2a3   : > { %v740_v41 = vmul.f32 %v2647_v32, %v724_v9 }
 0x2a5   : > { %v748_v47 = vsub.f32 2.0, %v740_v41 }
 0x2a7   : > { %v1613_v15 = vpop.f32.mrf.mxu1  ;;  %v756_v20 = vmul.f32 %v2647_v32, %v748_v47 }
 0x2a9   : > { %v719_v11 = vpop.xlane.xlu1 %718 }
 0x2aa   : > { %v727_v13 = vadd.f32 1.1920929e-07, %v719_v11 }
 0x2ab   : > { %v1583_v63 = vpop.f32.mrf.mxu3 }
 0x2ad   : > { %v713_v34 = vpop.xlane.xlu2 %712 }
 0x2ae   : > { %v725_v28 = vadd.f32 1.1920929e-07, %v713_v34 }
 0x2af   : > { %v1698_v1 = vpop.f32.mrf.mxu1 }
 0x2b0   : > { %2648 = vrcp.f32 %v725_v28 }
 0x2b1   : > { %2650 = vrcp.f32 %v726_v10 }
 0x2b2   : > { %2652 = vrcp.f32 %v727_v13 }
 0x2b3   : > { %v1542_v21 = vpop.f32.mrf.mxu2  ;;  %v1673_v42 = vpop.f32.mrf.mxu3 }
 0x2b4   : > { %v1584_v56 = vadd.f32 %v1583_v63, %v1542_v21 }
 0x2b6   : > { %v1614_v46 = vadd.f32 %v1613_v15, %v1584_v56  ;;  %v2649_v35 = vpop.eup %2648 }
 0x2b7   : > { %v2651_v40 = vpop.eup %2650  ;;  %v741_v14 = vmul.f32 %v2649_v35, %v725_v28 }
 0x2b8   : > { %v742_v45 = vmul.f32 %v2651_v40, %v726_v10  ;;  %v2653_v57 = vpop.eup %2652 }
 0x2b9   : > { %v749_v39 = vsub.f32 2.0, %v741_v14  ;;  %v743_v62 = vmul.f32 %v2653_v57, %v727_v13 }
 0x2ba   : > { %v750_v19 = vsub.f32 2.0, %v742_v45 }
 0x2bb   : > { %v1640_v43 = vpop.f32.mrf.mxu2  ;;  %v1801_v31 = vpop.f32.mrf.mxu1  ;;  %v757_v51 = vmul.f32 %v2649_v35, %v749_v39  ;;  %v751_v17 = vsub.f32 2.0, %v743_v62 }
 0x2bc   : > { %v1641_v37 = vadd.f32 %v1640_v43, %v1614_v46  ;;  %v758_v38 = vmul.f32 %v2651_v40, %v750_v19 }
 0x2be   : > { %v1674_v49 = vadd.f32 %v1673_v42, %v1641_v37 }
 0x2bf   : > { %v1771_v22 = vpop.f32.mrf.mxu3 }
 0x2c0   : > { %v1699_v33 = vadd.f32 %v1698_v1, %v1674_v49  ;;  %v759_v1 = vmul.f32 %v2653_v57, %v751_v17 }
 0x2c2   : > { %v2269_v50 = vmul.f32 %v1699_v33, %v756_v20 }
 0x2c3   : > { %v1886_v44 = vpop.f32.mrf.mxu1 }
 0x2c7   : > { %v1730_v2 = vpop.f32.mrf.mxu2  ;;  %v1861_v5 = vpop.f32.mrf.mxu3 }
 0x2c8   : > { %v1772_v12 = vadd.f32 %v1771_v22, %v1730_v2  ;;  %v2290_v22 = vrot.slane %v2269_v50, 4 }
 0x2ca   : > { %v1802_v29 = vadd.f32 %v1801_v31, %v1772_v12 }
 0x2cb   : > { %v1989_v54 = vpop.f32.mrf.mxu1 }
 0x2cf   : > { %v1828_v59 = vpop.f32.mrf.mxu2  ;;  %v1959_v55 = vpop.f32.mrf.mxu3 }
 0x2d0   : > { %v1829_v48 = vadd.f32 %v1828_v59, %v1802_v29  ;;  %v2292_v59 = vsel %vm2291_vm5, %v2290_v22, %v3598_v61 }
 0x2d2   : > { %v1862_v53 = vadd.f32 %v1861_v5, %v1829_v48 }
 0x2d4   : > { %v2074_v0 = vpop.f32.mrf.mxu1  ;;  %v1887_v24 = vadd.f32 %v1886_v44, %v1862_v53 }
 0x2d6   : > { %v2270_v63 = vmul.f32 %v1887_v24, %v757_v51 }
 0x2d7   : > { %v2049_v3 = vpop.f32.mrf.mxu3 }
 0x2d8   : > { %v1918_v8 = vpop.f32.mrf.mxu2  ;;  %v2293_v2 = vrot.slane %v2270_v63, 3 }
 0x2d9   : > { %v1960_v30 = vadd.f32 %v1959_v55, %v1918_v8 }
 0x2da   : > { %v2295_v55 = vsel %vm2294_vm6, %v2293_v2, %v2292_v59 }
 0x2db   : > { %v1990_v16 = vadd.f32 %v1989_v54, %v1960_v30 }
 0x2dc   : > { %v2177_v18 = vpop.f32.mrf.mxu1 }
 0x2df   : > { %v2147_v23 = vpop.f32.mrf.mxu3 }
 0x2e0   : > { %v2016_v4 = vpop.f32.mrf.mxu2 }
 0x2e1   : > { %v2017_v26 = vadd.f32 %v2016_v4, %v1990_v16 }
 0x2e3   : > { %v2050_v52 = vadd.f32 %v2049_v3, %v2017_v26 }
 0x2e4   : > { %v2262_v31 = vpop.f32.mrf.mxu1 }
 0x2e5   : > { %v2075_v36 = vadd.f32 %v2074_v0, %v2050_v52 }
 0x2e7   : > { %v2271_v21 = vmul.f32 %v2075_v36, %v758_v38  ;;  %v2237_v42 = vpop.f32.mrf.mxu3 }
 0x2e8   : > { %v2106_v25 = vpop.f32.mrf.mxu2 }
 0x2e9   : > { %v2148_v60 = vadd.f32 %v2147_v23, %v2106_v25  ;;  %v2296_v44 = vrot.slane %v2271_v21, 2 }
 0x2eb   : > { %v2178_v27 = vadd.f32 %v2177_v18, %v2148_v60  ;;  %v2298_v34 = vsel %vm2297_vm7, %v2296_v44, %v2295_v55 }
 0x2f0   : > { %v2204_v58 = vpop.f32.mrf.mxu2 }
 0x2f1   : > { %v2205_v15 = vadd.f32 %v2204_v58, %v2178_v27 }
 0x2f3   : > { %v2238_v43 = vadd.f32 %v2237_v42, %v2205_v15 }
 0x2f5   : > { %v2263_v5 = vadd.f32 %v2262_v31, %v2238_v43 }
 0x2f7   : > { %v2272_v6 = vmul.f32 %v2263_v5, %v759_v1 }
 0x2f9   : > { %v2299_v54 = vrot.slane %v2272_v6, 1 }
 0x2fb   : > { %v2301_v7 = vsel %vm2300_vm8, %v2299_v54, %v2298_v34 }
 0x2fc   : > { %2303 = vst [vmem:[%s302_s22] sm:$0xff] %v2301_v7 }
 0x2fd   : > { %2779 = shalt.err (!%p2776_p9)
}
 0x2fe   : > { %2499 = dma.vmem_to_hbm [thread:$0]  (%p2933_p7), %s2318_s30, 128, %s2320_s11, %s2305_s7  }
 0x2ff PF: > { %s2331_s10 = sand.u32 1, %s2814_s18   ;;  %p3659_p12 = scmp.ge.s32.totalorder %s2826_s21, 2 }
 0x300   : > { %s2332_s23 = scalar_lea.sflag [#allocation4], %s2331_s10 }
 0x301   : > { %p2513_p13 = pnand %p3659_p12, %p2898_p6 }
 0x303   : > { %p2514_p0 = pneg %p2513_p13 }
 0x305   : > { %2809 = dma.done.wait (%p2514_p0), %s2332_s23, 128  }
 0x306   : > { %2811 = vsyncadd (%p2514_p0), %s2332_s23, 4294967168  ;;  %s3660_s21 = sld [smem:[#allocation14_spill]]  ;;  %s3663_s18 = smov %s2818_s19 }
 0x307   : > { %s3661_s24 = sld [smem:[#allocation13_spill]] }
 0x308   : > { %s3662_s20 = sld [smem:[#allocation15_spill]] }
 0x30c   : > { %p21_p3 = scmp.ge.s32.totalorder %s3660_s21, 4  }
 0x30d   : > { %s3664_s19 = smov %s3661_s24 }
 0x30e   :  { %23 = sbr.rel (!%p21_p3) target bundleno = 9 (0x9), region = 102 }
 0x313   :  { %2338 = vsyncpa [#allocation3], 1 }
 0x314   :  { %2340 = vsyncpa [#allocation3 + $0x1], 1 }
 0x315   :  { %2341 = vsyncpa [#allocation6], 1 }
 0x316   :  { %2343 = vsyncpa [#allocation6 + $0x1], 1 }
 0x317   :  { %2344 = vsyncpa [#allocation4], 1 }
 0x318   :  { %2346 = vsyncpa [#allocation4 + $0x1], 1 }

// kernel: tpu_custom_call.1
= control target key start
LH: loop header
LB: loop body
LE: loop exit
PB: predicated region body
PF: predicated region fallthrough
CT: control target
= control target key end

     0   :  { %s3634_s0 = inlined_call_operand.hbm [shape: f32[16,32,128], index: 0, kind: input, shape index: {}]   ;;  %s3635_s1 = inlined_call_operand.hbm [shape: f32[16,1,32], index: 1, kind: input, shape index: {}]   ;;  %s3636_s2 = inlined_call_operand.hbm [shape: f32[128,128], index: 2, kind: input, shape index: {}]   ;;  %s3637_s3 = inlined_call_operand.vmem [shape: f32[1,128], index: 3, kind: input, shape index: {}]   ;;  %s3638_s4 = inlined_call_operand.vmem [shape: f32[1,1,128], index: 4, kind: input, shape index: {}]   ;;  %s3639_s5 = inlined_call_operand.hbm [shape: f32[16,1,128], index: 5, kind: output, shape index: {}]  }
   0x1   :  { %3645 = sst [smem:[#allocation16_spill]] %s3636_s2 }
   0x2   :  { %10 = vsyncpa [#allocation3], 0 }
   0x3   :  { %12 = vsyncpa [#allocation3 + $0x1], 0 }
   0x4   :  { %13 = vsyncpa [#allocation6], 0 }
   0x5   :  { %15 = vsyncpa [#allocation6 + $0x1], 0 }
   0x6   :  { %16 = vsyncpa [#allocation4], 0 }
   0x7   :  { %18 = vsyncpa [#allocation4 + $0x1], 0  ;;  %s2847_s18 = smov 0   ;;  %s2849_s19 = smov 0  }
   0x8   :  { %s2851_s20 = smov 0   ;;  %s2853_s21 = smov 0  }
   0x9 LB: > { %3646 = sst [smem:[#allocation13_spill]] %s2804_s20  ;;  %s2868_s22 = sadd.s32 4294967295, %s2808_s21   ;;  %s2808_s21 = sphi %s2853_s21, %s3658_s21   ;;  %s2804_s20 = sphi %s2851_s20, %s3660_s20   ;;  %s2800_s19 = sphi %s2849_s19, %s3662_s19   ;;  %s2796_s18 = sphi %s2847_s18, %s3661_s18  }
   0xa   : > { %s2402_s23 = sadd.s32 4294967294, %s2808_s21   ;;  %p44_p0 = scmp.ne.s32.totalorder %s2800_s19, %s2796_s18 }
   0xb   : > { %p45_p1 = scmp.eq.s32.totalorder %s2868_s22, 0  ;;  %p157_p2 = scmp.eq.s32.totalorder %s2868_s22, 1 }
   0xc   : > { %p163_p3 = scmp.eq.s32.totalorder %s2402_s23, 1  ;;  %p2403_p5 = scmp.ge.s32.totalorder %s2808_s21, 1 }
   0xd   : > { %p2877_p4 = por %p45_p1, %p44_p0  ;;  %p170_p7 = scmp.lt.s32.totalorder %s2808_s21, 3 }
   0xe   : > { %p2882_p6 = por %p163_p3, %p44_p0  ;;  %s3649_s2 = sld [smem:[#allocation16_spill]] }
   0xf   : > { %p2890_p8 = pnand %p2403_p5, %p170_p7  ;;  %s2810_s30 = smov [#allocation7]  }
  0x10   : > { %s183_s6 = sshll.u32 %s2810_s30, 4  ;;  %s2900_s7 = sadd.s32 1, %s2808_s21   ;;  %s184_s6 = int_to_ptr.vmem [resolvable:$true] %s183_s6 }
  0x11   : > { %p2481_p9 = pneg %p2890_p8  ;;  %3651 = sst [smem:[#allocation14_spill]] %s2900_s7 }
  0x12   : > { %s3640_s8 = smov 128   ;;  %s3641_s9 = smov 8  }
  0x13   : > { %p2482_p10 = pnand %p2481_p9, %p45_p1  ;;  %s28_s10 = ssub.s32 %s2808_s21, %s2900_s7 }
  0x14   : > { %s181_s28 = sshll.u32 %s3649_s2, 4  ;;  %s31_s11 = sadd.s32 1, %s2804_s20  ;;  %s182_s28 = int_to_ptr.hbm [resolvable:$true] %s181_s28 }
  0x15   : > { %2484 = dma.hbm_to_vmem [thread:$0]  (!%p2482_p10), %s182_s28, 2048, %s184_s6, [#allocation6], %s3640_s8, %s3640_s8, %s3641_s9  }
  0x16   : > { %p29_p12 = scmp.eq.s32.totalorder %s28_s10, 0  ;;  %p38_p13 = scmp.ne.s32.totalorder %s2804_s20, %s2800_s19 }
  0x17   : > { %p39_p0 = scmp.eq.s32.totalorder %s2808_s21, 0  ;;  %p2497_p3 = scmp.lt.s32.totalorder %s2808_s21, 2 }
  0x18   : > { %s2913_s12 = scalar_select %p29_p12, %s2804_s20, %s31_s11  }
  0x19   : > { %p40_p5 = por %p39_p0, %p38_p13  ;;  %p2917_p7 = por %p157_p2, %p38_p13 }
  0x1a   : > { %3652 = sst [smem:[#allocation15_spill]] %s2913_s12  ;;  %s2922_s14 = sand.u32 1, %s2804_s20  }
  0x1b   : > { %s2422_s15 = sshll.u32 %s2808_s21, 8  ;;  %s2406_s16 = sshll.u32 %s2922_s14, 8 }
  0x1c   : > { %s213_s26 = scalar_lea.hbm %s3634_s0, %s2422_s15  ;;  %s207_s28 = scalar_lea.vmem [#allocation2], %s2406_s16 }
  0x1d   : > { %s214_s27 = sshll.u32 %s213_s26, 4  ;;  %s216_s30 = sshll.u32 %s207_s28, 4  ;;  %s215_s27 = int_to_ptr.hbm [resolvable:$true] %s214_s27  ;;  %s217_s30 = int_to_ptr.vmem [resolvable:$true] %s216_s30 }
  0x1e   : > { %p2931_p2 = pnand %p2497_p3, %p40_p5  ;;  %s226_s10 = sand.u32 1, %s2808_s21  }
  0x1f   : > { %s2410_s11 = sshll.u32 %s2922_s14, 3  ;;  %s204_s8 = scalar_lea.sflag [#allocation3], %s2922_s14 }
  0x20   : > { %s2674_s9 = sshra.s32 %s215_s27, 4  ;;  %p2678_p10 = pneg %p2931_p2  ;;  %s2675_s9 = int_to_ptr.hbm [resolvable:$true] %s2674_s9 }
  0x21   : > { %s2676_s2 = scalar_lea.hbm %s2675_s9, 256  ;;  %s2681_s17 = scalar_lea.hbm %s3634_s0, 512 }
  0x22   : > { %p2677_p9 = scmp.ne.s32.totalorder %s2675_s9, %s2676_s2  ;;  %p2682_p0 = scmp.lt.s32.totalorder %s2675_s9, %s3634_s0 }
  0x23   : > { %p2683_p3 = scmp.lt.s32.totalorder %s2681_s17, %s2676_s2 }
  0x24   : > { %p2679_p12 = pnand %p2678_p10, %p2677_p9 }
  0x25   : > { %p2684_p5 = por %p2683_p3, %p2682_p0 }
  0x26   : > { %p2680_p13 = pneg %p2679_p12 }
  0x28   : > { %p2685_p11 = pnand %p2684_p5, %p2680_p13 }
  0x2a   : > { %2688 = shalt.err (!%p2685_p11)
}
  0x2b   : > { %s3655_s14 = smov 8   ;;  %s3656_s28 = smov 128  }
  0x2c   : > { %2488 = dma.hbm_to_vmem [thread:$0]  (!%p2931_p2), %s215_s27, 4096, %s217_s30, %s204_s8, %s3656_s28, %s3656_s28, %s3655_s14  }
  0x2d   : > { %s2411_s12 = sshll.u32 %s2808_s21, 3  ;;  %s230_s20 = scalar_lea.vmem [#allocation5], %s2410_s11 }
  0x2e   : > { %s237_s15 = sshll.u32 %s230_s20, 4  ;;  %s234_s23 = scalar_lea.hbm %s3635_s1, %s2411_s12  ;;  %s238_s15 = int_to_ptr.vmem [resolvable:$true] %s237_s15 }
  0x2f   : > { %s235_s2 = sshll.u32 %s234_s23, 4  ;;  %s227_s9 = scalar_lea.sflag [#allocation6], %s226_s10  ;;  %s236_s2 = int_to_ptr.hbm [resolvable:$true] %s235_s2 }
  0x30   : > { %s2704_s17 = sshra.s32 %s236_s2, 4  ;;  %s2711_s20 = scalar_lea.hbm %s3635_s1, 16  ;;  %s2705_s17 = int_to_ptr.hbm [resolvable:$true] %s2704_s17 }
  0x31   : > { %s2706_s26 = scalar_lea.hbm %s2705_s17, 8  ;;  %p2712_p13 = scmp.lt.s32.totalorder %s2705_s17, %s3635_s1 }
  0x32   : > { %p2707_p11 = scmp.ne.s32.totalorder %s2705_s17, %s2706_s26  ;;  %p2713_p0 = scmp.lt.s32.totalorder %s2711_s20, %s2706_s26 }
  0x34   : > { %p2709_p9 = pnand %p2707_p11, %p2678_p10  ;;  %p2714_p3 = por %p2713_p0, %p2712_p13 }
  0x36   : > { %p2710_p12 = pneg %p2709_p9 }
  0x38   : > { %p2715_p5 = pnand %p2714_p3, %p2710_p12 }
  0x3a   : > { %2718 = shalt.err (!%p2715_p5)
}
  0x3b   : > { %s2813_s7 = smov 16   ;;  %s2814_s12 = smov 1  }
  0x3c   : > { %2491 = dma.hbm_to_vmem [thread:$0]  (!%p2931_p2), %s236_s2, 128, %s238_s15, %s227_s9, %s2813_s7, %s2813_s7, %s2814_s12  }
  0x3d   : > { %249 = sbr.rel (%p2890_p8) target bundleno = 765 (0x2fd), region = 40  ;;  %s2972_s10 = sand.u32 (!%p2890_p8), 1, %s2800_s19  }
  0x3e   : > { %s2413_s14 = sshll.u32 (!%p2890_p8), %s2972_s10, 8  ;;  %s252_s28 = scalar_lea.sflag (!%p2890_p8), [#allocation3], %s2972_s10 }
  0x3f   : > { %s2976_s16 = scalar_lea.vmem (!%p2890_p8), [#allocation2], %s2413_s14 }
  0x42   : > { %2779 = dma.done.wait (%p2877_p4), %s252_s28, 4096  }
  0x43   : > { %2781 = vsyncadd (%p2877_p4), %s252_s28, 4294963200  ;;  %s261_s29 = sand.u32 1, %s2868_s22   ;;  %s2414_s6 = sshll.u32 %s2972_s10, 3 }
  0x44   : > { %s262_s15 = scalar_lea.sflag [#allocation6], %s261_s29  ;;  %s2986_s23 = scalar_lea.vmem [#allocation5], %s2414_s6 }
  0x45   : > { %2783 = dma.done.wait (%p2877_p4), %s262_s15, 128  }
  0x46   : > { %2785 = vsyncadd (%p2877_p4), %s262_s15, 4294967168 }
  0x47   : > { %2787 = dma.done.wait (%p45_p1), [#allocation6], 2048  }
  0x48   : > { %2789 = vsyncadd (%p45_p1), [#allocation6], 4294965248  ;;  %v353_v0 = vld [vmem:[#allocation7 + $0x78] sm:$0xff]  ;;  %v352_v1 = vld [vmem:[#allocation7 + $0x70] sm:$0xff]  ;;  %vm761_vm0 = vcmask 261120   ;;  %vm696_vm1 = vcmask 253952  }
  0x49   : > { %358 = vmatpush.msra.mxu0 %v353_v0  ;;  %2425 = vmatpush.msra.mxu3 %v353_v0  ;;  %v351_v2 = vld [vmem:[#allocation7 + $0x68] sm:$0xff]  ;;  %v350_v3 = vld [vmem:[#allocation7 + $0x60] sm:$0xff]  ;;  %v349_v4 = vld [vmem:[#allocation7 + $0x58] sm:$0xff]  ;;  %s3550_s26 = scalar_lea.vmem [#allocation8], %s2414_s6  ;;  %s2418_s8 = sshll.u32 %s2868_s22, 3 }
  0x4a   : > { %2424 = vmatpush.msra.mxu2 %v353_v0  ;;  %2423 = vmatpush.msra.mxu1 %v353_v0  ;;  %v348_v5 = vld [vmem:[#allocation7 + $0x50] sm:$0xff]  ;;  %v347_v6 = vld [vmem:[#allocation7 + $0x48] sm:$0xff]  ;;  %v346_v7 = vld [vmem:[#allocation7 + $0x40] sm:$0xff]  ;;  %s2293_s30 = scalar_lea.hbm %s3639_s5, %s2418_s8  ;;  %s2294_s11 = sshll.u32 %s3550_s26, 4  ;;  %s2295_s11 = int_to_ptr.vmem [resolvable:$true] %s2294_s11 }
  0x4b   : > { %359 = vmatpush.msra.mxu0 %v352_v1  ;;  %2428 = vmatpush.msra.mxu3 %v352_v1  ;;  %v345_v8 = vld [vmem:[#allocation7 + $0x38] sm:$0xff]  ;;  %v344_v9 = vld [vmem:[#allocation7 + $0x30] sm:$0xff]  ;;  %v343_v10 = vld [vmem:[#allocation7 + $0x28] sm:$0xff]  ;;  %s2296_s7 = sshll.u32 %s2293_s30, 4  ;;  %s2283_s22 = scalar_lea.sflag [#allocation4], %s2972_s10  ;;  %s2297_s7 = int_to_ptr.hbm [resolvable:$true] %s2296_s7 }
  0x4c   : > { %2427 = vmatpush.msra.mxu2 %v352_v1  ;;  %2426 = vmatpush.msra.mxu1 %v352_v1  ;;  %v342_v11 = vld [vmem:[#allocation7 + $0x20] sm:$0xff]  ;;  %v341_v12 = vld [vmem:[#allocation7 + $0x18] sm:$0xff]  ;;  %v340_v13 = vld [vmem:[#allocation7 + $0x10] sm:$0xff]  ;;  %s2748_s12 = sshra.s32 %s2297_s7, 4  ;;  %s2754_s29 = scalar_lea.hbm %s3639_s5, 16  ;;  %s2749_s12 = int_to_ptr.hbm [resolvable:$true] %s2748_s12 }
  0x4d   : > { %360 = vmatpush.msra.mxu0 %v351_v2  ;;  %2431 = vmatpush.msra.mxu3 %v351_v2  ;;  %v339_v14 = vld [vmem:[#allocation7 + $0x8] sm:$0xff]  ;;  %v338_v15 = vld [vmem:[#allocation7] sm:$0xff]  ;;  %v2997_v16 = vld [vmem:[%s2976_s16] sm:$0xff]  ;;  %s2750_s14 = scalar_lea.hbm %s2749_s12, 8  ;;  %p2755_p2 = scmp.lt.s32.totalorder %s2749_s12, %s3639_s5 }
  0x4e   : > { %2430 = vmatpush.msra.mxu2 %v351_v2  ;;  %2429 = vmatpush.msra.mxu1 %v351_v2  ;;  %v3001_v17 = vld [vmem:[%s2976_s16 + $0x8] sm:$0xff]  ;;  %v3005_v18 = vld [vmem:[%s2976_s16 + $0x10] sm:$0xff]  ;;  %v3009_v19 = vld [vmem:[%s2976_s16 + $0x18] sm:$0xff]  ;;  %p2751_p1 = scmp.ne.s32.totalorder %s2749_s12, %s2750_s14  ;;  %p2756_p10 = scmp.lt.s32.totalorder %s2754_s29, %s2750_s14 }
  0x4f   : > { %361 = vmatpush.msra.mxu0 %v350_v3  ;;  %2434 = vmatpush.msra.mxu3 %v350_v3  ;;  %v3013_v20 = vld [vmem:[%s2976_s16 + $0x20] sm:$0xff]  ;;  %v3017_v21 = vld [vmem:[%s2976_s16 + $0x28] sm:$0xff]  ;;  %v3021_v22 = vld [vmem:[%s2976_s16 + $0x30] sm:$0xff] }
  0x50   : > { %2433 = vmatpush.msra.mxu2 %v350_v3  ;;  %2432 = vmatpush.msra.mxu1 %v350_v3  ;;  %v3025_v23 = vld [vmem:[%s2976_s16 + $0x38] sm:$0xff]  ;;  %v3029_v24 = vld [vmem:[%s2976_s16 + $0x40] sm:$0xff]  ;;  %v3033_v25 = vld [vmem:[%s2976_s16 + $0x48] sm:$0xff]  ;;  %p2752_p4 = pnand %p2751_p1, %p2917_p7  ;;  %p2757_p11 = por %p2756_p10, %p2755_p2 }
  0x51   : > { %362 = vmatpush.msra.mxu0 %v349_v4  ;;  %2437 = vmatpush.msra.mxu3 %v349_v4  ;;  %v3037_v26 = vld [vmem:[%s2976_s16 + $0x50] sm:$0xff]  ;;  %v3041_v27 = vld [vmem:[%s2976_s16 + $0x58] sm:$0xff]  ;;  %v3045_v28 = vld [vmem:[%s2976_s16 + $0x60] sm:$0xff] }
  0x52   : > { %2436 = vmatpush.msra.mxu2 %v349_v4  ;;  %2435 = vmatpush.msra.mxu1 %v349_v4  ;;  %v3049_v29 = vld [vmem:[%s2976_s16 + $0x68] sm:$0xff]  ;;  %v334_v30 = vld [vmem:[%s2976_s16 + $0xe0] sm:$0xff]  ;;  %v3054_v31 = vld [vmem:[%s2976_s16 + $0x70] sm:$0xff]  ;;  %p2753_p8 = pneg %p2752_p4 }
  0x53   : > { %363 = vmatpush.msra.mxu0 %v348_v5  ;;  %2440 = vmatpush.msra.mxu3 %v348_v5  ;;  %v335_v32 = vld [vmem:[%s2976_s16 + $0xe8] sm:$0xff]  ;;  %v3060_v34 = vld [vmem:[%s2976_s16 + $0x78] sm:$0xff]  ;;  %v336_v35 = vld [vmem:[%s2976_s16 + $0xf0] sm:$0xff] }
  0x54   : > { %2439 = vmatpush.msra.mxu2 %v348_v5  ;;  %2438 = vmatpush.msra.mxu1 %v348_v5  ;;  %v331_v33 = vld [vmem:[%s2976_s16 + $0xc8] sm:$0xff]  ;;  %v332_v36 = vld [vmem:[%s2976_s16 + $0xd0] sm:$0xff]  ;;  %v3066_v38 = vld [vmem:[%s2976_s16 + $0x80] sm:$0xff]  ;;  %p2758_p9 = pnand %p2757_p11, %p2753_p8 }
  0x55   : > { %364 = vmatpush.msra.mxu0 %v347_v6  ;;  %2443 = vmatpush.msra.mxu3 %v347_v6  ;;  %v337_v39 = vld [vmem:[%s2976_s16 + $0xf8] sm:$0xff]  ;;  %v3072_v42 = vld [vmem:[%s2976_s16 + $0x88] sm:$0xff]  ;;  %v3080_v45 = vld [vmem:[%s2976_s16 + $0x90] sm:$0xff] }
  0x56   : > { %2442 = vmatpush.msra.mxu2 %v347_v6  ;;  %2441 = vmatpush.msra.mxu1 %v347_v6  ;;  %v333_v40 = vld [vmem:[%s2976_s16 + $0xd8] sm:$0xff]  ;;  %v3086_v46 = vld [vmem:[%s3637_s3] ss:$0 sm:$0xff]  ;;  %v3102_v59 = vld [vmem:[%s2976_s16 + $0xa8] sm:$0xff] }
  0x57   : > { %365 = vmatpush.msra.mxu0 %v346_v7  ;;  %2446 = vmatpush.msra.mxu3 %v346_v7  ;;  %v3076_v43 = vld [vmem:[%s2976_s16 + $0xb8] sm:$0xff]  ;;  %v3096_v53 = vld [vmem:[%s2976_s16 + $0xa0] sm:$0xff]  ;;  %v3111_v0 = vld [vmem:[%s2976_s16 + $0xb0] sm:$0xff] }
  0x58   : > { %2445 = vmatpush.msra.mxu2 %v346_v7  ;;  %2444 = vmatpush.msra.mxu1 %v346_v7  ;;  %v3089_v48 = vld [vmem:[%s2976_s16 + $0x98] sm:$0xff]  ;;  %v330_v57 = vld [vmem:[%s2976_s16 + $0xc0] sm:$0xff] }
  0x59   : > { %366 = vmatpush.msra.mxu0 %v345_v8  ;;  %2449 = vmatpush.msra.mxu3 %v345_v8  ;;  %v3108_v62 = vld [vmem:[%s3638_s4] sm:$0x1] }
  0x5a   : > { %2448 = vmatpush.msra.mxu2 %v345_v8  ;;  %2447 = vmatpush.msra.mxu1 %v345_v8 }
  0x5b   : > { %367 = vmatpush.msra.mxu0 %v344_v9  ;;  %2452 = vmatpush.msra.mxu3 %v344_v9 }
  0x5c   : > { %2451 = vmatpush.msra.mxu2 %v344_v9  ;;  %2450 = vmatpush.msra.mxu1 %v344_v9 }
  0x5d   : > { %368 = vmatpush.msra.mxu0 %v343_v10  ;;  %2455 = vmatpush.msra.mxu3 %v343_v10 }
  0x5e   : > { %2454 = vmatpush.msra.mxu2 %v343_v10  ;;  %2453 = vmatpush.msra.mxu1 %v343_v10 }
  0x5f   : > { %369 = vmatpush.msra.mxu0 %v342_v11  ;;  %2458 = vmatpush.msra.mxu3 %v342_v11 }
  0x60   : > { %2457 = vmatpush.msra.mxu2 %v342_v11  ;;  %2456 = vmatpush.msra.mxu1 %v342_v11 }
  0x61   : > { %370 = vmatpush.msra.mxu0 %v341_v12  ;;  %2461 = vmatpush.msra.mxu3 %v341_v12 }
  0x62   : > { %2460 = vmatpush.msra.mxu2 %v341_v12  ;;  %2459 = vmatpush.msra.mxu1 %v341_v12 }
  0x63   : > { %371 = vmatpush.msra.mxu0 %v340_v13  ;;  %2464 = vmatpush.msra.mxu3 %v340_v13 }
  0x64   : > { %2463 = vmatpush.msra.mxu2 %v340_v13  ;;  %2462 = vmatpush.msra.mxu1 %v340_v13 }
  0x65   : > { %372 = vmatpush.msra.mxu0 %v339_v14  ;;  %2467 = vmatpush.msra.mxu3 %v339_v14 }
  0x66   : > { %2466 = vmatpush.msra.mxu2 %v339_v14  ;;  %2465 = vmatpush.msra.mxu1 %v339_v14 }
  0x67   : > { %373 = vmatpush.msra.mxu0 %v338_v15  ;;  %2470 = vmatpush.msra.mxu3 %v338_v15 }
  0x68   : > { %374 = vmatmul.f32.vlgmr.msra.gmra.mxu0 %v2997_v16  ;;  %2469 = vmatpush.msra.mxu2 %v338_v15 }
  0x69   : > { %2468 = vmatpush.msra.mxu1 %v338_v15  ;;  %458 = vmatmul.f32.vlgmr.msra.gmra.mxu3 %v334_v30 }
  0x6a   : > { %449 = vmatmul.f32.vlgmr.msra.gmra.mxu2 %v331_v33  ;;  %443 = vmatmul.f32.vlgmr.msra.gmra.mxu1 %v3076_v43 }
  0x70   : > { %377 = vmatmul.f32.gmra.mxu0 %v3001_v17 }
  0x71   : > { %461 = vmatmul.f32.gmra.mxu3 %v335_v32 }
  0x72   : > { %452 = vmatmul.f32.gmra.mxu2 %v332_v36  ;;  %446 = vmatmul.f32.gmra.mxu1 %v330_v57 }
  0x78   : > { %380 = vmatmul.f32.gmra.mxu0 %v3005_v18 }
  0x79   : > { %464 = vmatmul.f32.gmra.mxu3 %v336_v35 }
  0x7a   : > { %455 = vmatmul.f32.gmra.mxu2 %v333_v40 }
  0x80   : > { %383 = vmatmul.f32.gmra.mxu0 %v3009_v19 }
  0x81   : > { %467 = vmatmul.f32.gmra.mxu3 %v337_v39 }
  0x88   : > { %386 = vmatmul.f32.gmra.mxu0 %v3013_v20 }
  0x90   : > { %389 = vmatmul.f32.gmra.mxu0 %v3017_v21 }
  0x98   : > { %392 = vmatmul.f32.gmra.mxu0 %v3021_v22 }
  0xa0   : > { %395 = vmatmul.f32.gmra.mxu0 %v3025_v23 }
  0xa8   : > { %398 = vmatmul.f32.gmra.mxu0 %v3029_v24 }
  0xb0   : > { %401 = vmatmul.f32.gmra.mxu0 %v3033_v25 }
  0xb8   : > { %404 = vmatmul.f32.gmra.mxu0 %v3037_v26 }
  0xc0   : > { %407 = vmatmul.f32.gmra.mxu0 %v3041_v27 }
  0xc8   : > { %410 = vmatmul.f32.gmra.mxu0 %v3045_v28 }
  0xd0   : > { %413 = vmatmul.f32.gmra.mxu0 %v3049_v29 }
  0xd8   : > { %416 = vmatmul.f32.gmra.mxu0 %v3054_v31 }
  0xe0   : > { %419 = vmatmul.f32.gmra.mxu0 %v3060_v34 }
  0xe5   : > { %v375_v37 = vpop.f32.mrf.mxu0 }
  0xe6   : > { %v376_v55 = vadd.f32 %v3086_v46, %v375_v37 }
  0xe8   : > { %422 = vmatmul.f32.gmra.mxu0 %v3066_v38 }
  0xed   : > { %v378_v41 = vpop.f32.mrf.mxu0 }
  0xee   : > { %v379_v51 = vadd.f32 %v3086_v46, %v378_v41 }
  0xf0   : > { %425 = vmatmul.f32.gmra.mxu0 %v3072_v42 }
  0xf5   : > { %v381_v44 = vpop.f32.mrf.mxu0 }
  0xf6   : > { %v382_v50 = vadd.f32 %v3086_v46, %v381_v44 }
  0xf8   : > { %428 = vmatmul.f32.gmra.mxu0 %v3080_v45 }
  0xfd   : > { %v384_v47 = vpop.f32.mrf.mxu0 }
  0xfe   : > { %v385_v49 = vadd.f32 %v3086_v46, %v384_v47 }
 0x100   : > { %2540 = vtanh.f32 %v385_v49  ;;  %431 = vmatmul.f32.gmra.mxu0 %v3089_v48  ;;  %v450_v49 = vpop.f32.mrf.mxu2 }
 0x101   : > { %2542 = vtanh.f32 %v382_v50 }
 0x102   : > { %2544 = vtanh.f32 %v379_v51 }
 0x103   : > { %2546 = vtanh.f32 %v376_v55  ;;  %v3128_v55 = vpop.f32.mrf.mxu3 }
 0x105   : > { %v387_v52 = vpop.f32.mrf.mxu0 }
 0x106   : > { %v2541_v54 = vpop.eup %2540  ;;  %v388_v7 = vadd.f32 %v3086_v46, %v387_v52 }
 0x107   : > { %516 = vmatpush.xpose.msrb.mxu1 %v2541_v54  ;;  %v2543_v56 = vpop.eup %2542 }
 0x108   : > { %434 = vmatmul.f32.gmra.mxu0 %v3096_v53  ;;  %v2545_v60 = vpop.eup %2544 }
 0x109   : > { %v2547_v61 = vpop.eup %2546 }
 0x10b   : > { %517 = vmatpush.xpose.msrb.mxu1 %v2543_v56  ;;  %v453_v56 = vpop.f32.mrf.mxu2 }
 0x10d   : > { %v390_v58 = vpop.f32.mrf.mxu0 }
 0x10e   : > { %v391_v4 = vadd.f32 %v3086_v46, %v390_v58 }
 0x10f   : > { %518 = vmatpush.xpose.msrb.mxu1 %v2545_v60 }
 0x110   : > { %437 = vmatmul.f32.gmra.mxu0 %v3102_v59 }
 0x113   : > { %519 = vmatpush.xpose.msrb.mxu1 %v2547_v61 }
 0x115   : > { %v393_v63 = vpop.f32.mrf.mxu0 }
 0x116   : > { %520 = vmatmul.f32.vlgmr.msrb.gmra.mxu1 %v3108_v62  ;;  %v394_v3 = vadd.f32 %v3086_v46, %v393_v63  ;;  %v454_v63 = vadd.f32 %v3086_v46, %v453_v56 }
 0x118   : > { %440 = vmatmul.f32.gmra.mxu0 %v3111_v0 }
 0x11d   : > { %v396_v1 = vpop.f32.mrf.mxu0 }
 0x11e   : > { %v397_v2 = vadd.f32 %v3086_v46, %v396_v1  ;;  %v456_v1 = vpop.f32.mrf.mxu2 }
 0x120   : > { %2548 = vtanh.f32 %v397_v2  ;;  %v462_v2 = vpop.f32.mrf.mxu3 }
 0x121   : > { %2550 = vtanh.f32 %v394_v3  ;;  %v457_v3 = vadd.f32 %v3086_v46, %v456_v1 }
 0x122   : > { %2552 = vtanh.f32 %v391_v4  ;;  %v444_v4 = vpop.f32.mrf.mxu1 }
 0x123   : > { %2554 = vtanh.f32 %v388_v7  ;;  %v451_v7 = vadd.f32 %v3086_v46, %v450_v49 }
 0x125   : > { %v399_v5 = vpop.f32.mrf.mxu0 }
 0x126   : > { %v2549_v6 = vpop.eup %2548  ;;  %v400_v35 = vadd.f32 %v3086_v46, %v399_v5 }
 0x127   : > { %536 = vmatpush.xpose.msrb.mxu2 %v2549_v6  ;;  %v2551_v8 = vpop.eup %2550  ;;  %v445_v6 = vadd.f32 %v3086_v46, %v444_v4  ;;  %v3161_v4 = vand.u32 4294901760, %v2997_v16 }
 0x128   : > { %v2553_v10 = vpop.eup %2552 }
 0x129   : > { %v2555_v11 = vpop.eup %2554 }
 0x12b   : > { %537 = vmatpush.xpose.msrb.mxu2 %v2551_v8 }
 0x12d   : > { %v402_v9 = vpop.f32.mrf.mxu0 }
 0x12e   : > { %v403_v30 = vadd.f32 %v3086_v46, %v402_v9 }
 0x12f   : > { %538 = vmatpush.xpose.msrb.mxu2 %v2553_v10 }
 0x133   : > { %539 = vmatpush.xpose.msrb.mxu2 %v2555_v11 }
 0x135   : > { %v405_v12 = vpop.f32.mrf.mxu0 }
 0x136   : > { %540 = vmatmul.f32.vlgmr.msrb.gmra.mxu2 %v3108_v62  ;;  %v406_v15 = vadd.f32 %v3086_v46, %v405_v12  ;;  %v465_v12 = vpop.f32.mrf.mxu3 }
 0x13d   : > { %v408_v13 = vpop.f32.mrf.mxu0 }
 0x13e   : > { %v409_v14 = vadd.f32 %v3086_v46, %v408_v13 }
 0x140   : > { %2556 = vtanh.f32 %v409_v14 }
 0x141   : > { %2558 = vtanh.f32 %v406_v15 }
 0x142   : > { %2560 = vtanh.f32 %v403_v30 }
 0x143   : > { %2562 = vtanh.f32 %v400_v35 }
 0x145   : > { %v411_v32 = vpop.f32.mrf.mxu0 }
 0x146   : > { %v2557_v33 = vpop.eup %2556  ;;  %v412_v57 = vadd.f32 %v3086_v46, %v411_v32 }
 0x147   : > { %556 = vmatpush.xpose.msrb.mxu3 %v2557_v33  ;;  %v2559_v36 = vpop.eup %2558  ;;  %v468_v33 = vpop.f32.mrf.mxu3 }
 0x148   : > { %v2561_v39 = vpop.eup %2560 }
 0x149   : > { %v2563_v40 = vpop.eup %2562 }
 0x14b   : > { %557 = vmatpush.xpose.msrb.mxu3 %v2559_v36 }
 0x14d   : > { %v414_v37 = vpop.f32.mrf.mxu0 }
 0x14e   : > { %v415_v51 = vadd.f32 %v3086_v46, %v414_v37 }
 0x14f   : > { %558 = vmatpush.xpose.msrb.mxu3 %v2561_v39  ;;  %v469_v39 = vadd.f32 %v3086_v46, %v468_v33  ;;  %v969_v33 = vand.u32 4294901760, %v3017_v21 }
 0x153   : > { %559 = vmatpush.xpose.msrb.mxu3 %v2563_v40  ;;  %v447_v40 = vpop.f32.mrf.mxu1 }
 0x155   : > { %v417_v41 = vpop.f32.mrf.mxu0 }
 0x156   : > { %560 = vmatmul.f32.vlgmr.msrb.gmra.mxu3 %v3108_v62  ;;  %v418_v50 = vadd.f32 %v3086_v46, %v417_v41 }
 0x15d   : > { %v420_v44 = vpop.f32.mrf.mxu0 }
 0x15e   : > { %v421_v47 = vadd.f32 %v3086_v46, %v420_v44  ;;  %v448_v44 = vadd.f32 %v3086_v46, %v447_v40 }
 0x160   : > { %2564 = vtanh.f32 %v421_v47  ;;  %v466_v47 = vadd.f32 %v3086_v46, %v465_v12 }
 0x161   : > { %2566 = vtanh.f32 %v418_v50 }
 0x162   : > { %2568 = vtanh.f32 %v415_v51  ;;  %v3144_v51 = vand.u32 4294901760, %v3009_v19 }
 0x163   : > { %2570 = vtanh.f32 %v412_v57  ;;  %v3148_v57 = vand.u32 4294901760, %v3005_v18 }
 0x164   : > { %2572 = vtanh.f32 %v457_v3 }
 0x165   : > { %v423_v52 = vpop.f32.mrf.mxu0  ;;  %2574 = vtanh.f32 %v454_v63  ;;  %v460_v63 = vadd.f32 %v3086_v46, %v3128_v55 }
 0x166   : > { %v2565_v54 = vpop.eup %2564  ;;  %2576 = vtanh.f32 %v445_v6  ;;  %v424_v37 = vadd.f32 %v3086_v46, %v423_v52  ;;  %v463_v52 = vadd.f32 %v3086_v46, %v462_v2 }
 0x167   : > { %576 = vmatpush.xpose.msra.mxu1 %v2565_v54  ;;  %v2567_v58 = vpop.eup %2566  ;;  %2578 = vtanh.f32 %v451_v7 }
 0x168   : > { %v2569_v61 = vpop.eup %2568 }
 0x169   : > { %v2571_v5 = vpop.eup %2570 }
 0x16a   : > { %v2573_v9 = vpop.eup %2572 }
 0x16b   : > { %577 = vmatpush.xpose.msra.mxu1 %v2567_v58  ;;  %v2575_v10 = vpop.eup %2574 }
 0x16c   : > { %v2577_v11 = vpop.eup %2576 }
 0x16d   : > { %v426_v60 = vpop.f32.mrf.mxu0  ;;  %616 = vmatpush.xpose.msra.mxu3 %v2577_v11  ;;  %v2579_v14 = vpop.eup %2578 }
 0x16e   : > { %v427_v32 = vadd.f32 %v3086_v46, %v426_v60  ;;  %v3152_v60 = vsub.f32 %v3009_v19, %v3144_v51  ;;  %v3165_v19 = vsub.f32 %v3005_v18, %v3148_v57 }
 0x16f   : > { %578 = vmatpush.xpose.msra.mxu1 %v2569_v61  ;;  %v3155_v61 = vand.u32 4294901760, %v3001_v17 }
 0x171   : > { %v3172_v6 = vsub.f32 %v3001_v17, %v3155_v61 }
 0x173   : > { %579 = vmatpush.xpose.msra.mxu1 %v2571_v5 }
 0x175   : > { %v429_v8 = vpop.f32.mrf.mxu0 }
 0x176   : > { %580 = vmatmul.f32.vlgmr.msra.gmra.mxu1 %v3108_v62  ;;  %v430_v30 = vadd.f32 %v3086_v46, %v429_v8  ;;  %v3178_v8 = vsub.f32 %v2997_v16, %v3161_v4  ;;  %v965_v16 = vand.u32 4294901760, %v3025_v23 }
 0x177   : > { %636 = vmatpush.xpose.msrb.mxu1 %v2573_v9  ;;  %v680_v9 = vld [vmem:[%s2986_s23] sm:$0x1] }
 0x17b   : > { %637 = vmatpush.xpose.msrb.mxu1 %v2575_v10 }
 0x17d   : > { %v432_v13 = vpop.f32.mrf.mxu0 }
 0x17e   : > { %v433_v15 = vadd.f32 %v3086_v46, %v432_v13 }
 0x17f   : > { %638 = vmatpush.xpose.msrb.mxu1 %v2579_v14 }
 0x180   : > { %2580 = vtanh.f32 %v433_v15  ;;  %v967_v15 = vand.u32 4294901760, %v3021_v22 }
 0x181   : > { %2582 = vtanh.f32 %v430_v30 }
 0x182   : > { %2584 = vtanh.f32 %v427_v32 }
 0x183   : > { %2586 = vtanh.f32 %v424_v37  ;;  %v3206_v37 = vsub.f32 %v3021_v22, %v967_v15 }
 0x184   : > { %2588 = vtanh.f32 %v469_v39 }
 0x185   : > { %v435_v35 = vpop.f32.mrf.mxu0  ;;  %2590 = vtanh.f32 %v448_v44  ;;  %v814_v44 = vand.u32 4294901760, %v3165_v19 }
 0x186   : > { %v2581_v36 = vpop.eup %2580  ;;  %2592 = vtanh.f32 %v466_v47  ;;  %v436_v17 = vadd.f32 %v3086_v46, %v435_v35  ;;  %v3200_v35 = vsub.f32 %v3025_v23, %v965_v16  ;;  %v971_v23 = vand.u32 4294901760, %v3013_v20 }
 0x187   : > { %596 = vmatpush.xpose.msra.mxu2 %v2581_v36  ;;  %v2583_v41 = vpop.eup %2582  ;;  %2594 = vtanh.f32 %v463_v52  ;;  %v808_v36 = vand.u32 4294901760, %v3152_v60  ;;  %v820_v47 = vand.u32 4294901760, %v3172_v6 }
 0x188   : > { %v2585_v50 = vpop.eup %2584 }
 0x189   : > { %v2587_v54 = vpop.eup %2586  ;;  %v809_v22 = vsub.f32 %v3152_v60, %v808_v36 }
 0x18a   : > { %v2589_v56 = vpop.eup %2588 }
 0x18b   : > { %597 = vmatpush.xpose.msra.mxu2 %v2583_v41  ;;  %v2591_v58 = vpop.eup %2590  ;;  %v3212_v41 = vsub.f32 %v3017_v21, %v969_v33  ;;  %v810_v52 = vand.u32 4294901760, %v809_v22 }
 0x18c   : > { %639 = vmatpush.xpose.msrb.mxu1 %v2591_v58  ;;  %v2593_v3 = vpop.eup %2592 }
 0x18d   : > { %v438_v49 = vpop.f32.mrf.mxu0  ;;  %v2595_v18 = vpop.eup %2594 }
 0x18e   : > { %v439_v7 = vadd.f32 %v3086_v46, %v438_v49  ;;  %v3223_v49 = vsub.f32 %v3013_v20, %v971_v23 }
 0x18f   : > { %598 = vmatpush.xpose.msra.mxu2 %v2585_v50  ;;  %640 = vmatmul.f32.vlgmr.msrb.gmra.mxu1 %v3108_v62  ;;  %v815_v50 = vsub.f32 %v3165_v19, %v814_v44 }
 0x190   : > { %849 = vmatpush.msra.mxu1 %v3152_v60  ;;  %v996_v60 = vand.u32 4294901760, %v3200_v35 }
 0x191   : > { %v816_v20 = vand.u32 4294901760, %v815_v50 }
 0x192   : > { %852 = vmatpush.msra.mxu1 %v3165_v19 }
 0x193   : > { %599 = vmatpush.xpose.msra.mxu2 %v2587_v54  ;;  %v521_v1 = vpop.f32.mrf.mxu1  ;;  %v821_v54 = vsub.f32 %v3172_v6, %v820_v47 }
 0x194   : > { %v664_v2 = vmul.f32 1.442695, %v521_v1  ;;  %855 = vmatpush.msra.mxu1 %v3172_v6  ;;  %v997_v1 = vsub.f32 %v3200_v35, %v996_v60 }
 0x195   : > { %v441_v5 = vpop.f32.mrf.mxu0 }
 0x196   : > { %v442_v55 = vadd.f32 %v3086_v46, %v441_v5  ;;  %600 = vmatmul.f32.vlgmr.msra.gmra.mxu2 %v3108_v62  ;;  %2596 = vpow2.f32 %v664_v2  ;;  %858 = vmatpush.msra.mxu1 %v3178_v8  ;;  %v1002_v2 = vand.u32 4294901760, %v3206_v37  ;;  %v998_v19 = vand.u32 4294901760, %v997_v1 }
 0x197   : > { %656 = vmatpush.xpose.msrb.mxu2 %v2589_v56  ;;  %2598 = vtanh.f32 %v460_v63 }
 0x198   : > { %2600 = vtanh.f32 %v442_v55  ;;  %938 = vmatpush.msrb.mxu1 %v3144_v51  ;;  %v1003_v5 = vsub.f32 %v3206_v37, %v1002_v2  ;;  %v1008_v55 = vand.u32 4294901760, %v3212_v41 }
 0x199   : > { %2602 = vtanh.f32 %v439_v7 }
 0x19a   : > { %940 = vmatpush.msrb.mxu1 %v3148_v57  ;;  %2604 = vtanh.f32 %v436_v17  ;;  %v1004_v6 = vand.u32 4294901760, %v1003_v5  ;;  %v1009_v7 = vsub.f32 %v3212_v41, %v1008_v55  ;;  %v3254_v17 = vand.u32 4294901760, %v3033_v25 }
 0x19b   : > { %657 = vmatpush.xpose.msrb.mxu2 %v2593_v3  ;;  %v3239_v3 = vand.u32 4294901760, %v3041_v27 }
 0x19c   : > { %v2597_v10 = vpop.eup %2596  ;;  %942 = vmatpush.msrb.mxu1 %v3155_v61 }
 0x19d   : > { %v2599_v11 = vpop.eup %2598  ;;  %v3185_v12 = vmul.f32 %v2597_v10, %v680_v9  ;;  %v1183_v9 = vsub.f32 %v3041_v27, %v3239_v3  ;;  %v681_v10 = vld [vmem:[%s2986_s23 + $0x1] sm:$0x1]  ;;  %v1195_v27 = vsub.f32 %v3033_v25, %v3254_v17 }
 0x19e   : > { %v2601_v13 = vpop.eup %2600  ;;  %944 = vmatpush.msrb.mxu1 %v3161_v4 }
 0x19f   : > { %658 = vmatpush.xpose.msrb.mxu2 %v2595_v18  ;;  %617 = vmatpush.xpose.msra.mxu3 %v2601_v13  ;;  %v763_v14 = vsel %vm761_vm0, %v3185_v12, 0  ;;  %v2603_v30 = vpop.eup %2602  ;;  %v1014_v18 = vand.u32 4294901760, %v3223_v49 }
 0x1a0   : > { %v3191_v46 = vand.u32 4294901760, %v763_v14  ;;  %v2605_v39 = vpop.eup %2604 }
 0x1a2   : > { %v786_v32 = vsub.f32 %v763_v14, %v3191_v46 }
 0x1a3   : > { %659 = vmatpush.xpose.msrb.mxu2 %v2599_v11  ;;  %618 = vmatpush.xpose.msra.mxu3 %v2603_v30  ;;  %v1010_v11 = vand.u32 4294901760, %v1009_v7  ;;  %v1184_v30 = vand.u32 4294901760, %v1183_v9 }
 0x1a4   : > { %861 = vmatmul.f32.vlgmr.msra.gmra.mxu1 %v786_v32  ;;  %v787_v40 = vand.u32 4294901760, %v786_v32 }
 0x1a5   : > { %1037 = vmatpush.msra.mxu1 %v3200_v35  ;;  %v3264_v35 = vand.u32 4294901760, %v3029_v24 }
 0x1a6   : > { %660 = vmatmul.f32.vlgmr.msrb.gmra.mxu2 %v3108_v62  ;;  %v788_v21 = vsub.f32 %v786_v32, %v787_v40 }
 0x1a7   : > { %878 = vmatpush.msra.mxu2 %v3144_v51  ;;  %619 = vmatpush.xpose.msra.mxu3 %v2605_v39  ;;  %v1196_v39 = vand.u32 4294901760, %v1195_v27  ;;  %v1201_v25 = vsub.f32 %v3029_v24, %v3264_v35 }
 0x1a8   : > { %1040 = vmatpush.msra.mxu1 %v3206_v37 }
 0x1a9   : > { %880 = vmatpush.msra.mxu2 %v3148_v57  ;;  %v1197_v22 = vsub.f32 %v1195_v27, %v1196_v39 }
 0x1aa   : > { %1043 = vmatpush.msra.mxu1 %v3212_v41  ;;  %620 = vmatmul.f32.vlgmr.msra.gmra.mxu3 %v3108_v62  ;;  %v789_v62 = vand.u32 4294901760, %v788_v21 }
 0x1ab   : > { %882 = vmatpush.msra.mxu2 %v3155_v61  ;;  %778 = vmatpush.msrb.mxu3 %v3144_v51  ;;  %v826_v51 = vand.u32 4294901760, %v3178_v8  ;;  %v1198_v50 = vand.u32 4294901760, %v1197_v22 }
 0x1ac   : > { %946 = vmatmul.f32.vlgmr.msrb.gmra.mxu1 %v3191_v46 }
 0x1ad   : > { %884 = vmatpush.msra.mxu2 %v3161_v4  ;;  %780 = vmatpush.msrb.mxu3 %v3148_v57  ;;  %v827_v56 = vsub.f32 %v3178_v8, %v826_v51  ;;  %v822_v57 = vand.u32 4294901760, %v821_v54  ;;  %v3248_v8 = vand.u32 4294901760, %v3037_v26  ;;  %v3278_v54 = vand.u32 4294901760, %v3054_v31 }
 0x1ae   : > { %888 = vmatmul.f32.vlgmr.msra.gmra.mxu2 %v787_v40  ;;  %1046 = vmatpush.msra.mxu1 %v3223_v49 }
 0x1af   : > { %966 = vmatpush.msrb.mxu2 %v965_v16  ;;  %782 = vmatpush.msrb.mxu3 %v3155_v61  ;;  %v828_v58 = vand.u32 4294901760, %v827_v56  ;;  %v3285_v56 = vand.u32 4294901760, %v3049_v29 }
 0x1b0   : > { %1126 = vmatpush.msrb.mxu1 %v965_v16 }
 0x1b1   : > { %968 = vmatpush.msrb.mxu2 %v967_v15  ;;  %784 = vmatpush.msrb.mxu3 %v3161_v4  ;;  %v697_v4 = vsel %vm696_vm1, %v3185_v12, 0.0  ;;  %v1015_v12 = vsub.f32 %v3223_v49, %v1014_v18  ;;  %v1202_v49 = vand.u32 4294901760, %v1201_v25 }
 0x1b2   : > { %1128 = vmatpush.msrb.mxu1 %v967_v15  ;;  %790 = vmatmul.f32.vlgmr.msrb.gmra.mxu3 %v789_v62 }
 0x1b3   : > { %970 = vmatpush.msrb.mxu2 %v969_v33  ;;  %811 = vmatpush.msra.mxu3 %v810_v52  ;;  %v1016_v14 = vand.u32 4294901760, %v1015_v12  ;;  %v3272_v52 = vand.u32 4294901760, %v3060_v34 }
 0x1b4   : > { %1130 = vmatpush.msrb.mxu1 %v969_v33  ;;  %698 = vadd.xlane.f32.xlu0 %v697_v4 }
 0x1b5   : > { %972 = vmatpush.msrb.mxu2 %v971_v23  ;;  %817 = vmatpush.msra.mxu3 %v816_v20  ;;  %v1371_v62 = vsub.f32 %v3060_v34, %v3272_v52  ;;  %v1377_v34 = vsub.f32 %v3054_v31, %v3278_v54 }
 0x1b6   : > { %1132 = vmatpush.msrb.mxu1 %v971_v23 }
 0x1b7   : > { %1066 = vmatpush.msra.mxu2 %v965_v16  ;;  %823 = vmatpush.msra.mxu3 %v822_v57 }
 0x1b9   : > { %1068 = vmatpush.msra.mxu2 %v967_v15  ;;  %829 = vmatpush.msra.mxu3 %v828_v58  ;;  %v541_v61 = vpop.f32.mrf.mxu2  ;;  %v1189_v15 = vsub.f32 %v3037_v26, %v3248_v8  ;;  %v3290_v58 = vand.u32 4294901760, %v3045_v28 }
 0x1ba   : > { %v666_v63 = vmul.f32 1.442695, %v541_v61  ;;  %831 = vmatmul.f32.vlgmr.msra.gmra.mxu3 %v3191_v46  ;;  %v1383_v61 = vsub.f32 %v3049_v29, %v3285_v56 }
 0x1bb   : > { %1070 = vmatpush.msra.mxu2 %v969_v33  ;;  %907 = vmatpush.msrb.mxu3 %v808_v36  ;;  %v1190_v37 = vand.u32 4294901760, %v1189_v15  ;;  %v1389_v1 = vsub.f32 %v3045_v28, %v3290_v58 }
 0x1bc   : > { %2606 = vpow2.f32 %v666_v63  ;;  %v682_v63 = vld [vmem:[%s2986_s23 + $0x2] sm:$0x1] }
 0x1bd   : > { %1072 = vmatpush.msra.mxu2 %v971_v23  ;;  %911 = vmatpush.msrb.mxu3 %v814_v44  ;;  %v1191_v23 = vsub.f32 %v1189_v15, %v1190_v37  ;;  %v1390_v29 = vand.u32 4294901760, %v1389_v1 }
 0x1bf   : > { %915 = vmatpush.msrb.mxu3 %v820_v47  ;;  %v1192_v21 = vand.u32 4294901760, %v1191_v23 }
 0x1c1   : > { %919 = vmatpush.msrb.mxu3 %v826_v51  ;;  %v1203_v51 = vsub.f32 %v1201_v25, %v1202_v49 }
 0x1c2   : > { %v2607_v13 = vpop.eup %2606  ;;  %921 = vmatmul.f32.vlgmr.msrb.gmra.mxu3 %v3191_v46  ;;  %v1185_v46 = vsub.f32 %v1183_v9, %v1184_v30 }
 0x1c3   : > { %999 = vmatpush.msra.mxu3 %v998_v19  ;;  %v689_v16 = vmul.f32 %v2607_v13, %v681_v10  ;;  %v1204_v24 = vand.u32 4294901760, %v1203_v51  ;;  %v1384_v19 = vand.u32 4294901760, %v1383_v61  ;;  %v1391_v10 = vsub.f32 %v1389_v1, %v1390_v29 }
 0x1c4   : > { %v1186_v44 = vand.u32 4294901760, %v1185_v46 }
 0x1c5   : > { %1005 = vmatpush.msra.mxu3 %v1004_v6  ;;  %v951_v32 = vsel %vm761_vm0, %v689_v16, 0  ;;  %v700_v40 = vsel %vm696_vm1, %v689_v16, 0.0  ;;  %v1392_v12 = vand.u32 4294901760, %v1391_v10 }
 0x1c6   : > { %v973_v33 = vand.u32 4294901760, %v951_v32  ;;  %701 = vadd.xlane.f32.xlu0 %v700_v40 }
 0x1c7   : > { %1011 = vmatpush.msra.mxu3 %v1010_v11 }
 0x1c8   : > { %v974_v36 = vsub.f32 %v951_v32, %v973_v33 }
 0x1c9   : > { %1017 = vmatpush.msra.mxu3 %v1016_v14  ;;  %v3305_v14 = vand.u32 4294901760, %v3089_v48 }
 0x1ca   : > { %v975_v26 = vand.u32 4294901760, %v974_v36  ;;  %1019 = vmatmul.f32.vlgmr.msra.gmra.mxu3 %v973_v33  ;;  %1049 = vmatmul.f32.vlgmr.msra.gmra.mxu1 %v974_v36 }
 0x1cb   : > { %1095 = vmatpush.msrb.mxu3 %v996_v60  ;;  %1225 = vmatpush.msra.mxu1 %v1183_v9  ;;  %v1372_v60 = vand.u32 4294901760, %v1371_v62  ;;  %v1559_v32 = vsub.f32 %v3089_v48, %v3305_v14  ;;  %v3326_v48 = vand.u32 4294901760, %v3066_v38 }
 0x1cc   : > { %v976_v41 = vsub.f32 %v974_v36, %v975_v26 }
 0x1cd   : > { %1099 = vmatpush.msrb.mxu3 %v1002_v2  ;;  %1228 = vmatpush.msra.mxu1 %v1189_v15  ;;  %v1373_v2 = vsub.f32 %v1371_v62, %v1372_v60  ;;  %v1560_v46 = vand.u32 4294901760, %v1559_v32 }
 0x1ce   : > { %v977_v47 = vand.u32 4294901760, %v976_v41 }
 0x1cf   : > { %1103 = vmatpush.msrb.mxu3 %v1008_v55  ;;  %1231 = vmatpush.msra.mxu1 %v1195_v27  ;;  %v1374_v55 = vand.u32 4294901760, %v1373_v2  ;;  %v3313_v27 = vand.u32 4294901760, %v3080_v45  ;;  %v3365_v2 = vand.u32 4294901760, %v3096_v53 }
 0x1d0   : > { %978 = vmatmul.f32.vlgmr.msrb.gmra.mxu2 %v977_v47 }
 0x1d1   : > { %1107 = vmatpush.msrb.mxu3 %v1014_v18  ;;  %1154 = vmatpush.msrb.mxu2 %v3239_v3  ;;  %v1385_v18 = vsub.f32 %v1383_v61, %v1384_v19  ;;  %v1565_v36 = vsub.f32 %v3080_v45, %v3313_v27 }
 0x1d2   : > { %1109 = vmatmul.f32.vlgmr.msrb.gmra.mxu3 %v973_v33  ;;  %1134 = vmatmul.f32.vlgmr.msrb.gmra.mxu1 %v973_v33 }
 0x1d3   : > { %1187 = vmatpush.msra.mxu3 %v1186_v44  ;;  %1156 = vmatpush.msrb.mxu2 %v3248_v8  ;;  %v1386_v28 = vand.u32 4294901760, %v1385_v18  ;;  %v1566_v40 = vand.u32 4294901760, %v1565_v36 }
 0x1d4   : > { %1234 = vmatpush.msra.mxu1 %v1201_v25 }
 0x1d5   : > { %1193 = vmatpush.msra.mxu3 %v1192_v21  ;;  %1158 = vmatpush.msrb.mxu2 %v3254_v17  ;;  %v1567_v23 = vsub.f32 %v1565_v36, %v1566_v40 }
 0x1d6   : > { %1314 = vmatpush.msrb.mxu1 %v3239_v3 }
 0x1d7   : > { %1199 = vmatpush.msra.mxu3 %v1198_v50  ;;  %1160 = vmatpush.msrb.mxu2 %v3264_v35 }
 0x1d8   : > { %1076 = vmatmul.f32.vlgmr.msra.gmra.mxu2 %v975_v26  ;;  %1316 = vmatpush.msrb.mxu1 %v3248_v8  ;;  %v1577_v26 = vsub.f32 %v3066_v38, %v3326_v48 }
 0x1d9   : > { %1205 = vmatpush.msra.mxu3 %v1204_v24  ;;  %v561_v20 = vpop.f32.mrf.mxu3  ;;  %1254 = vmatpush.msra.mxu2 %v3239_v3  ;;  %v1378_v3 = vand.u32 4294901760, %v1377_v34 }
 0x1da   : > { %v668_v57 = vmul.f32 1.442695, %v561_v20  ;;  %1318 = vmatpush.msrb.mxu1 %v3254_v17  ;;  %v1578_v50 = vand.u32 4294901760, %v1577_v26 }
 0x1db   : > { %1283 = vmatpush.msrb.mxu3 %v1184_v30  ;;  %1256 = vmatpush.msra.mxu2 %v3248_v8  ;;  %v1379_v5 = vsub.f32 %v1377_v34, %v1378_v3  ;;  %v3310_v30 = vand.u32 4294901760, %v3072_v42 }
 0x1dc   : > { %2608 = vpow2.f32 %v668_v57  ;;  %1320 = vmatpush.msrb.mxu1 %v3264_v35  ;;  %v1579_v24 = vsub.f32 %v1577_v26, %v1578_v50 }
 0x1dd   : > { %1287 = vmatpush.msrb.mxu3 %v1190_v37  ;;  %1258 = vmatpush.msra.mxu2 %v3254_v17  ;;  %v1380_v9 = vand.u32 4294901760, %v1379_v5  ;;  %v683_v37 = vld [vmem:[%s2986_s23 + $0x3] sm:$0x1]  ;;  %v3379_v5 = vsub.f32 %v3096_v53, %v3365_v2 }
 0x1df   : > { %1291 = vmatpush.msrb.mxu3 %v1196_v39  ;;  %1260 = vmatpush.msra.mxu2 %v3264_v35  ;;  %v1571_v35 = vsub.f32 %v3072_v42, %v3310_v30  ;;  %v1561_v42 = vsub.f32 %v1559_v32, %v1560_v46 }
 0x1e1   : > { %1295 = vmatpush.msrb.mxu3 %v1202_v49  ;;  %v1572_v45 = vand.u32 4294901760, %v1571_v35  ;;  %v1562_v22 = vand.u32 4294901760, %v1561_v42  ;;  %v1568_v49 = vand.u32 4294901760, %v1567_v23  ;;  %v687_v23 = vld [vmem:[%s2986_s23 + $0x7] sm:$0x1] }
 0x1e2   : > { %v2609_v4 = vpop.eup %2608 }
 0x1e3   : > { %v690_v31 = vmul.f32 %v2609_v4, %v682_v63  ;;  %v1573_v47 = vsub.f32 %v1571_v35, %v1572_v45 }
 0x1e5   : > { %v1139_v6 = vsel %vm761_vm0, %v690_v31, 0  ;;  %v703_v7 = vsel %vm696_vm1, %v690_v31, 0.0  ;;  %v1574_v38 = vand.u32 4294901760, %v1573_v47  ;;  %v686_v31 = vld [vmem:[%s2986_s23 + $0x6] sm:$0x1] }
 0x1e6   : > { %v1161_v8 = vand.u32 4294901760, %v1139_v6  ;;  %704 = vadd.xlane.f32.xlu1 %v703_v7  ;;  %v684_v7 = vld [vmem:[%s2986_s23 + $0x4] sm:$0x1] }
 0x1e8   : > { %v1162_v17 = vsub.f32 %v1139_v6, %v1161_v8  ;;  %1207 = vmatmul.f32.vlgmr.msra.gmra.mxu3 %v1161_v8 }
 0x1e9   : > { %1375 = vmatpush.msra.mxu3 %v1374_v55 }
 0x1ea   : > { %v1163_v11 = vand.u32 4294901760, %v1162_v17  ;;  %1237 = vmatmul.f32.vlgmr.msra.gmra.mxu1 %v1162_v17 }
 0x1eb   : > { %1381 = vmatpush.msra.mxu3 %v1380_v9  ;;  %1413 = vmatpush.msra.mxu1 %v1371_v62  ;;  %v1766_v9 = vand.u32 4294901760, %v3379_v5 }
 0x1ec   : > { %v1164_v13 = vsub.f32 %v1162_v17, %v1163_v11 }
 0x1ed   : > { %1387 = vmatpush.msra.mxu3 %v1386_v28  ;;  %1416 = vmatpush.msra.mxu1 %v1377_v34  ;;  %v3353_v34 = vand.u32 4294901760, %v3111_v0 }
 0x1ee   : > { %v1165_v16 = vand.u32 4294901760, %v1164_v13 }
 0x1ef   : > { %1393 = vmatpush.msra.mxu3 %v1392_v12  ;;  %1419 = vmatpush.msra.mxu1 %v1383_v61 }
 0x1f0   : > { %1166 = vmatmul.f32.vlgmr.msrb.gmra.mxu2 %v1165_v16  ;;  %1297 = vmatmul.f32.vlgmr.msrb.gmra.mxu3 %v1161_v8 }
 0x1f1   : > { %1342 = vmatpush.msrb.mxu2 %v3272_v52  ;;  %1471 = vmatpush.msrb.mxu3 %v1372_v60  ;;  %v3357_v60 = vand.u32 4294901760, %v3102_v59 }
 0x1f2   : > { %1322 = vmatmul.f32.vlgmr.msrb.gmra.mxu1 %v1161_v8 }
 0x1f3   : > { %v581_v15 = vpop.f32.mrf.mxu1  ;;  %1344 = vmatpush.msrb.mxu2 %v3278_v54  ;;  %1475 = vmatpush.msrb.mxu3 %v1378_v3  ;;  %v3369_v3 = vsub.f32 %v3111_v0, %v3353_v34 }
 0x1f4   : > { %v670_v33 = vmul.f32 1.442695, %v581_v15  ;;  %1422 = vmatpush.msra.mxu1 %v1389_v1 }
 0x1f5   : > { %1346 = vmatpush.msrb.mxu2 %v3285_v56  ;;  %1479 = vmatpush.msrb.mxu3 %v1384_v19  ;;  %v3373_v19 = vsub.f32 %v3102_v59, %v3357_v60  ;;  %v1754_v55 = vand.u32 4294901760, %v3369_v3 }
 0x1f6   : > { %2610 = vpow2.f32 %v670_v33  ;;  %1502 = vmatpush.msrb.mxu1 %v3272_v52 }
 0x1f7   : > { %1348 = vmatpush.msrb.mxu2 %v3290_v58  ;;  %1483 = vmatpush.msrb.mxu3 %v1390_v29  ;;  %v1760_v18 = vand.u32 4294901760, %v3373_v19  ;;  %v1755_v53 = vsub.f32 %v3369_v3, %v1754_v55 }
 0x1f8   : > { %1264 = vmatmul.f32.vlgmr.msra.gmra.mxu2 %v1163_v11  ;;  %1504 = vmatpush.msrb.mxu1 %v3278_v54 }
 0x1f9   : > { %1442 = vmatpush.msra.mxu2 %v3272_v52  ;;  %v1761_v11 = vsub.f32 %v3373_v19, %v1760_v18  ;;  %v1756_v16 = vand.u32 4294901760, %v1755_v53 }
 0x1fa   : > { %1506 = vmatpush.msrb.mxu1 %v3285_v56 }
 0x1fb   : > { %1444 = vmatpush.msra.mxu2 %v3278_v54  ;;  %v1580_v54 = vand.u32 4294901760, %v1579_v24  ;;  %v1762_v33 = vand.u32 4294901760, %v1761_v11 }
 0x1fc   : > { %v2611_v39 = vpop.eup %2610  ;;  %1508 = vmatpush.msrb.mxu1 %v3290_v58 }
 0x1fd   : > { %v691_v25 = vmul.f32 %v2611_v39, %v683_v37  ;;  %1446 = vmatpush.msra.mxu2 %v3285_v56  ;;  %v2638_v39 = vld [vmem:[%s2976_s16 + $0xc8] sm:$0xff] }
 0x1fe   : > { %v3416_v42 = vand.u32 4294901760, %v2638_v39 }
 0x1ff   : > { %v1327_v41 = vsel %vm761_vm0, %v691_v25, 0  ;;  %1448 = vmatpush.msra.mxu2 %v3290_v58  ;;  %v706_v44 = vsel %vm696_vm1, %v691_v25, 0.0  ;;  %v3349_v58 = vand.u32 4294901760, %v3076_v43 }
 0x200   : > { %v1349_v21 = vand.u32 4294901760, %v1327_v41  ;;  %707 = vadd.xlane.f32.xlu1 %v706_v44 }
 0x201   : > { %v3361_v61 = vsub.f32 %v3076_v43, %v3349_v58 }
 0x202   : > { %v1350_v51 = vsub.f32 %v1327_v41, %v1349_v21  ;;  %1395 = vmatmul.f32.vlgmr.msra.gmra.mxu3 %v1349_v21 }
 0x203   : > { %1563 = vmatpush.msra.mxu3 %v1562_v22  ;;  %v1748_v43 = vand.u32 4294901760, %v3361_v61  ;;  %v2639_v22 = vld [vmem:[%s2976_s16 + $0xc0] sm:$0xff] }
 0x204   : > { %v1351_v52 = vand.u32 4294901760, %v1350_v51  ;;  %1425 = vmatmul.f32.vlgmr.msra.gmra.mxu1 %v1350_v51  ;;  %v3427_v47 = vand.u32 4294901760, %v2639_v22 }
 0x205   : > { %1569 = vmatpush.msra.mxu3 %v1568_v49  ;;  %1601 = vmatpush.msra.mxu1 %v1559_v32  ;;  %v1749_v0 = vsub.f32 %v3361_v61, %v1748_v43 }
 0x206   : > { %v1352_v62 = vsub.f32 %v1350_v51, %v1351_v52 }
 0x207   : > { %1575 = vmatpush.msra.mxu3 %v1574_v38  ;;  %1604 = vmatpush.msra.mxu1 %v1565_v36  ;;  %v1750_v28 = vand.u32 4294901760, %v1749_v0  ;;  %v2637_v36 = vld [vmem:[%s2976_s16 + $0xd0] sm:$0xff] }
 0x208   : > { %v1353_v20 = vand.u32 4294901760, %v1352_v62  ;;  %v685_v62 = vld [vmem:[%s2986_s23 + $0x5] sm:$0x1] }
 0x209   : > { %1581 = vmatpush.msra.mxu3 %v1580_v54  ;;  %1607 = vmatpush.msra.mxu1 %v1571_v35 }
 0x20a   : > { %1354 = vmatmul.f32.vlgmr.msrb.gmra.mxu2 %v1353_v20  ;;  %1485 = vmatmul.f32.vlgmr.msrb.gmra.mxu3 %v1349_v21 }
 0x20b   : > { %1530 = vmatpush.msrb.mxu2 %v3305_v14  ;;  %1610 = vmatpush.msra.mxu1 %v1577_v26 }
 0x20c   : > { %1510 = vmatmul.f32.vlgmr.msrb.gmra.mxu1 %v1349_v21  ;;  %1659 = vmatpush.msrb.mxu3 %v1560_v46  ;;  %v641_v56 = vpop.f32.mrf.mxu1  ;;  %v3411_v46 = vand.u32 4294901760, %v2637_v36 }
 0x20d   : > { %1532 = vmatpush.msrb.mxu2 %v3313_v27  ;;  %1690 = vmatpush.msrb.mxu1 %v3305_v14  ;;  %v676_v57 = vmul.f32 1.442695, %v641_v56 }
 0x20e   : > { %1663 = vmatpush.msrb.mxu3 %v1566_v40  ;;  %v3424_v44 = vsub.f32 %v2637_v36, %v3411_v46 }
 0x20f   : > { %1534 = vmatpush.msrb.mxu2 %v3310_v30  ;;  %1692 = vmatpush.msrb.mxu1 %v3313_v27  ;;  %2612 = vpow2.f32 %v676_v57 }
 0x210   : > { %1667 = vmatpush.msrb.mxu3 %v1572_v45  ;;  %v1942_v54 = vand.u32 4294901760, %v3424_v44 }
 0x211   : > { %1536 = vmatpush.msrb.mxu2 %v3326_v48  ;;  %1694 = vmatpush.msrb.mxu1 %v3310_v30 }
 0x212   : > { %1452 = vmatmul.f32.vlgmr.msra.gmra.mxu2 %v1351_v52  ;;  %1671 = vmatpush.msrb.mxu3 %v1578_v50  ;;  %v3433_v50 = vsub.f32 %v2638_v39, %v3416_v42  ;;  %v3443_v52 = vsub.f32 %v2639_v22, %v3427_v47 }
 0x213   : > { %1630 = vmatpush.msra.mxu2 %v3305_v14  ;;  %1696 = vmatpush.msrb.mxu1 %v3326_v48  ;;  %v1767_v14 = vsub.f32 %v3379_v5, %v1766_v9 }
 0x214   : > { %v1948_v56 = vand.u32 4294901760, %v3433_v50 }
 0x215   : > { %1632 = vmatpush.msra.mxu2 %v3313_v27  ;;  %v2613_v4 = vpop.eup %2612  ;;  %v2636_v27 = vld [vmem:[%s2976_s16 + $0xd8] sm:$0xff] }
 0x216   : > { %v3382_v6 = vmul.f32 %v2613_v4, %v686_v31  ;;  %v3406_v32 = vand.u32 4294901760, %v2636_v27  ;;  %v2640_v4 = vld [vmem:[%s2976_s16 + $0xf8] sm:$0xff] }
 0x217   : > { %1634 = vmatpush.msra.mxu2 %v3310_v30 }
 0x218   : > { %v715_v59 = vsel %vm696_vm1, %v3382_v6, 0.0  ;;  %v3419_v40 = vsub.f32 %v2636_v27, %v3406_v32  ;;  %v1891_v11 = vsel %vm761_vm0, %v3382_v6, 0 }
 0x219   : > { %v601_v63 = vpop.f32.mrf.mxu2  ;;  %1636 = vmatpush.msra.mxu2 %v3326_v48  ;;  %716 = vadd.xlane.f32.xlu0 %v715_v59  ;;  %v1768_v48 = vand.u32 4294901760, %v1767_v14  ;;  %v3509_v36 = vand.u32 4294901760, %v1891_v11 }
 0x21a   : > { %v672_v1 = vmul.f32 1.442695, %v601_v63  ;;  %v1936_v51 = vand.u32 4294901760, %v3419_v40 }
 0x21c   : > { %2614 = vpow2.f32 %v672_v1  ;;  %v1937_v20 = vsub.f32 %v3419_v40, %v1936_v51  ;;  %v1943_v1 = vsub.f32 %v3424_v44, %v1942_v54 }
 0x222   : > { %v2615_v29 = vpop.eup %2614 }
 0x223   : > { %v692_v8 = vmul.f32 %v2615_v29, %v684_v7  ;;  %v1949_v7 = vsub.f32 %v3433_v50, %v1948_v56  ;;  %v862_v29 = vpop.f32.mrf.mxu1 }
 0x225   : > { %v709_v10 = vsel %vm696_vm1, %v692_v8, 0.0  ;;  %v1515_v17 = vsel %vm761_vm0, %v692_v8, 0  ;;  %v2641_v8 = vld [vmem:[%s2976_s16 + $0xf0] sm:$0xff] }
 0x226   : > { %v1537_v12 = vand.u32 4294901760, %v1515_v17  ;;  %710 = vadd.xlane.f32.xlu2 %v709_v10 }
 0x227   : > { %v699_v21 = vpop.xlane.xlu0 %698 }
 0x228   : > { %v3403_v30 = vsub.f32 %v1515_v17, %v1537_v12  ;;  %1583 = vmatmul.f32.vlgmr.msra.gmra.mxu3 %v1537_v12  ;;  %v721_v38 = vadd.f32 1.1920929e-07, %v699_v21 }
 0x229   : > { %v661_v13 = vpop.f32.mrf.mxu2  ;;  %1751 = vmatpush.msra.mxu3 %v1750_v28 }
 0x22a   : > { %v678_v15 = vmul.f32 1.442695, %v661_v13  ;;  %v1539_v35 = vand.u32 4294901760, %v3403_v30  ;;  %1613 = vmatmul.f32.vlgmr.msra.gmra.mxu1 %v3403_v30 }
 0x22b   : > { %1757 = vmatpush.msra.mxu3 %v1756_v16  ;;  %1789 = vmatpush.msra.mxu1 %v3361_v61 }
 0x22c   : > { %2616 = vpow2.f32 %v678_v15  ;;  %v1540_v37 = vsub.f32 %v3403_v30, %v1539_v35 }
 0x22d   : > { %v621_v45 = vpop.f32.mrf.mxu3  ;;  %1763 = vmatpush.msra.mxu3 %v1762_v33  ;;  %1792 = vmatpush.msra.mxu1 %v3369_v3  ;;  %v1954_v3 = vand.u32 4294901760, %v3443_v52  ;;  %v2643_v33 = vld [vmem:[%s2976_s16 + $0xe0] sm:$0xff] }
 0x22e   : > { %v674_v26 = vmul.f32 1.442695, %v621_v45  ;;  %v1541_v25 = vand.u32 4294901760, %v1540_v37 }
 0x22f   : > { %1769 = vmatpush.msra.mxu3 %v1768_v48  ;;  %1795 = vmatpush.msra.mxu1 %v3373_v19  ;;  %v1955_v59 = vsub.f32 %v3443_v52, %v1954_v3 }
 0x230   : > { %2618 = vpow2.f32 %v674_v26  ;;  %1542 = vmatmul.f32.vlgmr.msrb.gmra.mxu2 %v1541_v25  ;;  %1673 = vmatmul.f32.vlgmr.msrb.gmra.mxu3 %v1537_v12  ;;  %v3519_v25 = vsub.f32 %v1891_v11, %v3509_v36 }
 0x231   : > { %1718 = vmatpush.msrb.mxu2 %v3349_v58  ;;  %1798 = vmatpush.msra.mxu1 %v3379_v5  ;;  %2620 = vrcp.f32 %v721_v38  ;;  %v1944_v5 = vand.u32 4294901760, %v1943_v1  ;;  %v1956_v14 = vand.u32 4294901760, %v1955_v59  ;;  %v889_v15 = vpop.f32.mrf.mxu2 }
 0x232   : > { %v2617_v41 = vpop.eup %2616  ;;  %1698 = vmatmul.f32.vlgmr.msrb.gmra.mxu1 %v1537_v12  ;;  %1847 = vmatpush.msrb.mxu3 %v1748_v43  ;;  %v3466_v43 = vand.u32 4294901760, %v2640_v4 }
 0x233   : > { %v3430_v49 = vmul.f32 %v2617_v41, %v687_v23  ;;  %1720 = vmatpush.msrb.mxu2 %v3353_v34  ;;  %1878 = vmatpush.msrb.mxu1 %v3349_v58  ;;  %v947_v41 = vpop.f32.mrf.mxu1 }
 0x234   : > { %1851 = vmatpush.msrb.mxu3 %v1754_v55  ;;  %v1938_v55 = vand.u32 4294901760, %v1937_v20  ;;  %v3490_v17 = vsub.f32 %v2640_v4, %v3466_v43 }
 0x235   : > { %v718_v24 = vsel %vm696_vm1, %v3430_v49, 0.0  ;;  %1722 = vmatpush.msrb.mxu2 %v3357_v60  ;;  %1880 = vmatpush.msrb.mxu1 %v3353_v34  ;;  %v791_v57 = vpop.f32.mrf.mxu3 }
 0x236   : > { %719 = vadd.xlane.f32.xlu1 %v718_v24  ;;  %v2619_v61 = vpop.eup %2618  ;;  %1855 = vmatpush.msrb.mxu3 %v1760_v18  ;;  %v2124_v48 = vand.u32 4294901760, %v3490_v17 }
 0x237   : > { %v693_v63 = vmul.f32 %v2619_v61, %v685_v62  ;;  %1724 = vmatpush.msrb.mxu2 %v3365_v2  ;;  %1882 = vmatpush.msrb.mxu1 %v3357_v60  ;;  %v2621_v18 = vpop.eup %2620  ;;  %v1915_v61 = vand.u32 4294901760, %v3519_v25 }
 0x238   : > { %1640 = vmatmul.f32.vlgmr.msra.gmra.mxu2 %v1539_v35  ;;  %1859 = vmatpush.msrb.mxu3 %v1766_v9  ;;  %v2642_v9 = vld [vmem:[%s2976_s16 + $0xe8] sm:$0xff]  ;;  %v737_v13 = vmul.f32 %v2621_v18, %v721_v38  ;;  %v3504_v35 = vand.u32 4294901760, %v2643_v33  ;;  %v2125_v22 = vsub.f32 %v3490_v17, %v2124_v48 }
 0x239   : > { %v712_v19 = vsel %vm696_vm1, %v693_v63, 0.0  ;;  %v1703_v31 = vsel %vm761_vm0, %v693_v63, 0  ;;  %1818 = vmatpush.msra.mxu2 %v3349_v58  ;;  %1884 = vmatpush.msrb.mxu1 %v3365_v2  ;;  %v3482_v58 = vand.u32 4294901760, %v2641_v8  ;;  %v3487_v10 = vand.u32 4294901760, %v2642_v9  ;;  %v702_v62 = vpop.xlane.xlu0 %701 }
 0x23a   : > { %v1725_v0 = vand.u32 4294901760, %v1703_v31  ;;  %713 = vadd.xlane.f32.xlu2 %v712_v19  ;;  %v745_v39 = vsub.f32 2.0, %v737_v13  ;;  %v3516_v26 = vsub.f32 %v2643_v33, %v3504_v35  ;;  %v2079_v19 = vsel %vm761_vm0, %v3430_v49, 0 }
 0x23b   : > { %1820 = vmatpush.msra.mxu2 %v3353_v34  ;;  %v1950_v34 = vand.u32 4294901760, %v1949_v7  ;;  %v3499_v30 = vsub.f32 %v2641_v8, %v3482_v58  ;;  %v3507_v6 = vsub.f32 %v2642_v9, %v3487_v10 }
 0x23c   : > { %v3484_v53 = vsub.f32 %v1703_v31, %v1725_v0  ;;  %1771 = vmatmul.f32.vlgmr.msra.gmra.mxu3 %v1725_v0  ;;  %v753_v24 = vmul.f32 %v2621_v18, %v745_v39  ;;  %v2142_v20 = vand.u32 4294901760, %v3516_v26 }
 0x23d   : > { %1939 = vmatpush.msra.mxu3 %v1938_v55  ;;  %1822 = vmatpush.msra.mxu2 %v3357_v60  ;;  %v832_v28 = vpop.f32.mrf.mxu3  ;;  %v2136_v21 = vand.u32 4294901760, %v3507_v6 }
 0x23e   : > { %1801 = vmatmul.f32.vlgmr.msra.gmra.mxu1 %v3484_v53  ;;  %v1727_v12 = vand.u32 4294901760, %v3484_v53  ;;  %v833_v16 = vadd.f32 %v832_v28, %v791_v57  ;;  %v722_v57 = vadd.f32 1.1920929e-07, %v702_v62 }
 0x23f   : > { %1945 = vmatpush.msra.mxu3 %v1944_v5  ;;  %1977 = vmatpush.msra.mxu1 %v3419_v40 }
 0x240   : > { %v1728_v60 = vsub.f32 %v3484_v53, %v1727_v12  ;;  %1824 = vmatpush.msra.mxu2 %v3365_v2  ;;  %v863_v27 = vadd.f32 %v862_v29, %v833_v16  ;;  %v2130_v2 = vand.u32 4294901760, %v3499_v30  ;;  %2622 = vrcp.f32 %v722_v57 }
 0x241   : > { %1951 = vmatpush.msra.mxu3 %v1950_v34  ;;  %1980 = vmatpush.msra.mxu1 %v3424_v44  ;;  %v2126_v44 = vand.u32 4294901760, %v2125_v22 }
 0x242   : > { %v1729_v37 = vand.u32 4294901760, %v1728_v60  ;;  %v890_v45 = vadd.f32 %v889_v15, %v863_v27  ;;  %v2131_v40 = vsub.f32 %v3499_v30, %v2130_v2 }
 0x243   : > { %1957 = vmatpush.msra.mxu3 %v1956_v14  ;;  %1983 = vmatpush.msra.mxu1 %v3433_v50  ;;  %v2143_v50 = vsub.f32 %v3516_v26, %v2142_v20 }
 0x244   : > { %1730 = vmatmul.f32.vlgmr.msrb.gmra.mxu2 %v1729_v37  ;;  %1861 = vmatmul.f32.vlgmr.msrb.gmra.mxu3 %v1725_v0  ;;  %v2132_v1 = vand.u32 4294901760, %v2131_v40 }
 0x245   : > { %1906 = vmatpush.msrb.mxu2 %v3406_v32  ;;  %1986 = vmatpush.msra.mxu1 %v3443_v52  ;;  %v922_v23 = vpop.f32.mrf.mxu3 }
 0x246   : > { %1886 = vmatmul.f32.vlgmr.msrb.gmra.mxu1 %v1725_v0  ;;  %2035 = vmatpush.msrb.mxu3 %v1936_v51  ;;  %v923_v38 = vadd.f32 %v922_v23, %v890_v45  ;;  %v2623_v55 = vpop.eup %2622 }
 0x247   : > { %1908 = vmatpush.msrb.mxu2 %v3411_v46  ;;  %2066 = vmatpush.msrb.mxu1 %v3406_v32  ;;  %v1050_v7 = vpop.f32.mrf.mxu1  ;;  %v738_v0 = vmul.f32 %v2623_v55, %v722_v57 }
 0x248   : > { %2039 = vmatpush.msrb.mxu3 %v1942_v54  ;;  %v948_v51 = vadd.f32 %v947_v41, %v923_v38  ;;  %v2137_v54 = vsub.f32 %v3507_v6, %v2136_v21 }
 0x249   : > { %1910 = vmatpush.msrb.mxu2 %v3416_v42  ;;  %2068 = vmatpush.msrb.mxu1 %v3411_v46  ;;  %v746_v5 = vsub.f32 2.0, %v738_v0 }
 0x24a   : > { %2043 = vmatpush.msrb.mxu3 %v1948_v56  ;;  %v2266_v63 = vmul.f32 %v948_v51, %v753_v24  ;;  %v1916_v56 = vsub.f32 %v3519_v25, %v1915_v61  ;;  %v2138_v4 = vand.u32 4294901760, %v2137_v54 }
 0x24b   : > { %1912 = vmatpush.msrb.mxu2 %v3427_v47  ;;  %2070 = vmatpush.msrb.mxu1 %v3416_v42  ;;  %v754_v34 = vmul.f32 %v2623_v55, %v746_v5 }
 0x24c   : > { %1828 = vmatmul.f32.vlgmr.msra.gmra.mxu2 %v1727_v12  ;;  %1959 = vmatmul.f32.vlgmr.msra.gmra.mxu3 %v3509_v36  ;;  %2274 = vst [vmem:[%s3550_s26] sm:$0x1] %v2266_v63  ;;  %v1917_v31 = vand.u32 4294901760, %v1916_v56 }
 0x24d   : > { %2047 = vmatpush.msrb.mxu3 %v1954_v3  ;;  %2006 = vmatpush.msra.mxu2 %v3406_v32  ;;  %v2144_v32 = vand.u32 4294901760, %v2143_v50  ;;  %v1020_v52 = vpop.f32.mrf.mxu3  ;;  %v2101_v3 = vand.u32 4294901760, %v2079_v19 }
 0x24e   : > { %1989 = vmatmul.f32.vlgmr.msra.gmra.mxu1 %v3519_v25 }
 0x24f   : > { %2127 = vmatpush.msra.mxu3 %v2126_v44  ;;  %2072 = vmatpush.msrb.mxu1 %v3427_v47  ;;  %v1135_v53 = vpop.f32.mrf.mxu1 }
 0x250   : > { %2008 = vmatpush.msra.mxu2 %v3411_v46 }
 0x251   : > { %2133 = vmatpush.msra.mxu3 %v2132_v1  ;;  %2165 = vmatpush.msra.mxu1 %v3490_v17 }
 0x252   : > { %2010 = vmatpush.msra.mxu2 %v3416_v42  ;;  %v2102_v42 = vsub.f32 %v2079_v19, %v2101_v3 }
 0x253   : > { %2139 = vmatpush.msra.mxu3 %v2138_v4  ;;  %2168 = vmatpush.msra.mxu1 %v3499_v30  ;;  %v979_v49 = vpop.f32.mrf.mxu2 }
 0x254   : > { %2012 = vmatpush.msra.mxu2 %v3427_v47  ;;  %2049 = vmatmul.f32.vlgmr.msrb.gmra.mxu3 %v3509_v36  ;;  %v1021_v46 = vadd.f32 %v1020_v52, %v979_v49  ;;  %v2103_v18 = vand.u32 4294901760, %v2102_v42 }
 0x255   : > { %1918 = vmatmul.f32.vlgmr.msrb.gmra.mxu2 %v1917_v31  ;;  %2145 = vmatpush.msra.mxu3 %v2144_v32  ;;  %v1110_v29 = vpop.f32.mrf.mxu3 }
 0x256   : > { %2171 = vmatpush.msra.mxu1 %v3507_v6  ;;  %2094 = vmatpush.msrb.mxu2 %v3466_v43  ;;  %v1051_v47 = vadd.f32 %v1050_v7, %v1021_v46  ;;  %v2104_v9 = vsub.f32 %v2102_v42, %v2103_v18 }
 0x257   : > { %2074 = vmatmul.f32.vlgmr.msrb.gmra.mxu1 %v3509_v36  ;;  %2223 = vmatpush.msrb.mxu3 %v2124_v48 }
 0x258   : > { %2174 = vmatpush.msra.mxu1 %v3516_v26  ;;  %2096 = vmatpush.msrb.mxu2 %v3482_v58  ;;  %v2105_v11 = vand.u32 4294901760, %v2104_v9 }
 0x259   : > { %2227 = vmatpush.msrb.mxu3 %v2130_v2 }
 0x25a   : > { %2254 = vmatpush.msrb.mxu1 %v3466_v43  ;;  %2098 = vmatpush.msrb.mxu2 %v3487_v10 }
 0x25b   : > { %2231 = vmatpush.msrb.mxu3 %v2136_v21  ;;  %v1077_v59 = vpop.f32.mrf.mxu2 }
 0x25c   : > { %2256 = vmatpush.msrb.mxu1 %v3482_v58  ;;  %2147 = vmatmul.f32.vlgmr.msra.gmra.mxu3 %v2101_v3  ;;  %v1078_v8 = vadd.f32 %v1077_v59, %v1051_v47 }
 0x25d   : > { %2016 = vmatmul.f32.vlgmr.msra.gmra.mxu2 %v1915_v61  ;;  %2235 = vmatpush.msrb.mxu3 %v2142_v20 }
 0x25e   : > { %2100 = vmatpush.msrb.mxu2 %v3504_v35  ;;  %v1111_v17 = vadd.f32 %v1110_v29, %v1078_v8  ;;  %2258 = vmatpush.msrb.mxu1 %v3487_v10 }
 0x25f   : > { %2177 = vmatmul.f32.vlgmr.msra.gmra.mxu1 %v2102_v42 }
 0x260   : > { %2194 = vmatpush.msra.mxu2 %v3466_v43  ;;  %v1136_v28 = vadd.f32 %v1135_v53, %v1111_v17  ;;  %2260 = vmatpush.msrb.mxu1 %v3504_v35  ;;  %v705_v43 = vpop.xlane.xlu1 %704 }
 0x261   : > { %v723_v13 = vadd.f32 1.1920929e-07, %v705_v43 }
 0x262   : > { %2196 = vmatpush.msra.mxu2 %v3482_v58  ;;  %v2267_v12 = vmul.f32 %v1136_v28, %v754_v34 }
 0x263   : > { %2624 = vrcp.f32 %v723_v13 }
 0x264   : > { %2198 = vmatpush.msra.mxu2 %v3487_v10  ;;  %2237 = vmatmul.f32.vlgmr.msrb.gmra.mxu3 %v2101_v3  ;;  %2275 = vst [vmem:[%s3550_s26 + $0x1] sm:$0x1] %v2267_v12 }
 0x265   : > { %2106 = vmatmul.f32.vlgmr.msrb.gmra.mxu2 %v2105_v11 }
 0x266   : > { %2200 = vmatpush.msra.mxu2 %v3504_v35 }
 0x267   : > { %2262 = vmatmul.f32.vlgmr.msrb.gmra.mxu1 %v2101_v3  ;;  %v1238_v15 = vpop.f32.mrf.mxu1 }
 0x269   : > { %v2625_v14 = vpop.eup %2624 }
 0x26a   : > { %v739_v60 = vmul.f32 %v2625_v14, %v723_v13 }
 0x26b   : > { %v1208_v16 = vpop.f32.mrf.mxu3 }
 0x26c   : > { %v747_v10 = vsub.f32 2.0, %v739_v60 }
 0x26d   : > { %2204 = vmatmul.f32.vlgmr.msra.gmra.mxu2 %v2103_v18 }
 0x26e   : > { %v755_v35 = vmul.f32 %v2625_v14, %v747_v10 }
 0x26f   : > { %v1323_v48 = vpop.f32.mrf.mxu1 }
 0x273   : > { %v1167_v58 = vpop.f32.mrf.mxu2  ;;  %v1298_v6 = vpop.f32.mrf.mxu3 }
 0x274   : > { %v1209_v30 = vadd.f32 %v1208_v16, %v1167_v58  ;;  %v708_v2 = vpop.xlane.xlu1 %707 }
 0x275   : > { %v724_v26 = vadd.f32 1.1920929e-07, %v708_v2 }
 0x276   : > { %v1239_v27 = vadd.f32 %v1238_v15, %v1209_v30 }
 0x277   : > { %2626 = vrcp.f32 %v724_v26 }
 0x27b   : > { %v1265_v33 = vpop.f32.mrf.mxu2 }
 0x27c   : > { %v1266_v36 = vadd.f32 %v1265_v33, %v1239_v27 }
 0x27d   : > { %v2627_v21 = vpop.eup %2626 }
 0x27e   : > { %v1299_v37 = vadd.f32 %v1298_v6, %v1266_v36  ;;  %v740_v38 = vmul.f32 %v2627_v21, %v724_v26 }
 0x280   : > { %v1324_v39 = vadd.f32 %v1323_v48, %v1299_v37  ;;  %v748_v51 = vsub.f32 2.0, %v740_v38 }
 0x281   : > { %v1426_v41 = vpop.f32.mrf.mxu1 }
 0x282   : > { %v2268_v45 = vmul.f32 %v1324_v39, %v755_v35  ;;  %v756_v44 = vmul.f32 %v2627_v21, %v748_v51 }
 0x284   : > { %2276 = vst [vmem:[%s3550_s26 + $0x2] sm:$0x1] %v2268_v45 }
 0x285   : > { %v1396_v25 = vpop.f32.mrf.mxu3 }
 0x289   : > { %v1511_v57 = vpop.f32.mrf.mxu1 }
 0x28c   : > { %v717_v43 = vpop.xlane.xlu0 %716 }
 0x28d   : > { %v1355_v23 = vpop.f32.mrf.mxu2  ;;  %v1486_v40 = vpop.f32.mrf.mxu3  ;;  %v727_v16 = vadd.f32 1.1920929e-07, %v717_v43 }
 0x28e   : > { %v1397_v22 = vadd.f32 %v1396_v25, %v1355_v23 }
 0x290   : > { %v1427_v24 = vadd.f32 %v1426_v41, %v1397_v22 }
 0x295   : > { %v1453_v62 = vpop.f32.mrf.mxu2 }
 0x296   : > { %v1454_v20 = vadd.f32 %v1453_v62, %v1427_v24 }
 0x298   : > { %v1487_v61 = vadd.f32 %v1486_v40, %v1454_v20 }
 0x299   : > { %v711_v1 = vpop.xlane.xlu2 %710 }
 0x29a   : > { %v1512_v54 = vadd.f32 %v1511_v57, %v1487_v61  ;;  %v725_v50 = vadd.f32 1.1920929e-07, %v711_v1 }
 0x29c   : > { %v2269_v63 = vmul.f32 %v1512_v54, %v756_v44  ;;  %2628 = vrcp.f32 %v725_v50 }
 0x29e   : > { %2277 = vst [vmem:[%s3550_s26 + $0x3] sm:$0x1] %v2269_v63 }
 0x2a2   : > { %v2629_v32 = vpop.eup %2628 }
 0x2a3   : > { %v741_v31 = vmul.f32 %v2629_v32, %v725_v50 }
 0x2a5   : > { %v749_v46 = vsub.f32 2.0, %v741_v31 }
 0x2a7   : > { %v1614_v4 = vpop.f32.mrf.mxu1  ;;  %v757_v59 = vmul.f32 %v2629_v32, %v749_v46 }
 0x2a9   : > { %v720_v39 = vpop.xlane.xlu1 %719 }
 0x2aa   : > { %v728_v26 = vadd.f32 1.1920929e-07, %v720_v39 }
 0x2ab   : > { %v1584_v56 = vpop.f32.mrf.mxu3 }
 0x2ad   : > { %v714_v42 = vpop.xlane.xlu2 %713 }
 0x2ae   : > { %v726_v18 = vadd.f32 1.1920929e-07, %v714_v42 }
 0x2af   : > { %v1699_v55 = vpop.f32.mrf.mxu1 }
 0x2b0   : > { %2630 = vrcp.f32 %v726_v18 }
 0x2b1   : > { %2632 = vrcp.f32 %v727_v16 }
 0x2b2   : > { %2634 = vrcp.f32 %v728_v26 }
 0x2b3   : > { %v1543_v19 = vpop.f32.mrf.mxu2  ;;  %v1674_v3 = vpop.f32.mrf.mxu3 }
 0x2b4   : > { %v1585_v52 = vadd.f32 %v1584_v56, %v1543_v19 }
 0x2b6   : > { %v1615_v49 = vadd.f32 %v1614_v4, %v1585_v52  ;;  %v2631_v17 = vpop.eup %2630 }
 0x2b7   : > { %v742_v12 = vmul.f32 %v2631_v17, %v726_v18  ;;  %v2633_v48 = vpop.eup %2632 }
 0x2b8   : > { %v743_v35 = vmul.f32 %v2633_v48, %v727_v16  ;;  %v2635_v20 = vpop.eup %2634 }
 0x2b9   : > { %v750_v58 = vsub.f32 2.0, %v742_v12  ;;  %v744_v44 = vmul.f32 %v2635_v20, %v728_v26 }
 0x2ba   : > { %v751_v41 = vsub.f32 2.0, %v743_v35 }
 0x2bb   : > { %v1641_v7 = vpop.f32.mrf.mxu2  ;;  %v1802_v8 = vpop.f32.mrf.mxu1  ;;  %v758_v27 = vmul.f32 %v2631_v17, %v750_v58  ;;  %v752_v1 = vsub.f32 2.0, %v744_v44 }
 0x2bc   : > { %v1642_v0 = vadd.f32 %v1641_v7, %v1615_v49  ;;  %v759_v38 = vmul.f32 %v2633_v48, %v751_v41 }
 0x2bd   : > { %v760_v32 = vmul.f32 %v2635_v20, %v752_v1 }
 0x2be   : > { %v1675_v47 = vadd.f32 %v1674_v3, %v1642_v0 }
 0x2bf   : > { %v1772_v5 = vpop.f32.mrf.mxu3 }
 0x2c0   : > { %v1700_v29 = vadd.f32 %v1699_v55, %v1675_v47 }
 0x2c2   : > { %v2270_v53 = vmul.f32 %v1700_v29, %v757_v59 }
 0x2c3   : > { %v1887_v11 = vpop.f32.mrf.mxu1 }
 0x2c4   : > { %2278 = vst [vmem:[%s3550_s26 + $0x4] sm:$0x1] %v2270_v53 }
 0x2c7   : > { %v1731_v9 = vpop.f32.mrf.mxu2  ;;  %v1862_v34 = vpop.f32.mrf.mxu3 }
 0x2c8   : > { %v1773_v28 = vadd.f32 %v1772_v5, %v1731_v9 }
 0x2ca   : > { %v1803_v13 = vadd.f32 %v1802_v8, %v1773_v28 }
 0x2cb   : > { %v1990_v33 = vpop.f32.mrf.mxu1 }
 0x2cf   : > { %v1829_v14 = vpop.f32.mrf.mxu2  ;;  %v1960_v60 = vpop.f32.mrf.mxu3 }
 0x2d0   : > { %v1830_v15 = vadd.f32 %v1829_v14, %v1803_v13 }
 0x2d2   : > { %v1863_v30 = vadd.f32 %v1862_v34, %v1830_v15 }
 0x2d4   : > { %v1888_v10 = vadd.f32 %v1887_v11, %v1863_v30  ;;  %v2075_v25 = vpop.f32.mrf.mxu1 }
 0x2d6   : > { %v2271_v6 = vmul.f32 %v1888_v10, %v758_v27 }
 0x2d7   : > { %v2050_v45 = vpop.f32.mrf.mxu3 }
 0x2d8   : > { %v1919_v36 = vpop.f32.mrf.mxu2  ;;  %2279 = vst [vmem:[%s3550_s26 + $0x5] sm:$0x1] %v2271_v6 }
 0x2d9   : > { %v1961_v37 = vadd.f32 %v1960_v60, %v1919_v36 }
 0x2db   : > { %v1991_v2 = vadd.f32 %v1990_v33, %v1961_v37 }
 0x2dc   : > { %v2178_v57 = vpop.f32.mrf.mxu1 }
 0x2df   : > { %v2148_v40 = vpop.f32.mrf.mxu3 }
 0x2e0   : > { %v2017_v23 = vpop.f32.mrf.mxu2 }
 0x2e1   : > { %v2018_v22 = vadd.f32 %v2017_v23, %v1991_v2 }
 0x2e3   : > { %v2051_v21 = vadd.f32 %v2050_v45, %v2018_v22 }
 0x2e4   : > { %v2263_v19 = vpop.f32.mrf.mxu1 }
 0x2e5   : > { %v2076_v24 = vadd.f32 %v2075_v25, %v2051_v21 }
 0x2e7   : > { %v2272_v62 = vmul.f32 %v2076_v24, %v759_v38  ;;  %v2238_v56 = vpop.f32.mrf.mxu3 }
 0x2e8   : > { %v2107_v51 = vpop.f32.mrf.mxu2 }
 0x2e9   : > { %2280 = vst [vmem:[%s3550_s26 + $0x6] sm:$0x1] %v2272_v62  ;;  %v2149_v61 = vadd.f32 %v2148_v40, %v2107_v51 }
 0x2eb   : > { %v2179_v54 = vadd.f32 %v2178_v57, %v2149_v61 }
 0x2f0   : > { %v2205_v63 = vpop.f32.mrf.mxu2 }
 0x2f1   : > { %v2206_v50 = vadd.f32 %v2205_v63, %v2179_v54 }
 0x2f3   : > { %v2239_v4 = vadd.f32 %v2238_v56, %v2206_v50 }
 0x2f5   : > { %v2264_v52 = vadd.f32 %v2263_v19, %v2239_v4 }
 0x2f7   : > { %v2273_v3 = vmul.f32 %v2264_v52, %v760_v32 }
 0x2f9   : > { %2281 = vst [vmem:[%s3550_s26 + $0x7] sm:$0x1] %v2273_v3 }
 0x2fa   : > { %2761 = shalt.err (!%p2758_p9)
}
 0x2fb   : > { %s2815_s10 = smov 16   ;;  %s2816_s23 = smov 1  }
 0x2fc   : > { %2479 = dma.vmem_to_hbm [thread:$0]  (%p2917_p7), %s2295_s11, 128, %s2297_s7, %s2283_s22, %s2815_s10, %s2815_s10, %s2816_s23  }
 0x2fd PF: > { %s2311_s24 = sand.u32 1, %s2796_s18   ;;  %p3657_p12 = scmp.ge.s32.totalorder %s2808_s21, 2 }
 0x2fe   : > { %s2312_s2 = scalar_lea.sflag [#allocation4], %s2311_s24 }
 0x2ff   : > { %p2493_p13 = pnand %p3657_p12, %p2882_p6 }
 0x301   : > { %p2494_p0 = pneg %p2493_p13 }
 0x303   : > { %2791 = dma.done.wait (%p2494_p0), %s2312_s2, 128  }
 0x304   : > { %2793 = vsyncadd (%p2494_p0), %s2312_s2, 4294967168  ;;  %s3658_s21 = sld [smem:[#allocation14_spill]]  ;;  %s3661_s18 = smov %s2800_s19 }
 0x305   : > { %s3659_s9 = sld [smem:[#allocation13_spill]] }
 0x306   : > { %s3660_s20 = sld [smem:[#allocation15_spill]] }
 0x30a   : > { %p21_p3 = scmp.ge.s32.totalorder %s3658_s21, 4  }
 0x30b   : > { %s3662_s19 = smov %s3659_s9 }
 0x30c   :  { %23 = sbr.rel (!%p21_p3) target bundleno = 9 (0x9), region = 102 }
 0x311   :  { %2318 = vsyncpa [#allocation3], 1 }
 0x312   :  { %2320 = vsyncpa [#allocation3 + $0x1], 1 }
 0x313   :  { %2321 = vsyncpa [#allocation6], 1 }
 0x314   :  { %2323 = vsyncpa [#allocation6 + $0x1], 1 }
 0x315   :  { %2324 = vsyncpa [#allocation4], 1 }
 0x316   :  { %2326 = vsyncpa [#allocation4 + $0x1], 1 }

// kernel: tpu_custom_call.1
= control target key start
LH: loop header
LB: loop body
LE: loop exit
PB: predicated region body
PF: predicated region fallthrough
CT: control target
= control target key end

     0   :  { %s3634_s0 = inlined_call_operand.hbm [shape: f32[16,32,128], index: 0, kind: input, shape index: {}]   ;;  %s3635_s1 = inlined_call_operand.hbm [shape: f32[16,1,32], index: 1, kind: input, shape index: {}]   ;;  %s3636_s2 = inlined_call_operand.hbm [shape: f32[128,128], index: 2, kind: input, shape index: {}]   ;;  %s3637_s3 = inlined_call_operand.vmem [shape: f32[1,128], index: 3, kind: input, shape index: {}]   ;;  %s3638_s4 = inlined_call_operand.vmem [shape: f32[1,1,128], index: 4, kind: input, shape index: {}]   ;;  %s3639_s5 = inlined_call_operand.hbm [shape: f32[16,1,128], index: 5, kind: output, shape index: {}]  }
   0x1   :  { %3645 = sst [smem:[#allocation16_spill]] %s3636_s2 }
   0x2   :  { %10 = vsyncpa [#allocation3], 0 }
   0x3   :  { %12 = vsyncpa [#allocation3 + $0x1], 0 }
   0x4   :  { %13 = vsyncpa [#allocation6], 0 }
   0x5   :  { %15 = vsyncpa [#allocation6 + $0x1], 0 }
   0x6   :  { %16 = vsyncpa [#allocation4], 0 }
   0x7   :  { %18 = vsyncpa [#allocation4 + $0x1], 0  ;;  %s2847_s18 = smov 0   ;;  %s2849_s19 = smov 0  }
   0x8   :  { %s2851_s20 = smov 0   ;;  %s2853_s21 = smov 0  }
   0x9 LB: > { %3646 = sst [smem:[#allocation13_spill]] %s2804_s20  ;;  %s2868_s22 = sadd.s32 4294967295, %s2808_s21   ;;  %s2808_s21 = sphi %s2853_s21, %s3658_s21   ;;  %s2804_s20 = sphi %s2851_s20, %s3660_s20   ;;  %s2800_s19 = sphi %s2849_s19, %s3662_s19   ;;  %s2796_s18 = sphi %s2847_s18, %s3661_s18  }
   0xa   : > { %s2402_s23 = sadd.s32 4294967294, %s2808_s21   ;;  %p44_p0 = scmp.ne.s32.totalorder %s2800_s19, %s2796_s18 }
   0xb   : > { %p45_p1 = scmp.eq.s32.totalorder %s2868_s22, 0  ;;  %p157_p2 = scmp.eq.s32.totalorder %s2868_s22, 1 }
   0xc   : > { %p163_p3 = scmp.eq.s32.totalorder %s2402_s23, 1  ;;  %p2403_p5 = scmp.ge.s32.totalorder %s2808_s21, 1 }
   0xd   : > { %p2877_p4 = por %p45_p1, %p44_p0  ;;  %p170_p7 = scmp.lt.s32.totalorder %s2808_s21, 3 }
   0xe   : > { %p2882_p6 = por %p163_p3, %p44_p0  ;;  %s3649_s2 = sld [smem:[#allocation16_spill]] }
   0xf   : > { %p2890_p8 = pnand %p2403_p5, %p170_p7  ;;  %s2810_s30 = smov [#allocation7]  }
  0x10   : > { %s183_s6 = sshll.u32 %s2810_s30, 4  ;;  %s2900_s7 = sadd.s32 1, %s2808_s21   ;;  %s184_s6 = int_to_ptr.vmem [resolvable:$true] %s183_s6 }
  0x11   : > { %p2481_p9 = pneg %p2890_p8  ;;  %3651 = sst [smem:[#allocation14_spill]] %s2900_s7 }
  0x12   : > { %s3640_s8 = smov 128   ;;  %s3641_s9 = smov 8  }
  0x13   : > { %p2482_p10 = pnand %p2481_p9, %p45_p1  ;;  %s28_s10 = ssub.s32 %s2808_s21, %s2900_s7 }
  0x14   : > { %s181_s28 = sshll.u32 %s3649_s2, 4  ;;  %s31_s11 = sadd.s32 1, %s2804_s20  ;;  %s182_s28 = int_to_ptr.hbm [resolvable:$true] %s181_s28 }
  0x15   : > { %2484 = dma.hbm_to_vmem [thread:$0]  (!%p2482_p10), %s182_s28, 2048, %s184_s6, [#allocation6], %s3640_s8, %s3640_s8, %s3641_s9  }
  0x16   : > { %p29_p12 = scmp.eq.s32.totalorder %s28_s10, 0  ;;  %p38_p13 = scmp.ne.s32.totalorder %s2804_s20, %s2800_s19 }
  0x17   : > { %p39_p0 = scmp.eq.s32.totalorder %s2808_s21, 0  ;;  %p2497_p3 = scmp.lt.s32.totalorder %s2808_s21, 2 }
  0x18   : > { %s2913_s12 = scalar_select %p29_p12, %s2804_s20, %s31_s11  }
  0x19   : > { %p40_p5 = por %p39_p0, %p38_p13  ;;  %p2917_p7 = por %p157_p2, %p38_p13 }
  0x1a   : > { %3652 = sst [smem:[#allocation15_spill]] %s2913_s12  ;;  %s2922_s14 = sand.u32 1, %s2804_s20  }
  0x1b   : > { %s2422_s15 = sshll.u32 %s2808_s21, 8  ;;  %s2406_s16 = sshll.u32 %s2922_s14, 8 }
  0x1c   : > { %s213_s26 = scalar_lea.hbm %s3634_s0, %s2422_s15  ;;  %s207_s28 = scalar_lea.vmem [#allocation2], %s2406_s16 }
  0x1d   : > { %s214_s27 = sshll.u32 %s213_s26, 4  ;;  %s216_s30 = sshll.u32 %s207_s28, 4  ;;  %s215_s27 = int_to_ptr.hbm [resolvable:$true] %s214_s27  ;;  %s217_s30 = int_to_ptr.vmem [resolvable:$true] %s216_s30 }
  0x1e   : > { %p2931_p2 = pnand %p2497_p3, %p40_p5  ;;  %s226_s10 = sand.u32 1, %s2808_s21  }
  0x1f   : > { %s2410_s11 = sshll.u32 %s2922_s14, 3  ;;  %s204_s8 = scalar_lea.sflag [#allocation3], %s2922_s14 }
  0x20   : > { %s2674_s9 = sshra.s32 %s215_s27, 4  ;;  %p2678_p10 = pneg %p2931_p2  ;;  %s2675_s9 = int_to_ptr.hbm [resolvable:$true] %s2674_s9 }
  0x21   : > { %s2676_s2 = scalar_lea.hbm %s2675_s9, 256  ;;  %s2681_s17 = scalar_lea.hbm %s3634_s0, 512 }
  0x22   : > { %p2677_p9 = scmp.ne.s32.totalorder %s2675_s9, %s2676_s2  ;;  %p2682_p0 = scmp.lt.s32.totalorder %s2675_s9, %s3634_s0 }
  0x23   : > { %p2683_p3 = scmp.lt.s32.totalorder %s2681_s17, %s2676_s2 }
  0x24   : > { %p2679_p12 = pnand %p2678_p10, %p2677_p9 }
  0x25   : > { %p2684_p5 = por %p2683_p3, %p2682_p0 }
  0x26   : > { %p2680_p13 = pneg %p2679_p12 }
  0x28   : > { %p2685_p11 = pnand %p2684_p5, %p2680_p13 }
  0x2a   : > { %2688 = shalt.err (!%p2685_p11)
}
  0x2b   : > { %s3655_s14 = smov 8   ;;  %s3656_s28 = smov 128  }
  0x2c   : > { %2488 = dma.hbm_to_vmem [thread:$0]  (!%p2931_p2), %s215_s27, 4096, %s217_s30, %s204_s8, %s3656_s28, %s3656_s28, %s3655_s14  }
  0x2d   : > { %s2411_s12 = sshll.u32 %s2808_s21, 3  ;;  %s230_s20 = scalar_lea.vmem [#allocation5], %s2410_s11 }
  0x2e   : > { %s237_s15 = sshll.u32 %s230_s20, 4  ;;  %s234_s23 = scalar_lea.hbm %s3635_s1, %s2411_s12  ;;  %s238_s15 = int_to_ptr.vmem [resolvable:$true] %s237_s15 }
  0x2f   : > { %s235_s2 = sshll.u32 %s234_s23, 4  ;;  %s227_s9 = scalar_lea.sflag [#allocation6], %s226_s10  ;;  %s236_s2 = int_to_ptr.hbm [resolvable:$true] %s235_s2 }
  0x30   : > { %s2704_s17 = sshra.s32 %s236_s2, 4  ;;  %s2711_s20 = scalar_lea.hbm %s3635_s1, 16  ;;  %s2705_s17 = int_to_ptr.hbm [resolvable:$true] %s2704_s17 }
  0x31   : > { %s2706_s26 = scalar_lea.hbm %s2705_s17, 8  ;;  %p2712_p13 = scmp.lt.s32.totalorder %s2705_s17, %s3635_s1 }
  0x32   : > { %p2707_p11 = scmp.ne.s32.totalorder %s2705_s17, %s2706_s26  ;;  %p2713_p0 = scmp.lt.s32.totalorder %s2711_s20, %s2706_s26 }
  0x34   : > { %p2709_p9 = pnand %p2707_p11, %p2678_p10  ;;  %p2714_p3 = por %p2713_p0, %p2712_p13 }
  0x36   : > { %p2710_p12 = pneg %p2709_p9 }
  0x38   : > { %p2715_p5 = pnand %p2714_p3, %p2710_p12 }
  0x3a   : > { %2718 = shalt.err (!%p2715_p5)
}
  0x3b   : > { %s2813_s7 = smov 16   ;;  %s2814_s12 = smov 1  }
  0x3c   : > { %2491 = dma.hbm_to_vmem [thread:$0]  (!%p2931_p2), %s236_s2, 128, %s238_s15, %s227_s9, %s2813_s7, %s2813_s7, %s2814_s12  }
  0x3d   : > { %249 = sbr.rel (%p2890_p8) target bundleno = 765 (0x2fd), region = 40  ;;  %s2972_s10 = sand.u32 (!%p2890_p8), 1, %s2800_s19  }
  0x3e   : > { %s2413_s14 = sshll.u32 (!%p2890_p8), %s2972_s10, 8  ;;  %s252_s28 = scalar_lea.sflag (!%p2890_p8), [#allocation3], %s2972_s10 }
  0x3f   : > { %s2976_s16 = scalar_lea.vmem (!%p2890_p8), [#allocation2], %s2413_s14 }
  0x42   : > { %2779 = dma.done.wait (%p2877_p4), %s252_s28, 4096  }
  0x43   : > { %2781 = vsyncadd (%p2877_p4), %s252_s28, 4294963200  ;;  %s261_s29 = sand.u32 1, %s2868_s22   ;;  %s2414_s6 = sshll.u32 %s2972_s10, 3 }
  0x44   : > { %s262_s15 = scalar_lea.sflag [#allocation6], %s261_s29  ;;  %s2986_s23 = scalar_lea.vmem [#allocation5], %s2414_s6 }
  0x45   : > { %2783 = dma.done.wait (%p2877_p4), %s262_s15, 128  }
  0x46   : > { %2785 = vsyncadd (%p2877_p4), %s262_s15, 4294967168 }
  0x47   : > { %2787 = dma.done.wait (%p45_p1), [#allocation6], 2048  }
  0x48   : > { %2789 = vsyncadd (%p45_p1), [#allocation6], 4294965248  ;;  %v353_v0 = vld [vmem:[#allocation7 + $0x78] sm:$0xff]  ;;  %v352_v1 = vld [vmem:[#allocation7 + $0x70] sm:$0xff]  ;;  %vm761_vm0 = vcmask 261120   ;;  %vm696_vm1 = vcmask 253952  }
  0x49   : > { %358 = vmatpush.msra.mxu0 %v353_v0  ;;  %2425 = vmatpush.msra.mxu3 %v353_v0  ;;  %v351_v2 = vld [vmem:[#allocation7 + $0x68] sm:$0xff]  ;;  %v350_v3 = vld [vmem:[#allocation7 + $0x60] sm:$0xff]  ;;  %v349_v4 = vld [vmem:[#allocation7 + $0x58] sm:$0xff]  ;;  %s3550_s26 = scalar_lea.vmem [#allocation8], %s2414_s6  ;;  %s2418_s8 = sshll.u32 %s2868_s22, 3 }
  0x4a   : > { %2424 = vmatpush.msra.mxu2 %v353_v0  ;;  %2423 = vmatpush.msra.mxu1 %v353_v0  ;;  %v348_v5 = vld [vmem:[#allocation7 + $0x50] sm:$0xff]  ;;  %v347_v6 = vld [vmem:[#allocation7 + $0x48] sm:$0xff]  ;;  %v346_v7 = vld [vmem:[#allocation7 + $0x40] sm:$0xff]  ;;  %s2293_s30 = scalar_lea.hbm %s3639_s5, %s2418_s8  ;;  %s2294_s11 = sshll.u32 %s3550_s26, 4  ;;  %s2295_s11 = int_to_ptr.vmem [resolvable:$true] %s2294_s11 }
  0x4b   : > { %359 = vmatpush.msra.mxu0 %v352_v1  ;;  %2428 = vmatpush.msra.mxu3 %v352_v1  ;;  %v345_v8 = vld [vmem:[#allocation7 + $0x38] sm:$0xff]  ;;  %v344_v9 = vld [vmem:[#allocation7 + $0x30] sm:$0xff]  ;;  %v343_v10 = vld [vmem:[#allocation7 + $0x28] sm:$0xff]  ;;  %s2296_s7 = sshll.u32 %s2293_s30, 4  ;;  %s2283_s22 = scalar_lea.sflag [#allocation4], %s2972_s10  ;;  %s2297_s7 = int_to_ptr.hbm [resolvable:$true] %s2296_s7 }
  0x4c   : > { %2427 = vmatpush.msra.mxu2 %v352_v1  ;;  %2426 = vmatpush.msra.mxu1 %v352_v1  ;;  %v342_v11 = vld [vmem:[#allocation7 + $0x20] sm:$0xff]  ;;  %v341_v12 = vld [vmem:[#allocation7 + $0x18] sm:$0xff]  ;;  %v340_v13 = vld [vmem:[#allocation7 + $0x10] sm:$0xff]  ;;  %s2748_s12 = sshra.s32 %s2297_s7, 4  ;;  %s2754_s29 = scalar_lea.hbm %s3639_s5, 16  ;;  %s2749_s12 = int_to_ptr.hbm [resolvable:$true] %s2748_s12 }
  0x4d   : > { %360 = vmatpush.msra.mxu0 %v351_v2  ;;  %2431 = vmatpush.msra.mxu3 %v351_v2  ;;  %v339_v14 = vld [vmem:[#allocation7 + $0x8] sm:$0xff]  ;;  %v338_v15 = vld [vmem:[#allocation7] sm:$0xff]  ;;  %v2997_v16 = vld [vmem:[%s2976_s16] sm:$0xff]  ;;  %s2750_s14 = scalar_lea.hbm %s2749_s12, 8  ;;  %p2755_p2 = scmp.lt.s32.totalorder %s2749_s12, %s3639_s5 }
  0x4e   : > { %2430 = vmatpush.msra.mxu2 %v351_v2  ;;  %2429 = vmatpush.msra.mxu1 %v351_v2  ;;  %v3001_v17 = vld [vmem:[%s2976_s16 + $0x8] sm:$0xff]  ;;  %v3005_v18 = vld [vmem:[%s2976_s16 + $0x10] sm:$0xff]  ;;  %v3009_v19 = vld [vmem:[%s2976_s16 + $0x18] sm:$0xff]  ;;  %p2751_p1 = scmp.ne.s32.totalorder %s2749_s12, %s2750_s14  ;;  %p2756_p10 = scmp.lt.s32.totalorder %s2754_s29, %s2750_s14 }
  0x4f   : > { %361 = vmatpush.msra.mxu0 %v350_v3  ;;  %2434 = vmatpush.msra.mxu3 %v350_v3  ;;  %v3013_v20 = vld [vmem:[%s2976_s16 + $0x20] sm:$0xff]  ;;  %v3017_v21 = vld [vmem:[%s2976_s16 + $0x28] sm:$0xff]  ;;  %v3021_v22 = vld [vmem:[%s2976_s16 + $0x30] sm:$0xff] }
  0x50   : > { %2433 = vmatpush.msra.mxu2 %v350_v3  ;;  %2432 = vmatpush.msra.mxu1 %v350_v3  ;;  %v3025_v23 = vld [vmem:[%s2976_s16 + $0x38] sm:$0xff]  ;;  %v3029_v24 = vld [vmem:[%s2976_s16 + $0x40] sm:$0xff]  ;;  %v3033_v25 = vld [vmem:[%s2976_s16 + $0x48] sm:$0xff]  ;;  %p2752_p4 = pnand %p2751_p1, %p2917_p7  ;;  %p2757_p11 = por %p2756_p10, %p2755_p2 }
  0x51   : > { %362 = vmatpush.msra.mxu0 %v349_v4  ;;  %2437 = vmatpush.msra.mxu3 %v349_v4  ;;  %v3037_v26 = vld [vmem:[%s2976_s16 + $0x50] sm:$0xff]  ;;  %v3041_v27 = vld [vmem:[%s2976_s16 + $0x58] sm:$0xff]  ;;  %v3045_v28 = vld [vmem:[%s2976_s16 + $0x60] sm:$0xff] }
  0x52   : > { %2436 = vmatpush.msra.mxu2 %v349_v4  ;;  %2435 = vmatpush.msra.mxu1 %v349_v4  ;;  %v3049_v29 = vld [vmem:[%s2976_s16 + $0x68] sm:$0xff]  ;;  %v334_v30 = vld [vmem:[%s2976_s16 + $0xe0] sm:$0xff]  ;;  %v3054_v31 = vld [vmem:[%s2976_s16 + $0x70] sm:$0xff]  ;;  %p2753_p8 = pneg %p2752_p4 }
  0x53   : > { %363 = vmatpush.msra.mxu0 %v348_v5  ;;  %2440 = vmatpush.msra.mxu3 %v348_v5  ;;  %v335_v32 = vld [vmem:[%s2976_s16 + $0xe8] sm:$0xff]  ;;  %v3060_v34 = vld [vmem:[%s2976_s16 + $0x78] sm:$0xff]  ;;  %v336_v35 = vld [vmem:[%s2976_s16 + $0xf0] sm:$0xff] }
  0x54   : > { %2439 = vmatpush.msra.mxu2 %v348_v5  ;;  %2438 = vmatpush.msra.mxu1 %v348_v5  ;;  %v331_v33 = vld [vmem:[%s2976_s16 + $0xc8] sm:$0xff]  ;;  %v332_v36 = vld [vmem:[%s2976_s16 + $0xd0] sm:$0xff]  ;;  %v3066_v38 = vld [vmem:[%s2976_s16 + $0x80] sm:$0xff]  ;;  %p2758_p9 = pnand %p2757_p11, %p2753_p8 }
  0x55   : > { %364 = vmatpush.msra.mxu0 %v347_v6  ;;  %2443 = vmatpush.msra.mxu3 %v347_v6  ;;  %v337_v39 = vld [vmem:[%s2976_s16 + $0xf8] sm:$0xff]  ;;  %v3072_v42 = vld [vmem:[%s2976_s16 + $0x88] sm:$0xff]  ;;  %v3080_v45 = vld [vmem:[%s2976_s16 + $0x90] sm:$0xff] }
  0x56   : > { %2442 = vmatpush.msra.mxu2 %v347_v6  ;;  %2441 = vmatpush.msra.mxu1 %v347_v6  ;;  %v333_v40 = vld [vmem:[%s2976_s16 + $0xd8] sm:$0xff]  ;;  %v3086_v46 = vld [vmem:[%s3637_s3] ss:$0 sm:$0xff]  ;;  %v3102_v59 = vld [vmem:[%s2976_s16 + $0xa8] sm:$0xff] }
  0x57   : > { %365 = vmatpush.msra.mxu0 %v346_v7  ;;  %2446 = vmatpush.msra.mxu3 %v346_v7  ;;  %v3076_v43 = vld [vmem:[%s2976_s16 + $0xb8] sm:$0xff]  ;;  %v3096_v53 = vld [vmem:[%s2976_s16 + $0xa0] sm:$0xff]  ;;  %v3111_v0 = vld [vmem:[%s2976_s16 + $0xb0] sm:$0xff] }
  0x58   : > { %2445 = vmatpush.msra.mxu2 %v346_v7  ;;  %2444 = vmatpush.msra.mxu1 %v346_v7  ;;  %v3089_v48 = vld [vmem:[%s2976_s16 + $0x98] sm:$0xff]  ;;  %v330_v57 = vld [vmem:[%s2976_s16 + $0xc0] sm:$0xff] }
  0x59   : > { %366 = vmatpush.msra.mxu0 %v345_v8  ;;  %2449 = vmatpush.msra.mxu3 %v345_v8  ;;  %v3108_v62 = vld [vmem:[%s3638_s4] sm:$0x1] }
  0x5a   : > { %2448 = vmatpush.msra.mxu2 %v345_v8  ;;  %2447 = vmatpush.msra.mxu1 %v345_v8 }
  0x5b   : > { %367 = vmatpush.msra.mxu0 %v344_v9  ;;  %2452 = vmatpush.msra.mxu3 %v344_v9 }
  0x5c   : > { %2451 = vmatpush.msra.mxu2 %v344_v9  ;;  %2450 = vmatpush.msra.mxu1 %v344_v9 }
  0x5d   : > { %368 = vmatpush.msra.mxu0 %v343_v10  ;;  %2455 = vmatpush.msra.mxu3 %v343_v10 }
  0x5e   : > { %2454 = vmatpush.msra.mxu2 %v343_v10  ;;  %2453 = vmatpush.msra.mxu1 %v343_v10 }
  0x5f   : > { %369 = vmatpush.msra.mxu0 %v342_v11  ;;  %2458 = vmatpush.msra.mxu3 %v342_v11 }
  0x60   : > { %2457 = vmatpush.msra.mxu2 %v342_v11  ;;  %2456 = vmatpush.msra.mxu1 %v342_v11 }
  0x61   : > { %370 = vmatpush.msra.mxu0 %v341_v12  ;;  %2461 = vmatpush.msra.mxu3 %v341_v12 }
  0x62   : > { %2460 = vmatpush.msra.mxu2 %v341_v12  ;;  %2459 = vmatpush.msra.mxu1 %v341_v12 }
  0x63   : > { %371 = vmatpush.msra.mxu0 %v340_v13  ;;  %2464 = vmatpush.msra.mxu3 %v340_v13 }
  0x64   : > { %2463 = vmatpush.msra.mxu2 %v340_v13  ;;  %2462 = vmatpush.msra.mxu1 %v340_v13 }
  0x65   : > { %372 = vmatpush.msra.mxu0 %v339_v14  ;;  %2467 = vmatpush.msra.mxu3 %v339_v14 }
  0x66   : > { %2466 = vmatpush.msra.mxu2 %v339_v14  ;;  %2465 = vmatpush.msra.mxu1 %v339_v14 }
  0x67   : > { %373 = vmatpush.msra.mxu0 %v338_v15  ;;  %2470 = vmatpush.msra.mxu3 %v338_v15 }
  0x68   : > { %374 = vmatmul.f32.vlgmr.msra.gmra.mxu0 %v2997_v16  ;;  %2469 = vmatpush.msra.mxu2 %v338_v15 }
  0x69   : > { %2468 = vmatpush.msra.mxu1 %v338_v15  ;;  %458 = vmatmul.f32.vlgmr.msra.gmra.mxu3 %v334_v30 }
  0x6a   : > { %449 = vmatmul.f32.vlgmr.msra.gmra.mxu2 %v331_v33  ;;  %443 = vmatmul.f32.vlgmr.msra.gmra.mxu1 %v3076_v43 }
  0x70   : > { %377 = vmatmul.f32.gmra.mxu0 %v3001_v17 }
  0x71   : > { %461 = vmatmul.f32.gmra.mxu3 %v335_v32 }
  0x72   : > { %452 = vmatmul.f32.gmra.mxu2 %v332_v36  ;;  %446 = vmatmul.f32.gmra.mxu1 %v330_v57 }
  0x78   : > { %380 = vmatmul.f32.gmra.mxu0 %v3005_v18 }
  0x79   : > { %464 = vmatmul.f32.gmra.mxu3 %v336_v35 }
  0x7a   : > { %455 = vmatmul.f32.gmra.mxu2 %v333_v40 }
  0x80   : > { %383 = vmatmul.f32.gmra.mxu0 %v3009_v19 }
  0x81   : > { %467 = vmatmul.f32.gmra.mxu3 %v337_v39 }
  0x88   : > { %386 = vmatmul.f32.gmra.mxu0 %v3013_v20 }
  0x90   : > { %389 = vmatmul.f32.gmra.mxu0 %v3017_v21 }
  0x98   : > { %392 = vmatmul.f32.gmra.mxu0 %v3021_v22 }
  0xa0   : > { %395 = vmatmul.f32.gmra.mxu0 %v3025_v23 }
  0xa8   : > { %398 = vmatmul.f32.gmra.mxu0 %v3029_v24 }
  0xb0   : > { %401 = vmatmul.f32.gmra.mxu0 %v3033_v25 }
  0xb8   : > { %404 = vmatmul.f32.gmra.mxu0 %v3037_v26 }
  0xc0   : > { %407 = vmatmul.f32.gmra.mxu0 %v3041_v27 }
  0xc8   : > { %410 = vmatmul.f32.gmra.mxu0 %v3045_v28 }
  0xd0   : > { %413 = vmatmul.f32.gmra.mxu0 %v3049_v29 }
  0xd8   : > { %416 = vmatmul.f32.gmra.mxu0 %v3054_v31 }
  0xe0   : > { %419 = vmatmul.f32.gmra.mxu0 %v3060_v34 }
  0xe5   : > { %v375_v37 = vpop.f32.mrf.mxu0 }
  0xe6   : > { %v376_v55 = vadd.f32 %v3086_v46, %v375_v37 }
  0xe8   : > { %422 = vmatmul.f32.gmra.mxu0 %v3066_v38 }
  0xed   : > { %v378_v41 = vpop.f32.mrf.mxu0 }
  0xee   : > { %v379_v51 = vadd.f32 %v3086_v46, %v378_v41 }
  0xf0   : > { %425 = vmatmul.f32.gmra.mxu0 %v3072_v42 }
  0xf5   : > { %v381_v44 = vpop.f32.mrf.mxu0 }
  0xf6   : > { %v382_v50 = vadd.f32 %v3086_v46, %v381_v44 }
  0xf8   : > { %428 = vmatmul.f32.gmra.mxu0 %v3080_v45 }
  0xfd   : > { %v384_v47 = vpop.f32.mrf.mxu0 }
  0xfe   : > { %v385_v49 = vadd.f32 %v3086_v46, %v384_v47 }
 0x100   : > { %2540 = vtanh.f32 %v385_v49  ;;  %431 = vmatmul.f32.gmra.mxu0 %v3089_v48  ;;  %v450_v49 = vpop.f32.mrf.mxu2 }
 0x101   : > { %2542 = vtanh.f32 %v382_v50 }
 0x102   : > { %2544 = vtanh.f32 %v379_v51 }
 0x103   : > { %2546 = vtanh.f32 %v376_v55  ;;  %v3128_v55 = vpop.f32.mrf.mxu3 }
 0x105   : > { %v387_v52 = vpop.f32.mrf.mxu0 }
 0x106   : > { %v2541_v54 = vpop.eup %2540  ;;  %v388_v7 = vadd.f32 %v3086_v46, %v387_v52 }
 0x107   : > { %516 = vmatpush.xpose.msrb.mxu1 %v2541_v54  ;;  %v2543_v56 = vpop.eup %2542 }
 0x108   : > { %434 = vmatmul.f32.gmra.mxu0 %v3096_v53  ;;  %v2545_v60 = vpop.eup %2544 }
 0x109   : > { %v2547_v61 = vpop.eup %2546 }
 0x10b   : > { %517 = vmatpush.xpose.msrb.mxu1 %v2543_v56  ;;  %v453_v56 = vpop.f32.mrf.mxu2 }
 0x10d   : > { %v390_v58 = vpop.f32.mrf.mxu0 }
 0x10e   : > { %v391_v4 = vadd.f32 %v3086_v46, %v390_v58 }
 0x10f   : > { %518 = vmatpush.xpose.msrb.mxu1 %v2545_v60 }
 0x110   : > { %437 = vmatmul.f32.gmra.mxu0 %v3102_v59 }
 0x113   : > { %519 = vmatpush.xpose.msrb.mxu1 %v2547_v61 }
 0x115   : > { %v393_v63 = vpop.f32.mrf.mxu0 }
 0x116   : > { %520 = vmatmul.f32.vlgmr.msrb.gmra.mxu1 %v3108_v62  ;;  %v394_v3 = vadd.f32 %v3086_v46, %v393_v63  ;;  %v454_v63 = vadd.f32 %v3086_v46, %v453_v56 }
 0x118   : > { %440 = vmatmul.f32.gmra.mxu0 %v3111_v0 }
 0x11d   : > { %v396_v1 = vpop.f32.mrf.mxu0 }
 0x11e   : > { %v397_v2 = vadd.f32 %v3086_v46, %v396_v1  ;;  %v456_v1 = vpop.f32.mrf.mxu2 }
 0x120   : > { %2548 = vtanh.f32 %v397_v2  ;;  %v462_v2 = vpop.f32.mrf.mxu3 }
 0x121   : > { %2550 = vtanh.f32 %v394_v3  ;;  %v457_v3 = vadd.f32 %v3086_v46, %v456_v1 }
 0x122   : > { %2552 = vtanh.f32 %v391_v4  ;;  %v444_v4 = vpop.f32.mrf.mxu1 }
 0x123   : > { %2554 = vtanh.f32 %v388_v7  ;;  %v451_v7 = vadd.f32 %v3086_v46, %v450_v49 }
 0x125   : > { %v399_v5 = vpop.f32.mrf.mxu0 }
 0x126   : > { %v2549_v6 = vpop.eup %2548  ;;  %v400_v35 = vadd.f32 %v3086_v46, %v399_v5 }
 0x127   : > { %536 = vmatpush.xpose.msrb.mxu2 %v2549_v6  ;;  %v2551_v8 = vpop.eup %2550  ;;  %v445_v6 = vadd.f32 %v3086_v46, %v444_v4  ;;  %v3161_v4 = vand.u32 4294901760, %v2997_v16 }
 0x128   : > { %v2553_v10 = vpop.eup %2552 }
 0x129   : > { %v2555_v11 = vpop.eup %2554 }
 0x12b   : > { %537 = vmatpush.xpose.msrb.mxu2 %v2551_v8 }
 0x12d   : > { %v402_v9 = vpop.f32.mrf.mxu0 }
 0x12e   : > { %v403_v30 = vadd.f32 %v3086_v46, %v402_v9 }
 0x12f   : > { %538 = vmatpush.xpose.msrb.mxu2 %v2553_v10 }
 0x133   : > { %539 = vmatpush.xpose.msrb.mxu2 %v2555_v11 }
 0x135   : > { %v405_v12 = vpop.f32.mrf.mxu0 }
 0x136   : > { %540 = vmatmul.f32.vlgmr.msrb.gmra.mxu2 %v3108_v62  ;;  %v406_v15 = vadd.f32 %v3086_v46, %v405_v12  ;;  %v465_v12 = vpop.f32.mrf.mxu3 }
 0x13d   : > { %v408_v13 = vpop.f32.mrf.mxu0 }
 0x13e   : > { %v409_v14 = vadd.f32 %v3086_v46, %v408_v13 }
 0x140   : > { %2556 = vtanh.f32 %v409_v14 }
 0x141   : > { %2558 = vtanh.f32 %v406_v15 }
 0x142   : > { %2560 = vtanh.f32 %v403_v30 }
 0x143   : > { %2562 = vtanh.f32 %v400_v35 }
 0x145   : > { %v411_v32 = vpop.f32.mrf.mxu0 }
 0x146   : > { %v2557_v33 = vpop.eup %2556  ;;  %v412_v57 = vadd.f32 %v3086_v46, %v411_v32 }
 0x147   : > { %556 = vmatpush.xpose.msrb.mxu3 %v2557_v33  ;;  %v2559_v36 = vpop.eup %2558  ;;  %v468_v33 = vpop.f32.mrf.mxu3 }
 0x148   : > { %v2561_v39 = vpop.eup %2560 }
 0x149   : > { %v2563_v40 = vpop.eup %2562 }
 0x14b   : > { %557 = vmatpush.xpose.msrb.mxu3 %v2559_v36 }
 0x14d   : > { %v414_v37 = vpop.f32.mrf.mxu0 }
 0x14e   : > { %v415_v51 = vadd.f32 %v3086_v46, %v414_v37 }
 0x14f   : > { %558 = vmatpush.xpose.msrb.mxu3 %v2561_v39  ;;  %v469_v39 = vadd.f32 %v3086_v46, %v468_v33  ;;  %v969_v33 = vand.u32 4294901760, %v3017_v21 }
 0x153   : > { %559 = vmatpush.xpose.msrb.mxu3 %v2563_v40  ;;  %v447_v40 = vpop.f32.mrf.mxu1 }
 0x155   : > { %v417_v41 = vpop.f32.mrf.mxu0 }
 0x156   : > { %560 = vmatmul.f32.vlgmr.msrb.gmra.mxu3 %v3108_v62  ;;  %v418_v50 = vadd.f32 %v3086_v46, %v417_v41 }
 0x15d   : > { %v420_v44 = vpop.f32.mrf.mxu0 }
 0x15e   : > { %v421_v47 = vadd.f32 %v3086_v46, %v420_v44  ;;  %v448_v44 = vadd.f32 %v3086_v46, %v447_v40 }
 0x160   : > { %2564 = vtanh.f32 %v421_v47  ;;  %v466_v47 = vadd.f32 %v3086_v46, %v465_v12 }
 0x161   : > { %2566 = vtanh.f32 %v418_v50 }
 0x162   : > { %2568 = vtanh.f32 %v415_v51  ;;  %v3144_v51 = vand.u32 4294901760, %v3009_v19 }
 0x163   : > { %2570 = vtanh.f32 %v412_v57  ;;  %v3148_v57 = vand.u32 4294901760, %v3005_v18 }
 0x164   : > { %2572 = vtanh.f32 %v457_v3 }
 0x165   : > { %v423_v52 = vpop.f32.mrf.mxu0  ;;  %2574 = vtanh.f32 %v454_v63  ;;  %v460_v63 = vadd.f32 %v3086_v46, %v3128_v55 }
 0x166   : > { %v2565_v54 = vpop.eup %2564  ;;  %2576 = vtanh.f32 %v445_v6  ;;  %v424_v37 = vadd.f32 %v3086_v46, %v423_v52  ;;  %v463_v52 = vadd.f32 %v3086_v46, %v462_v2 }
 0x167   : > { %576 = vmatpush.xpose.msra.mxu1 %v2565_v54  ;;  %v2567_v58 = vpop.eup %2566  ;;  %2578 = vtanh.f32 %v451_v7 }
 0x168   : > { %v2569_v61 = vpop.eup %2568 }
 0x169   : > { %v2571_v5 = vpop.eup %2570 }
 0x16a   : > { %v2573_v9 = vpop.eup %2572 }
 0x16b   : > { %577 = vmatpush.xpose.msra.mxu1 %v2567_v58  ;;  %v2575_v10 = vpop.eup %2574 }
 0x16c   : > { %v2577_v11 = vpop.eup %2576 }
 0x16d   : > { %v426_v60 = vpop.f32.mrf.mxu0  ;;  %616 = vmatpush.xpose.msra.mxu3 %v2577_v11  ;;  %v2579_v14 = vpop.eup %2578 }
 0x16e   : > { %v427_v32 = vadd.f32 %v3086_v46, %v426_v60  ;;  %v3152_v60 = vsub.f32 %v3009_v19, %v3144_v51  ;;  %v3165_v19 = vsub.f32 %v3005_v18, %v3148_v57 }
 0x16f   : > { %578 = vmatpush.xpose.msra.mxu1 %v2569_v61  ;;  %v3155_v61 = vand.u32 4294901760, %v3001_v17 }
 0x171   : > { %v3172_v6 = vsub.f32 %v3001_v17, %v3155_v61 }
 0x173   : > { %579 = vmatpush.xpose.msra.mxu1 %v2571_v5 }
 0x175   : > { %v429_v8 = vpop.f32.mrf.mxu0 }
 0x176   : > { %580 = vmatmul.f32.vlgmr.msra.gmra.mxu1 %v3108_v62  ;;  %v430_v30 = vadd.f32 %v3086_v46, %v429_v8  ;;  %v3178_v8 = vsub.f32 %v2997_v16, %v3161_v4  ;;  %v965_v16 = vand.u32 4294901760, %v3025_v23 }
 0x177   : > { %636 = vmatpush.xpose.msrb.mxu1 %v2573_v9  ;;  %v680_v9 = vld [vmem:[%s2986_s23] sm:$0x1] }
 0x17b   : > { %637 = vmatpush.xpose.msrb.mxu1 %v2575_v10 }
 0x17d   : > { %v432_v13 = vpop.f32.mrf.mxu0 }
 0x17e   : > { %v433_v15 = vadd.f32 %v3086_v46, %v432_v13 }
 0x17f   : > { %638 = vmatpush.xpose.msrb.mxu1 %v2579_v14 }
 0x180   : > { %2580 = vtanh.f32 %v433_v15  ;;  %v967_v15 = vand.u32 4294901760, %v3021_v22 }
 0x181   : > { %2582 = vtanh.f32 %v430_v30 }
 0x182   : > { %2584 = vtanh.f32 %v427_v32 }
 0x183   : > { %2586 = vtanh.f32 %v424_v37  ;;  %v3206_v37 = vsub.f32 %v3021_v22, %v967_v15 }
 0x184   : > { %2588 = vtanh.f32 %v469_v39 }
 0x185   : > { %v435_v35 = vpop.f32.mrf.mxu0  ;;  %2590 = vtanh.f32 %v448_v44  ;;  %v814_v44 = vand.u32 4294901760, %v3165_v19 }
 0x186   : > { %v2581_v36 = vpop.eup %2580  ;;  %2592 = vtanh.f32 %v466_v47  ;;  %v436_v17 = vadd.f32 %v3086_v46, %v435_v35  ;;  %v3200_v35 = vsub.f32 %v3025_v23, %v965_v16  ;;  %v971_v23 = vand.u32 4294901760, %v3013_v20 }
 0x187   : > { %596 = vmatpush.xpose.msra.mxu2 %v2581_v36  ;;  %v2583_v41 = vpop.eup %2582  ;;  %2594 = vtanh.f32 %v463_v52  ;;  %v808_v36 = vand.u32 4294901760, %v3152_v60  ;;  %v820_v47 = vand.u32 4294901760, %v3172_v6 }
 0x188   : > { %v2585_v50 = vpop.eup %2584 }
 0x189   : > { %v2587_v54 = vpop.eup %2586  ;;  %v809_v22 = vsub.f32 %v3152_v60, %v808_v36 }
 0x18a   : > { %v2589_v56 = vpop.eup %2588 }
 0x18b   : > { %597 = vmatpush.xpose.msra.mxu2 %v2583_v41  ;;  %v2591_v58 = vpop.eup %2590  ;;  %v3212_v41 = vsub.f32 %v3017_v21, %v969_v33  ;;  %v810_v52 = vand.u32 4294901760, %v809_v22 }
 0x18c   : > { %639 = vmatpush.xpose.msrb.mxu1 %v2591_v58  ;;  %v2593_v3 = vpop.eup %2592 }
 0x18d   : > { %v438_v49 = vpop.f32.mrf.mxu0  ;;  %v2595_v18 = vpop.eup %2594 }
 0x18e   : > { %v439_v7 = vadd.f32 %v3086_v46, %v438_v49  ;;  %v3223_v49 = vsub.f32 %v3013_v20, %v971_v23 }
 0x18f   : > { %598 = vmatpush.xpose.msra.mxu2 %v2585_v50  ;;  %640 = vmatmul.f32.vlgmr.msrb.gmra.mxu1 %v3108_v62  ;;  %v815_v50 = vsub.f32 %v3165_v19, %v814_v44 }
 0x190   : > { %849 = vmatpush.msra.mxu1 %v3152_v60  ;;  %v996_v60 = vand.u32 4294901760, %v3200_v35 }
 0x191   : > { %v816_v20 = vand.u32 4294901760, %v815_v50 }
 0x192   : > { %852 = vmatpush.msra.mxu1 %v3165_v19 }
 0x193   : > { %599 = vmatpush.xpose.msra.mxu2 %v2587_v54  ;;  %v521_v1 = vpop.f32.mrf.mxu1  ;;  %v821_v54 = vsub.f32 %v3172_v6, %v820_v47 }
 0x194   : > { %v664_v2 = vmul.f32 1.442695, %v521_v1  ;;  %855 = vmatpush.msra.mxu1 %v3172_v6  ;;  %v997_v1 = vsub.f32 %v3200_v35, %v996_v60 }
 0x195   : > { %v441_v5 = vpop.f32.mrf.mxu0 }
 0x196   : > { %v442_v55 = vadd.f32 %v3086_v46, %v441_v5  ;;  %600 = vmatmul.f32.vlgmr.msra.gmra.mxu2 %v3108_v62  ;;  %2596 = vpow2.f32 %v664_v2  ;;  %858 = vmatpush.msra.mxu1 %v3178_v8  ;;  %v1002_v2 = vand.u32 4294901760, %v3206_v37  ;;  %v998_v19 = vand.u32 4294901760, %v997_v1 }
 0x197   : > { %656 = vmatpush.xpose.msrb.mxu2 %v2589_v56  ;;  %2598 = vtanh.f32 %v460_v63 }
 0x198   : > { %2600 = vtanh.f32 %v442_v55  ;;  %938 = vmatpush.msrb.mxu1 %v3144_v51  ;;  %v1003_v5 = vsub.f32 %v3206_v37, %v1002_v2  ;;  %v1008_v55 = vand.u32 4294901760, %v3212_v41 }
 0x199   : > { %2602 = vtanh.f32 %v439_v7 }
 0x19a   : > { %940 = vmatpush.msrb.mxu1 %v3148_v57  ;;  %2604 = vtanh.f32 %v436_v17  ;;  %v1004_v6 = vand.u32 4294901760, %v1003_v5  ;;  %v1009_v7 = vsub.f32 %v3212_v41, %v1008_v55  ;;  %v3254_v17 = vand.u32 4294901760, %v3033_v25 }
 0x19b   : > { %657 = vmatpush.xpose.msrb.mxu2 %v2593_v3  ;;  %v3239_v3 = vand.u32 4294901760, %v3041_v27 }
 0x19c   : > { %v2597_v10 = vpop.eup %2596  ;;  %942 = vmatpush.msrb.mxu1 %v3155_v61 }
 0x19d   : > { %v2599_v11 = vpop.eup %2598  ;;  %v3185_v12 = vmul.f32 %v2597_v10, %v680_v9  ;;  %v1183_v9 = vsub.f32 %v3041_v27, %v3239_v3  ;;  %v681_v10 = vld [vmem:[%s2986_s23 + $0x1] sm:$0x1]  ;;  %v1195_v27 = vsub.f32 %v3033_v25, %v3254_v17 }
 0x19e   : > { %v2601_v13 = vpop.eup %2600  ;;  %944 = vmatpush.msrb.mxu1 %v3161_v4 }
 0x19f   : > { %658 = vmatpush.xpose.msrb.mxu2 %v2595_v18  ;;  %617 = vmatpush.xpose.msra.mxu3 %v2601_v13  ;;  %v763_v14 = vsel %vm761_vm0, %v3185_v12, 0  ;;  %v2603_v30 = vpop.eup %2602  ;;  %v1014_v18 = vand.u32 4294901760, %v3223_v49 }
 0x1a0   : > { %v3191_v46 = vand.u32 4294901760, %v763_v14  ;;  %v2605_v39 = vpop.eup %2604 }
 0x1a2   : > { %v786_v32 = vsub.f32 %v763_v14, %v3191_v46 }
 0x1a3   : > { %659 = vmatpush.xpose.msrb.mxu2 %v2599_v11  ;;  %618 = vmatpush.xpose.msra.mxu3 %v2603_v30  ;;  %v1010_v11 = vand.u32 4294901760, %v1009_v7  ;;  %v1184_v30 = vand.u32 4294901760, %v1183_v9 }
 0x1a4   : > { %861 = vmatmul.f32.vlgmr.msra.gmra.mxu1 %v786_v32  ;;  %v787_v40 = vand.u32 4294901760, %v786_v32 }
 0x1a5   : > { %1037 = vmatpush.msra.mxu1 %v3200_v35  ;;  %v3264_v35 = vand.u32 4294901760, %v3029_v24 }
 0x1a6   : > { %660 = vmatmul.f32.vlgmr.msrb.gmra.mxu2 %v3108_v62  ;;  %v788_v21 = vsub.f32 %v786_v32, %v787_v40 }
 0x1a7   : > { %878 = vmatpush.msra.mxu2 %v3144_v51  ;;  %619 = vmatpush.xpose.msra.mxu3 %v2605_v39  ;;  %v1196_v39 = vand.u32 4294901760, %v1195_v27  ;;  %v1201_v25 = vsub.f32 %v3029_v24, %v3264_v35 }
 0x1a8   : > { %1040 = vmatpush.msra.mxu1 %v3206_v37 }
 0x1a9   : > { %880 = vmatpush.msra.mxu2 %v3148_v57  ;;  %v1197_v22 = vsub.f32 %v1195_v27, %v1196_v39 }
 0x1aa   : > { %1043 = vmatpush.msra.mxu1 %v3212_v41  ;;  %620 = vmatmul.f32.vlgmr.msra.gmra.mxu3 %v3108_v62  ;;  %v789_v62 = vand.u32 4294901760, %v788_v21 }
 0x1ab   : > { %882 = vmatpush.msra.mxu2 %v3155_v61  ;;  %778 = vmatpush.msrb.mxu3 %v3144_v51  ;;  %v826_v51 = vand.u32 4294901760, %v3178_v8  ;;  %v1198_v50 = vand.u32 4294901760, %v1197_v22 }
 0x1ac   : > { %946 = vmatmul.f32.vlgmr.msrb.gmra.mxu1 %v3191_v46 }
 0x1ad   : > { %884 = vmatpush.msra.mxu2 %v3161_v4  ;;  %780 = vmatpush.msrb.mxu3 %v3148_v57  ;;  %v827_v56 = vsub.f32 %v3178_v8, %v826_v51  ;;  %v822_v57 = vand.u32 4294901760, %v821_v54  ;;  %v3248_v8 = vand.u32 4294901760, %v3037_v26  ;;  %v3278_v54 = vand.u32 4294901760, %v3054_v31 }
 0x1ae   : > { %888 = vmatmul.f32.vlgmr.msra.gmra.mxu2 %v787_v40  ;;  %1046 = vmatpush.msra.mxu1 %v3223_v49 }
 0x1af   : > { %966 = vmatpush.msrb.mxu2 %v965_v16  ;;  %782 = vmatpush.msrb.mxu3 %v3155_v61  ;;  %v828_v58 = vand.u32 4294901760, %v827_v56  ;;  %v3285_v56 = vand.u32 4294901760, %v3049_v29 }
 0x1b0   : > { %1126 = vmatpush.msrb.mxu1 %v965_v16 }
 0x1b1   : > { %968 = vmatpush.msrb.mxu2 %v967_v15  ;;  %784 = vmatpush.msrb.mxu3 %v3161_v4  ;;  %v697_v4 = vsel %vm696_vm1, %v3185_v12, 0.0  ;;  %v1015_v12 = vsub.f32 %v3223_v49, %v1014_v18  ;;  %v1202_v49 = vand.u32 4294901760, %v1201_v25 }
 0x1b2   : > { %1128 = vmatpush.msrb.mxu1 %v967_v15  ;;  %790 = vmatmul.f32.vlgmr.msrb.gmra.mxu3 %v789_v62 }
 0x1b3   : > { %970 = vmatpush.msrb.mxu2 %v969_v33  ;;  %811 = vmatpush.msra.mxu3 %v810_v52  ;;  %v1016_v14 = vand.u32 4294901760, %v1015_v12  ;;  %v3272_v52 = vand.u32 4294901760, %v3060_v34 }
 0x1b4   : > { %1130 = vmatpush.msrb.mxu1 %v969_v33  ;;  %698 = vadd.xlane.f32.xlu0 %v697_v4 }
 0x1b5   : > { %972 = vmatpush.msrb.mxu2 %v971_v23  ;;  %817 = vmatpush.msra.mxu3 %v816_v20  ;;  %v1371_v62 = vsub.f32 %v3060_v34, %v3272_v52  ;;  %v1377_v34 = vsub.f32 %v3054_v31, %v3278_v54 }
 0x1b6   : > { %1132 = vmatpush.msrb.mxu1 %v971_v23 }
 0x1b7   : > { %1066 = vmatpush.msra.mxu2 %v965_v16  ;;  %823 = vmatpush.msra.mxu3 %v822_v57 }
 0x1b9   : > { %1068 = vmatpush.msra.mxu2 %v967_v15  ;;  %829 = vmatpush.msra.mxu3 %v828_v58  ;;  %v541_v61 = vpop.f32.mrf.mxu2  ;;  %v1189_v15 = vsub.f32 %v3037_v26, %v3248_v8  ;;  %v3290_v58 = vand.u32 4294901760, %v3045_v28 }
 0x1ba   : > { %v666_v63 = vmul.f32 1.442695, %v541_v61  ;;  %831 = vmatmul.f32.vlgmr.msra.gmra.mxu3 %v3191_v46  ;;  %v1383_v61 = vsub.f32 %v3049_v29, %v3285_v56 }
 0x1bb   : > { %1070 = vmatpush.msra.mxu2 %v969_v33  ;;  %907 = vmatpush.msrb.mxu3 %v808_v36  ;;  %v1190_v37 = vand.u32 4294901760, %v1189_v15  ;;  %v1389_v1 = vsub.f32 %v3045_v28, %v3290_v58 }
 0x1bc   : > { %2606 = vpow2.f32 %v666_v63  ;;  %v682_v63 = vld [vmem:[%s2986_s23 + $0x2] sm:$0x1] }
 0x1bd   : > { %1072 = vmatpush.msra.mxu2 %v971_v23  ;;  %911 = vmatpush.msrb.mxu3 %v814_v44  ;;  %v1191_v23 = vsub.f32 %v1189_v15, %v1190_v37  ;;  %v1390_v29 = vand.u32 4294901760, %v1389_v1 }
 0x1bf   : > { %915 = vmatpush.msrb.mxu3 %v820_v47  ;;  %v1192_v21 = vand.u32 4294901760, %v1191_v23 }
 0x1c1   : > { %919 = vmatpush.msrb.mxu3 %v826_v51  ;;  %v1203_v51 = vsub.f32 %v1201_v25, %v1202_v49 }
 0x1c2   : > { %v2607_v13 = vpop.eup %2606  ;;  %921 = vmatmul.f32.vlgmr.msrb.gmra.mxu3 %v3191_v46  ;;  %v1185_v46 = vsub.f32 %v1183_v9, %v1184_v30 }
 0x1c3   : > { %999 = vmatpush.msra.mxu3 %v998_v19  ;;  %v689_v16 = vmul.f32 %v2607_v13, %v681_v10  ;;  %v1204_v24 = vand.u32 4294901760, %v1203_v51  ;;  %v1384_v19 = vand.u32 4294901760, %v1383_v61  ;;  %v1391_v10 = vsub.f32 %v1389_v1, %v1390_v29 }
 0x1c4   : > { %v1186_v44 = vand.u32 4294901760, %v1185_v46 }
 0x1c5   : > { %1005 = vmatpush.msra.mxu3 %v1004_v6  ;;  %v951_v32 = vsel %vm761_vm0, %v689_v16, 0  ;;  %v700_v40 = vsel %vm696_vm1, %v689_v16, 0.0  ;;  %v1392_v12 = vand.u32 4294901760, %v1391_v10 }
 0x1c6   : > { %v973_v33 = vand.u32 4294901760, %v951_v32  ;;  %701 = vadd.xlane.f32.xlu0 %v700_v40 }
 0x1c7   : > { %1011 = vmatpush.msra.mxu3 %v1010_v11 }
 0x1c8   : > { %v974_v36 = vsub.f32 %v951_v32, %v973_v33 }
 0x1c9   : > { %1017 = vmatpush.msra.mxu3 %v1016_v14  ;;  %v3305_v14 = vand.u32 4294901760, %v3089_v48 }
 0x1ca   : > { %v975_v26 = vand.u32 4294901760, %v974_v36  ;;  %1019 = vmatmul.f32.vlgmr.msra.gmra.mxu3 %v973_v33  ;;  %1049 = vmatmul.f32.vlgmr.msra.gmra.mxu1 %v974_v36 }
 0x1cb   : > { %1095 = vmatpush.msrb.mxu3 %v996_v60  ;;  %1225 = vmatpush.msra.mxu1 %v1183_v9  ;;  %v1372_v60 = vand.u32 4294901760, %v1371_v62  ;;  %v1559_v32 = vsub.f32 %v3089_v48, %v3305_v14  ;;  %v3326_v48 = vand.u32 4294901760, %v3066_v38 }
 0x1cc   : > { %v976_v41 = vsub.f32 %v974_v36, %v975_v26 }
 0x1cd   : > { %1099 = vmatpush.msrb.mxu3 %v1002_v2  ;;  %1228 = vmatpush.msra.mxu1 %v1189_v15  ;;  %v1373_v2 = vsub.f32 %v1371_v62, %v1372_v60  ;;  %v1560_v46 = vand.u32 4294901760, %v1559_v32 }
 0x1ce   : > { %v977_v47 = vand.u32 4294901760, %v976_v41 }
 0x1cf   : > { %1103 = vmatpush.msrb.mxu3 %v1008_v55  ;;  %1231 = vmatpush.msra.mxu1 %v1195_v27  ;;  %v1374_v55 = vand.u32 4294901760, %v1373_v2  ;;  %v3313_v27 = vand.u32 4294901760, %v3080_v45  ;;  %v3365_v2 = vand.u32 4294901760, %v3096_v53 }
 0x1d0   : > { %978 = vmatmul.f32.vlgmr.msrb.gmra.mxu2 %v977_v47 }
 0x1d1   : > { %1107 = vmatpush.msrb.mxu3 %v1014_v18  ;;  %1154 = vmatpush.msrb.mxu2 %v3239_v3  ;;  %v1385_v18 = vsub.f32 %v1383_v61, %v1384_v19  ;;  %v1565_v36 = vsub.f32 %v3080_v45, %v3313_v27 }
 0x1d2   : > { %1109 = vmatmul.f32.vlgmr.msrb.gmra.mxu3 %v973_v33  ;;  %1134 = vmatmul.f32.vlgmr.msrb.gmra.mxu1 %v973_v33 }
 0x1d3   : > { %1187 = vmatpush.msra.mxu3 %v1186_v44  ;;  %1156 = vmatpush.msrb.mxu2 %v3248_v8  ;;  %v1386_v28 = vand.u32 4294901760, %v1385_v18  ;;  %v1566_v40 = vand.u32 4294901760, %v1565_v36 }
 0x1d4   : > { %1234 = vmatpush.msra.mxu1 %v1201_v25 }
 0x1d5   : > { %1193 = vmatpush.msra.mxu3 %v1192_v21  ;;  %1158 = vmatpush.msrb.mxu2 %v3254_v17  ;;  %v1567_v23 = vsub.f32 %v1565_v36, %v1566_v40 }
 0x1d6   : > { %1314 = vmatpush.msrb.mxu1 %v3239_v3 }
 0x1d7   : > { %1199 = vmatpush.msra.mxu3 %v1198_v50  ;;  %1160 = vmatpush.msrb.mxu2 %v3264_v35 }
 0x1d8   : > { %1076 = vmatmul.f32.vlgmr.msra.gmra.mxu2 %v975_v26  ;;  %1316 = vmatpush.msrb.mxu1 %v3248_v8  ;;  %v1577_v26 = vsub.f32 %v3066_v38, %v3326_v48 }
 0x1d9   : > { %1205 = vmatpush.msra.mxu3 %v1204_v24  ;;  %v561_v20 = vpop.f32.mrf.mxu3  ;;  %1254 = vmatpush.msra.mxu2 %v3239_v3  ;;  %v1378_v3 = vand.u32 4294901760, %v1377_v34 }
 0x1da   : > { %v668_v57 = vmul.f32 1.442695, %v561_v20  ;;  %1318 = vmatpush.msrb.mxu1 %v3254_v17  ;;  %v1578_v50 = vand.u32 4294901760, %v1577_v26 }
 0x1db   : > { %1283 = vmatpush.msrb.mxu3 %v1184_v30  ;;  %1256 = vmatpush.msra.mxu2 %v3248_v8  ;;  %v1379_v5 = vsub.f32 %v1377_v34, %v1378_v3  ;;  %v3310_v30 = vand.u32 4294901760, %v3072_v42 }
 0x1dc   : > { %2608 = vpow2.f32 %v668_v57  ;;  %1320 = vmatpush.msrb.mxu1 %v3264_v35  ;;  %v1579_v24 = vsub.f32 %v1577_v26, %v1578_v50 }
 0x1dd   : > { %1287 = vmatpush.msrb.mxu3 %v1190_v37  ;;  %1258 = vmatpush.msra.mxu2 %v3254_v17  ;;  %v1380_v9 = vand.u32 4294901760, %v1379_v5  ;;  %v683_v37 = vld [vmem:[%s2986_s23 + $0x3] sm:$0x1]  ;;  %v3379_v5 = vsub.f32 %v3096_v53, %v3365_v2 }
 0x1df   : > { %1291 = vmatpush.msrb.mxu3 %v1196_v39  ;;  %1260 = vmatpush.msra.mxu2 %v3264_v35  ;;  %v1571_v35 = vsub.f32 %v3072_v42, %v3310_v30  ;;  %v1561_v42 = vsub.f32 %v1559_v32, %v1560_v46 }
 0x1e1   : > { %1295 = vmatpush.msrb.mxu3 %v1202_v49  ;;  %v1572_v45 = vand.u32 4294901760, %v1571_v35  ;;  %v1562_v22 = vand.u32 4294901760, %v1561_v42  ;;  %v1568_v49 = vand.u32 4294901760, %v1567_v23  ;;  %v687_v23 = vld [vmem:[%s2986_s23 + $0x7] sm:$0x1] }
 0x1e2   : > { %v2609_v4 = vpop.eup %2608 }
 0x1e3   : > { %v690_v31 = vmul.f32 %v2609_v4, %v682_v63  ;;  %v1573_v47 = vsub.f32 %v1571_v35, %v1572_v45 }
 0x1e5   : > { %v1139_v6 = vsel %vm761_vm0, %v690_v31, 0  ;;  %v703_v7 = vsel %vm696_vm1, %v690_v31, 0.0  ;;  %v1574_v38 = vand.u32 4294901760, %v1573_v47  ;;  %v686_v31 = vld [vmem:[%s2986_s23 + $0x6] sm:$0x1] }
 0x1e6   : > { %v1161_v8 = vand.u32 4294901760, %v1139_v6  ;;  %704 = vadd.xlane.f32.xlu1 %v703_v7  ;;  %v684_v7 = vld [vmem:[%s2986_s23 + $0x4] sm:$0x1] }
 0x1e8   : > { %v1162_v17 = vsub.f32 %v1139_v6, %v1161_v8  ;;  %1207 = vmatmul.f32.vlgmr.msra.gmra.mxu3 %v1161_v8 }
 0x1e9   : > { %1375 = vmatpush.msra.mxu3 %v1374_v55 }
 0x1ea   : > { %v1163_v11 = vand.u32 4294901760, %v1162_v17  ;;  %1237 = vmatmul.f32.vlgmr.msra.gmra.mxu1 %v1162_v17 }
 0x1eb   : > { %1381 = vmatpush.msra.mxu3 %v1380_v9  ;;  %1413 = vmatpush.msra.mxu1 %v1371_v62  ;;  %v1766_v9 = vand.u32 4294901760, %v3379_v5 }
 0x1ec   : > { %v1164_v13 = vsub.f32 %v1162_v17, %v1163_v11 }
 0x1ed   : > { %1387 = vmatpush.msra.mxu3 %v1386_v28  ;;  %1416 = vmatpush.msra.mxu1 %v1377_v34  ;;  %v3353_v34 = vand.u32 4294901760, %v3111_v0 }
 0x1ee   : > { %v1165_v16 = vand.u32 4294901760, %v1164_v13 }
 0x1ef   : > { %1393 = vmatpush.msra.mxu3 %v1392_v12  ;;  %1419 = vmatpush.msra.mxu1 %v1383_v61 }
 0x1f0   : > { %1166 = vmatmul.f32.vlgmr.msrb.gmra.mxu2 %v1165_v16  ;;  %1297 = vmatmul.f32.vlgmr.msrb.gmra.mxu3 %v1161_v8 }
 0x1f1   : > { %1342 = vmatpush.msrb.mxu2 %v3272_v52  ;;  %1471 = vmatpush.msrb.mxu3 %v1372_v60  ;;  %v3357_v60 = vand.u32 4294901760, %v3102_v59 }
 0x1f2   : > { %1322 = vmatmul.f32.vlgmr.msrb.gmra.mxu1 %v1161_v8 }
 0x1f3   : > { %v581_v15 = vpop.f32.mrf.mxu1  ;;  %1344 = vmatpush.msrb.mxu2 %v3278_v54  ;;  %1475 = vmatpush.msrb.mxu3 %v1378_v3  ;;  %v3369_v3 = vsub.f32 %v3111_v0, %v3353_v34 }
 0x1f4   : > { %v670_v33 = vmul.f32 1.442695, %v581_v15  ;;  %1422 = vmatpush.msra.mxu1 %v1389_v1 }
 0x1f5   : > { %1346 = vmatpush.msrb.mxu2 %v3285_v56  ;;  %1479 = vmatpush.msrb.mxu3 %v1384_v19  ;;  %v3373_v19 = vsub.f32 %v3102_v59, %v3357_v60  ;;  %v1754_v55 = vand.u32 4294901760, %v3369_v3 }
 0x1f6   : > { %2610 = vpow2.f32 %v670_v33  ;;  %1502 = vmatpush.msrb.mxu1 %v3272_v52 }
 0x1f7   : > { %1348 = vmatpush.msrb.mxu2 %v3290_v58  ;;  %1483 = vmatpush.msrb.mxu3 %v1390_v29  ;;  %v1760_v18 = vand.u32 4294901760, %v3373_v19  ;;  %v1755_v53 = vsub.f32 %v3369_v3, %v1754_v55 }
 0x1f8   : > { %1264 = vmatmul.f32.vlgmr.msra.gmra.mxu2 %v1163_v11  ;;  %1504 = vmatpush.msrb.mxu1 %v3278_v54 }
 0x1f9   : > { %1442 = vmatpush.msra.mxu2 %v3272_v52  ;;  %v1761_v11 = vsub.f32 %v3373_v19, %v1760_v18  ;;  %v1756_v16 = vand.u32 4294901760, %v1755_v53 }
 0x1fa   : > { %1506 = vmatpush.msrb.mxu1 %v3285_v56 }
 0x1fb   : > { %1444 = vmatpush.msra.mxu2 %v3278_v54  ;;  %v1580_v54 = vand.u32 4294901760, %v1579_v24  ;;  %v1762_v33 = vand.u32 4294901760, %v1761_v11 }
 0x1fc   : > { %v2611_v39 = vpop.eup %2610  ;;  %1508 = vmatpush.msrb.mxu1 %v3290_v58 }
 0x1fd   : > { %v691_v25 = vmul.f32 %v2611_v39, %v683_v37  ;;  %1446 = vmatpush.msra.mxu2 %v3285_v56  ;;  %v2638_v39 = vld [vmem:[%s2976_s16 + $0xc8] sm:$0xff] }
 0x1fe   : > { %v3416_v42 = vand.u32 4294901760, %v2638_v39 }
 0x1ff   : > { %v1327_v41 = vsel %vm761_vm0, %v691_v25, 0  ;;  %1448 = vmatpush.msra.mxu2 %v3290_v58  ;;  %v706_v44 = vsel %vm696_vm1, %v691_v25, 0.0  ;;  %v3349_v58 = vand.u32 4294901760, %v3076_v43 }
 0x200   : > { %v1349_v21 = vand.u32 4294901760, %v1327_v41  ;;  %707 = vadd.xlane.f32.xlu1 %v706_v44 }
 0x201   : > { %v3361_v61 = vsub.f32 %v3076_v43, %v3349_v58 }
 0x202   : > { %v1350_v51 = vsub.f32 %v1327_v41, %v1349_v21  ;;  %1395 = vmatmul.f32.vlgmr.msra.gmra.mxu3 %v1349_v21 }
 0x203   : > { %1563 = vmatpush.msra.mxu3 %v1562_v22  ;;  %v1748_v43 = vand.u32 4294901760, %v3361_v61  ;;  %v2639_v22 = vld [vmem:[%s2976_s16 + $0xc0] sm:$0xff] }
 0x204   : > { %v1351_v52 = vand.u32 4294901760, %v1350_v51  ;;  %1425 = vmatmul.f32.vlgmr.msra.gmra.mxu1 %v1350_v51  ;;  %v3427_v47 = vand.u32 4294901760, %v2639_v22 }
 0x205   : > { %1569 = vmatpush.msra.mxu3 %v1568_v49  ;;  %1601 = vmatpush.msra.mxu1 %v1559_v32  ;;  %v1749_v0 = vsub.f32 %v3361_v61, %v1748_v43 }
 0x206   : > { %v1352_v62 = vsub.f32 %v1350_v51, %v1351_v52 }
 0x207   : > { %1575 = vmatpush.msra.mxu3 %v1574_v38  ;;  %1604 = vmatpush.msra.mxu1 %v1565_v36  ;;  %v1750_v28 = vand.u32 4294901760, %v1749_v0  ;;  %v2637_v36 = vld [vmem:[%s2976_s16 + $0xd0] sm:$0xff] }
 0x208   : > { %v1353_v20 = vand.u32 4294901760, %v1352_v62  ;;  %v685_v62 = vld [vmem:[%s2986_s23 + $0x5] sm:$0x1] }
 0x209   : > { %1581 = vmatpush.msra.mxu3 %v1580_v54  ;;  %1607 = vmatpush.msra.mxu1 %v1571_v35 }
 0x20a   : > { %1354 = vmatmul.f32.vlgmr.msrb.gmra.mxu2 %v1353_v20  ;;  %1485 = vmatmul.f32.vlgmr.msrb.gmra.mxu3 %v1349_v21 }
 0x20b   : > { %1530 = vmatpush.msrb.mxu2 %v3305_v14  ;;  %1610 = vmatpush.msra.mxu1 %v1577_v26 }
 0x20c   : > { %1510 = vmatmul.f32.vlgmr.msrb.gmra.mxu1 %v1349_v21  ;;  %1659 = vmatpush.msrb.mxu3 %v1560_v46  ;;  %v641_v56 = vpop.f32.mrf.mxu1  ;;  %v3411_v46 = vand.u32 4294901760, %v2637_v36 }
 0x20d   : > { %1532 = vmatpush.msrb.mxu2 %v3313_v27  ;;  %1690 = vmatpush.msrb.mxu1 %v3305_v14  ;;  %v676_v57 = vmul.f32 1.442695, %v641_v56 }
 0x20e   : > { %1663 = vmatpush.msrb.mxu3 %v1566_v40  ;;  %v3424_v44 = vsub.f32 %v2637_v36, %v3411_v46 }
 0x20f   : > { %1534 = vmatpush.msrb.mxu2 %v3310_v30  ;;  %1692 = vmatpush.msrb.mxu1 %v3313_v27  ;;  %2612 = vpow2.f32 %v676_v57 }
 0x210   : > { %1667 = vmatpush.msrb.mxu3 %v1572_v45  ;;  %v1942_v54 = vand.u32 4294901760, %v3424_v44 }
 0x211   : > { %1536 = vmatpush.msrb.mxu2 %v3326_v48  ;;  %1694 = vmatpush.msrb.mxu1 %v3310_v30 }
 0x212   : > { %1452 = vmatmul.f32.vlgmr.msra.gmra.mxu2 %v1351_v52  ;;  %1671 = vmatpush.msrb.mxu3 %v1578_v50  ;;  %v3433_v50 = vsub.f32 %v2638_v39, %v3416_v42  ;;  %v3443_v52 = vsub.f32 %v2639_v22, %v3427_v47 }
 0x213   : > { %1630 = vmatpush.msra.mxu2 %v3305_v14  ;;  %1696 = vmatpush.msrb.mxu1 %v3326_v48  ;;  %v1767_v14 = vsub.f32 %v3379_v5, %v1766_v9 }
 0x214   : > { %v1948_v56 = vand.u32 4294901760, %v3433_v50 }
 0x215   : > { %1632 = vmatpush.msra.mxu2 %v3313_v27  ;;  %v2613_v4 = vpop.eup %2612  ;;  %v2636_v27 = vld [vmem:[%s2976_s16 + $0xd8] sm:$0xff] }
 0x216   : > { %v3382_v6 = vmul.f32 %v2613_v4, %v686_v31  ;;  %v3406_v32 = vand.u32 4294901760, %v2636_v27  ;;  %v2640_v4 = vld [vmem:[%s2976_s16 + $0xf8] sm:$0xff] }
 0x217   : > { %1634 = vmatpush.msra.mxu2 %v3310_v30 }
 0x218   : > { %v715_v59 = vsel %vm696_vm1, %v3382_v6, 0.0  ;;  %v3419_v40 = vsub.f32 %v2636_v27, %v3406_v32  ;;  %v1891_v11 = vsel %vm761_vm0, %v3382_v6, 0 }
 0x219   : > { %v601_v63 = vpop.f32.mrf.mxu2  ;;  %1636 = vmatpush.msra.mxu2 %v3326_v48  ;;  %716 = vadd.xlane.f32.xlu0 %v715_v59  ;;  %v1768_v48 = vand.u32 4294901760, %v1767_v14  ;;  %v3509_v36 = vand.u32 4294901760, %v1891_v11 }
 0x21a   : > { %v672_v1 = vmul.f32 1.442695, %v601_v63  ;;  %v1936_v51 = vand.u32 4294901760, %v3419_v40 }
 0x21c   : > { %2614 = vpow2.f32 %v672_v1  ;;  %v1937_v20 = vsub.f32 %v3419_v40, %v1936_v51  ;;  %v1943_v1 = vsub.f32 %v3424_v44, %v1942_v54 }
 0x222   : > { %v2615_v29 = vpop.eup %2614 }
 0x223   : > { %v692_v8 = vmul.f32 %v2615_v29, %v684_v7  ;;  %v1949_v7 = vsub.f32 %v3433_v50, %v1948_v56  ;;  %v862_v29 = vpop.f32.mrf.mxu1 }
 0x225   : > { %v709_v10 = vsel %vm696_vm1, %v692_v8, 0.0  ;;  %v1515_v17 = vsel %vm761_vm0, %v692_v8, 0  ;;  %v2641_v8 = vld [vmem:[%s2976_s16 + $0xf0] sm:$0xff] }
 0x226   : > { %v1537_v12 = vand.u32 4294901760, %v1515_v17  ;;  %710 = vadd.xlane.f32.xlu2 %v709_v10 }
 0x227   : > { %v699_v21 = vpop.xlane.xlu0 %698 }
 0x228   : > { %v3403_v30 = vsub.f32 %v1515_v17, %v1537_v12  ;;  %1583 = vmatmul.f32.vlgmr.msra.gmra.mxu3 %v1537_v12  ;;  %v721_v38 = vadd.f32 1.1920929e-07, %v699_v21 }
 0x229   : > { %v661_v13 = vpop.f32.mrf.mxu2  ;;  %1751 = vmatpush.msra.mxu3 %v1750_v28 }
 0x22a   : > { %v678_v15 = vmul.f32 1.442695, %v661_v13  ;;  %v1539_v35 = vand.u32 4294901760, %v3403_v30  ;;  %1613 = vmatmul.f32.vlgmr.msra.gmra.mxu1 %v3403_v30 }
 0x22b   : > { %1757 = vmatpush.msra.mxu3 %v1756_v16  ;;  %1789 = vmatpush.msra.mxu1 %v3361_v61 }
 0x22c   : > { %2616 = vpow2.f32 %v678_v15  ;;  %v1540_v37 = vsub.f32 %v3403_v30, %v1539_v35 }
 0x22d   : > { %v621_v45 = vpop.f32.mrf.mxu3  ;;  %1763 = vmatpush.msra.mxu3 %v1762_v33  ;;  %1792 = vmatpush.msra.mxu1 %v3369_v3  ;;  %v1954_v3 = vand.u32 4294901760, %v3443_v52  ;;  %v2643_v33 = vld [vmem:[%s2976_s16 + $0xe0] sm:$0xff] }
 0x22e   : > { %v674_v26 = vmul.f32 1.442695, %v621_v45  ;;  %v1541_v25 = vand.u32 4294901760, %v1540_v37 }
 0x22f   : > { %1769 = vmatpush.msra.mxu3 %v1768_v48  ;;  %1795 = vmatpush.msra.mxu1 %v3373_v19  ;;  %v1955_v59 = vsub.f32 %v3443_v52, %v1954_v3 }
 0x230   : > { %2618 = vpow2.f32 %v674_v26  ;;  %1542 = vmatmul.f32.vlgmr.msrb.gmra.mxu2 %v1541_v25  ;;  %1673 = vmatmul.f32.vlgmr.msrb.gmra.mxu3 %v1537_v12  ;;  %v3519_v25 = vsub.f32 %v1891_v11, %v3509_v36 }
 0x231   : > { %1718 = vmatpush.msrb.mxu2 %v3349_v58  ;;  %1798 = vmatpush.msra.mxu1 %v3379_v5  ;;  %2620 = vrcp.f32 %v721_v38  ;;  %v1944_v5 = vand.u32 4294901760, %v1943_v1  ;;  %v1956_v14 = vand.u32 4294901760, %v1955_v59  ;;  %v889_v15 = vpop.f32.mrf.mxu2 }
 0x232   : > { %v2617_v41 = vpop.eup %2616  ;;  %1698 = vmatmul.f32.vlgmr.msrb.gmra.mxu1 %v1537_v12  ;;  %1847 = vmatpush.msrb.mxu3 %v1748_v43  ;;  %v3466_v43 = vand.u32 4294901760, %v2640_v4 }
 0x233   : > { %v3430_v49 = vmul.f32 %v2617_v41, %v687_v23  ;;  %1720 = vmatpush.msrb.mxu2 %v3353_v34  ;;  %1878 = vmatpush.msrb.mxu1 %v3349_v58  ;;  %v947_v41 = vpop.f32.mrf.mxu1 }
 0x234   : > { %1851 = vmatpush.msrb.mxu3 %v1754_v55  ;;  %v1938_v55 = vand.u32 4294901760, %v1937_v20  ;;  %v3490_v17 = vsub.f32 %v2640_v4, %v3466_v43 }
 0x235   : > { %v718_v24 = vsel %vm696_vm1, %v3430_v49, 0.0  ;;  %1722 = vmatpush.msrb.mxu2 %v3357_v60  ;;  %1880 = vmatpush.msrb.mxu1 %v3353_v34  ;;  %v791_v57 = vpop.f32.mrf.mxu3 }
 0x236   : > { %719 = vadd.xlane.f32.xlu1 %v718_v24  ;;  %v2619_v61 = vpop.eup %2618  ;;  %1855 = vmatpush.msrb.mxu3 %v1760_v18  ;;  %v2124_v48 = vand.u32 4294901760, %v3490_v17 }
 0x237   : > { %v693_v63 = vmul.f32 %v2619_v61, %v685_v62  ;;  %1724 = vmatpush.msrb.mxu2 %v3365_v2  ;;  %1882 = vmatpush.msrb.mxu1 %v3357_v60  ;;  %v2621_v18 = vpop.eup %2620  ;;  %v1915_v61 = vand.u32 4294901760, %v3519_v25 }
 0x238   : > { %1640 = vmatmul.f32.vlgmr.msra.gmra.mxu2 %v1539_v35  ;;  %1859 = vmatpush.msrb.mxu3 %v1766_v9  ;;  %v2642_v9 = vld [vmem:[%s2976_s16 + $0xe8] sm:$0xff]  ;;  %v737_v13 = vmul.f32 %v2621_v18, %v721_v38  ;;  %v3504_v35 = vand.u32 4294901760, %v2643_v33  ;;  %v2125_v22 = vsub.f32 %v3490_v17, %v2124_v48 }
 0x239   : > { %v712_v19 = vsel %vm696_vm1, %v693_v63, 0.0  ;;  %v1703_v31 = vsel %vm761_vm0, %v693_v63, 0  ;;  %1818 = vmatpush.msra.mxu2 %v3349_v58  ;;  %1884 = vmatpush.msrb.mxu1 %v3365_v2  ;;  %v3482_v58 = vand.u32 4294901760, %v2641_v8  ;;  %v3487_v10 = vand.u32 4294901760, %v2642_v9  ;;  %v702_v62 = vpop.xlane.xlu0 %701 }
 0x23a   : > { %v1725_v0 = vand.u32 4294901760, %v1703_v31  ;;  %713 = vadd.xlane.f32.xlu2 %v712_v19  ;;  %v745_v39 = vsub.f32 2.0, %v737_v13  ;;  %v3516_v26 = vsub.f32 %v2643_v33, %v3504_v35  ;;  %v2079_v19 = vsel %vm761_vm0, %v3430_v49, 0 }
 0x23b   : > { %1820 = vmatpush.msra.mxu2 %v3353_v34  ;;  %v1950_v34 = vand.u32 4294901760, %v1949_v7  ;;  %v3499_v30 = vsub.f32 %v2641_v8, %v3482_v58  ;;  %v3507_v6 = vsub.f32 %v2642_v9, %v3487_v10 }
 0x23c   : > { %v3484_v53 = vsub.f32 %v1703_v31, %v1725_v0  ;;  %1771 = vmatmul.f32.vlgmr.msra.gmra.mxu3 %v1725_v0  ;;  %v753_v24 = vmul.f32 %v2621_v18, %v745_v39  ;;  %v2142_v20 = vand.u32 4294901760, %v3516_v26 }
 0x23d   : > { %1939 = vmatpush.msra.mxu3 %v1938_v55  ;;  %1822 = vmatpush.msra.mxu2 %v3357_v60  ;;  %v832_v28 = vpop.f32.mrf.mxu3  ;;  %v2136_v21 = vand.u32 4294901760, %v3507_v6 }
 0x23e   : > { %1801 = vmatmul.f32.vlgmr.msra.gmra.mxu1 %v3484_v53  ;;  %v1727_v12 = vand.u32 4294901760, %v3484_v53  ;;  %v833_v16 = vadd.f32 %v832_v28, %v791_v57  ;;  %v722_v57 = vadd.f32 1.1920929e-07, %v702_v62 }
 0x23f   : > { %1945 = vmatpush.msra.mxu3 %v1944_v5  ;;  %1977 = vmatpush.msra.mxu1 %v3419_v40 }
 0x240   : > { %v1728_v60 = vsub.f32 %v3484_v53, %v1727_v12  ;;  %1824 = vmatpush.msra.mxu2 %v3365_v2  ;;  %v863_v27 = vadd.f32 %v862_v29, %v833_v16  ;;  %v2130_v2 = vand.u32 4294901760, %v3499_v30  ;;  %2622 = vrcp.f32 %v722_v57 }
 0x241   : > { %1951 = vmatpush.msra.mxu3 %v1950_v34  ;;  %1980 = vmatpush.msra.mxu1 %v3424_v44  ;;  %v2126_v44 = vand.u32 4294901760, %v2125_v22 }
 0x242   : > { %v1729_v37 = vand.u32 4294901760, %v1728_v60  ;;  %v890_v45 = vadd.f32 %v889_v15, %v863_v27  ;;  %v2131_v40 = vsub.f32 %v3499_v30, %v2130_v2 }
 0x243   : > { %1957 = vmatpush.msra.mxu3 %v1956_v14  ;;  %1983 = vmatpush.msra.mxu1 %v3433_v50  ;;  %v2143_v50 = vsub.f32 %v3516_v26, %v2142_v20 }
 0x244   : > { %1730 = vmatmul.f32.vlgmr.msrb.gmra.mxu2 %v1729_v37  ;;  %1861 = vmatmul.f32.vlgmr.msrb.gmra.mxu3 %v1725_v0  ;;  %v2132_v1 = vand.u32 4294901760, %v2131_v40 }
 0x245   : > { %1906 = vmatpush.msrb.mxu2 %v3406_v32  ;;  %1986 = vmatpush.msra.mxu1 %v3443_v52  ;;  %v922_v23 = vpop.f32.mrf.mxu3 }
 0x246   : > { %1886 = vmatmul.f32.vlgmr.msrb.gmra.mxu1 %v1725_v0  ;;  %2035 = vmatpush.msrb.mxu3 %v1936_v51  ;;  %v923_v38 = vadd.f32 %v922_v23, %v890_v45  ;;  %v2623_v55 = vpop.eup %2622 }
 0x247   : > { %1908 = vmatpush.msrb.mxu2 %v3411_v46  ;;  %2066 = vmatpush.msrb.mxu1 %v3406_v32  ;;  %v1050_v7 = vpop.f32.mrf.mxu1  ;;  %v738_v0 = vmul.f32 %v2623_v55, %v722_v57 }
 0x248   : > { %2039 = vmatpush.msrb.mxu3 %v1942_v54  ;;  %v948_v51 = vadd.f32 %v947_v41, %v923_v38  ;;  %v2137_v54 = vsub.f32 %v3507_v6, %v2136_v21 }
 0x249   : > { %1910 = vmatpush.msrb.mxu2 %v3416_v42  ;;  %2068 = vmatpush.msrb.mxu1 %v3411_v46  ;;  %v746_v5 = vsub.f32 2.0, %v738_v0 }
 0x24a   : > { %2043 = vmatpush.msrb.mxu3 %v1948_v56  ;;  %v2266_v63 = vmul.f32 %v948_v51, %v753_v24  ;;  %v1916_v56 = vsub.f32 %v3519_v25, %v1915_v61  ;;  %v2138_v4 = vand.u32 4294901760, %v2137_v54 }
 0x24b   : > { %1912 = vmatpush.msrb.mxu2 %v3427_v47  ;;  %2070 = vmatpush.msrb.mxu1 %v3416_v42  ;;  %v754_v34 = vmul.f32 %v2623_v55, %v746_v5 }
 0x24c   : > { %1828 = vmatmul.f32.vlgmr.msra.gmra.mxu2 %v1727_v12  ;;  %1959 = vmatmul.f32.vlgmr.msra.gmra.mxu3 %v3509_v36  ;;  %2274 = vst [vmem:[%s3550_s26] sm:$0x1] %v2266_v63  ;;  %v1917_v31 = vand.u32 4294901760, %v1916_v56 }
 0x24d   : > { %2047 = vmatpush.msrb.mxu3 %v1954_v3  ;;  %2006 = vmatpush.msra.mxu2 %v3406_v32  ;;  %v2144_v32 = vand.u32 4294901760, %v2143_v50  ;;  %v1020_v52 = vpop.f32.mrf.mxu3  ;;  %v2101_v3 = vand.u32 4294901760, %v2079_v19 }
 0x24e   : > { %1989 = vmatmul.f32.vlgmr.msra.gmra.mxu1 %v3519_v25 }
 0x24f   : > { %2127 = vmatpush.msra.mxu3 %v2126_v44  ;;  %2072 = vmatpush.msrb.mxu1 %v3427_v47  ;;  %v1135_v53 = vpop.f32.mrf.mxu1 }
 0x250   : > { %2008 = vmatpush.msra.mxu2 %v3411_v46 }
 0x251   : > { %2133 = vmatpush.msra.mxu3 %v2132_v1  ;;  %2165 = vmatpush.msra.mxu1 %v3490_v17 }
 0x252   : > { %2010 = vmatpush.msra.mxu2 %v3416_v42  ;;  %v2102_v42 = vsub.f32 %v2079_v19, %v2101_v3 }
 0x253   : > { %2139 = vmatpush.msra.mxu3 %v2138_v4  ;;  %2168 = vmatpush.msra.mxu1 %v3499_v30  ;;  %v979_v49 = vpop.f32.mrf.mxu2 }
 0x254   : > { %2012 = vmatpush.msra.mxu2 %v3427_v47  ;;  %2049 = vmatmul.f32.vlgmr.msrb.gmra.mxu3 %v3509_v36  ;;  %v1021_v46 = vadd.f32 %v1020_v52, %v979_v49  ;;  %v2103_v18 = vand.u32 4294901760, %v2102_v42 }
 0x255   : > { %1918 = vmatmul.f32.vlgmr.msrb.gmra.mxu2 %v1917_v31  ;;  %2145 = vmatpush.msra.mxu3 %v2144_v32  ;;  %v1110_v29 = vpop.f32.mrf.mxu3 }
 0x256   : > { %2171 = vmatpush.msra.mxu1 %v3507_v6  ;;  %2094 = vmatpush.msrb.mxu2 %v3466_v43  ;;  %v1051_v47 = vadd.f32 %v1050_v7, %v1021_v46  ;;  %v2104_v9 = vsub.f32 %v2102_v42, %v2103_v18 }
 0x257   : > { %2074 = vmatmul.f32.vlgmr.msrb.gmra.mxu1 %v3509_v36  ;;  %2223 = vmatpush.msrb.mxu3 %v2124_v48 }
 0x258   : > { %2174 = vmatpush.msra.mxu1 %v3516_v26  ;;  %2096 = vmatpush.msrb.mxu2 %v3482_v58  ;;  %v2105_v11 = vand.u32 4294901760, %v2104_v9 }
 0x259   : > { %2227 = vmatpush.msrb.mxu3 %v2130_v2 }
 0x25a   : > { %2254 = vmatpush.msrb.mxu1 %v3466_v43  ;;  %2098 = vmatpush.msrb.mxu2 %v3487_v10 }
 0x25b   : > { %2231 = vmatpush.msrb.mxu3 %v2136_v21  ;;  %v1077_v59 = vpop.f32.mrf.mxu2 }
 0x25c   : > { %2256 = vmatpush.msrb.mxu1 %v3482_v58  ;;  %2147 = vmatmul.f32.vlgmr.msra.gmra.mxu3 %v2101_v3  ;;  %v1078_v8 = vadd.f32 %v1077_v59, %v1051_v47 }
 0x25d   : > { %2016 = vmatmul.f32.vlgmr.msra.gmra.mxu2 %v1915_v61  ;;  %2235 = vmatpush.msrb.mxu3 %v2142_v20 }
 0x25e   : > { %2100 = vmatpush.msrb.mxu2 %v3504_v35  ;;  %v1111_v17 = vadd.f32 %v1110_v29, %v1078_v8  ;;  %2258 = vmatpush.msrb.mxu1 %v3487_v10 }
 0x25f   : > { %2177 = vmatmul.f32.vlgmr.msra.gmra.mxu1 %v2102_v42 }
 0x260   : > { %2194 = vmatpush.msra.mxu2 %v3466_v43  ;;  %v1136_v28 = vadd.f32 %v1135_v53, %v1111_v17  ;;  %2260 = vmatpush.msrb.mxu1 %v3504_v35  ;;  %v705_v43 = vpop.xlane.xlu1 %704 }
 0x261   : > { %v723_v13 = vadd.f32 1.1920929e-07, %v705_v43 }
 0x262   : > { %2196 = vmatpush.msra.mxu2 %v3482_v58  ;;  %v2267_v12 = vmul.f32 %v1136_v28, %v754_v34 }
 0x263   : > { %2624 = vrcp.f32 %v723_v13 }
 0x264   : > { %2198 = vmatpush.msra.mxu2 %v3487_v10  ;;  %2237 = vmatmul.f32.vlgmr.msrb.gmra.mxu3 %v2101_v3  ;;  %2275 = vst [vmem:[%s3550_s26 + $0x1] sm:$0x1] %v2267_v12 }
 0x265   : > { %2106 = vmatmul.f32.vlgmr.msrb.gmra.mxu2 %v2105_v11 }
 0x266   : > { %2200 = vmatpush.msra.mxu2 %v3504_v35 }
 0x267   : > { %2262 = vmatmul.f32.vlgmr.msrb.gmra.mxu1 %v2101_v3  ;;  %v1238_v15 = vpop.f32.mrf.mxu1 }
 0x269   : > { %v2625_v14 = vpop.eup %2624 }
 0x26a   : > { %v739_v60 = vmul.f32 %v2625_v14, %v723_v13 }
 0x26b   : > { %v1208_v16 = vpop.f32.mrf.mxu3 }
 0x26c   : > { %v747_v10 = vsub.f32 2.0, %v739_v60 }
 0x26d   : > { %2204 = vmatmul.f32.vlgmr.msra.gmra.mxu2 %v2103_v18 }
 0x26e   : > { %v755_v35 = vmul.f32 %v2625_v14, %v747_v10 }
 0x26f   : > { %v1323_v48 = vpop.f32.mrf.mxu1 }
 0x273   : > { %v1167_v58 = vpop.f32.mrf.mxu2  ;;  %v1298_v6 = vpop.f32.mrf.mxu3 }
 0x274   : > { %v1209_v30 = vadd.f32 %v1208_v16, %v1167_v58  ;;  %v708_v2 = vpop.xlane.xlu1 %707 }
 0x275   : > { %v724_v26 = vadd.f32 1.1920929e-07, %v708_v2 }
 0x276   : > { %v1239_v27 = vadd.f32 %v1238_v15, %v1209_v30 }
 0x277   : > { %2626 = vrcp.f32 %v724_v26 }
 0x27b   : > { %v1265_v33 = vpop.f32.mrf.mxu2 }
 0x27c   : > { %v1266_v36 = vadd.f32 %v1265_v33, %v1239_v27 }
 0x27d   : > { %v2627_v21 = vpop.eup %2626 }
 0x27e   : > { %v1299_v37 = vadd.f32 %v1298_v6, %v1266_v36  ;;  %v740_v38 = vmul.f32 %v2627_v21, %v724_v26 }
 0x280   : > { %v1324_v39 = vadd.f32 %v1323_v48, %v1299_v37  ;;  %v748_v51 = vsub.f32 2.0, %v740_v38 }
 0x281   : > { %v1426_v41 = vpop.f32.mrf.mxu1 }
 0x282   : > { %v2268_v45 = vmul.f32 %v1324_v39, %v755_v35  ;;  %v756_v44 = vmul.f32 %v2627_v21, %v748_v51 }
 0x284   : > { %2276 = vst [vmem:[%s3550_s26 + $0x2] sm:$0x1] %v2268_v45 }
 0x285   : > { %v1396_v25 = vpop.f32.mrf.mxu3 }
 0x289   : > { %v1511_v57 = vpop.f32.mrf.mxu1 }
 0x28c   : > { %v717_v43 = vpop.xlane.xlu0 %716 }
 0x28d   : > { %v1355_v23 = vpop.f32.mrf.mxu2  ;;  %v1486_v40 = vpop.f32.mrf.mxu3  ;;  %v727_v16 = vadd.f32 1.1920929e-07, %v717_v43 }
 0x28e   : > { %v1397_v22 = vadd.f32 %v1396_v25, %v1355_v23 }
 0x290   : > { %v1427_v24 = vadd.f32 %v1426_v41, %v1397_v22 }
 0x295   : > { %v1453_v62 = vpop.f32.mrf.mxu2 }
 0x296   : > { %v1454_v20 = vadd.f32 %v1453_v62, %v1427_v24 }
 0x298   : > { %v1487_v61 = vadd.f32 %v1486_v40, %v1454_v20 }
 0x299   : > { %v711_v1 = vpop.xlane.xlu2 %710 }
 0x29a   : > { %v1512_v54 = vadd.f32 %v1511_v57, %v1487_v61  ;;  %v725_v50 = vadd.f32 1.1920929e-07, %v711_v1 }
 0x29c   : > { %v2269_v63 = vmul.f32 %v1512_v54, %v756_v44  ;;  %2628 = vrcp.f32 %v725_v50 }
 0x29e   : > { %2277 = vst [vmem:[%s3550_s26 + $0x3] sm:$0x1] %v2269_v63 }
 0x2a2   : > { %v2629_v32 = vpop.eup %2628 }
 0x2a3   : > { %v741_v31 = vmul.f32 %v2629_v32, %v725_v50 }
 0x2a5   : > { %v749_v46 = vsub.f32 2.0, %v741_v31 }
 0x2a7   : > { %v1614_v4 = vpop.f32.mrf.mxu1  ;;  %v757_v59 = vmul.f32 %v2629_v32, %v749_v46 }
 0x2a9   : > { %v720_v39 = vpop.xlane.xlu1 %719 }
 0x2aa   : > { %v728_v26 = vadd.f32 1.1920929e-07, %v720_v39 }
 0x2ab   : > { %v1584_v56 = vpop.f32.mrf.mxu3 }
 0x2ad   : > { %v714_v42 = vpop.xlane.xlu2 %713 }
 0x2ae   : > { %v726_v18 = vadd.f32 1.1920929e-07, %v714_v42 }
 0x2af   : > { %v1699_v55 = vpop.f32.mrf.mxu1 }
 0x2b0   : > { %2630 = vrcp.f32 %v726_v18 }
 0x2b1   : > { %2632 = vrcp.f32 %v727_v16 }
 0x2b2   : > { %2634 = vrcp.f32 %v728_v26 }
 0x2b3   : > { %v1543_v19 = vpop.f32.mrf.mxu2  ;;  %v1674_v3 = vpop.f32.mrf.mxu3 }
 0x2b4   : > { %v1585_v52 = vadd.f32 %v1584_v56, %v1543_v19 }
 0x2b6   : > { %v1615_v49 = vadd.f32 %v1614_v4, %v1585_v52  ;;  %v2631_v17 = vpop.eup %2630 }
 0x2b7   : > { %v742_v12 = vmul.f32 %v2631_v17, %v726_v18  ;;  %v2633_v48 = vpop.eup %2632 }
 0x2b8   : > { %v743_v35 = vmul.f32 %v2633_v48, %v727_v16  ;;  %v2635_v20 = vpop.eup %2634 }
 0x2b9   : > { %v750_v58 = vsub.f32 2.0, %v742_v12  ;;  %v744_v44 = vmul.f32 %v2635_v20, %v728_v26 }
 0x2ba   : > { %v751_v41 = vsub.f32 2.0, %v743_v35 }
 0x2bb   : > { %v1641_v7 = vpop.f32.mrf.mxu2  ;;  %v1802_v8 = vpop.f32.mrf.mxu1  ;;  %v758_v27 = vmul.f32 %v2631_v17, %v750_v58  ;;  %v752_v1 = vsub.f32 2.0, %v744_v44 }
 0x2bc   : > { %v1642_v0 = vadd.f32 %v1641_v7, %v1615_v49  ;;  %v759_v38 = vmul.f32 %v2633_v48, %v751_v41 }
 0x2bd   : > { %v760_v32 = vmul.f32 %v2635_v20, %v752_v1 }
 0x2be   : > { %v1675_v47 = vadd.f32 %v1674_v3, %v1642_v0 }
 0x2bf   : > { %v1772_v5 = vpop.f32.mrf.mxu3 }
 0x2c0   : > { %v1700_v29 = vadd.f32 %v1699_v55, %v1675_v47 }
 0x2c2   : > { %v2270_v53 = vmul.f32 %v1700_v29, %v757_v59 }
 0x2c3   : > { %v1887_v11 = vpop.f32.mrf.mxu1 }
 0x2c4   : > { %2278 = vst [vmem:[%s3550_s26 + $0x4] sm:$0x1] %v2270_v53 }
 0x2c7   : > { %v1731_v9 = vpop.f32.mrf.mxu2  ;;  %v1862_v34 = vpop.f32.mrf.mxu3 }
 0x2c8   : > { %v1773_v28 = vadd.f32 %v1772_v5, %v1731_v9 }
 0x2ca   : > { %v1803_v13 = vadd.f32 %v1802_v8, %v1773_v28 }
 0x2cb   : > { %v1990_v33 = vpop.f32.mrf.mxu1 }
 0x2cf   : > { %v1829_v14 = vpop.f32.mrf.mxu2  ;;  %v1960_v60 = vpop.f32.mrf.mxu3 }
 0x2d0   : > { %v1830_v15 = vadd.f32 %v1829_v14, %v1803_v13 }
 0x2d2   : > { %v1863_v30 = vadd.f32 %v1862_v34, %v1830_v15 }
 0x2d4   : > { %v1888_v10 = vadd.f32 %v1887_v11, %v1863_v30  ;;  %v2075_v25 = vpop.f32.mrf.mxu1 }
 0x2d6   : > { %v2271_v6 = vmul.f32 %v1888_v10, %v758_v27 }
 0x2d7   : > { %v2050_v45 = vpop.f32.mrf.mxu3 }
 0x2d8   : > { %v1919_v36 = vpop.f32.mrf.mxu2  ;;  %2279 = vst [vmem:[%s3550_s26 + $0x5] sm:$0x1] %v2271_v6 }
 0x2d9   : > { %v1961_v37 = vadd.f32 %v1960_v60, %v1919_v36 }
 0x2db   : > { %v1991_v2 = vadd.f32 %v1990_v33, %v1961_v37 }
 0x2dc   : > { %v2178_v57 = vpop.f32.mrf.mxu1 }
 0x2df   : > { %v2148_v40 = vpop.f32.mrf.mxu3 }
 0x2e0   : > { %v2017_v23 = vpop.f32.mrf.mxu2 }
 0x2e1   : > { %v2018_v22 = vadd.f32 %v2017_v23, %v1991_v2 }
 0x2e3   : > { %v2051_v21 = vadd.f32 %v2050_v45, %v2018_v22 }
 0x2e4   : > { %v2263_v19 = vpop.f32.mrf.mxu1 }
 0x2e5   : > { %v2076_v24 = vadd.f32 %v2075_v25, %v2051_v21 }
 0x2e7   : > { %v2272_v62 = vmul.f32 %v2076_v24, %v759_v38  ;;  %v2238_v56 = vpop.f32.mrf.mxu3 }
 0x2e8   : > { %v2107_v51 = vpop.f32.mrf.mxu2 }
 0x2e9   : > { %2280 = vst [vmem:[%s3550_s26 + $0x6] sm:$0x1] %v2272_v62  ;;  %v2149_v61 = vadd.f32 %v2148_v40, %v2107_v51 }
 0x2eb   : > { %v2179_v54 = vadd.f32 %v2178_v57, %v2149_v61 }
 0x2f0   : > { %v2205_v63 = vpop.f32.mrf.mxu2 }
 0x2f1   : > { %v2206_v50 = vadd.f32 %v2205_v63, %v2179_v54 }
 0x2f3   : > { %v2239_v4 = vadd.f32 %v2238_v56, %v2206_v50 }
 0x2f5   : > { %v2264_v52 = vadd.f32 %v2263_v19, %v2239_v4 }
 0x2f7   : > { %v2273_v3 = vmul.f32 %v2264_v52, %v760_v32 }
 0x2f9   : > { %2281 = vst [vmem:[%s3550_s26 + $0x7] sm:$0x1] %v2273_v3 }
 0x2fa   : > { %2761 = shalt.err (!%p2758_p9)
}
 0x2fb   : > { %s2815_s10 = smov 16   ;;  %s2816_s23 = smov 1  }
 0x2fc   : > { %2479 = dma.vmem_to_hbm [thread:$0]  (%p2917_p7), %s2295_s11, 128, %s2297_s7, %s2283_s22, %s2815_s10, %s2815_s10, %s2816_s23  }
 0x2fd PF: > { %s2311_s24 = sand.u32 1, %s2796_s18   ;;  %p3657_p12 = scmp.ge.s32.totalorder %s2808_s21, 2 }
 0x2fe   : > { %s2312_s2 = scalar_lea.sflag [#allocation4], %s2311_s24 }
 0x2ff   : > { %p2493_p13 = pnand %p3657_p12, %p2882_p6 }
 0x301   : > { %p2494_p0 = pneg %p2493_p13 }
 0x303   : > { %2791 = dma.done.wait (%p2494_p0), %s2312_s2, 128  }
 0x304   : > { %2793 = vsyncadd (%p2494_p0), %s2312_s2, 4294967168  ;;  %s3658_s21 = sld [smem:[#allocation14_spill]]  ;;  %s3661_s18 = smov %s2800_s19 }
 0x305   : > { %s3659_s9 = sld [smem:[#allocation13_spill]] }
 0x306   : > { %s3660_s20 = sld [smem:[#allocation15_spill]] }
 0x30a   : > { %p21_p3 = scmp.ge.s32.totalorder %s3658_s21, 4  }
 0x30b   : > { %s3662_s19 = smov %s3659_s9 }
 0x30c   :  { %23 = sbr.rel (!%p21_p3) target bundleno = 9 (0x9), region = 102 }
 0x311   :  { %2318 = vsyncpa [#allocation3], 1 }
 0x312   :  { %2320 = vsyncpa [#allocation3 + $0x1], 1 }
 0x313   :  { %2321 = vsyncpa [#allocation6], 1 }
 0x314   :  { %2323 = vsyncpa [#allocation6 + $0x1], 1 }
 0x315   :  { %2324 = vsyncpa [#allocation4], 1 }
 0x316   :  { %2326 = vsyncpa [#allocation4 + $0x1], 1 }

</bundles_post_ra>
